<compile_context>
chip_gen: v5e
topology: v5e:2x2
jax: 0.10.0
libtpu: 0.0.40
codegen_flags: <defaults>
</compile_context>

<pallas_src>
import numpy as np
import jax
import jax.numpy as jnp
from jax.experimental import pallas as pl
from jax.experimental.pallas import tpu as pltpu


# ----------------------------------------------------------------------------
# Pallas kernels (GEMM-centric; bf16 MXU inputs, f32 accumulate + f32 epilogue)
# ----------------------------------------------------------------------------
def _gemm_bias_relu_kernel(a_ref, w_ref, b_ref, o_ref):
    """o = relu(a @ w + b).  a:(tm,K) bf16, w:(K,N) bf16, b:(1,N) f32."""
    acc = jnp.dot(a_ref[...], w_ref[...], preferred_element_type=jnp.float32)
    o_ref[...] = jnp.maximum(acc + b_ref[...], 0.0).astype(o_ref.dtype)


def _conv2_tconv2_kernel(a_ref, w2_ref, b2_ref, w3_ref, o_ref):
    """conv2 GEMM + bias + ReLU fused with the t_conv2 direct GEMM.

    o = relu(a @ w2 + b2) @ w3.  The (tm, 4) conv2 activation never touches HBM.
    """
    h = jnp.dot(a_ref[...], w2_ref[...], preferred_element_type=jnp.float32)
    h = jnp.maximum(h + b2_ref[...], 0.0)                       # f32 epilogue
    o_ref[...] = jnp.dot(h.astype(jnp.bfloat16), w3_ref[...],
                         preferred_element_type=jnp.float32).astype(o_ref.dtype)


def _bias_relu_gemm_kernel(p_ref, b_ref, w_ref, o_ref):
    """t_conv2 epilogue fused with the t_conv1 direct GEMM.

    o = relu(p + b).astype(bf16) @ w;  p is the t_conv2 col2im result (pre-bias, f32).
    """
    h = jnp.maximum(p_ref[...] + b_ref[...], 0.0)
    o_ref[...] = jnp.dot(h.astype(jnp.bfloat16), w_ref[...],
                         preferred_element_type=jnp.float32).astype(o_ref.dtype)


# ----------------------------------------------------------------------------
# Generation-aware tiling / VMEM budget
# ----------------------------------------------------------------------------
_DEV_INFO = None


def _device_info():
    """(n_tensorcores, per-call working-set budget, vmem_limit_bytes)."""
    global _DEV_INFO
    if _DEV_INFO is None:
        kind = ""
        try:
            kind = jax.devices()[0].device_kind.lower()
        except Exception:
            pass
        is_v7 = ("v7" in kind) or ("7x" in kind)
        try:
            vmem_cap = int(pltpu.get_tpu_info().vmem_capacity_bytes)
        except Exception:
            vmem_cap = (64 if is_v7 else 128) * 2**20       # v7x: 64 MiB/TC, else 128 MiB
        n_cores = 2 if is_v7 else 1                         # v7x has 2 TCs/chip
        budget = vmem_cap // 3                              # headroom for double-buffering
        limit = min(vmem_cap // 2, 64 * 2**20)
        _DEV_INFO = (n_cores, budget, limit)
    return _DEV_INFO


def _call_m_tiled(kernel, a, consts, n_out, out_dtype=jnp.float32):
    """Run `kernel` on a:(M,K), tiled along M only; consts are full VMEM-resident blocks.

    v5e/v6e: a single full-array tile (no pad / no output slice — the (8,128)
    rule is satisfied by 'block equals full array dim').
    v7x:     >=2 M-tiles on a "parallel" grid axis (one per TensorCore).
    Tile rows shrink until the double-buffered working set fits the VMEM budget
    (only matters for large batch).
    """
    m, k = a.shape
    n_cores, vmem_budget, vmem_limit = _device_info()

    row_bytes = 2 * (k * a.dtype.itemsize + n_out * jnp.dtype(out_dtype).itemsize)
    const_bytes = sum(2 * c.size * c.dtype.itemsize for c in consts)

    def tile_rows(t):
        if t == 1:
            return m
        return ((-(-m // t) + 7) // 8) * 8                  # sublane-aligned tile rows

    n_tiles = n_cores
    while (tile_rows(n_tiles) * row_bytes + const_bytes > vmem_budget
           and tile_rows(n_tiles) > 8):
        n_tiles *= 2

    tm = tile_rows(n_tiles)
    m_pad = m if n_tiles == 1 else tm * n_tiles
    if m_pad != m:
        # Padded rows produce garbage through relu(bias) @ W; they are dropped
        # by the out[:m] slice below — keep pad and slice together.
        a = jnp.pad(a, ((0, m_pad - m), (0, 0)))

    in_specs = [pl.BlockSpec((tm, k), lambda i: (i, 0))]
    # Constant index_map -> weights/biases stay VMEM-resident across the grid.
    # (pl.Buffered(1) on these consts was considered; skipped — negligible at this size.)
    in_specs += [pl.BlockSpec(c.shape, lambda i: (0, 0)) for c in consts]

    out = pl.pallas_call(
        kernel,
        out_shape=jax.ShapeDtypeStruct((m_pad, n_out), out_dtype),
        grid=(n_tiles,),
        in_specs=in_specs,
        out_specs=pl.BlockSpec((tm, n_out), lambda i: (i, 0)),
        compiler_params=pltpu.CompilerParams(
            dimension_semantics=("parallel",),
            vmem_limit_bytes=vmem_limit),
    )(a, *consts)
    return out if m_pad == m else out[:m]


# ----------------------------------------------------------------------------
# Single-HLO glue: im2col patch extraction and ConvT col2im placement.
# These are pure data movement (0/1 kernels); all real MACs are in Pallas.
# ----------------------------------------------------------------------------
def _im2col_patches(x, k, s):
    """x:(B,H,W,C) -> (B,OH,OW, C*k*k) patches, channel-major (c, kh, kw) order."""
    return jax.lax.conv_general_dilated_patches(
        x, (k, k), (s, s), "VALID",
        dimension_numbers=("NHWC", "HWIO", "NHWC"))


def _make_placement_kernel(k, cout, n_in):
    """One-hot col2im kernel for ConvTranspose2d placement (stride s, no padding).

    K[dh, dw, (kh*k + kw)*cout + co, co] = 1 with kh = k-1-dh, kw = k-1-dw, so
    conv_general_dilated(y, K, lhs_dilation=(s,s), padding=k-1) implements
    out[b, s*i+kh, s*j+kw, co] += y[b, i, j, (kh,kw,co)].  Input channels
    >= k*k*cout (lane padding of the GEMM output) hit all-zero rows.
    """
    ker = np.zeros((k, k, n_in, cout), np.float32)
    for dh in range(k):
        for dw in range(k):
            kh, kw = k - 1 - dh, k - 1 - dw
            for co in range(cout):
                ker[dh, dw, (kh * k + kw) * cout + co, co] = 1.0
    return jnp.asarray(ker)


def _col2im_conv(y, k, s, placement_kernel):
    """y:(B,H,W,n_in) f32 -> overlap-add -> (B,(H-1)*s+k,(W-1)*s+k,cout).  1 HLO."""
    return jax.lax.conv_general_dilated(
        y, placement_kernel,
        window_strides=(1, 1),
        padding=((k - 1, k - 1), (k - 1, k - 1)),
        lhs_dilation=(s, s),
        dimension_numbers=("NHWC", "HWIO", "NHWC"),
        precision=jax.lax.Precision.HIGHEST)   # pure placement: keep f32 fidelity


# ----------------------------------------------------------------------------
# Model: deterministic synthetic parameters (PyTorch layouts) + forward pass.
# ----------------------------------------------------------------------------
def init_params(key, chan=3):
    ks = jax.random.split(key, 8)
    s = 0.05
    n = jax.random.normal
    return {
        # PyTorch layouts: Conv2d (Cout,Cin,KH,KW); ConvTranspose2d (Cin,Cout,KH,KW)
        "w_conv1": s * n(ks[0], (16, chan, 9, 9), jnp.float32),
        "b_conv1": s * n(ks[1], (16,), jnp.float32),
        "w_conv2": s * n(ks[2], (4, 16, 3, 3), jnp.float32),
        "b_conv2": s * n(ks[3], (4,), jnp.float32),
        "w_tconv2": s * n(ks[4], (4, 16, 3, 3), jnp.float32),
        "b_tconv2": s * n(ks[5], (16,), jnp.float32),
        "w_tconv1": s * n(ks[6], (16, chan, 9, 9), jnp.float32),
        "b_tconv1": s * n(ks[7], (chan,), jnp.float32),
    }


def conv_autoencoder_shallow_forward(params, x_nchw):
    """x_nchw: (B, chan, 69, 69) f32 -> (B, chan, 69, 69) f32 (PyTorch semantics)."""
    bsz, chan = x_nchw.shape[0], x_nchw.shape[1]
    x = jnp.transpose(x_nchw, (0, 2, 3, 1)).astype(jnp.bfloat16)        # NHWC, MXU dtype

    # conv1: k=9, s=2, chan->16, ReLU  (im2col = 1 HLO; Pallas GEMM, bf16 output)
    a1 = _im2col_patches(x, 9, 2)                                       # (B,31,31,81*chan)
    oh1, ow1 = a1.shape[1], a1.shape[2]
    a1 = a1.reshape(bsz * oh1 * ow1, 81 * chan)
    w1 = jnp.transpose(params["w_conv1"], (1, 2, 3, 0)).reshape(81 * chan, 16)
    h1 = _call_m_tiled(
        _gemm_bias_relu_kernel, a1,
        [w1.astype(jnp.bfloat16),
         params["b_conv1"].reshape(1, 16).astype(jnp.float32)],
        16, out_dtype=jnp.bfloat16)
    h1 = h1.reshape(bsz, oh1, ow1, 16)                                  # (B,31,31,16) bf16

    # conv2 (k=3, s=2, 16->4, ReLU) fused with the t_conv2 direct GEMM (4 -> 3*3*16)
    # TODO(synk): the conv2 im2col could move in-kernel (strided pl.ds reads from a
    # VMEM-resident h1) to collapse all three GEMMs into one pallas_call; kept as a
    # separate single-HLO patches op for lowering robustness.
    a2 = _im2col_patches(h1, 3, 2)                                      # (B,15,15,144) bf16
    oh2, ow2 = a2.shape[1], a2.shape[2]
    a2 = a2.reshape(bsz * oh2 * ow2, 9 * 16)
    w2 = jnp.transpose(params["w_conv2"], (1, 2, 3, 0)).reshape(9 * 16, 4)
    w3 = jnp.transpose(params["w_tconv2"], (0, 2, 3, 1)).reshape(4, 9 * 16)
    y3 = _call_m_tiled(
        _conv2_tconv2_kernel, a2,
        [w2.astype(jnp.bfloat16),
         params["b_conv2"].reshape(1, 4).astype(jnp.float32),
         w3.astype(jnp.bfloat16)],
        9 * 16)                                                          # (B*225,144) f32

    # t_conv2 col2im overlap-add (1 HLO); its bias+ReLU are deferred to the next kernel
    p3 = _col2im_conv(y3.reshape(bsz, oh2, ow2, 9 * 16), 3, 2,
                      _make_placement_kernel(3, 16, 9 * 16))             # (B,31,31,16)
    p3 = p3.reshape(bsz * 31 * 31, 16)

    # t_conv2 bias+ReLU fused with the t_conv1 direct GEMM (16 -> 9*9*chan, 256-lane pad)
    n4 = 81 * chan
    n4_pad = ((n4 + 127) // 128) * 128                                   # 243 -> 256
    w4 = jnp.transpose(params["w_tconv1"], (0, 2, 3, 1)).reshape(16, n4)
    w4 = jnp.pad(w4, ((0, 0), (0, n4_pad - n4)))
    y4 = _call_m_tiled(
        _bias_relu_gemm_kernel, p3,
        [params["b_tconv2"].reshape(1, 16).astype(jnp.float32),
         w4.astype(jnp.bfloat16)],
        n4_pad)                                                          # (B*961,256) f32

    # t_conv1 col2im overlap-add (1 HLO; padded lanes map to all-zero kernel rows) + bias
    out = _col2im_conv(y4.reshape(bsz, 31, 31, n4_pad), 9, 2,
                       _make_placement_kernel(9, chan, n4_pad))          # (B,69,69,chan)
    out = out + params["b_tconv1"].reshape(1, 1, 1, chan)
    out = jnp.transpose(out, (0, 3, 1, 2))                               # NCHW
    return out.reshape(bsz, chan, 69, 69)


if __name__ == "__main__":
    key = jax.random.PRNGKey(0)
    pkey, xkey = jax.random.split(key)

    params = init_params(pkey, chan=3)
    # Input spatial size 69x69 is what the module's final view(B, 3, 69, 69) implies.
    x = jax.random.normal(xkey, (2, 3, 69, 69), jnp.float32)

    fwd = jax.jit(conv_autoencoder_shallow_forward)
    out = jax.block_until_ready(fwd(params, x))

    assert out.shape == (2, 3, 69, 69), out.shape
    assert out.dtype == jnp.float32
    assert bool(jnp.all(jnp.isfinite(out)))
    print("KERNEL_OK")
</pallas_src>

<mosaic_0001>
module attributes {stable_mosaic.version = 11 : i64} {
  func.func @_gemm_bias_relu_kernel(%arg0: i32, %arg1: memref<1922x243xbf16, #tpu.memory_space<vmem>>, %arg2: memref<243x16xbf16, #tpu.memory_space<vmem>>, %arg3: memref<1x16xf32, #tpu.memory_space<vmem>>, %arg4: memref<1922x16xbf16, #tpu.memory_space<vmem>>) attributes {dimension_semantics = [#tpu.dimension_semantics<parallel>], iteration_bounds = array<i64: 1>, scalar_prefetch = 0 : i64, scratch_operands = 0 : i64, tpu.core_type = #tpu.core_type<tc>, window_params = [{transform_indices = @transform_0, window_bounds = array<i64: 1922, 243>}, {pipeline_mode = #tpu.pipeline_mode<synchronous>, transform_indices = @transform_1, window_bounds = array<i64: 243, 16>}, {pipeline_mode = #tpu.pipeline_mode<synchronous>, transform_indices = @transform_2, window_bounds = array<i64: 1, 16>}, {transform_indices = @transform_3, window_bounds = array<i64: 1922, 16>}]} {
    %c0 = arith.constant 0 : index
    %c0_0 = arith.constant 0 : index
    %0 = vector.load %arg1[%c0, %c0_0] : memref<1922x243xbf16, #tpu.memory_space<vmem>>, vector<1922x243xbf16>
    %c0_1 = arith.constant 0 : index
    %c0_2 = arith.constant 0 : index
    %1 = vector.load %arg2[%c0_1, %c0_2] : memref<243x16xbf16, #tpu.memory_space<vmem>>, vector<243x16xbf16>
    %cst = arith.constant dense<0.000000e+00> : vector<1922x16xf32>
    %2 = tpu.matmul %0, %1, %cst {dimension_numbers = #tpu.dot_dimension_numbers<[1], [0], [0], [1], [0, 0, 1, 1], [], []>} : vector<1922x243xbf16>, vector<243x16xbf16>, vector<1922x16xf32> -> vector<1922x16xf32>
    %c0_3 = arith.constant 0 : index
    %c0_4 = arith.constant 0 : index
    %3 = vector.load %arg3[%c0_3, %c0_4] : memref<1x16xf32, #tpu.memory_space<vmem>>, vector<1x16xf32>
    %4 = vector.broadcast %3 : vector<1x16xf32> to vector<1922x16xf32>
    %5 = arith.addf %2, %4 : vector<1922x16xf32>
    %cst_5 = arith.constant 0.000000e+00 : f32
    %6 = vector.broadcast %cst_5 : f32 to vector<1922x16xf32>
    %7 = arith.maximumf %5, %6 : vector<1922x16xf32>
    %8 = arith.truncf %7 : vector<1922x16xf32> to vector<1922x16xbf16>
    %c0_6 = arith.constant 0 : index
    %c0_7 = arith.constant 0 : index
    %9 = vector.load %arg4[%c0_6, %c0_7] : memref<1922x16xbf16, #tpu.memory_space<vmem>>, vector<1922x16xbf16>
    tpu.vector_store %arg4[%c0_6, %c0_7], %8 {strides = array<i32>} : memref<1922x16xbf16, #tpu.memory_space<vmem>>, vector<1922x16xbf16>,
    return
  }
  func.func @transform_0(%arg0: i32) -> (i32, i32) {
    %c0_i32 = arith.constant 0 : i32
    %c0_i32_0 = arith.constant 0 : i32
    return %arg0, %c0_i32 : i32, i32
  }
  func.func @transform_1(%arg0: i32) -> (i32, i32) {
    %c0_i32 = arith.constant 0 : i32
    %c0_i32_0 = arith.constant 0 : i32
    %c0_i32_1 = arith.constant 0 : i32
    return %c0_i32, %c0_i32_0 : i32, i32
  }
  func.func @transform_2(%arg0: i32) -> (i32, i32) {
    %c0_i32 = arith.constant 0 : i32
    %c0_i32_0 = arith.constant 0 : i32
    %c0_i32_1 = arith.constant 0 : i32
    return %c0_i32, %c0_i32_0 : i32, i32
  }
  func.func @transform_3(%arg0: i32) -> (i32, i32) {
    %c0_i32 = arith.constant 0 : i32
    %c0_i32_0 = arith.constant 0 : i32
    return %arg0, %c0_i32 : i32, i32
  }
}

module attributes {stable_mosaic.version = 11 : i64} {
  func.func @_conv2_tconv2_kernel(%arg0: i32, %arg1: memref<450x144xbf16, #tpu.memory_space<vmem>>, %arg2: memref<144x4xbf16, #tpu.memory_space<vmem>>, %arg3: memref<1x4xf32, #tpu.memory_space<vmem>>, %arg4: memref<4x144xbf16, #tpu.memory_space<vmem>>, %arg5: memref<450x144xf32, #tpu.memory_space<vmem>>) attributes {dimension_semantics = [#tpu.dimension_semantics<parallel>], iteration_bounds = array<i64: 1>, scalar_prefetch = 0 : i64, scratch_operands = 0 : i64, tpu.core_type = #tpu.core_type<tc>, window_params = [{transform_indices = @transform_0, window_bounds = array<i64: 450, 144>}, {pipeline_mode = #tpu.pipeline_mode<synchronous>, transform_indices = @transform_1, window_bounds = array<i64: 144, 4>}, {pipeline_mode = #tpu.pipeline_mode<synchronous>, transform_indices = @transform_2, window_bounds = array<i64: 1, 4>}, {pipeline_mode = #tpu.pipeline_mode<synchronous>, transform_indices = @transform_3, window_bounds = array<i64: 4, 144>}, {transform_indices = @transform_4, window_bounds = array<i64: 450, 144>}]} {
    %c0 = arith.constant 0 : index
    %c0_0 = arith.constant 0 : index
    %0 = vector.load %arg1[%c0, %c0_0] : memref<450x144xbf16, #tpu.memory_space<vmem>>, vector<450x144xbf16>
    %c0_1 = arith.constant 0 : index
    %c0_2 = arith.constant 0 : index
    %1 = vector.load %arg2[%c0_1, %c0_2] : memref<144x4xbf16, #tpu.memory_space<vmem>>, vector<144x4xbf16>
    %cst = arith.constant dense<0.000000e+00> : vector<450x4xf32>
    %2 = tpu.matmul %0, %1, %cst {dimension_numbers = #tpu.dot_dimension_numbers<[1], [0], [0], [1], [0, 0, 1, 1], [], []>} : vector<450x144xbf16>, vector<144x4xbf16>, vector<450x4xf32> -> vector<450x4xf32>
    %c0_3 = arith.constant 0 : index
    %c0_4 = arith.constant 0 : index
    %3 = vector.load %arg3[%c0_3, %c0_4] : memref<1x4xf32, #tpu.memory_space<vmem>>, vector<1x4xf32>
    %4 = vector.broadcast %3 : vector<1x4xf32> to vector<450x4xf32>
    %5 = arith.addf %2, %4 : vector<450x4xf32>
    %cst_5 = arith.constant 0.000000e+00 : f32
    %6 = vector.broadcast %cst_5 : f32 to vector<450x4xf32>
    %7 = arith.maximumf %5, %6 : vector<450x4xf32>
    %8 = arith.truncf %7 : vector<450x4xf32> to vector<450x4xbf16>
    %c0_6 = arith.constant 0 : index
    %c0_7 = arith.constant 0 : index
    %9 = vector.load %arg4[%c0_6, %c0_7] : memref<4x144xbf16, #tpu.memory_space<vmem>>, vector<4x144xbf16>
    %cst_8 = arith.constant dense<0.000000e+00> : vector<450x144xf32>
    %10 = tpu.matmul %8, %9, %cst_8 {dimension_numbers = #tpu.dot_dimension_numbers<[1], [0], [0], [1], [0, 0, 1, 1], [], []>} : vector<450x4xbf16>, vector<4x144xbf16>, vector<450x144xf32> -> vector<450x144xf32>
    %c0_9 = arith.constant 0 : index
    %c0_10 = arith.constant 0 : index
    %11 = vector.load %arg5[%c0_9, %c0_10] : memref<450x144xf32, #tpu.memory_space<vmem>>, vector<450x144xf32>
    tpu.vector_store %arg5[%c0_9, %c0_10], %10 {strides = array<i32>} : memref<450x144xf32, #tpu.memory_space<vmem>>, vector<450x144xf32>,
    return
  }
  func.func @transform_0(%arg0: i32) -> (i32, i32) {
    %c0_i32 = arith.constant 0 : i32
    %c0_i32_0 = arith.constant 0 : i32
    return %arg0, %c0_i32 : i32, i32
  }
  func.func @transform_1(%arg0: i32) -> (i32, i32) {
    %c0_i32 = arith.constant 0 : i32
    %c0_i32_0 = arith.constant 0 : i32
    %c0_i32_1 = arith.constant 0 : i32
    return %c0_i32, %c0_i32_0 : i32, i32
  }
  func.func @transform_2(%arg0: i32) -> (i32, i32) {
    %c0_i32 = arith.constant 0 : i32
    %c0_i32_0 = arith.constant 0 : i32
    %c0_i32_1 = arith.constant 0 : i32
    return %c0_i32, %c0_i32_0 : i32, i32
  }
  func.func @transform_3(%arg0: i32) -> (i32, i32) {
    %c0_i32 = arith.constant 0 : i32
    %c0_i32_0 = arith.constant 0 : i32
    %c0_i32_1 = arith.constant 0 : i32
    return %c0_i32, %c0_i32_0 : i32, i32
  }
  func.func @transform_4(%arg0: i32) -> (i32, i32) {
    %c0_i32 = arith.constant 0 : i32
    %c0_i32_0 = arith.constant 0 : i32
    return %arg0, %c0_i32 : i32, i32
  }
}

module attributes {stable_mosaic.version = 11 : i64} {
  func.func @_bias_relu_gemm_kernel(%arg0: i32, %arg1: memref<1922x16xf32, #tpu.memory_space<vmem>>, %arg2: memref<1x16xf32, #tpu.memory_space<vmem>>, %arg3: memref<16x256xbf16, #tpu.memory_space<vmem>>, %arg4: memref<1922x256xf32, #tpu.memory_space<vmem>>) attributes {dimension_semantics = [#tpu.dimension_semantics<parallel>], iteration_bounds = array<i64: 1>, scalar_prefetch = 0 : i64, scratch_operands = 0 : i64, tpu.core_type = #tpu.core_type<tc>, window_params = [{transform_indices = @transform_0, window_bounds = array<i64: 1922, 16>}, {pipeline_mode = #tpu.pipeline_mode<synchronous>, transform_indices = @transform_1, window_bounds = array<i64: 1, 16>}, {pipeline_mode = #tpu.pipeline_mode<synchronous>, transform_indices = @transform_2, window_bounds = array<i64: 16, 256>}, {transform_indices = @transform_3, window_bounds = array<i64: 1922, 256>}]} {
    %c0 = arith.constant 0 : index
    %c0_0 = arith.constant 0 : index
    %0 = vector.load %arg1[%c0, %c0_0] : memref<1922x16xf32, #tpu.memory_space<vmem>>, vector<1922x16xf32>
    %c0_1 = arith.constant 0 : index
    %c0_2 = arith.constant 0 : index
    %1 = vector.load %arg2[%c0_1, %c0_2] : memref<1x16xf32, #tpu.memory_space<vmem>>, vector<1x16xf32>
    %2 = vector.broadcast %1 : vector<1x16xf32> to vector<1922x16xf32>
    %3 = arith.addf %0, %2 : vector<1922x16xf32>
    %cst = arith.constant 0.000000e+00 : f32
    %4 = vector.broadcast %cst : f32 to vector<1922x16xf32>
    %5 = arith.maximumf %3, %4 : vector<1922x16xf32>
    %6 = arith.truncf %5 : vector<1922x16xf32> to vector<1922x16xbf16>
    %c0_3 = arith.constant 0 : index
    %c0_4 = arith.constant 0 : index
    %7 = vector.load %arg3[%c0_3, %c0_4] : memref<16x256xbf16, #tpu.memory_space<vmem>>, vector<16x256xbf16>
    %cst_5 = arith.constant dense<0.000000e+00> : vector<1922x256xf32>
    %8 = tpu.matmul %6, %7, %cst_5 {dimension_numbers = #tpu.dot_dimension_numbers<[1], [0], [0], [1], [0, 0, 1, 1], [], []>} : vector<1922x16xbf16>, vector<16x256xbf16>, vector<1922x256xf32> -> vector<1922x256xf32>
    %c0_6 = arith.constant 0 : index
    %c0_7 = arith.constant 0 : index
    %9 = vector.load %arg4[%c0_6, %c0_7] : memref<1922x256xf32, #tpu.memory_space<vmem>>, vector<1922x256xf32>
    tpu.vector_store %arg4[%c0_6, %c0_7], %8 {strides = array<i32>} : memref<1922x256xf32, #tpu.memory_space<vmem>>, vector<1922x256xf32>,
    return
  }
  func.func @transform_0(%arg0: i32) -> (i32, i32) {
    %c0_i32 = arith.constant 0 : i32
    %c0_i32_0 = arith.constant 0 : i32
    return %arg0, %c0_i32 : i32, i32
  }
  func.func @transform_1(%arg0: i32) -> (i32, i32) {
    %c0_i32 = arith.constant 0 : i32
    %c0_i32_0 = arith.constant 0 : i32
    %c0_i32_1 = arith.constant 0 : i32
    return %c0_i32, %c0_i32_0 : i32, i32
  }
  func.func @transform_2(%arg0: i32) -> (i32, i32) {
    %c0_i32 = arith.constant 0 : i32
    %c0_i32_0 = arith.constant 0 : i32
    %c0_i32_1 = arith.constant 0 : i32
    return %c0_i32, %c0_i32_0 : i32, i32
  }
  func.func @transform_3(%arg0: i32) -> (i32, i32) {
    %c0_i32 = arith.constant 0 : i32
    %c0_i32_0 = arith.constant 0 : i32
    return %arg0, %c0_i32 : i32, i32
  }
}

</mosaic_0001>

<bundles_post_ra>
// kernel: conv_autoencoder_shallow_forward.3
= control target key start
LH: loop header
LB: loop body
LE: loop exit
PB: predicated region body
PF: predicated region fallthrough
CT: control target
= control target key end

     0   :  { %vm1833_vm0 = vcmask 1040384   ;;  %vm1834_vm1 = vcmask 1041408   ;;  %v5213_v2 = vmov 65535   ;;  %vm1469_vm2 = vcmask 941056   ;;  %s8081_s1 = inlined_call_operand.vmem [shape: bf16[243,16], index: 1, kind: input, shape index: {}]   ;;  %s8082_s0 = inlined_call_operand.vmem [shape: bf16[1922,243], index: 0, kind: input, shape index: {}]   ;;  %s8083_s2 = inlined_call_operand.vmem [shape: f32[1,16], index: 2, kind: input, shape index: {}]   ;;  %s8084_s3 = inlined_call_operand.vmem [shape: bf16[1922,16], index: 3, kind: output, shape index: {}]  }
   0x1   :  { %v5183_v0 = vld [vmem:[%s8081_s1 + $0x38] sm:$0xff]  ;;  %v1835_v3 = vsel %vm1833_vm0, 4294967295, %v5213_v2  ;;  %v5182_v5 = vld [vmem:[%s8081_s1 + $0x30] sm:$0xff]  ;;  %v5181_v9 = vld [vmem:[%s8081_s1 + $0x28] sm:$0xff]  ;;  %vm3548_vm3 = vcmask 125952   ;;  %vm3789_vm4 = vcmask 122880  }
   0x2   :  { %v285_v1 = vld [vmem:[%s8081_s1 + $0x78] sm:$0x3]  ;;  %5191 = vmatpush.bf16.msra.mxu2 %v5183_v0  ;;  %1840 = vmatpush.bf16.msra.mxu0 %v5183_v0  ;;  %v1836_v6 = vsel %vm1834_vm1, %v1835_v3, 0  ;;  %v5190_v10 = vld [vmem:[%s8081_s1 + $0x70] sm:$0xff]  ;;  %v5180_v11 = vld [vmem:[%s8081_s1 + $0x20] sm:$0xff] }
   0x3   :  { %v1437_v4 = vunpack.c.l.b16 %v285_v1  ;;  %v5189_v12 = vld [vmem:[%s8081_s1 + $0x68] sm:$0xff]  ;;  %v5179_v13 = vld [vmem:[%s8081_s1 + $0x18] sm:$0xff]  ;;  %v5188_v14 = vld [vmem:[%s8081_s1 + $0x60] sm:$0xff] }
   0x4   :  { %v5178_v15 = vld [vmem:[%s8081_s1 + $0x10] sm:$0xff]  ;;  %v5187_v16 = vld [vmem:[%s8081_s1 + $0x58] sm:$0xff]  ;;  %v5177_v17 = vld [vmem:[%s8081_s1 + $0x8] sm:$0xff] }
   0x5   :  { %v1453_v7 = vpack.c.b16 %v1437_v4, %v1437_v4  ;;  %v5186_v18 = vld [vmem:[%s8081_s1 + $0x50] sm:$0xff]  ;;  %v5176_v19 = vld [vmem:[%s8081_s1] sm:$0xff]  ;;  %v5057_v21 = vld [vmem:[%s8082_s0 + $0x3c4] sm:$0xf0] }
   0x6   :  { %5192 = vmatpush.bf16.msra.mxu2 %v5182_v5  ;;  %1841 = vmatpush.bf16.msra.mxu0 %v5182_v5  ;;  %v4277_v20 = vld [vmem:[%s8082_s0 + $0x3c0] sm:$0xf]  ;;  %v4937_v23 = vld [vmem:[%s8082_s0 + $0x4] sm:$0xf0]  ;;  %v4936_v28 = vld [vmem:[%s8082_s0 + $0x4] sm:$0xf] }
   0x7   :  { %v1838_v8 = vand.u32 %v1836_v6, %v1453_v7  ;;  %v3797_v22 = vld [vmem:[%s8082_s0] sm:$0xf]  ;;  %v5185_v24 = vld [vmem:[%s8081_s1 + $0x48] sm:$0xff]  ;;  %v4278_v25 = vor.u32 %v5057_v21, %v4277_v20  ;;  %v5058_v30 = vld [vmem:[%s8082_s0 + $0x3d4] sm:$0xf] }
   0x8   :  { %v3798_v26 = vor.u32 %v4937_v23, %v3797_v22  ;;  %v5184_v27 = vld [vmem:[%s8081_s1 + $0x40] sm:$0xff]  ;;  %v3799_v29 = vld [vmem:[%s8082_s0 + $0x8] sm:$0xf0]  ;;  %v4287_v31 = vld [vmem:[%s8082_s0 + $0x3d8] sm:$0xf0] }
   0x9   :  { %2453 = vmatpush.bf16.msra.mxu1 %v1838_v8  ;;  %5199 = vmatpush.bf16.msra.mxu3 %v1838_v8  ;;  %v3802_v32 = vor.u32 %v4936_v28, %v3799_v29  ;;  %v4290_v33 = vor.u32 %v5058_v30, %v4287_v31  ;;  %v4285_v34 = vld [vmem:[%s8082_s0 + $0x3d0] sm:$0xf]  ;;  %v5059_v35 = vld [vmem:[%s8082_s0 + $0x3d4] sm:$0xf0]  ;;  %v4938_v40 = vld [vmem:[%s8082_s0 + $0x14] sm:$0xf] }
   0xa   :  { %5193 = vmatpush.bf16.msra.mxu2 %v5181_v9  ;;  %1842 = vmatpush.bf16.msra.mxu0 %v5181_v9  ;;  %v3805_v36 = vld [vmem:[%s8082_s0 + $0x10] sm:$0xf]  ;;  %v4939_v37 = vld [vmem:[%s8082_s0 + $0x14] sm:$0xf0]  ;;  %v4286_v38 = vor.u32 %v5059_v35, %v4285_v34  ;;  %v3807_v41 = vld [vmem:[%s8082_s0 + $0x18] sm:$0xf0] }
   0xb   :  { %v3806_v39 = vor.u32 %v4939_v37, %v3805_v36  ;;  %v5060_v42 = vld [vmem:[%s8082_s0 + $0x3e4] sm:$0xf]  ;;  %v4295_v43 = vld [vmem:[%s8082_s0 + $0x3e8] sm:$0xf0]  ;;  %v3810_v44 = vor.u32 %v4938_v40, %v3807_v41  ;;  %v4293_v46 = vld [vmem:[%s8082_s0 + $0x3e0] sm:$0xf] }
   0xc   :  { %v4298_v45 = vor.u32 %v5060_v42, %v4295_v43  ;;  %v5061_v47 = vld [vmem:[%s8082_s0 + $0x3e4] sm:$0xf0]  ;;  %v3813_v48 = vld [vmem:[%s8082_s0 + $0x20] sm:$0xf]  ;;  %v4940_v52 = vld [vmem:[%s8082_s0 + $0x24] sm:$0xf] }
   0xd   :  { %2454 = vmatpush.bf16.msra.mxu1 %v5190_v10  ;;  %5200 = vmatpush.bf16.msra.mxu3 %v5190_v10  ;;  %v4941_v49 = vld [vmem:[%s8082_s0 + $0x24] sm:$0xf0]  ;;  %v4294_v50 = vor.u32 %v5061_v47, %v4293_v46  ;;  %v3815_v53 = vld [vmem:[%s8082_s0 + $0x28] sm:$0xf0]  ;;  %v5062_v54 = vld [vmem:[%s8082_s0 + $0x3f4] sm:$0xf] }
   0xe   :  { %5194 = vmatpush.bf16.msra.mxu2 %v5180_v11  ;;  %1843 = vmatpush.bf16.msra.mxu0 %v5180_v11  ;;  %v3814_v51 = vor.u32 %v4941_v49, %v3813_v48  ;;  %v4303_v55 = vld [vmem:[%s8082_s0 + $0x3f8] sm:$0xf0]  ;;  %v3818_v56 = vor.u32 %v4940_v52, %v3815_v53  ;;  %v4301_v58 = vld [vmem:[%s8082_s0 + $0x3f0] sm:$0xf]  ;;  %v5063_v59 = vld [vmem:[%s8082_s0 + $0x3f4] sm:$0xf0] }
   0xf   :  { %v4306_v57 = vor.u32 %v5062_v54, %v4303_v55  ;;  %v3821_v60 = vld [vmem:[%s8082_s0 + $0x30] sm:$0xf]  ;;  %v4943_v61 = vld [vmem:[%s8082_s0 + $0x34] sm:$0xf0]  ;;  %v4302_v62 = vor.u32 %v5063_v59, %v4301_v58  ;;  %v4942_v0 = vld [vmem:[%s8082_s0 + $0x34] sm:$0xf] }
  0x10   :  { %v3822_v63 = vor.u32 %v4943_v61, %v3821_v60  ;;  %v3823_v1 = vld [vmem:[%s8082_s0 + $0x38] sm:$0xf0]  ;;  %v5064_v2 = vld [vmem:[%s8082_s0 + $0x404] sm:$0xf]  ;;  %v4311_v3 = vld [vmem:[%s8082_s0 + $0x408] sm:$0xf0] }
  0x11   :  { %2455 = vmatpush.bf16.msra.mxu1 %v5189_v12  ;;  %5201 = vmatpush.bf16.msra.mxu3 %v5189_v12  ;;  %v3826_v4 = vor.u32 %v4942_v0, %v3823_v1  ;;  %v4314_v5 = vor.u32 %v5064_v2, %v4311_v3  ;;  %v4309_v6 = vld [vmem:[%s8082_s0 + $0x400] sm:$0xf]  ;;  %v5065_v7 = vld [vmem:[%s8082_s0 + $0x404] sm:$0xf0]  ;;  %v4944_v12 = vld [vmem:[%s8082_s0 + $0x44] sm:$0xf] }
  0x12   :  { %5195 = vmatpush.bf16.msra.mxu2 %v5179_v13  ;;  %1844 = vmatpush.bf16.msra.mxu0 %v5179_v13  ;;  %v3829_v8 = vld [vmem:[%s8082_s0 + $0x40] sm:$0xf]  ;;  %v4945_v9 = vld [vmem:[%s8082_s0 + $0x44] sm:$0xf0]  ;;  %v4310_v10 = vor.u32 %v5065_v7, %v4309_v6  ;;  %v3831_v13 = vld [vmem:[%s8082_s0 + $0x48] sm:$0xf0] }
  0x13   :  { %v3830_v11 = vor.u32 %v4945_v9, %v3829_v8  ;;  %v3837_v20 = vld [vmem:[%s8082_s0 + $0x50] sm:$0xf]  ;;  %v4947_v21 = vld [vmem:[%s8082_s0 + $0x54] sm:$0xf0]  ;;  %v4325_v30 = vld [vmem:[%s8082_s0 + $0x420] sm:$0xf] }
  0x14   :  { %v3838_v23 = vor.u32 %v4947_v21, %v3837_v20  ;;  %v5069_v31 = vld [vmem:[%s8082_s0 + $0x424] sm:$0xf0]  ;;  %v4948_v36 = vld [vmem:[%s8082_s0 + $0x64] sm:$0xf]  ;;  %v3847_v37 = vld [vmem:[%s8082_s0 + $0x68] sm:$0xf0] }
  0x15   :  { %2456 = vmatpush.bf16.msra.mxu1 %v5188_v14  ;;  %5202 = vmatpush.bf16.msra.mxu3 %v5188_v14  ;;  %v5066_v14 = vld [vmem:[%s8082_s0 + $0x414] sm:$0xf]  ;;  %v4326_v34 = vor.u32 %v5069_v31, %v4325_v30  ;;  %v3850_v40 = vor.u32 %v4948_v36, %v3847_v37  ;;  %v4333_v42 = vld [vmem:[%s8082_s0 + $0x430] sm:$0xf]  ;;  %v5071_v43 = vld [vmem:[%s8082_s0 + $0x434] sm:$0xf0] }
  0x16   :  { %5196 = vmatpush.bf16.msra.mxu2 %v5178_v15  ;;  %1845 = vmatpush.bf16.msra.mxu0 %v5178_v15  ;;  %v4319_v15 = vld [vmem:[%s8082_s0 + $0x418] sm:$0xf0]  ;;  %v4334_v46 = vor.u32 %v5071_v43, %v4333_v42  ;;  %v4950_v48 = vld [vmem:[%s8082_s0 + $0x74] sm:$0xf]  ;;  %v4341_v54 = vld [vmem:[%s8082_s0 + $0x440] sm:$0xf] }
  0x17   :  { %v3855_v49 = vld [vmem:[%s8082_s0 + $0x78] sm:$0xf0]  ;;  %v5073_v55 = vld [vmem:[%s8082_s0 + $0x444] sm:$0xf0]  ;;  %v5505_v58 = vld [vmem:[%s8083_s2] ss:$0 sm:$0xff] }
  0x18   :  { %v3858_v52 = vor.u32 %v4950_v48, %v3855_v49  ;;  %v4342_v59 = vor.u32 %v5073_v55, %v4341_v54  ;;  %v5074_v0 = vld [vmem:[%s8082_s0 + $0x454] sm:$0xf]  ;;  %v4351_v1 = vld [vmem:[%s8082_s0 + $0x458] sm:$0xf0]  ;;  %v4357_v43 = vld [vmem:[%s8082_s0 + $0x460] sm:$0xf] }
  0x19   :  { %2457 = vmatpush.bf16.msra.mxu1 %v5187_v16  ;;  %5203 = vmatpush.bf16.msra.mxu3 %v5187_v16  ;;  %v3834_v16 = vor.u32 %v4944_v12, %v3831_v13  ;;  %v4349_v12 = vld [vmem:[%s8082_s0 + $0x450] sm:$0xf]  ;;  %v5075_v13 = vld [vmem:[%s8082_s0 + $0x454] sm:$0xf0] }
  0x1a   :  { %5197 = vmatpush.bf16.msra.mxu2 %v5177_v17  ;;  %1846 = vmatpush.bf16.msra.mxu0 %v5177_v17  ;;  %v4322_v17 = vor.u32 %v5066_v14, %v4319_v15  ;;  %v3869_v15 = vld [vmem:[%s8082_s0 + $0x90] sm:$0xf]  ;;  %v4350_v20 = vor.u32 %v5075_v13, %v4349_v12 }
  0x1d   :  { %2458 = vmatpush.bf16.msra.mxu1 %v5186_v18  ;;  %5204 = vmatpush.bf16.msra.mxu3 %v5186_v18  ;;  %v4317_v18 = vld [vmem:[%s8082_s0 + $0x410] sm:$0xf] }
  0x1e   :  { %5198 = vmatpush.bf16.msra.mxu2 %v5176_v19  ;;  %1847 = vmatpush.bf16.msra.mxu0 %v5176_v19  ;;  %v5067_v19 = vld [vmem:[%s8082_s0 + $0x414] sm:$0xf0] }
  0x1f   :  { %v4318_v22 = vor.u32 %v5067_v19, %v4317_v18 }
  0x21   :  { %2459 = vmatpush.bf16.msra.mxu1 %v5185_v24  ;;  %5205 = vmatpush.bf16.msra.mxu3 %v5185_v24  ;;  %v4946_v24 = vld [vmem:[%s8082_s0 + $0x54] sm:$0xf] }
  0x22   :  { %2148 = vmatmul.bf16.vlgmr.msra.gmra.mxu2 %v4278_v25  ;;  %1848 = vmatmul.bf16.vlgmr.msra.gmra.mxu0 %v3798_v26  ;;  %v3839_v25 = vld [vmem:[%s8082_s0 + $0x58] sm:$0xf0]  ;;  %v5068_v26 = vld [vmem:[%s8082_s0 + $0x424] sm:$0xf] }
  0x23   :  { %v3842_v28 = vor.u32 %v4946_v24, %v3839_v25  ;;  %v4954_v24 = vld [vmem:[%s8082_s0 + $0x94] sm:$0xf]  ;;  %v3871_v25 = vld [vmem:[%s8082_s0 + $0x98] sm:$0xf0] }
  0x24   :  { %v3874_v31 = vor.u32 %v4954_v24, %v3871_v25 }
  0x25   :  { %2460 = vmatpush.bf16.msra.mxu1 %v5184_v27  ;;  %5206 = vmatpush.bf16.msra.mxu3 %v5184_v27  ;;  %v4327_v27 = vld [vmem:[%s8082_s0 + $0x428] sm:$0xf0] }
  0x26   :  { %v4330_v29 = vor.u32 %v5068_v26, %v4327_v27  ;;  %v5076_v26 = vld [vmem:[%s8082_s0 + $0x464] sm:$0xf]  ;;  %v4359_v27 = vld [vmem:[%s8082_s0 + $0x468] sm:$0xf0] }
  0x28   :  { %4815 = vmatmul.msk.bf16.vlgmr.msra.gmra.mxu1 %vm1469_vm2, %v3802_v32  ;;  %4876 = vmatmul.msk.bf16.vlgmr.msra.gmra.mxu3 %vm1469_vm2, %v4290_v33  ;;  %v3845_v32 = vld [vmem:[%s8082_s0 + $0x60] sm:$0xf]  ;;  %v4949_v33 = vld [vmem:[%s8082_s0 + $0x64] sm:$0xf0] }
  0x29   :  { %v3846_v35 = vor.u32 %v4949_v33, %v3845_v32  ;;  %v4362_v32 = vor.u32 %v5076_v26, %v4359_v27 }
  0x32   :  { %2153 = vmatmul.bf16.gmra.mxu2 %v4286_v38  ;;  %1853 = vmatmul.bf16.gmra.mxu0 %v3806_v39  ;;  %v5070_v38 = vld [vmem:[%s8082_s0 + $0x434] sm:$0xf]  ;;  %v4335_v39 = vld [vmem:[%s8082_s0 + $0x438] sm:$0xf0] }
  0x33   :  { %v4338_v41 = vor.u32 %v5070_v38, %v4335_v39 }
  0x38   :  { %4816 = vmatmul.msk.bf16.gmra.mxu1 %vm1469_vm2, %v3810_v44  ;;  %4877 = vmatmul.msk.bf16.gmra.mxu3 %vm1469_vm2, %v4298_v45  ;;  %v3853_v44 = vld [vmem:[%s8082_s0 + $0x70] sm:$0xf]  ;;  %v4951_v45 = vld [vmem:[%s8082_s0 + $0x74] sm:$0xf0] }
  0x39   :  { %v3854_v47 = vor.u32 %v4951_v45, %v3853_v44  ;;  %v5077_v44 = vld [vmem:[%s8082_s0 + $0x464] sm:$0xf0] }
  0x42   :  { %2158 = vmatmul.bf16.gmra.mxu2 %v4294_v50  ;;  %1858 = vmatmul.bf16.gmra.mxu0 %v3814_v51  ;;  %v5072_v50 = vld [vmem:[%s8082_s0 + $0x444] sm:$0xf]  ;;  %v4343_v51 = vld [vmem:[%s8082_s0 + $0x448] sm:$0xf0] }
  0x43   :  { %v4346_v53 = vor.u32 %v5072_v50, %v4343_v51 }
  0x48   :  { %4817 = vmatmul.msk.bf16.gmra.mxu1 %vm1469_vm2, %v3818_v56  ;;  %4878 = vmatmul.msk.bf16.gmra.mxu3 %vm1469_vm2, %v4306_v57  ;;  %v3861_v56 = vld [vmem:[%s8082_s0 + $0x80] sm:$0xf]  ;;  %v4953_v57 = vld [vmem:[%s8082_s0 + $0x84] sm:$0xf0] }
  0x49   :  { %v3862_v60 = vor.u32 %v4953_v57, %v3861_v56  ;;  %v4956_v57 = vld [vmem:[%s8082_s0 + $0xa4] sm:$0xf] }
  0x52   :  { %2163 = vmatmul.bf16.gmra.mxu2 %v4302_v62  ;;  %1863 = vmatmul.bf16.gmra.mxu0 %v3822_v63  ;;  %v4952_v62 = vld [vmem:[%s8082_s0 + $0x84] sm:$0xf]  ;;  %v3863_v63 = vld [vmem:[%s8082_s0 + $0x88] sm:$0xf0] }
  0x53   :  { %v3866_v3 = vor.u32 %v4952_v62, %v3863_v63  ;;  %v4367_v62 = vld [vmem:[%s8082_s0 + $0x478] sm:$0xf0] }
  0x58   :  { %4818 = vmatmul.msk.bf16.gmra.mxu1 %vm1469_vm2, %v3826_v4  ;;  %4879 = vmatmul.msk.bf16.gmra.mxu3 %vm1469_vm2, %v4314_v5  ;;  %v4354_v4 = vor.u32 %v5074_v0, %v4351_v1 }
  0x62   :  { %2168 = vmatmul.bf16.gmra.mxu2 %v4310_v10  ;;  %1868 = vmatmul.bf16.gmra.mxu0 %v3830_v11 }
  0x68   :  { %4819 = vmatmul.msk.bf16.gmra.mxu1 %vm1469_vm2, %v3834_v16  ;;  %4880 = vmatmul.msk.bf16.gmra.mxu3 %vm1469_vm2, %v4322_v17  ;;  %v4955_v16 = vld [vmem:[%s8082_s0 + $0x94] sm:$0xf0] }
  0x69   :  { %v3870_v21 = vor.u32 %v4955_v16, %v3869_v15 }
  0x72   :  { %2173 = vmatmul.bf16.gmra.mxu2 %v4318_v22  ;;  %1873 = vmatmul.bf16.gmra.mxu0 %v3838_v23 }
  0x78   :  { %4820 = vmatmul.msk.bf16.gmra.mxu1 %vm1469_vm2, %v3842_v28  ;;  %4881 = vmatmul.msk.bf16.gmra.mxu3 %vm1469_vm2, %v4330_v29 }
  0x82   :  { %2178 = vmatmul.bf16.gmra.mxu2 %v4326_v34  ;;  %1878 = vmatmul.bf16.gmra.mxu0 %v3846_v35 }
  0x88   :  { %4821 = vmatmul.msk.bf16.gmra.mxu1 %vm1469_vm2, %v3850_v40  ;;  %4882 = vmatmul.msk.bf16.gmra.mxu3 %vm1469_vm2, %v4338_v41 }
  0x92   :  { %2183 = vmatmul.bf16.gmra.mxu2 %v4334_v46  ;;  %1883 = vmatmul.bf16.gmra.mxu0 %v3854_v47  ;;  %v3877_v46 = vld [vmem:[%s8082_s0 + $0xa0] sm:$0xf]  ;;  %v4957_v47 = vld [vmem:[%s8082_s0 + $0xa4] sm:$0xf0] }
  0x93   :  { %v3878_v54 = vor.u32 %v4957_v47, %v3877_v46 }
  0x98   :  { %4822 = vmatmul.msk.bf16.gmra.mxu1 %vm1469_vm2, %v3858_v52  ;;  %4883 = vmatmul.msk.bf16.gmra.mxu3 %vm1469_vm2, %v4346_v53  ;;  %v4358_v53 = vor.u32 %v5077_v44, %v4357_v43 }
  0x9f   :  { %v1849_v61 = vpop.f32.mrf.mxu0 }
  0xa0   :  { %v1850_v2 = vadd.f32 %v5505_v58, %v1849_v61  ;;  %v5078_v61 = vld [vmem:[%s8082_s0 + $0x474] sm:$0xf] }
  0xa2   :  { %2188 = vmatmul.bf16.gmra.mxu2 %v4342_v59  ;;  %1888 = vmatmul.bf16.gmra.mxu0 %v3862_v60  ;;  %v3879_v60 = vld [vmem:[%s8082_s0 + $0xa8] sm:$0xf0] }
  0xa5   :  { %v2462_v5 = vpop.f32.mrf.mxu1  ;;  %v5520_v7 = vpop.f32.mrf.mxu2 }
  0xa6   :  { %v2463_v6 = vadd.f32 %v2462_v5, %v1850_v2 }
  0xa7   :  { %v1851_v9 = vpop.f32.mrf.mxu0 }
  0xa8   :  { %v3066_v8 = vmax.f32 %v2463_v6, 0.0  ;;  %4823 = vmatmul.msk.bf16.gmra.mxu1 %vm1469_vm2, %v3866_v3  ;;  %4884 = vmatmul.msk.bf16.gmra.mxu3 %vm1469_vm2, %v4354_v4  ;;  %v1852_v11 = vadd.f32 %v5505_v58, %v1851_v9  ;;  %v3882_v3 = vor.u32 %v4956_v57, %v3879_v60  ;;  %v4370_v4 = vor.u32 %v5078_v61, %v4367_v62  ;;  %v3893_v57 = vld [vmem:[%s8082_s0 + $0xc0] sm:$0xf] }
  0xaa   :  { %v3307_v10 = vpack.c.bf16 %v3066_v8, %v3066_v8 }
  0xab   :  { %v2767_v14 = vpop.f32.mrf.mxu3 }
  0xac   :  { %3549 = vst.msk [vmem:[%s8084_s3] sm:$0xf] %vm3548_vm3, %v3307_v10 }
  0xad   :  { %v2464_v17 = vpop.f32.mrf.mxu1  ;;  %v5541_v19 = vpop.f32.mrf.mxu2 }
  0xae   :  { %v2465_v18 = vadd.f32 %v2464_v17, %v1852_v11  ;;  %v4365_v17 = vld [vmem:[%s8082_s0 + $0x470] sm:$0xf] }
  0xaf   :  { %v1854_v23 = vpop.f32.mrf.mxu0 }
  0xb0   :  { %v3067_v22 = vmax.f32 %v2465_v18, 0.0  ;;  %v1855_v29 = vadd.f32 %v5505_v58, %v1854_v23  ;;  %v5079_v18 = vld [vmem:[%s8082_s0 + $0x474] sm:$0xf0] }
  0xb2   :  { %v3308_v28 = vpack.c.bf16 %v3067_v22, %v3067_v22  ;;  %2193 = vmatmul.bf16.gmra.mxu2 %v4350_v20  ;;  %1893 = vmatmul.bf16.gmra.mxu0 %v3870_v21  ;;  %v3885_v21 = vld [vmem:[%s8082_s0 + $0xb0] sm:$0xf]  ;;  %v4959_v22 = vld [vmem:[%s8082_s0 + $0xb4] sm:$0xf0] }
  0xb3   :  { %v2769_v30 = vpop.f32.mrf.mxu3 }
  0xb4   :  { %3550 = vst.msk [vmem:[%s8084_s3 + $0x4] sm:$0xf] %vm3548_vm3, %v3308_v28  ;;  %v4366_v28 = vor.u32 %v5079_v18, %v4365_v17 }
  0xb5   :  { %v2467_v33 = vpop.f32.mrf.mxu1  ;;  %v2154_v35 = vpop.f32.mrf.mxu2 }
  0xb6   :  { %v2468_v34 = vadd.f32 %v2467_v33, %v1855_v29  ;;  %v2155_v36 = vadd.f32 %v5505_v58, %v2154_v35  ;;  %v3886_v29 = vor.u32 %v4959_v22, %v3885_v21  ;;  %v5080_v35 = vld [vmem:[%s8082_s0 + $0x484] sm:$0xf] }
  0xb7   :  { %v1856_v38 = vpop.f32.mrf.mxu0 }
  0xb8   :  { %v3068_v37 = vmax.f32 %v2468_v34, 0.0  ;;  %4824 = vmatmul.msk.bf16.gmra.mxu1 %vm1469_vm2, %v3874_v31  ;;  %4885 = vmatmul.msk.bf16.gmra.mxu3 %vm1469_vm2, %v4362_v32  ;;  %v2768_v39 = vadd.f32 %v2767_v14, %v2155_v36  ;;  %v1857_v41 = vadd.f32 %v5505_v58, %v1856_v38  ;;  %v4958_v32 = vld [vmem:[%s8082_s0 + $0xb4] sm:$0xf]  ;;  %v3887_v34 = vld [vmem:[%s8082_s0 + $0xb8] sm:$0xf0] }
  0xb9   :  { %v4375_v36 = vld [vmem:[%s8082_s0 + $0x488] sm:$0xf0] }
  0xba   :  { %v3309_v40 = vpack.c.bf16 %v3068_v37, %v3068_v37  ;;  %v3188_v42 = vmax.f32 %v2768_v39, 0.0 }
  0xbb   :  { %v2772_v45 = vpop.f32.mrf.mxu3 }
  0xbc   :  { %3551 = vst.msk [vmem:[%s8084_s3 + $0x8] sm:$0xf] %vm3548_vm3, %v3309_v40  ;;  %v3429_v48 = vpack.c.bf16 %v3188_v42, %v3188_v42  ;;  %v4378_v42 = vor.u32 %v5080_v35, %v4375_v36 }
  0xbd   :  { %v2469_v49 = vpop.f32.mrf.mxu1  ;;  %v2156_v51 = vpop.f32.mrf.mxu2 }
  0xbe   :  { %v2470_v50 = vadd.f32 %v2469_v49, %v1857_v41  ;;  %3671 = vst.msk [vmem:[%s8084_s3 + $0x1e8] sm:$0xf] %vm3548_vm3, %v3429_v48  ;;  %v2157_v52 = vadd.f32 %v5505_v58, %v2156_v51  ;;  %v3890_v41 = vor.u32 %v4958_v32, %v3887_v34  ;;  %v3901_v32 = vld [vmem:[%s8082_s0 + $0xd0] sm:$0xf] }
  0xbf   :  { %v1859_v56 = vpop.f32.mrf.mxu0 }
  0xc0   :  { %v3069_v55 = vmax.f32 %v2470_v50, 0.0  ;;  %v2770_v59 = vadd.f32 %v2769_v30, %v2157_v52  ;;  %v1860_v0 = vadd.f32 %v5505_v58, %v1859_v56 }
  0xc2   :  { %v3310_v63 = vpack.c.bf16 %v3069_v55, %v3069_v55  ;;  %v3189_v1 = vmax.f32 %v2770_v59, 0.0  ;;  %2198 = vmatmul.bf16.gmra.mxu2 %v4358_v53  ;;  %1898 = vmatmul.bf16.gmra.mxu0 %v3878_v54  ;;  %v4373_v54 = vld [vmem:[%s8082_s0 + $0x480] sm:$0xf]  ;;  %v5081_v55 = vld [vmem:[%s8082_s0 + $0x484] sm:$0xf0] }
  0xc3   :  { %v2774_v2 = vpop.f32.mrf.mxu3  ;;  %v4961_v59 = vld [vmem:[%s8082_s0 + $0xc4] sm:$0xf0] }
  0xc4   :  { %3552 = vst.msk [vmem:[%s8084_s3 + $0xc] sm:$0xf] %vm3548_vm3, %v3310_v63  ;;  %v3430_v5 = vpack.c.bf16 %v3189_v1, %v3189_v1  ;;  %v4374_v1 = vor.u32 %v5081_v55, %v4373_v54 }
  0xc5   :  { %v2472_v6 = vpop.f32.mrf.mxu1  ;;  %v2159_v9 = vpop.f32.mrf.mxu2 }
  0xc6   :  { %v2473_v8 = vadd.f32 %v2472_v6, %v1860_v0  ;;  %3672 = vst.msk [vmem:[%s8084_s3 + $0x1ec] sm:$0xf] %vm3548_vm3, %v3430_v5  ;;  %v2160_v10 = vadd.f32 %v5505_v58, %v2159_v9  ;;  %v4960_v5 = vld [vmem:[%s8082_s0 + $0xc4] sm:$0xf]  ;;  %v5082_v9 = vld [vmem:[%s8082_s0 + $0x494] sm:$0xf] }
  0xc7   :  { %v1861_v12 = vpop.f32.mrf.mxu0 }
  0xc8   :  { %v3070_v11 = vmax.f32 %v2473_v8, 0.0  ;;  %4825 = vmatmul.msk.bf16.gmra.mxu1 %vm1469_vm2, %v3882_v3  ;;  %4886 = vmatmul.msk.bf16.gmra.mxu3 %vm1469_vm2, %v4370_v4  ;;  %v2773_v13 = vadd.f32 %v2772_v45, %v2160_v10  ;;  %v1862_v15 = vadd.f32 %v5505_v58, %v1861_v12  ;;  %v3895_v8 = vld [vmem:[%s8082_s0 + $0xc8] sm:$0xf0]  ;;  %v4383_v10 = vld [vmem:[%s8082_s0 + $0x498] sm:$0xf0] }
  0xca   :  { %v3311_v14 = vpack.c.bf16 %v3070_v11, %v3070_v11  ;;  %v3190_v16 = vmax.f32 %v2773_v13, 0.0 }
  0xcb   :  { %v2777_v20 = vpop.f32.mrf.mxu3 }
  0xcc   :  { %3553 = vst.msk [vmem:[%s8084_s3 + $0x10] sm:$0xf] %vm3548_vm3, %v3311_v14  ;;  %v3431_v23 = vpack.c.bf16 %v3190_v16, %v3190_v16  ;;  %v4386_v16 = vor.u32 %v5082_v9, %v4383_v10 }
  0xcd   :  { %v2474_v24 = vpop.f32.mrf.mxu1  ;;  %v2161_v26 = vpop.f32.mrf.mxu2 }
  0xce   :  { %v2475_v25 = vadd.f32 %v2474_v24, %v1862_v15  ;;  %3673 = vst.msk [vmem:[%s8084_s3 + $0x1f0] sm:$0xf] %vm3548_vm3, %v3431_v23  ;;  %v2162_v27 = vadd.f32 %v5505_v58, %v2161_v26  ;;  %v3898_v15 = vor.u32 %v4960_v5, %v3895_v8  ;;  %v3909_v5 = vld [vmem:[%s8082_s0 + $0xe0] sm:$0xf] }
  0xcf   :  { %v1864_v31 = vpop.f32.mrf.mxu0 }
  0xd0   :  { %v3071_v30 = vmax.f32 %v2475_v25, 0.0  ;;  %v2775_v33 = vadd.f32 %v2774_v2, %v2162_v27  ;;  %v1865_v38 = vadd.f32 %v5505_v58, %v1864_v31  ;;  %v3894_v2 = vor.u32 %v4961_v59, %v3893_v57 }
  0xd2   :  { %v3312_v37 = vpack.c.bf16 %v3071_v30, %v3071_v30  ;;  %v3191_v39 = vmax.f32 %v2775_v33, 0.0  ;;  %2203 = vmatmul.bf16.gmra.mxu2 %v4366_v28  ;;  %1903 = vmatmul.bf16.gmra.mxu0 %v3886_v29  ;;  %v4381_v29 = vld [vmem:[%s8082_s0 + $0x490] sm:$0xf]  ;;  %v5083_v30 = vld [vmem:[%s8082_s0 + $0x494] sm:$0xf0] }
  0xd3   :  { %v2779_v40 = vpop.f32.mrf.mxu3  ;;  %v4963_v33 = vld [vmem:[%s8082_s0 + $0xd4] sm:$0xf0] }
  0xd4   :  { %3554 = vst.msk [vmem:[%s8084_s3 + $0x14] sm:$0xf] %vm3548_vm3, %v3312_v37  ;;  %v3432_v43 = vpack.c.bf16 %v3191_v39, %v3191_v39  ;;  %v4382_v39 = vor.u32 %v5083_v30, %v4381_v29 }
  0xd5   :  { %v2477_v44 = vpop.f32.mrf.mxu1  ;;  %v2164_v46 = vpop.f32.mrf.mxu2 }
  0xd6   :  { %v2478_v45 = vadd.f32 %v2477_v44, %v1865_v38  ;;  %3674 = vst.msk [vmem:[%s8084_s3 + $0x1f4] sm:$0xf] %vm3548_vm3, %v3432_v43  ;;  %v2165_v47 = vadd.f32 %v5505_v58, %v2164_v46  ;;  %v4962_v43 = vld [vmem:[%s8082_s0 + $0xd4] sm:$0xf]  ;;  %v5084_v46 = vld [vmem:[%s8082_s0 + $0x4a4] sm:$0xf] }
  0xd7   :  { %v1866_v49 = vpop.f32.mrf.mxu0 }
  0xd8   :  { %v3072_v48 = vmax.f32 %v2478_v45, 0.0  ;;  %4826 = vmatmul.msk.bf16.gmra.mxu1 %vm1469_vm2, %v3890_v41  ;;  %4887 = vmatmul.msk.bf16.gmra.mxu3 %vm1469_vm2, %v4378_v42  ;;  %v2778_v50 = vadd.f32 %v2777_v20, %v2165_v47  ;;  %v1867_v52 = vadd.f32 %v5505_v58, %v1866_v49  ;;  %v3903_v45 = vld [vmem:[%s8082_s0 + $0xd8] sm:$0xf0]  ;;  %v4391_v47 = vld [vmem:[%s8082_s0 + $0x4a8] sm:$0xf0] }
  0xda   :  { %v3313_v51 = vpack.c.bf16 %v3072_v48, %v3072_v48  ;;  %v3192_v53 = vmax.f32 %v2778_v50, 0.0 }
  0xdb   :  { %v2782_v56 = vpop.f32.mrf.mxu3 }
  0xdc   :  { %3555 = vst.msk [vmem:[%s8084_s3 + $0x18] sm:$0xf] %vm3548_vm3, %v3313_v51  ;;  %v3433_v60 = vpack.c.bf16 %v3192_v53, %v3192_v53  ;;  %v4394_v53 = vor.u32 %v5084_v46, %v4391_v47 }
  0xdd   :  { %v2479_v61 = vpop.f32.mrf.mxu1  ;;  %v2166_v63 = vpop.f32.mrf.mxu2 }
  0xde   :  { %v2480_v62 = vadd.f32 %v2479_v61, %v1867_v52  ;;  %3675 = vst.msk [vmem:[%s8084_s3 + $0x1f8] sm:$0xf] %vm3548_vm3, %v3433_v60  ;;  %v2167_v0 = vadd.f32 %v5505_v58, %v2166_v63  ;;  %v3906_v52 = vor.u32 %v4962_v43, %v3903_v45  ;;  %v3917_v43 = vld [vmem:[%s8082_s0 + $0xf0] sm:$0xf] }
  0xdf   :  { %v1869_v4 = vpop.f32.mrf.mxu0 }
  0xe0   :  { %v3073_v3 = vmax.f32 %v2480_v62, 0.0  ;;  %v2780_v6 = vadd.f32 %v2779_v40, %v2167_v0  ;;  %v1870_v12 = vadd.f32 %v5505_v58, %v1869_v4  ;;  %v3902_v40 = vor.u32 %v4963_v33, %v3901_v32 }
  0xe2   :  { %v3314_v11 = vpack.c.bf16 %v3073_v3, %v3073_v3  ;;  %v3193_v13 = vmax.f32 %v2780_v6, 0.0  ;;  %2208 = vmatmul.bf16.gmra.mxu2 %v4374_v1  ;;  %1908 = vmatmul.bf16.gmra.mxu0 %v3894_v2  ;;  %v4389_v2 = vld [vmem:[%s8082_s0 + $0x4a0] sm:$0xf]  ;;  %v5085_v3 = vld [vmem:[%s8082_s0 + $0x4a4] sm:$0xf0] }
  0xe3   :  { %v2784_v14 = vpop.f32.mrf.mxu3  ;;  %v4965_v6 = vld [vmem:[%s8082_s0 + $0xe4] sm:$0xf0] }
  0xe4   :  { %3556 = vst.msk [vmem:[%s8084_s3 + $0x1c] sm:$0xf] %vm3548_vm3, %v3314_v11  ;;  %v3434_v17 = vpack.c.bf16 %v3193_v13, %v3193_v13  ;;  %v4390_v13 = vor.u32 %v5085_v3, %v4389_v2 }
  0xe5   :  { %v2482_v18 = vpop.f32.mrf.mxu1  ;;  %v2169_v21 = vpop.f32.mrf.mxu2 }
  0xe6   :  { %v2483_v20 = vadd.f32 %v2482_v18, %v1870_v12  ;;  %3676 = vst.msk [vmem:[%s8084_s3 + $0x1fc] sm:$0xf] %vm3548_vm3, %v3434_v17  ;;  %v2170_v22 = vadd.f32 %v5505_v58, %v2169_v21  ;;  %v4964_v17 = vld [vmem:[%s8082_s0 + $0xe4] sm:$0xf]  ;;  %v5086_v21 = vld [vmem:[%s8082_s0 + $0x4b4] sm:$0xf] }
  0xe7   :  { %v1871_v24 = vpop.f32.mrf.mxu0 }
  0xe8   :  { %v3074_v23 = vmax.f32 %v2483_v20, 0.0  ;;  %4827 = vmatmul.msk.bf16.gmra.mxu1 %vm1469_vm2, %v3898_v15  ;;  %4888 = vmatmul.msk.bf16.gmra.mxu3 %vm1469_vm2, %v4386_v16  ;;  %v2783_v25 = vadd.f32 %v2782_v56, %v2170_v22  ;;  %v1872_v27 = vadd.f32 %v5505_v58, %v1871_v24  ;;  %v3911_v20 = vld [vmem:[%s8082_s0 + $0xe8] sm:$0xf0]  ;;  %v4399_v22 = vld [vmem:[%s8082_s0 + $0x4b8] sm:$0xf0] }
  0xea   :  { %v3315_v26 = vpack.c.bf16 %v3074_v23, %v3074_v23  ;;  %v3194_v28 = vmax.f32 %v2783_v25, 0.0 }
  0xeb   :  { %v2787_v31 = vpop.f32.mrf.mxu3 }
  0xec   :  { %3557 = vst.msk [vmem:[%s8084_s3 + $0x20] sm:$0xf] %vm3548_vm3, %v3315_v26  ;;  %v3435_v34 = vpack.c.bf16 %v3194_v28, %v3194_v28  ;;  %v4402_v28 = vor.u32 %v5086_v21, %v4399_v22 }
  0xed   :  { %v2484_v35 = vpop.f32.mrf.mxu1  ;;  %v2171_v37 = vpop.f32.mrf.mxu2 }
  0xee   :  { %v2485_v36 = vadd.f32 %v2484_v35, %v1872_v27  ;;  %3677 = vst.msk [vmem:[%s8084_s3 + $0x200] sm:$0xf] %vm3548_vm3, %v3435_v34  ;;  %v2172_v38 = vadd.f32 %v5505_v58, %v2171_v37  ;;  %v3914_v27 = vor.u32 %v4964_v17, %v3911_v20  ;;  %v3925_v17 = vld [vmem:[%s8082_s0 + $0x100] sm:$0xf] }
  0xef   :  { %v1874_v42 = vpop.f32.mrf.mxu0 }
  0xf0   :  { %v3075_v41 = vmax.f32 %v2485_v36, 0.0  ;;  %v2785_v44 = vadd.f32 %v2784_v14, %v2172_v38  ;;  %v1875_v49 = vadd.f32 %v5505_v58, %v1874_v42  ;;  %v3910_v14 = vor.u32 %v4965_v6, %v3909_v5 }
  0xf2   :  { %v3316_v48 = vpack.c.bf16 %v3075_v41, %v3075_v41  ;;  %v3195_v50 = vmax.f32 %v2785_v44, 0.0  ;;  %2213 = vmatmul.bf16.gmra.mxu2 %v4382_v39  ;;  %1913 = vmatmul.bf16.gmra.mxu0 %v3902_v40  ;;  %v4397_v40 = vld [vmem:[%s8082_s0 + $0x4b0] sm:$0xf]  ;;  %v5087_v41 = vld [vmem:[%s8082_s0 + $0x4b4] sm:$0xf0] }
  0xf3   :  { %v2789_v51 = vpop.f32.mrf.mxu3  ;;  %v4967_v44 = vld [vmem:[%s8082_s0 + $0xf4] sm:$0xf0] }
  0xf4   :  { %3558 = vst.msk [vmem:[%s8084_s3 + $0x24] sm:$0xf] %vm3548_vm3, %v3316_v48  ;;  %v3436_v54 = vpack.c.bf16 %v3195_v50, %v3195_v50  ;;  %v4398_v50 = vor.u32 %v5087_v41, %v4397_v40 }
  0xf5   :  { %v2487_v55 = vpop.f32.mrf.mxu1  ;;  %v2174_v57 = vpop.f32.mrf.mxu2 }
  0xf6   :  { %v2488_v56 = vadd.f32 %v2487_v55, %v1875_v49  ;;  %3678 = vst.msk [vmem:[%s8084_s3 + $0x204] sm:$0xf] %vm3548_vm3, %v3436_v54  ;;  %v2175_v59 = vadd.f32 %v5505_v58, %v2174_v57  ;;  %v4966_v54 = vld [vmem:[%s8082_s0 + $0xf4] sm:$0xf]  ;;  %v5088_v57 = vld [vmem:[%s8082_s0 + $0x4c4] sm:$0xf] }
  0xf7   :  { %v1876_v61 = vpop.f32.mrf.mxu0 }
  0xf8   :  { %v3076_v60 = vmax.f32 %v2488_v56, 0.0  ;;  %4828 = vmatmul.msk.bf16.gmra.mxu1 %vm1469_vm2, %v3906_v52  ;;  %4889 = vmatmul.msk.bf16.gmra.mxu3 %vm1469_vm2, %v4394_v53  ;;  %v2788_v62 = vadd.f32 %v2787_v31, %v2175_v59  ;;  %v1877_v0 = vadd.f32 %v5505_v58, %v1876_v61  ;;  %v3919_v56 = vld [vmem:[%s8082_s0 + $0xf8] sm:$0xf0]  ;;  %v4407_v59 = vld [vmem:[%s8082_s0 + $0x4c8] sm:$0xf0] }
  0xfa   :  { %v3317_v63 = vpack.c.bf16 %v3076_v60, %v3076_v60  ;;  %v3196_v1 = vmax.f32 %v2788_v62, 0.0 }
  0xfb   :  { %v2792_v4 = vpop.f32.mrf.mxu3 }
  0xfc   :  { %3559 = vst.msk [vmem:[%s8084_s3 + $0x28] sm:$0xf] %vm3548_vm3, %v3317_v63  ;;  %v3437_v8 = vpack.c.bf16 %v3196_v1, %v3196_v1  ;;  %v4410_v1 = vor.u32 %v5088_v57, %v4407_v59 }
  0xfd   :  { %v2489_v9 = vpop.f32.mrf.mxu1  ;;  %v2176_v11 = vpop.f32.mrf.mxu2 }
  0xfe   :  { %v2490_v10 = vadd.f32 %v2489_v9, %v1877_v0  ;;  %3679 = vst.msk [vmem:[%s8084_s3 + $0x208] sm:$0xf] %vm3548_vm3, %v3437_v8  ;;  %v2177_v12 = vadd.f32 %v5505_v58, %v2176_v11  ;;  %v3922_v0 = vor.u32 %v4966_v54, %v3919_v56  ;;  %v3933_v54 = vld [vmem:[%s8082_s0 + $0x110] sm:$0xf] }
  0xff   :  { %v1879_v16 = vpop.f32.mrf.mxu0 }
 0x100   :  { %v3077_v15 = vmax.f32 %v2490_v10, 0.0  ;;  %v2790_v18 = vadd.f32 %v2789_v51, %v2177_v12  ;;  %v1880_v24 = vadd.f32 %v5505_v58, %v1879_v16  ;;  %v3918_v51 = vor.u32 %v4967_v44, %v3917_v43 }
 0x102   :  { %v3318_v23 = vpack.c.bf16 %v3077_v15, %v3077_v15  ;;  %v3197_v25 = vmax.f32 %v2790_v18, 0.0  ;;  %2218 = vmatmul.bf16.gmra.mxu2 %v4390_v13  ;;  %1918 = vmatmul.bf16.gmra.mxu0 %v3910_v14  ;;  %v4405_v14 = vld [vmem:[%s8082_s0 + $0x4c0] sm:$0xf]  ;;  %v5089_v15 = vld [vmem:[%s8082_s0 + $0x4c4] sm:$0xf0] }
 0x103   :  { %v2794_v26 = vpop.f32.mrf.mxu3  ;;  %v4969_v18 = vld [vmem:[%s8082_s0 + $0x104] sm:$0xf0] }
 0x104   :  { %3560 = vst.msk [vmem:[%s8084_s3 + $0x2c] sm:$0xf] %vm3548_vm3, %v3318_v23  ;;  %v3438_v29 = vpack.c.bf16 %v3197_v25, %v3197_v25  ;;  %v4406_v25 = vor.u32 %v5089_v15, %v4405_v14 }
 0x105   :  { %v2492_v30 = vpop.f32.mrf.mxu1  ;;  %v2179_v32 = vpop.f32.mrf.mxu2 }
 0x106   :  { %v2493_v31 = vadd.f32 %v2492_v30, %v1880_v24  ;;  %3680 = vst.msk [vmem:[%s8084_s3 + $0x20c] sm:$0xf] %vm3548_vm3, %v3438_v29  ;;  %v2180_v33 = vadd.f32 %v5505_v58, %v2179_v32  ;;  %v4968_v29 = vld [vmem:[%s8082_s0 + $0x104] sm:$0xf]  ;;  %v5090_v32 = vld [vmem:[%s8082_s0 + $0x4d4] sm:$0xf] }
 0x107   :  { %v1881_v35 = vpop.f32.mrf.mxu0 }
 0x108   :  { %v3078_v34 = vmax.f32 %v2493_v31, 0.0  ;;  %4829 = vmatmul.msk.bf16.gmra.mxu1 %vm1469_vm2, %v3914_v27  ;;  %4890 = vmatmul.msk.bf16.gmra.mxu3 %vm1469_vm2, %v4402_v28  ;;  %v2793_v36 = vadd.f32 %v2792_v4, %v2180_v33  ;;  %v1882_v38 = vadd.f32 %v5505_v58, %v1881_v35  ;;  %v3927_v31 = vld [vmem:[%s8082_s0 + $0x108] sm:$0xf0]  ;;  %v4415_v33 = vld [vmem:[%s8082_s0 + $0x4d8] sm:$0xf0] }
 0x10a   :  { %v3319_v37 = vpack.c.bf16 %v3078_v34, %v3078_v34  ;;  %v3198_v39 = vmax.f32 %v2793_v36, 0.0 }
 0x10b   :  { %v2797_v42 = vpop.f32.mrf.mxu3 }
 0x10c   :  { %3561 = vst.msk [vmem:[%s8084_s3 + $0x30] sm:$0xf] %vm3548_vm3, %v3319_v37  ;;  %v3439_v45 = vpack.c.bf16 %v3198_v39, %v3198_v39  ;;  %v4418_v39 = vor.u32 %v5090_v32, %v4415_v33 }
 0x10d   :  { %v2494_v46 = vpop.f32.mrf.mxu1  ;;  %v2181_v48 = vpop.f32.mrf.mxu2 }
 0x10e   :  { %v2495_v47 = vadd.f32 %v2494_v46, %v1882_v38  ;;  %3681 = vst.msk [vmem:[%s8084_s3 + $0x210] sm:$0xf] %vm3548_vm3, %v3439_v45  ;;  %v2182_v49 = vadd.f32 %v5505_v58, %v2181_v48  ;;  %v3930_v38 = vor.u32 %v4968_v29, %v3927_v31  ;;  %v3941_v29 = vld [vmem:[%s8082_s0 + $0x120] sm:$0xf] }
 0x10f   :  { %v1884_v53 = vpop.f32.mrf.mxu0 }
 0x110   :  { %v3079_v52 = vmax.f32 %v2495_v47, 0.0  ;;  %v2795_v55 = vadd.f32 %v2794_v26, %v2182_v49  ;;  %v1885_v61 = vadd.f32 %v5505_v58, %v1884_v53  ;;  %v3926_v26 = vor.u32 %v4969_v18, %v3925_v17 }
 0x112   :  { %v3320_v60 = vpack.c.bf16 %v3079_v52, %v3079_v52  ;;  %v3199_v62 = vmax.f32 %v2795_v55, 0.0  ;;  %2223 = vmatmul.bf16.gmra.mxu2 %v4398_v50  ;;  %1923 = vmatmul.bf16.gmra.mxu0 %v3918_v51  ;;  %v4413_v51 = vld [vmem:[%s8082_s0 + $0x4d0] sm:$0xf]  ;;  %v5091_v52 = vld [vmem:[%s8082_s0 + $0x4d4] sm:$0xf0] }
 0x113   :  { %v2799_v63 = vpop.f32.mrf.mxu3  ;;  %v4971_v55 = vld [vmem:[%s8082_s0 + $0x114] sm:$0xf0] }
 0x114   :  { %3562 = vst.msk [vmem:[%s8084_s3 + $0x34] sm:$0xf] %vm3548_vm3, %v3320_v60  ;;  %v3440_v2 = vpack.c.bf16 %v3199_v62, %v3199_v62  ;;  %v4414_v62 = vor.u32 %v5091_v52, %v4413_v51 }
 0x115   :  { %v2497_v3 = vpop.f32.mrf.mxu1  ;;  %v2184_v5 = vpop.f32.mrf.mxu2 }
 0x116   :  { %v2498_v4 = vadd.f32 %v2497_v3, %v1885_v61  ;;  %3682 = vst.msk [vmem:[%s8084_s3 + $0x214] sm:$0xf] %vm3548_vm3, %v3440_v2  ;;  %v2185_v6 = vadd.f32 %v5505_v58, %v2184_v5  ;;  %v4970_v2 = vld [vmem:[%s8082_s0 + $0x114] sm:$0xf]  ;;  %v5092_v5 = vld [vmem:[%s8082_s0 + $0x4e4] sm:$0xf] }
 0x117   :  { %v1886_v9 = vpop.f32.mrf.mxu0 }
 0x118   :  { %v3080_v8 = vmax.f32 %v2498_v4, 0.0  ;;  %4830 = vmatmul.msk.bf16.gmra.mxu1 %vm1469_vm2, %v3922_v0  ;;  %4891 = vmatmul.msk.bf16.gmra.mxu3 %vm1469_vm2, %v4410_v1  ;;  %v2798_v10 = vadd.f32 %v2797_v42, %v2185_v6  ;;  %v1887_v12 = vadd.f32 %v5505_v58, %v1886_v9  ;;  %v3935_v4 = vld [vmem:[%s8082_s0 + $0x118] sm:$0xf0]  ;;  %v4423_v6 = vld [vmem:[%s8082_s0 + $0x4e8] sm:$0xf0] }
 0x11a   :  { %v3321_v11 = vpack.c.bf16 %v3080_v8, %v3080_v8  ;;  %v3200_v13 = vmax.f32 %v2798_v10, 0.0 }
 0x11b   :  { %v2802_v16 = vpop.f32.mrf.mxu3 }
 0x11c   :  { %3563 = vst.msk [vmem:[%s8084_s3 + $0x38] sm:$0xf] %vm3548_vm3, %v3321_v11  ;;  %v3441_v20 = vpack.c.bf16 %v3200_v13, %v3200_v13  ;;  %v4426_v13 = vor.u32 %v5092_v5, %v4423_v6 }
 0x11d   :  { %v2499_v21 = vpop.f32.mrf.mxu1  ;;  %v2186_v23 = vpop.f32.mrf.mxu2 }
 0x11e   :  { %v2500_v22 = vadd.f32 %v2499_v21, %v1887_v12  ;;  %3683 = vst.msk [vmem:[%s8084_s3 + $0x218] sm:$0xf] %vm3548_vm3, %v3441_v20  ;;  %v2187_v24 = vadd.f32 %v5505_v58, %v2186_v23  ;;  %v3938_v12 = vor.u32 %v4970_v2, %v3935_v4  ;;  %v3949_v2 = vld [vmem:[%s8082_s0 + $0x130] sm:$0xf] }
 0x11f   :  { %v1889_v28 = vpop.f32.mrf.mxu0 }
 0x120   :  { %v3081_v27 = vmax.f32 %v2500_v22, 0.0  ;;  %v2800_v30 = vadd.f32 %v2799_v63, %v2187_v24  ;;  %v1890_v35 = vadd.f32 %v5505_v58, %v1889_v28  ;;  %v3934_v63 = vor.u32 %v4971_v55, %v3933_v54 }
 0x122   :  { %v3322_v34 = vpack.c.bf16 %v3081_v27, %v3081_v27  ;;  %v3201_v36 = vmax.f32 %v2800_v30, 0.0  ;;  %2228 = vmatmul.bf16.gmra.mxu2 %v4406_v25  ;;  %1928 = vmatmul.bf16.gmra.mxu0 %v3926_v26  ;;  %v4421_v26 = vld [vmem:[%s8082_s0 + $0x4e0] sm:$0xf]  ;;  %v5093_v27 = vld [vmem:[%s8082_s0 + $0x4e4] sm:$0xf0] }
 0x123   :  { %v2804_v37 = vpop.f32.mrf.mxu3  ;;  %v4973_v30 = vld [vmem:[%s8082_s0 + $0x124] sm:$0xf0] }
 0x124   :  { %3564 = vst.msk [vmem:[%s8084_s3 + $0x3c] sm:$0xf] %vm3548_vm3, %v3322_v34  ;;  %v3442_v40 = vpack.c.bf16 %v3201_v36, %v3201_v36  ;;  %v4422_v36 = vor.u32 %v5093_v27, %v4421_v26 }
 0x125   :  { %v2502_v41 = vpop.f32.mrf.mxu1  ;;  %v2189_v43 = vpop.f32.mrf.mxu2 }
 0x126   :  { %v2503_v42 = vadd.f32 %v2502_v41, %v1890_v35  ;;  %3684 = vst.msk [vmem:[%s8084_s3 + $0x21c] sm:$0xf] %vm3548_vm3, %v3442_v40  ;;  %v2190_v44 = vadd.f32 %v5505_v58, %v2189_v43  ;;  %v4972_v40 = vld [vmem:[%s8082_s0 + $0x124] sm:$0xf]  ;;  %v5094_v43 = vld [vmem:[%s8082_s0 + $0x4f4] sm:$0xf] }
 0x127   :  { %v1891_v46 = vpop.f32.mrf.mxu0 }
 0x128   :  { %v3082_v45 = vmax.f32 %v2503_v42, 0.0  ;;  %4831 = vmatmul.msk.bf16.gmra.mxu1 %vm1469_vm2, %v3930_v38  ;;  %4892 = vmatmul.msk.bf16.gmra.mxu3 %vm1469_vm2, %v4418_v39  ;;  %v2803_v47 = vadd.f32 %v2802_v16, %v2190_v44  ;;  %v1892_v49 = vadd.f32 %v5505_v58, %v1891_v46  ;;  %v3943_v42 = vld [vmem:[%s8082_s0 + $0x128] sm:$0xf0]  ;;  %v4431_v44 = vld [vmem:[%s8082_s0 + $0x4f8] sm:$0xf0] }
 0x12a   :  { %v3323_v48 = vpack.c.bf16 %v3082_v45, %v3082_v45  ;;  %v3202_v50 = vmax.f32 %v2803_v47, 0.0 }
 0x12b   :  { %v2807_v53 = vpop.f32.mrf.mxu3 }
 0x12c   :  { %3565 = vst.msk [vmem:[%s8084_s3 + $0x40] sm:$0xf] %vm3548_vm3, %v3323_v48  ;;  %v3443_v56 = vpack.c.bf16 %v3202_v50, %v3202_v50  ;;  %v4434_v50 = vor.u32 %v5094_v43, %v4431_v44 }
 0x12d   :  { %v2504_v57 = vpop.f32.mrf.mxu1  ;;  %v2191_v60 = vpop.f32.mrf.mxu2 }
 0x12e   :  { %v2505_v59 = vadd.f32 %v2504_v57, %v1892_v49  ;;  %3685 = vst.msk [vmem:[%s8084_s3 + $0x220] sm:$0xf] %vm3548_vm3, %v3443_v56  ;;  %v2192_v61 = vadd.f32 %v5505_v58, %v2191_v60  ;;  %v3946_v49 = vor.u32 %v4972_v40, %v3943_v42  ;;  %v3957_v40 = vld [vmem:[%s8082_s0 + $0x140] sm:$0xf] }
 0x12f   :  { %v1894_v1 = vpop.f32.mrf.mxu0 }
 0x130   :  { %v3083_v0 = vmax.f32 %v2505_v59, 0.0  ;;  %v2805_v3 = vadd.f32 %v2804_v37, %v2192_v61  ;;  %v1895_v9 = vadd.f32 %v5505_v58, %v1894_v1  ;;  %v3942_v37 = vor.u32 %v4973_v30, %v3941_v29 }
 0x132   :  { %v3324_v8 = vpack.c.bf16 %v3083_v0, %v3083_v0  ;;  %v3203_v10 = vmax.f32 %v2805_v3, 0.0  ;;  %2233 = vmatmul.bf16.gmra.mxu2 %v4414_v62  ;;  %1933 = vmatmul.bf16.gmra.mxu0 %v3934_v63  ;;  %v4429_v63 = vld [vmem:[%s8082_s0 + $0x4f0] sm:$0xf]  ;;  %v5095_v0 = vld [vmem:[%s8082_s0 + $0x4f4] sm:$0xf0] }
 0x133   :  { %v2809_v11 = vpop.f32.mrf.mxu3  ;;  %v4975_v3 = vld [vmem:[%s8082_s0 + $0x134] sm:$0xf0] }
 0x134   :  { %3566 = vst.msk [vmem:[%s8084_s3 + $0x44] sm:$0xf] %vm3548_vm3, %v3324_v8  ;;  %v3444_v14 = vpack.c.bf16 %v3203_v10, %v3203_v10  ;;  %v4430_v10 = vor.u32 %v5095_v0, %v4429_v63 }
 0x135   :  { %v2507_v15 = vpop.f32.mrf.mxu1  ;;  %v2194_v17 = vpop.f32.mrf.mxu2 }
 0x136   :  { %v2508_v16 = vadd.f32 %v2507_v15, %v1895_v9  ;;  %3686 = vst.msk [vmem:[%s8084_s3 + $0x224] sm:$0xf] %vm3548_vm3, %v3444_v14  ;;  %v2195_v18 = vadd.f32 %v5505_v58, %v2194_v17  ;;  %v4974_v14 = vld [vmem:[%s8082_s0 + $0x134] sm:$0xf]  ;;  %v5096_v17 = vld [vmem:[%s8082_s0 + $0x504] sm:$0xf] }
 0x137   :  { %v1896_v21 = vpop.f32.mrf.mxu0 }
 0x138   :  { %v3084_v20 = vmax.f32 %v2508_v16, 0.0  ;;  %4832 = vmatmul.msk.bf16.gmra.mxu1 %vm1469_vm2, %v3938_v12  ;;  %4893 = vmatmul.msk.bf16.gmra.mxu3 %vm1469_vm2, %v4426_v13  ;;  %v2808_v22 = vadd.f32 %v2807_v53, %v2195_v18  ;;  %v1897_v24 = vadd.f32 %v5505_v58, %v1896_v21  ;;  %v3951_v16 = vld [vmem:[%s8082_s0 + $0x138] sm:$0xf0]  ;;  %v4439_v18 = vld [vmem:[%s8082_s0 + $0x508] sm:$0xf0] }
 0x13a   :  { %v3325_v23 = vpack.c.bf16 %v3084_v20, %v3084_v20  ;;  %v3204_v25 = vmax.f32 %v2808_v22, 0.0 }
 0x13b   :  { %v2812_v28 = vpop.f32.mrf.mxu3 }
 0x13c   :  { %3567 = vst.msk [vmem:[%s8084_s3 + $0x48] sm:$0xf] %vm3548_vm3, %v3325_v23  ;;  %v3445_v31 = vpack.c.bf16 %v3204_v25, %v3204_v25  ;;  %v4442_v25 = vor.u32 %v5096_v17, %v4439_v18 }
 0x13d   :  { %v2509_v32 = vpop.f32.mrf.mxu1  ;;  %v2196_v34 = vpop.f32.mrf.mxu2 }
 0x13e   :  { %v2510_v33 = vadd.f32 %v2509_v32, %v1897_v24  ;;  %3687 = vst.msk [vmem:[%s8084_s3 + $0x228] sm:$0xf] %vm3548_vm3, %v3445_v31  ;;  %v2197_v35 = vadd.f32 %v5505_v58, %v2196_v34  ;;  %v3954_v24 = vor.u32 %v4974_v14, %v3951_v16  ;;  %v3965_v14 = vld [vmem:[%s8082_s0 + $0x150] sm:$0xf] }
 0x13f   :  { %v1899_v39 = vpop.f32.mrf.mxu0 }
 0x140   :  { %v3085_v38 = vmax.f32 %v2510_v33, 0.0  ;;  %v2810_v41 = vadd.f32 %v2809_v11, %v2197_v35  ;;  %v1900_v46 = vadd.f32 %v5505_v58, %v1899_v39  ;;  %v3950_v11 = vor.u32 %v4975_v3, %v3949_v2 }
 0x142   :  { %v3326_v45 = vpack.c.bf16 %v3085_v38, %v3085_v38  ;;  %v3205_v47 = vmax.f32 %v2810_v41, 0.0  ;;  %2238 = vmatmul.bf16.gmra.mxu2 %v4422_v36  ;;  %1938 = vmatmul.bf16.gmra.mxu0 %v3942_v37  ;;  %v4437_v37 = vld [vmem:[%s8082_s0 + $0x500] sm:$0xf]  ;;  %v5097_v38 = vld [vmem:[%s8082_s0 + $0x504] sm:$0xf0] }
 0x143   :  { %v2814_v48 = vpop.f32.mrf.mxu3 }
 0x144   :  { %3568 = vst.msk [vmem:[%s8084_s3 + $0x4c] sm:$0xf] %vm3548_vm3, %v3326_v45  ;;  %v3446_v51 = vpack.c.bf16 %v3205_v47, %v3205_v47  ;;  %v6047_v45 = vld [vmem:[%s8083_s2] ss:$0 sm:$0xff]  ;;  %v4438_v47 = vor.u32 %v5097_v38, %v4437_v37 }
 0x145   :  { %v2512_v52 = vpop.f32.mrf.mxu1  ;;  %v2199_v54 = vpop.f32.mrf.mxu2 }
 0x146   :  { %v2513_v53 = vadd.f32 %v2512_v52, %v1900_v46  ;;  %3688 = vst.msk [vmem:[%s8084_s3 + $0x22c] sm:$0xf] %vm3548_vm3, %v3446_v51  ;;  %v2200_v55 = vadd.f32 %v5505_v58, %v2199_v54  ;;  %v4976_v51 = vld [vmem:[%s8082_s0 + $0x144] sm:$0xf]  ;;  %v5098_v54 = vld [vmem:[%s8082_s0 + $0x514] sm:$0xf] }
 0x147   :  { %v1901_v57 = vpop.f32.mrf.mxu0 }
 0x148   :  { %v3086_v56 = vmax.f32 %v2513_v53, 0.0  ;;  %4833 = vmatmul.msk.bf16.gmra.mxu1 %vm1469_vm2, %v3946_v49  ;;  %4894 = vmatmul.msk.bf16.gmra.mxu3 %vm1469_vm2, %v4434_v50  ;;  %v2813_v59 = vadd.f32 %v2812_v28, %v2200_v55  ;;  %v1902_v61 = vadd.f32 %v5505_v58, %v1901_v57  ;;  %v3959_v53 = vld [vmem:[%s8082_s0 + $0x148] sm:$0xf0]  ;;  %v4447_v55 = vld [vmem:[%s8082_s0 + $0x518] sm:$0xf0] }
 0x14a   :  { %v3327_v60 = vpack.c.bf16 %v3086_v56, %v3086_v56  ;;  %v3206_v62 = vmax.f32 %v2813_v59, 0.0 }
 0x14b   :  { %v2817_v1 = vpop.f32.mrf.mxu3 }
 0x14c   :  { %3569 = vst.msk [vmem:[%s8084_s3 + $0x50] sm:$0xf] %vm3548_vm3, %v3327_v60  ;;  %v3447_v4 = vpack.c.bf16 %v3206_v62, %v3206_v62  ;;  %v4450_v62 = vor.u32 %v5098_v54, %v4447_v55 }
 0x14d   :  { %v2514_v5 = vpop.f32.mrf.mxu1  ;;  %v2201_v8 = vpop.f32.mrf.mxu2 }
 0x14e   :  { %v2515_v6 = vadd.f32 %v2514_v5, %v1902_v61  ;;  %3689 = vst.msk [vmem:[%s8084_s3 + $0x230] sm:$0xf] %vm3548_vm3, %v3447_v4  ;;  %v2202_v9 = vadd.f32 %v5505_v58, %v2201_v8  ;;  %v3962_v61 = vor.u32 %v4976_v51, %v3959_v53  ;;  %v3973_v51 = vld [vmem:[%s8082_s0 + $0x160] sm:$0xf] }
 0x14f   :  { %v1904_v13 = vpop.f32.mrf.mxu0 }
 0x150   :  { %v3087_v12 = vmax.f32 %v2515_v6, 0.0  ;;  %v2815_v15 = vadd.f32 %v2814_v48, %v2202_v9  ;;  %v1905_v21 = vadd.f32 %v5505_v58, %v1904_v13 }
 0x152   :  { %v3328_v20 = vpack.c.bf16 %v3087_v12, %v3087_v12  ;;  %v3207_v22 = vmax.f32 %v2815_v15, 0.0  ;;  %2243 = vmatmul.bf16.gmra.mxu2 %v4430_v10  ;;  %1943 = vmatmul.bf16.gmra.mxu0 %v3950_v11  ;;  %v4445_v11 = vld [vmem:[%s8082_s0 + $0x510] sm:$0xf]  ;;  %v5099_v12 = vld [vmem:[%s8082_s0 + $0x514] sm:$0xf0] }
 0x153   :  { %v2819_v23 = vpop.f32.mrf.mxu3  ;;  %v4979_v15 = vld [vmem:[%s8082_s0 + $0x154] sm:$0xf0] }
 0x154   :  { %3570 = vst.msk [vmem:[%s8084_s3 + $0x54] sm:$0xf] %vm3548_vm3, %v3328_v20  ;;  %v3448_v26 = vpack.c.bf16 %v3207_v22, %v3207_v22  ;;  %v4446_v22 = vor.u32 %v5099_v12, %v4445_v11 }
 0x155   :  { %v2517_v27 = vpop.f32.mrf.mxu1  ;;  %v2204_v29 = vpop.f32.mrf.mxu2 }
 0x156   :  { %v2518_v28 = vadd.f32 %v2517_v27, %v1905_v21  ;;  %3690 = vst.msk [vmem:[%s8084_s3 + $0x234] sm:$0xf] %vm3548_vm3, %v3448_v26  ;;  %v2205_v30 = vadd.f32 %v5505_v58, %v2204_v29  ;;  %v4978_v26 = vld [vmem:[%s8082_s0 + $0x154] sm:$0xf]  ;;  %v5100_v29 = vld [vmem:[%s8082_s0 + $0x524] sm:$0xf] }
 0x157   :  { %v1906_v32 = vpop.f32.mrf.mxu0 }
 0x158   :  { %v3088_v31 = vmax.f32 %v2518_v28, 0.0  ;;  %4834 = vmatmul.msk.bf16.gmra.mxu1 %vm1469_vm2, %v3954_v24  ;;  %4895 = vmatmul.msk.bf16.gmra.mxu3 %vm1469_vm2, %v4442_v25  ;;  %v2818_v33 = vadd.f32 %v2817_v1, %v2205_v30  ;;  %v1907_v35 = vadd.f32 %v5505_v58, %v1906_v32  ;;  %v4977_v58 = vld [vmem:[%s8082_s0 + $0x144] sm:$0xf0]  ;;  %v3967_v28 = vld [vmem:[%s8082_s0 + $0x158] sm:$0xf0] }
 0x159   :  { %v3958_v48 = vor.u32 %v4977_v58, %v3957_v40  ;;  %v4455_v30 = vld [vmem:[%s8082_s0 + $0x528] sm:$0xf0] }
 0x15a   :  { %v3329_v34 = vpack.c.bf16 %v3088_v31, %v3088_v31  ;;  %v3208_v36 = vmax.f32 %v2818_v33, 0.0 }
 0x15b   :  { %v2822_v39 = vpop.f32.mrf.mxu3 }
 0x15c   :  { %3571 = vst.msk [vmem:[%s8084_s3 + $0x58] sm:$0xf] %vm3548_vm3, %v3329_v34  ;;  %v3449_v41 = vpack.c.bf16 %v3208_v36, %v3208_v36  ;;  %v4458_v36 = vor.u32 %v5100_v29, %v4455_v30 }
 0x15d   :  { %v2519_v42 = vpop.f32.mrf.mxu1  ;;  %v2206_v44 = vpop.f32.mrf.mxu2 }
 0x15e   :  { %v2520_v43 = vadd.f32 %v2519_v42, %v1907_v35  ;;  %3691 = vst.msk [vmem:[%s8084_s3 + $0x238] sm:$0xf] %vm3548_vm3, %v3449_v41  ;;  %v2207_v46 = vadd.f32 %v6047_v45, %v2206_v44  ;;  %v3970_v35 = vor.u32 %v4978_v26, %v3967_v28  ;;  %v3981_v26 = vld [vmem:[%s8082_s0 + $0x170] sm:$0xf] }
 0x15f   :  { %v1909_v50 = vpop.f32.mrf.mxu0 }
 0x160   :  { %v3089_v49 = vmax.f32 %v2520_v43, 0.0  ;;  %v2820_v52 = vadd.f32 %v2819_v23, %v2207_v46  ;;  %v1910_v57 = vadd.f32 %v6047_v45, %v1909_v50  ;;  %v3966_v23 = vor.u32 %v4979_v15, %v3965_v14 }
 0x162   :  { %v3330_v56 = vpack.c.bf16 %v3089_v49, %v3089_v49  ;;  %v3209_v59 = vmax.f32 %v2820_v52, 0.0  ;;  %2248 = vmatmul.bf16.gmra.mxu2 %v4438_v47  ;;  %1948 = vmatmul.bf16.gmra.mxu0 %v3958_v48  ;;  %v4453_v48 = vld [vmem:[%s8082_s0 + $0x520] sm:$0xf]  ;;  %v5101_v49 = vld [vmem:[%s8082_s0 + $0x524] sm:$0xf0] }
 0x163   :  { %v2824_v60 = vpop.f32.mrf.mxu3  ;;  %v4981_v52 = vld [vmem:[%s8082_s0 + $0x164] sm:$0xf0] }
 0x164   :  { %3572 = vst.msk [vmem:[%s8084_s3 + $0x5c] sm:$0xf] %vm3548_vm3, %v3330_v56  ;;  %v3450_v63 = vpack.c.bf16 %v3209_v59, %v3209_v59  ;;  %v4454_v59 = vor.u32 %v5101_v49, %v4453_v48 }
 0x165   :  { %v2522_v0 = vpop.f32.mrf.mxu1  ;;  %v2209_v2 = vpop.f32.mrf.mxu2 }
 0x166   :  { %v2523_v1 = vadd.f32 %v2522_v0, %v1910_v57  ;;  %3692 = vst.msk [vmem:[%s8084_s3 + $0x23c] sm:$0xf] %vm3548_vm3, %v3450_v63  ;;  %v2210_v3 = vadd.f32 %v6047_v45, %v2209_v2  ;;  %v4980_v63 = vld [vmem:[%s8082_s0 + $0x164] sm:$0xf]  ;;  %v5102_v2 = vld [vmem:[%s8082_s0 + $0x534] sm:$0xf] }
 0x167   :  { %v1911_v5 = vpop.f32.mrf.mxu0 }
 0x168   :  { %v3090_v4 = vmax.f32 %v2523_v1, 0.0  ;;  %4835 = vmatmul.msk.bf16.gmra.mxu1 %vm1469_vm2, %v3962_v61  ;;  %4896 = vmatmul.msk.bf16.gmra.mxu3 %vm1469_vm2, %v4450_v62  ;;  %v2823_v6 = vadd.f32 %v2822_v39, %v2210_v3  ;;  %v1912_v9 = vadd.f32 %v6047_v45, %v1911_v5  ;;  %v3975_v1 = vld [vmem:[%s8082_s0 + $0x168] sm:$0xf0]  ;;  %v4463_v3 = vld [vmem:[%s8082_s0 + $0x538] sm:$0xf0] }
 0x16a   :  { %v3331_v8 = vpack.c.bf16 %v3090_v4, %v3090_v4  ;;  %v3210_v10 = vmax.f32 %v2823_v6, 0.0 }
 0x16b   :  { %v2827_v13 = vpop.f32.mrf.mxu3 }
 0x16c   :  { %3573 = vst.msk [vmem:[%s8084_s3 + $0x60] sm:$0xf] %vm3548_vm3, %v3331_v8  ;;  %v3451_v16 = vpack.c.bf16 %v3210_v10, %v3210_v10  ;;  %v4466_v10 = vor.u32 %v5102_v2, %v4463_v3 }
 0x16d   :  { %v2524_v17 = vpop.f32.mrf.mxu1  ;;  %v2211_v20 = vpop.f32.mrf.mxu2 }
 0x16e   :  { %v2525_v18 = vadd.f32 %v2524_v17, %v1912_v9  ;;  %3693 = vst.msk [vmem:[%s8084_s3 + $0x240] sm:$0xf] %vm3548_vm3, %v3451_v16  ;;  %v2212_v21 = vadd.f32 %v6047_v45, %v2211_v20  ;;  %v3978_v9 = vor.u32 %v4980_v63, %v3975_v1  ;;  %v3989_v63 = vld [vmem:[%s8082_s0 + $0x180] sm:$0xf] }
 0x16f   :  { %v1914_v25 = vpop.f32.mrf.mxu0 }
 0x170   :  { %v3091_v24 = vmax.f32 %v2525_v18, 0.0  ;;  %v2825_v27 = vadd.f32 %v2824_v60, %v2212_v21  ;;  %v1915_v32 = vadd.f32 %v6047_v45, %v1914_v25  ;;  %v3974_v60 = vor.u32 %v4981_v52, %v3973_v51 }
 0x172   :  { %v3332_v31 = vpack.c.bf16 %v3091_v24, %v3091_v24  ;;  %v3211_v33 = vmax.f32 %v2825_v27, 0.0  ;;  %2253 = vmatmul.bf16.gmra.mxu2 %v4446_v22  ;;  %1953 = vmatmul.bf16.gmra.mxu0 %v3966_v23  ;;  %v4461_v23 = vld [vmem:[%s8082_s0 + $0x530] sm:$0xf]  ;;  %v5103_v24 = vld [vmem:[%s8082_s0 + $0x534] sm:$0xf0] }
 0x173   :  { %v2829_v34 = vpop.f32.mrf.mxu3  ;;  %v4983_v27 = vld [vmem:[%s8082_s0 + $0x174] sm:$0xf0] }
 0x174   :  { %3574 = vst.msk [vmem:[%s8084_s3 + $0x64] sm:$0xf] %vm3548_vm3, %v3332_v31  ;;  %v3452_v37 = vpack.c.bf16 %v3211_v33, %v3211_v33  ;;  %v4462_v33 = vor.u32 %v5103_v24, %v4461_v23 }
 0x175   :  { %v2527_v38 = vpop.f32.mrf.mxu1  ;;  %v2214_v40 = vpop.f32.mrf.mxu2 }
 0x176   :  { %v2528_v39 = vadd.f32 %v2527_v38, %v1915_v32  ;;  %3694 = vst.msk [vmem:[%s8084_s3 + $0x244] sm:$0xf] %vm3548_vm3, %v3452_v37  ;;  %v2215_v58 = vadd.f32 %v6047_v45, %v2214_v40  ;;  %v4982_v37 = vld [vmem:[%s8082_s0 + $0x174] sm:$0xf]  ;;  %v5104_v40 = vld [vmem:[%s8082_s0 + $0x544] sm:$0xf] }
 0x177   :  { %v1916_v42 = vpop.f32.mrf.mxu0 }
 0x178   :  { %v3092_v41 = vmax.f32 %v2528_v39, 0.0  ;;  %4836 = vmatmul.msk.bf16.gmra.mxu1 %vm1469_vm2, %v3970_v35  ;;  %4897 = vmatmul.msk.bf16.gmra.mxu3 %vm1469_vm2, %v4458_v36  ;;  %v2828_v43 = vadd.f32 %v2827_v13, %v2215_v58  ;;  %v1917_v46 = vadd.f32 %v6047_v45, %v1916_v42  ;;  %v3983_v39 = vld [vmem:[%s8082_s0 + $0x178] sm:$0xf0]  ;;  %v4471_v58 = vld [vmem:[%s8082_s0 + $0x548] sm:$0xf0] }
 0x17a   :  { %v3333_v44 = vpack.c.bf16 %v3092_v41, %v3092_v41  ;;  %v3212_v47 = vmax.f32 %v2828_v43, 0.0 }
 0x17b   :  { %v2832_v50 = vpop.f32.mrf.mxu3 }
 0x17c   :  { %3575 = vst.msk [vmem:[%s8084_s3 + $0x68] sm:$0xf] %vm3548_vm3, %v3333_v44  ;;  %v3453_v53 = vpack.c.bf16 %v3212_v47, %v3212_v47  ;;  %v4474_v47 = vor.u32 %v5104_v40, %v4471_v58 }
 0x17d   :  { %v2529_v54 = vpop.f32.mrf.mxu1  ;;  %v2216_v56 = vpop.f32.mrf.mxu2 }
 0x17e   :  { %v2530_v55 = vadd.f32 %v2529_v54, %v1917_v46  ;;  %3695 = vst.msk [vmem:[%s8084_s3 + $0x248] sm:$0xf] %vm3548_vm3, %v3453_v53  ;;  %v2217_v57 = vadd.f32 %v6047_v45, %v2216_v56  ;;  %v3986_v46 = vor.u32 %v4982_v37, %v3983_v39  ;;  %v3997_v37 = vld [vmem:[%s8082_s0 + $0x190] sm:$0xf] }
 0x17f   :  { %v1919_v62 = vpop.f32.mrf.mxu0 }
 0x180   :  { %v3093_v61 = vmax.f32 %v2530_v55, 0.0  ;;  %v2830_v0 = vadd.f32 %v2829_v34, %v2217_v57  ;;  %v1920_v5 = vadd.f32 %v6047_v45, %v1919_v62  ;;  %v3982_v34 = vor.u32 %v4983_v27, %v3981_v26 }
 0x182   :  { %v3334_v4 = vpack.c.bf16 %v3093_v61, %v3093_v61  ;;  %v3213_v6 = vmax.f32 %v2830_v0, 0.0  ;;  %2258 = vmatmul.bf16.gmra.mxu2 %v4454_v59  ;;  %1958 = vmatmul.bf16.gmra.mxu0 %v3974_v60  ;;  %v4469_v60 = vld [vmem:[%s8082_s0 + $0x540] sm:$0xf]  ;;  %v5105_v61 = vld [vmem:[%s8082_s0 + $0x544] sm:$0xf0] }
 0x183   :  { %v2834_v8 = vpop.f32.mrf.mxu3  ;;  %v4985_v0 = vld [vmem:[%s8082_s0 + $0x184] sm:$0xf0] }
 0x184   :  { %3576 = vst.msk [vmem:[%s8084_s3 + $0x6c] sm:$0xf] %vm3548_vm3, %v3334_v4  ;;  %v3454_v11 = vpack.c.bf16 %v3213_v6, %v3213_v6  ;;  %v4470_v6 = vor.u32 %v5105_v61, %v4469_v60 }
 0x185   :  { %v2532_v12 = vpop.f32.mrf.mxu1  ;;  %v2219_v14 = vpop.f32.mrf.mxu2 }
 0x186   :  { %v2533_v13 = vadd.f32 %v2532_v12, %v1920_v5  ;;  %3696 = vst.msk [vmem:[%s8084_s3 + $0x24c] sm:$0xf] %vm3548_vm3, %v3454_v11  ;;  %v2220_v15 = vadd.f32 %v6047_v45, %v2219_v14  ;;  %v4984_v11 = vld [vmem:[%s8082_s0 + $0x184] sm:$0xf]  ;;  %v5106_v14 = vld [vmem:[%s8082_s0 + $0x554] sm:$0xf] }
 0x187   :  { %v1921_v17 = vpop.f32.mrf.mxu0 }
 0x188   :  { %v3094_v16 = vmax.f32 %v2533_v13, 0.0  ;;  %4837 = vmatmul.msk.bf16.gmra.mxu1 %vm1469_vm2, %v3978_v9  ;;  %4898 = vmatmul.msk.bf16.gmra.mxu3 %vm1469_vm2, %v4466_v10  ;;  %v2833_v18 = vadd.f32 %v2832_v50, %v2220_v15  ;;  %v1922_v21 = vadd.f32 %v6047_v45, %v1921_v17  ;;  %v3991_v13 = vld [vmem:[%s8082_s0 + $0x188] sm:$0xf0]  ;;  %v4479_v15 = vld [vmem:[%s8082_s0 + $0x558] sm:$0xf0] }
 0x18a   :  { %v3335_v20 = vpack.c.bf16 %v3094_v16, %v3094_v16  ;;  %v3214_v22 = vmax.f32 %v2833_v18, 0.0 }
 0x18b   :  { %v2837_v25 = vpop.f32.mrf.mxu3 }
 0x18c   :  { %3577 = vst.msk [vmem:[%s8084_s3 + $0x70] sm:$0xf] %vm3548_vm3, %v3335_v20  ;;  %v3455_v28 = vpack.c.bf16 %v3214_v22, %v3214_v22  ;;  %v4482_v22 = vor.u32 %v5106_v14, %v4479_v15 }
 0x18d   :  { %v2534_v29 = vpop.f32.mrf.mxu1  ;;  %v2221_v31 = vpop.f32.mrf.mxu2 }
 0x18e   :  { %v2535_v30 = vadd.f32 %v2534_v29, %v1922_v21  ;;  %3697 = vst.msk [vmem:[%s8084_s3 + $0x250] sm:$0xf] %vm3548_vm3, %v3455_v28  ;;  %v2222_v32 = vadd.f32 %v6047_v45, %v2221_v31  ;;  %v3994_v21 = vor.u32 %v4984_v11, %v3991_v13  ;;  %v4005_v11 = vld [vmem:[%s8082_s0 + $0x1a0] sm:$0xf] }
 0x18f   :  { %v1924_v36 = vpop.f32.mrf.mxu0 }
 0x190   :  { %v3095_v35 = vmax.f32 %v2535_v30, 0.0  ;;  %v2835_v38 = vadd.f32 %v2834_v8, %v2222_v32  ;;  %v1925_v42 = vadd.f32 %v6047_v45, %v1924_v36  ;;  %v3990_v8 = vor.u32 %v4985_v0, %v3989_v63 }
 0x192   :  { %v3336_v41 = vpack.c.bf16 %v3095_v35, %v3095_v35  ;;  %v3215_v43 = vmax.f32 %v2835_v38, 0.0  ;;  %2263 = vmatmul.bf16.gmra.mxu2 %v4462_v33  ;;  %1963 = vmatmul.bf16.gmra.mxu0 %v3982_v34  ;;  %v4477_v34 = vld [vmem:[%s8082_s0 + $0x550] sm:$0xf]  ;;  %v5107_v35 = vld [vmem:[%s8082_s0 + $0x554] sm:$0xf0] }
 0x193   :  { %v2839_v44 = vpop.f32.mrf.mxu3  ;;  %v4987_v38 = vld [vmem:[%s8082_s0 + $0x194] sm:$0xf0] }
 0x194   :  { %3578 = vst.msk [vmem:[%s8084_s3 + $0x74] sm:$0xf] %vm3548_vm3, %v3336_v41  ;;  %v3456_v48 = vpack.c.bf16 %v3215_v43, %v3215_v43  ;;  %v4478_v43 = vor.u32 %v5107_v35, %v4477_v34 }
 0x195   :  { %v2537_v49 = vpop.f32.mrf.mxu1  ;;  %v2224_v51 = vpop.f32.mrf.mxu2 }
 0x196   :  { %v2538_v50 = vadd.f32 %v2537_v49, %v1925_v42  ;;  %3698 = vst.msk [vmem:[%s8084_s3 + $0x254] sm:$0xf] %vm3548_vm3, %v3456_v48  ;;  %v2225_v52 = vadd.f32 %v6047_v45, %v2224_v51  ;;  %v4986_v48 = vld [vmem:[%s8082_s0 + $0x194] sm:$0xf]  ;;  %v5108_v51 = vld [vmem:[%s8082_s0 + $0x564] sm:$0xf] }
 0x197   :  { %v1926_v54 = vpop.f32.mrf.mxu0 }
 0x198   :  { %v3096_v53 = vmax.f32 %v2538_v50, 0.0  ;;  %4838 = vmatmul.msk.bf16.gmra.mxu1 %vm1469_vm2, %v3986_v46  ;;  %4899 = vmatmul.msk.bf16.gmra.mxu3 %vm1469_vm2, %v4474_v47  ;;  %v2838_v55 = vadd.f32 %v2837_v25, %v2225_v52  ;;  %v1927_v57 = vadd.f32 %v6047_v45, %v1926_v54  ;;  %v3999_v50 = vld [vmem:[%s8082_s0 + $0x198] sm:$0xf0]  ;;  %v4487_v52 = vld [vmem:[%s8082_s0 + $0x568] sm:$0xf0] }
 0x19a   :  { %v3337_v56 = vpack.c.bf16 %v3096_v53, %v3096_v53  ;;  %v3216_v59 = vmax.f32 %v2838_v55, 0.0 }
 0x19b   :  { %v2842_v62 = vpop.f32.mrf.mxu3 }
 0x19c   :  { %3579 = vst.msk [vmem:[%s8084_s3 + $0x78] sm:$0xf] %vm3548_vm3, %v3337_v56  ;;  %v3457_v1 = vpack.c.bf16 %v3216_v59, %v3216_v59  ;;  %v4490_v59 = vor.u32 %v5108_v51, %v4487_v52 }
 0x19d   :  { %v2539_v2 = vpop.f32.mrf.mxu1  ;;  %v2226_v4 = vpop.f32.mrf.mxu2 }
 0x19e   :  { %v2540_v3 = vadd.f32 %v2539_v2, %v1927_v57  ;;  %3699 = vst.msk [vmem:[%s8084_s3 + $0x258] sm:$0xf] %vm3548_vm3, %v3457_v1  ;;  %v2227_v5 = vadd.f32 %v6047_v45, %v2226_v4  ;;  %v4002_v57 = vor.u32 %v4986_v48, %v3999_v50  ;;  %v4013_v48 = vld [vmem:[%s8082_s0 + $0x1b0] sm:$0xf] }
 0x19f   :  { %v1929_v10 = vpop.f32.mrf.mxu0 }
 0x1a0   :  { %v3097_v9 = vmax.f32 %v2540_v3, 0.0  ;;  %v2840_v12 = vadd.f32 %v2839_v44, %v2227_v5  ;;  %v1930_v17 = vadd.f32 %v6047_v45, %v1929_v10  ;;  %v3998_v44 = vor.u32 %v4987_v38, %v3997_v37 }
 0x1a2   :  { %v3338_v16 = vpack.c.bf16 %v3097_v9, %v3097_v9  ;;  %v3217_v18 = vmax.f32 %v2840_v12, 0.0  ;;  %2268 = vmatmul.bf16.gmra.mxu2 %v4470_v6  ;;  %1968 = vmatmul.bf16.gmra.mxu0 %v3990_v8  ;;  %v4485_v8 = vld [vmem:[%s8082_s0 + $0x560] sm:$0xf]  ;;  %v5109_v9 = vld [vmem:[%s8082_s0 + $0x564] sm:$0xf0] }
 0x1a3   :  { %v2844_v20 = vpop.f32.mrf.mxu3  ;;  %v4989_v12 = vld [vmem:[%s8082_s0 + $0x1a4] sm:$0xf0] }
 0x1a4   :  { %3580 = vst.msk [vmem:[%s8084_s3 + $0x7c] sm:$0xf] %vm3548_vm3, %v3338_v16  ;;  %v3458_v23 = vpack.c.bf16 %v3217_v18, %v3217_v18  ;;  %v4486_v18 = vor.u32 %v5109_v9, %v4485_v8 }
 0x1a5   :  { %v2542_v24 = vpop.f32.mrf.mxu1  ;;  %v2229_v26 = vpop.f32.mrf.mxu2 }
 0x1a6   :  { %v2543_v25 = vadd.f32 %v2542_v24, %v1930_v17  ;;  %3700 = vst.msk [vmem:[%s8084_s3 + $0x25c] sm:$0xf] %vm3548_vm3, %v3458_v23  ;;  %v2230_v27 = vadd.f32 %v6047_v45, %v2229_v26  ;;  %v4988_v23 = vld [vmem:[%s8082_s0 + $0x1a4] sm:$0xf]  ;;  %v5110_v26 = vld [vmem:[%s8082_s0 + $0x574] sm:$0xf] }
 0x1a7   :  { %v1931_v29 = vpop.f32.mrf.mxu0 }
 0x1a8   :  { %v3098_v28 = vmax.f32 %v2543_v25, 0.0  ;;  %4839 = vmatmul.msk.bf16.gmra.mxu1 %vm1469_vm2, %v3994_v21  ;;  %4900 = vmatmul.msk.bf16.gmra.mxu3 %vm1469_vm2, %v4482_v22  ;;  %v2843_v30 = vadd.f32 %v2842_v62, %v2230_v27  ;;  %v1932_v32 = vadd.f32 %v6047_v45, %v1931_v29  ;;  %v4007_v25 = vld [vmem:[%s8082_s0 + $0x1a8] sm:$0xf0]  ;;  %v4495_v27 = vld [vmem:[%s8082_s0 + $0x578] sm:$0xf0] }
 0x1aa   :  { %v3339_v31 = vpack.c.bf16 %v3098_v28, %v3098_v28  ;;  %v3218_v33 = vmax.f32 %v2843_v30, 0.0 }
 0x1ab   :  { %v2847_v36 = vpop.f32.mrf.mxu3 }
 0x1ac   :  { %3581 = vst.msk [vmem:[%s8084_s3 + $0x80] sm:$0xf] %vm3548_vm3, %v3339_v31  ;;  %v3459_v39 = vpack.c.bf16 %v3218_v33, %v3218_v33  ;;  %v4498_v33 = vor.u32 %v5110_v26, %v4495_v27 }
 0x1ad   :  { %v2544_v40 = vpop.f32.mrf.mxu1  ;;  %v2231_v41 = vpop.f32.mrf.mxu2 }
 0x1ae   :  { %v2545_v58 = vadd.f32 %v2544_v40, %v1932_v32  ;;  %3701 = vst.msk [vmem:[%s8084_s3 + $0x260] sm:$0xf] %vm3548_vm3, %v3459_v39  ;;  %v2232_v42 = vadd.f32 %v6047_v45, %v2231_v41  ;;  %v4010_v32 = vor.u32 %v4988_v23, %v4007_v25  ;;  %v4021_v23 = vld [vmem:[%s8082_s0 + $0x1c0] sm:$0xf] }
 0x1af   :  { %v1934_v47 = vpop.f32.mrf.mxu0 }
 0x1b0   :  { %v3099_v46 = vmax.f32 %v2545_v58, 0.0  ;;  %v2845_v49 = vadd.f32 %v2844_v20, %v2232_v42  ;;  %v1935_v54 = vadd.f32 %v6047_v45, %v1934_v47  ;;  %v4006_v20 = vor.u32 %v4989_v12, %v4005_v11 }
 0x1b2   :  { %v3340_v53 = vpack.c.bf16 %v3099_v46, %v3099_v46  ;;  %v3219_v55 = vmax.f32 %v2845_v49, 0.0  ;;  %2273 = vmatmul.bf16.gmra.mxu2 %v4478_v43  ;;  %1973 = vmatmul.bf16.gmra.mxu0 %v3998_v44  ;;  %v4493_v44 = vld [vmem:[%s8082_s0 + $0x570] sm:$0xf]  ;;  %v5111_v46 = vld [vmem:[%s8082_s0 + $0x574] sm:$0xf0] }
 0x1b3   :  { %v2849_v56 = vpop.f32.mrf.mxu3  ;;  %v4991_v49 = vld [vmem:[%s8082_s0 + $0x1b4] sm:$0xf0] }
 0x1b4   :  { %3582 = vst.msk [vmem:[%s8084_s3 + $0x84] sm:$0xf] %vm3548_vm3, %v3340_v53  ;;  %v3460_v60 = vpack.c.bf16 %v3219_v55, %v3219_v55  ;;  %v4494_v55 = vor.u32 %v5111_v46, %v4493_v44 }
 0x1b5   :  { %v2547_v61 = vpop.f32.mrf.mxu1  ;;  %v2234_v63 = vpop.f32.mrf.mxu2 }
 0x1b6   :  { %v2548_v62 = vadd.f32 %v2547_v61, %v1935_v54  ;;  %3702 = vst.msk [vmem:[%s8084_s3 + $0x264] sm:$0xf] %vm3548_vm3, %v3460_v60  ;;  %v2235_v0 = vadd.f32 %v6047_v45, %v2234_v63  ;;  %v4990_v60 = vld [vmem:[%s8082_s0 + $0x1b4] sm:$0xf]  ;;  %v5112_v63 = vld [vmem:[%s8082_s0 + $0x584] sm:$0xf] }
 0x1b7   :  { %v1936_v2 = vpop.f32.mrf.mxu0 }
 0x1b8   :  { %v3100_v1 = vmax.f32 %v2548_v62, 0.0  ;;  %4840 = vmatmul.msk.bf16.gmra.mxu1 %vm1469_vm2, %v4002_v57  ;;  %4901 = vmatmul.msk.bf16.gmra.mxu3 %vm1469_vm2, %v4490_v59  ;;  %v2848_v3 = vadd.f32 %v2847_v36, %v2235_v0  ;;  %v1937_v5 = vadd.f32 %v6047_v45, %v1936_v2  ;;  %v4015_v62 = vld [vmem:[%s8082_s0 + $0x1b8] sm:$0xf0]  ;;  %v4503_v0 = vld [vmem:[%s8082_s0 + $0x588] sm:$0xf0] }
 0x1ba   :  { %v3341_v4 = vpack.c.bf16 %v3100_v1, %v3100_v1  ;;  %v3220_v6 = vmax.f32 %v2848_v3, 0.0 }
 0x1bb   :  { %v2852_v10 = vpop.f32.mrf.mxu3 }
 0x1bc   :  { %3583 = vst.msk [vmem:[%s8084_s3 + $0x88] sm:$0xf] %vm3548_vm3, %v3341_v4  ;;  %v3461_v13 = vpack.c.bf16 %v3220_v6, %v3220_v6  ;;  %v4506_v6 = vor.u32 %v5112_v63, %v4503_v0 }
 0x1bd   :  { %v2549_v14 = vpop.f32.mrf.mxu1  ;;  %v2236_v16 = vpop.f32.mrf.mxu2 }
 0x1be   :  { %v2550_v15 = vadd.f32 %v2549_v14, %v1937_v5  ;;  %3703 = vst.msk [vmem:[%s8084_s3 + $0x268] sm:$0xf] %vm3548_vm3, %v3461_v13  ;;  %v2237_v17 = vadd.f32 %v6047_v45, %v2236_v16  ;;  %v4018_v5 = vor.u32 %v4990_v60, %v4015_v62  ;;  %v4029_v60 = vld [vmem:[%s8082_s0 + $0x1d0] sm:$0xf] }
 0x1bf   :  { %v1939_v22 = vpop.f32.mrf.mxu0 }
 0x1c0   :  { %v3101_v21 = vmax.f32 %v2550_v15, 0.0  ;;  %v2850_v24 = vadd.f32 %v2849_v56, %v2237_v17  ;;  %v1940_v29 = vadd.f32 %v6047_v45, %v1939_v22  ;;  %v4014_v56 = vor.u32 %v4991_v49, %v4013_v48 }
 0x1c2   :  { %v3342_v28 = vpack.c.bf16 %v3101_v21, %v3101_v21  ;;  %v3221_v30 = vmax.f32 %v2850_v24, 0.0  ;;  %2278 = vmatmul.bf16.gmra.mxu2 %v4486_v18  ;;  %1978 = vmatmul.bf16.gmra.mxu0 %v4006_v20  ;;  %v4501_v20 = vld [vmem:[%s8082_s0 + $0x580] sm:$0xf]  ;;  %v5113_v21 = vld [vmem:[%s8082_s0 + $0x584] sm:$0xf0] }
 0x1c3   :  { %v2854_v31 = vpop.f32.mrf.mxu3  ;;  %v4993_v24 = vld [vmem:[%s8082_s0 + $0x1c4] sm:$0xf0] }
 0x1c4   :  { %3584 = vst.msk [vmem:[%s8084_s3 + $0x8c] sm:$0xf] %vm3548_vm3, %v3342_v28  ;;  %v3462_v34 = vpack.c.bf16 %v3221_v30, %v3221_v30  ;;  %v4502_v30 = vor.u32 %v5113_v21, %v4501_v20 }
 0x1c5   :  { %v2552_v35 = vpop.f32.mrf.mxu1  ;;  %v2239_v37 = vpop.f32.mrf.mxu2 }
 0x1c6   :  { %v2553_v36 = vadd.f32 %v2552_v35, %v1940_v29  ;;  %3704 = vst.msk [vmem:[%s8084_s3 + $0x26c] sm:$0xf] %vm3548_vm3, %v3462_v34  ;;  %v2240_v38 = vadd.f32 %v6047_v45, %v2239_v37  ;;  %v4992_v34 = vld [vmem:[%s8082_s0 + $0x1c4] sm:$0xf]  ;;  %v5114_v37 = vld [vmem:[%s8082_s0 + $0x594] sm:$0xf] }
 0x1c7   :  { %v1941_v40 = vpop.f32.mrf.mxu0 }
 0x1c8   :  { %v3102_v39 = vmax.f32 %v2553_v36, 0.0  ;;  %4841 = vmatmul.msk.bf16.gmra.mxu1 %vm1469_vm2, %v4010_v32  ;;  %4902 = vmatmul.msk.bf16.gmra.mxu3 %vm1469_vm2, %v4498_v33  ;;  %v2853_v58 = vadd.f32 %v2852_v10, %v2240_v38  ;;  %v1942_v42 = vadd.f32 %v6047_v45, %v1941_v40  ;;  %v4023_v36 = vld [vmem:[%s8082_s0 + $0x1c8] sm:$0xf0]  ;;  %v4511_v38 = vld [vmem:[%s8082_s0 + $0x598] sm:$0xf0] }
 0x1ca   :  { %v3343_v41 = vpack.c.bf16 %v3102_v39, %v3102_v39  ;;  %v3222_v43 = vmax.f32 %v2853_v58, 0.0 }
 0x1cb   :  { %v2857_v47 = vpop.f32.mrf.mxu3 }
 0x1cc   :  { %3585 = vst.msk [vmem:[%s8084_s3 + $0x90] sm:$0xf] %vm3548_vm3, %v3343_v41  ;;  %v3463_v50 = vpack.c.bf16 %v3222_v43, %v3222_v43  ;;  %v4514_v43 = vor.u32 %v5114_v37, %v4511_v38 }
 0x1cd   :  { %v2554_v51 = vpop.f32.mrf.mxu1  ;;  %v2241_v53 = vpop.f32.mrf.mxu2 }
 0x1ce   :  { %v2555_v52 = vadd.f32 %v2554_v51, %v1942_v42  ;;  %3705 = vst.msk [vmem:[%s8084_s3 + $0x270] sm:$0xf] %vm3548_vm3, %v3463_v50  ;;  %v2242_v54 = vadd.f32 %v6047_v45, %v2241_v53  ;;  %v4026_v42 = vor.u32 %v4992_v34, %v4023_v36  ;;  %v4037_v34 = vld [vmem:[%s8082_s0 + $0x1e0] sm:$0xf] }
 0x1cf   :  { %v1944_v59 = vpop.f32.mrf.mxu0 }
 0x1d0   :  { %v3103_v57 = vmax.f32 %v2555_v52, 0.0  ;;  %v2855_v61 = vadd.f32 %v2854_v31, %v2242_v54  ;;  %v1945_v2 = vadd.f32 %v6047_v45, %v1944_v59  ;;  %v4022_v31 = vor.u32 %v4993_v24, %v4021_v23 }
 0x1d2   :  { %v3344_v1 = vpack.c.bf16 %v3103_v57, %v3103_v57  ;;  %v3223_v3 = vmax.f32 %v2855_v61, 0.0  ;;  %2283 = vmatmul.bf16.gmra.mxu2 %v4494_v55  ;;  %1983 = vmatmul.bf16.gmra.mxu0 %v4014_v56  ;;  %v4509_v56 = vld [vmem:[%s8082_s0 + $0x590] sm:$0xf]  ;;  %v5115_v57 = vld [vmem:[%s8082_s0 + $0x594] sm:$0xf0] }
 0x1d3   :  { %v2859_v4 = vpop.f32.mrf.mxu3  ;;  %v4995_v61 = vld [vmem:[%s8082_s0 + $0x1d4] sm:$0xf0] }
 0x1d4   :  { %3586 = vst.msk [vmem:[%s8084_s3 + $0x94] sm:$0xf] %vm3548_vm3, %v3344_v1  ;;  %v3464_v8 = vpack.c.bf16 %v3223_v3, %v3223_v3  ;;  %v4510_v3 = vor.u32 %v5115_v57, %v4509_v56 }
 0x1d5   :  { %v2557_v9 = vpop.f32.mrf.mxu1  ;;  %v2244_v11 = vpop.f32.mrf.mxu2 }
 0x1d6   :  { %v2558_v10 = vadd.f32 %v2557_v9, %v1945_v2  ;;  %3706 = vst.msk [vmem:[%s8084_s3 + $0x274] sm:$0xf] %vm3548_vm3, %v3464_v8  ;;  %v2245_v12 = vadd.f32 %v6047_v45, %v2244_v11  ;;  %v4994_v8 = vld [vmem:[%s8082_s0 + $0x1d4] sm:$0xf]  ;;  %v5116_v11 = vld [vmem:[%s8082_s0 + $0x5a4] sm:$0xf] }
 0x1d7   :  { %v1946_v14 = vpop.f32.mrf.mxu0 }
 0x1d8   :  { %v3104_v13 = vmax.f32 %v2558_v10, 0.0  ;;  %4842 = vmatmul.msk.bf16.gmra.mxu1 %vm1469_vm2, %v4018_v5  ;;  %4903 = vmatmul.msk.bf16.gmra.mxu3 %vm1469_vm2, %v4506_v6  ;;  %v2858_v15 = vadd.f32 %v2857_v47, %v2245_v12  ;;  %v1947_v17 = vadd.f32 %v6047_v45, %v1946_v14  ;;  %v4031_v10 = vld [vmem:[%s8082_s0 + $0x1d8] sm:$0xf0]  ;;  %v4519_v12 = vld [vmem:[%s8082_s0 + $0x5a8] sm:$0xf0] }
 0x1da   :  { %v3345_v16 = vpack.c.bf16 %v3104_v13, %v3104_v13  ;;  %v3224_v18 = vmax.f32 %v2858_v15, 0.0 }
 0x1db   :  { %v2862_v22 = vpop.f32.mrf.mxu3 }
 0x1dc   :  { %3587 = vst.msk [vmem:[%s8084_s3 + $0x98] sm:$0xf] %vm3548_vm3, %v3345_v16  ;;  %v3465_v25 = vpack.c.bf16 %v3224_v18, %v3224_v18  ;;  %v4522_v18 = vor.u32 %v5116_v11, %v4519_v12 }
 0x1dd   :  { %v2559_v26 = vpop.f32.mrf.mxu1  ;;  %v2246_v28 = vpop.f32.mrf.mxu2 }
 0x1de   :  { %v2560_v27 = vadd.f32 %v2559_v26, %v1947_v17  ;;  %3707 = vst.msk [vmem:[%s8084_s3 + $0x278] sm:$0xf] %vm3548_vm3, %v3465_v25  ;;  %v2247_v29 = vadd.f32 %v6047_v45, %v2246_v28  ;;  %v4034_v17 = vor.u32 %v4994_v8, %v4031_v10  ;;  %v4045_v8 = vld [vmem:[%s8082_s0 + $0x1f0] sm:$0xf] }
 0x1df   :  { %v1949_v33 = vpop.f32.mrf.mxu0 }
 0x1e0   :  { %v3105_v32 = vmax.f32 %v2560_v27, 0.0  ;;  %v2860_v35 = vadd.f32 %v2859_v4, %v2247_v29  ;;  %v1950_v40 = vadd.f32 %v6047_v45, %v1949_v33  ;;  %v4030_v4 = vor.u32 %v4995_v61, %v4029_v60 }
 0x1e2   :  { %v3346_v39 = vpack.c.bf16 %v3105_v32, %v3105_v32  ;;  %v3225_v58 = vmax.f32 %v2860_v35, 0.0  ;;  %2288 = vmatmul.bf16.gmra.mxu2 %v4502_v30  ;;  %1988 = vmatmul.bf16.gmra.mxu0 %v4022_v31  ;;  %v4517_v31 = vld [vmem:[%s8082_s0 + $0x5a0] sm:$0xf]  ;;  %v5117_v32 = vld [vmem:[%s8082_s0 + $0x5a4] sm:$0xf0] }
 0x1e3   :  { %v2864_v41 = vpop.f32.mrf.mxu3  ;;  %v4997_v35 = vld [vmem:[%s8082_s0 + $0x1e4] sm:$0xf0] }
 0x1e4   :  { %3588 = vst.msk [vmem:[%s8084_s3 + $0x9c] sm:$0xf] %vm3548_vm3, %v3346_v39  ;;  %v3466_v44 = vpack.c.bf16 %v3225_v58, %v3225_v58  ;;  %v4518_v58 = vor.u32 %v5117_v32, %v4517_v31 }
 0x1e5   :  { %v2562_v46 = vpop.f32.mrf.mxu1  ;;  %v2249_v48 = vpop.f32.mrf.mxu2 }
 0x1e6   :  { %v2563_v47 = vadd.f32 %v2562_v46, %v1950_v40  ;;  %3708 = vst.msk [vmem:[%s8084_s3 + $0x27c] sm:$0xf] %vm3548_vm3, %v3466_v44  ;;  %v2250_v49 = vadd.f32 %v6047_v45, %v2249_v48  ;;  %v4996_v44 = vld [vmem:[%s8082_s0 + $0x1e4] sm:$0xf]  ;;  %v5118_v48 = vld [vmem:[%s8082_s0 + $0x5b4] sm:$0xf] }
 0x1e7   :  { %v1951_v51 = vpop.f32.mrf.mxu0 }
 0x1e8   :  { %v3106_v50 = vmax.f32 %v2563_v47, 0.0  ;;  %4843 = vmatmul.msk.bf16.gmra.mxu1 %vm1469_vm2, %v4026_v42  ;;  %4904 = vmatmul.msk.bf16.gmra.mxu3 %vm1469_vm2, %v4514_v43  ;;  %v2863_v52 = vadd.f32 %v2862_v22, %v2250_v49  ;;  %v1952_v54 = vadd.f32 %v6047_v45, %v1951_v51  ;;  %v4039_v47 = vld [vmem:[%s8082_s0 + $0x1e8] sm:$0xf0]  ;;  %v4527_v49 = vld [vmem:[%s8082_s0 + $0x5b8] sm:$0xf0] }
 0x1ea   :  { %v3347_v53 = vpack.c.bf16 %v3106_v50, %v3106_v50  ;;  %v3226_v55 = vmax.f32 %v2863_v52, 0.0 }
 0x1eb   :  { %v2867_v59 = vpop.f32.mrf.mxu3 }
 0x1ec   :  { %3589 = vst.msk [vmem:[%s8084_s3 + $0xa0] sm:$0xf] %vm3548_vm3, %v3347_v53  ;;  %v3467_v62 = vpack.c.bf16 %v3226_v55, %v3226_v55  ;;  %v4530_v55 = vor.u32 %v5118_v48, %v4527_v49 }
 0x1ed   :  { %v2564_v63 = vpop.f32.mrf.mxu1  ;;  %v2251_v1 = vpop.f32.mrf.mxu2 }
 0x1ee   :  { %v2565_v0 = vadd.f32 %v2564_v63, %v1952_v54  ;;  %3709 = vst.msk [vmem:[%s8084_s3 + $0x280] sm:$0xf] %vm3548_vm3, %v3467_v62  ;;  %v2252_v2 = vadd.f32 %v6047_v45, %v2251_v1  ;;  %v4042_v54 = vor.u32 %v4996_v44, %v4039_v47  ;;  %v4053_v44 = vld [vmem:[%s8082_s0 + $0x200] sm:$0xf] }
 0x1ef   :  { %v1954_v6 = vpop.f32.mrf.mxu0 }
 0x1f0   :  { %v3107_v5 = vmax.f32 %v2565_v0, 0.0  ;;  %v2865_v9 = vadd.f32 %v2864_v41, %v2252_v2  ;;  %v1955_v14 = vadd.f32 %v6047_v45, %v1954_v6  ;;  %v4038_v41 = vor.u32 %v4997_v35, %v4037_v34 }
 0x1f2   :  { %v3348_v13 = vpack.c.bf16 %v3107_v5, %v3107_v5  ;;  %v3227_v15 = vmax.f32 %v2865_v9, 0.0  ;;  %2293 = vmatmul.bf16.gmra.mxu2 %v4510_v3  ;;  %1993 = vmatmul.bf16.gmra.mxu0 %v4030_v4  ;;  %v4525_v4 = vld [vmem:[%s8082_s0 + $0x5b0] sm:$0xf]  ;;  %v5119_v5 = vld [vmem:[%s8082_s0 + $0x5b4] sm:$0xf0] }
 0x1f3   :  { %v2869_v16 = vpop.f32.mrf.mxu3  ;;  %v4999_v9 = vld [vmem:[%s8082_s0 + $0x1f4] sm:$0xf0] }
 0x1f4   :  { %3590 = vst.msk [vmem:[%s8084_s3 + $0xa4] sm:$0xf] %vm3548_vm3, %v3348_v13  ;;  %v3468_v20 = vpack.c.bf16 %v3227_v15, %v3227_v15  ;;  %v4526_v15 = vor.u32 %v5119_v5, %v4525_v4 }
 0x1f5   :  { %v2567_v21 = vpop.f32.mrf.mxu1  ;;  %v2254_v23 = vpop.f32.mrf.mxu2 }
 0x1f6   :  { %v2568_v22 = vadd.f32 %v2567_v21, %v1955_v14  ;;  %3710 = vst.msk [vmem:[%s8084_s3 + $0x284] sm:$0xf] %vm3548_vm3, %v3468_v20  ;;  %v2255_v24 = vadd.f32 %v6047_v45, %v2254_v23  ;;  %v4998_v20 = vld [vmem:[%s8082_s0 + $0x1f4] sm:$0xf]  ;;  %v5120_v23 = vld [vmem:[%s8082_s0 + $0x5c4] sm:$0xf] }
 0x1f7   :  { %v1956_v26 = vpop.f32.mrf.mxu0 }
 0x1f8   :  { %v3108_v25 = vmax.f32 %v2568_v22, 0.0  ;;  %4844 = vmatmul.msk.bf16.gmra.mxu1 %vm1469_vm2, %v4034_v17  ;;  %4905 = vmatmul.msk.bf16.gmra.mxu3 %vm1469_vm2, %v4522_v18  ;;  %v2868_v27 = vadd.f32 %v2867_v59, %v2255_v24  ;;  %v1957_v29 = vadd.f32 %v6047_v45, %v1956_v26  ;;  %v4047_v22 = vld [vmem:[%s8082_s0 + $0x1f8] sm:$0xf0]  ;;  %v4535_v24 = vld [vmem:[%s8082_s0 + $0x5c8] sm:$0xf0] }
 0x1fa   :  { %v3349_v28 = vpack.c.bf16 %v3108_v25, %v3108_v25  ;;  %v3228_v30 = vmax.f32 %v2868_v27, 0.0 }
 0x1fb   :  { %v2872_v33 = vpop.f32.mrf.mxu3 }
 0x1fc   :  { %3591 = vst.msk [vmem:[%s8084_s3 + $0xa8] sm:$0xf] %vm3548_vm3, %v3349_v28  ;;  %v3469_v36 = vpack.c.bf16 %v3228_v30, %v3228_v30  ;;  %v4538_v30 = vor.u32 %v5120_v23, %v4535_v24 }
 0x1fd   :  { %v2569_v37 = vpop.f32.mrf.mxu1  ;;  %v2256_v39 = vpop.f32.mrf.mxu2 }
 0x1fe   :  { %v2570_v38 = vadd.f32 %v2569_v37, %v1957_v29  ;;  %3711 = vst.msk [vmem:[%s8084_s3 + $0x288] sm:$0xf] %vm3548_vm3, %v3469_v36  ;;  %v2257_v40 = vadd.f32 %v6047_v45, %v2256_v39  ;;  %v4050_v29 = vor.u32 %v4998_v20, %v4047_v22  ;;  %v4061_v20 = vld [vmem:[%s8082_s0 + $0x210] sm:$0xf] }
 0x1ff   :  { %v1959_v43 = vpop.f32.mrf.mxu0 }
 0x200   :  { %v3109_v42 = vmax.f32 %v2570_v38, 0.0  ;;  %v2870_v46 = vadd.f32 %v2869_v16, %v2257_v40  ;;  %v1960_v51 = vadd.f32 %v6047_v45, %v1959_v43  ;;  %v4046_v16 = vor.u32 %v4999_v9, %v4045_v8  ;;  %v6583_v40 = vld [vmem:[%s8083_s2] ss:$0 sm:$0xff] }
 0x202   :  { %v3350_v50 = vpack.c.bf16 %v3109_v42, %v3109_v42  ;;  %v3229_v52 = vmax.f32 %v2870_v46, 0.0  ;;  %2298 = vmatmul.bf16.gmra.mxu2 %v4518_v58  ;;  %1998 = vmatmul.bf16.gmra.mxu0 %v4038_v41  ;;  %v5121_v42 = vld [vmem:[%s8082_s0 + $0x5c4] sm:$0xf0] }
 0x203   :  { %v2874_v53 = vpop.f32.mrf.mxu3  ;;  %v5001_v46 = vld [vmem:[%s8082_s0 + $0x204] sm:$0xf0] }
 0x204   :  { %3592 = vst.msk [vmem:[%s8084_s3 + $0xac] sm:$0xf] %vm3548_vm3, %v3350_v50  ;;  %v3470_v56 = vpack.c.bf16 %v3229_v52, %v3229_v52 }
 0x205   :  { %v2572_v57 = vpop.f32.mrf.mxu1  ;;  %v2259_v60 = vpop.f32.mrf.mxu2 }
 0x206   :  { %v2573_v59 = vadd.f32 %v2572_v57, %v1960_v51  ;;  %3712 = vst.msk [vmem:[%s8084_s3 + $0x28c] sm:$0xf] %vm3548_vm3, %v3470_v56  ;;  %v2260_v61 = vadd.f32 %v6047_v45, %v2259_v60  ;;  %v5000_v56 = vld [vmem:[%s8082_s0 + $0x204] sm:$0xf]  ;;  %v5122_v60 = vld [vmem:[%s8082_s0 + $0x5d4] sm:$0xf] }
 0x207   :  { %v1961_v63 = vpop.f32.mrf.mxu0 }
 0x208   :  { %v3110_v62 = vmax.f32 %v2573_v59, 0.0  ;;  %4845 = vmatmul.msk.bf16.gmra.mxu1 %vm1469_vm2, %v4042_v54  ;;  %4906 = vmatmul.msk.bf16.gmra.mxu3 %vm1469_vm2, %v4530_v55  ;;  %v2873_v0 = vadd.f32 %v2872_v33, %v2260_v61  ;;  %v1962_v2 = vadd.f32 %v6047_v45, %v1961_v63  ;;  %v4055_v59 = vld [vmem:[%s8082_s0 + $0x208] sm:$0xf0]  ;;  %v4543_v61 = vld [vmem:[%s8082_s0 + $0x5d8] sm:$0xf0] }
 0x20a   :  { %v3351_v1 = vpack.c.bf16 %v3110_v62, %v3110_v62  ;;  %v3230_v3 = vmax.f32 %v2873_v0, 0.0 }
 0x20b   :  { %v2877_v6 = vpop.f32.mrf.mxu3 }
 0x20c   :  { %3593 = vst.msk [vmem:[%s8084_s3 + $0xb0] sm:$0xf] %vm3548_vm3, %v3351_v1  ;;  %v3471_v10 = vpack.c.bf16 %v3230_v3, %v3230_v3  ;;  %v4546_v3 = vor.u32 %v5122_v60, %v4543_v61 }
 0x20d   :  { %v2574_v11 = vpop.f32.mrf.mxu1  ;;  %v2261_v13 = vpop.f32.mrf.mxu2 }
 0x20e   :  { %v2575_v12 = vadd.f32 %v2574_v11, %v1962_v2  ;;  %3713 = vst.msk [vmem:[%s8084_s3 + $0x290] sm:$0xf] %vm3548_vm3, %v3471_v10  ;;  %v2262_v14 = vadd.f32 %v6047_v45, %v2261_v13  ;;  %v4058_v2 = vor.u32 %v5000_v56, %v4055_v59  ;;  %v4069_v56 = vld [vmem:[%s8082_s0 + $0x220] sm:$0xf] }
 0x20f   :  { %v1964_v18 = vpop.f32.mrf.mxu0 }
 0x210   :  { %v3111_v17 = vmax.f32 %v2575_v12, 0.0  ;;  %v2875_v21 = vadd.f32 %v2874_v53, %v2262_v14  ;;  %v1965_v26 = vadd.f32 %v6047_v45, %v1964_v18  ;;  %v4054_v53 = vor.u32 %v5001_v46, %v4053_v44 }
 0x212   :  { %v3352_v25 = vpack.c.bf16 %v3111_v17, %v3111_v17  ;;  %v3231_v27 = vmax.f32 %v2875_v21, 0.0  ;;  %2303 = vmatmul.bf16.gmra.mxu2 %v4526_v15  ;;  %2003 = vmatmul.bf16.gmra.mxu0 %v4046_v16  ;;  %v4541_v16 = vld [vmem:[%s8082_s0 + $0x5d0] sm:$0xf]  ;;  %v5123_v17 = vld [vmem:[%s8082_s0 + $0x5d4] sm:$0xf0] }
 0x213   :  { %v2879_v28 = vpop.f32.mrf.mxu3  ;;  %v5003_v21 = vld [vmem:[%s8082_s0 + $0x214] sm:$0xf0] }
 0x214   :  { %3594 = vst.msk [vmem:[%s8084_s3 + $0xb4] sm:$0xf] %vm3548_vm3, %v3352_v25  ;;  %v3472_v31 = vpack.c.bf16 %v3231_v27, %v3231_v27  ;;  %v4542_v27 = vor.u32 %v5123_v17, %v4541_v16 }
 0x215   :  { %v2577_v32 = vpop.f32.mrf.mxu1  ;;  %v2264_v34 = vpop.f32.mrf.mxu2 }
 0x216   :  { %v2578_v33 = vadd.f32 %v2577_v32, %v1965_v26  ;;  %3714 = vst.msk [vmem:[%s8084_s3 + $0x294] sm:$0xf] %vm3548_vm3, %v3472_v31  ;;  %v2265_v35 = vadd.f32 %v6047_v45, %v2264_v34  ;;  %v4533_v45 = vld [vmem:[%s8082_s0 + $0x5c0] sm:$0xf]  ;;  %v5002_v31 = vld [vmem:[%s8082_s0 + $0x214] sm:$0xf] }
 0x217   :  { %v1966_v37 = vpop.f32.mrf.mxu0  ;;  %v4534_v52 = vor.u32 %v5121_v42, %v4533_v45  ;;  %v5124_v34 = vld [vmem:[%s8082_s0 + $0x5e4] sm:$0xf] }
 0x218   :  { %v3112_v36 = vmax.f32 %v2578_v33, 0.0  ;;  %4846 = vmatmul.msk.bf16.gmra.mxu1 %vm1469_vm2, %v4050_v29  ;;  %4907 = vmatmul.msk.bf16.gmra.mxu3 %vm1469_vm2, %v4538_v30  ;;  %v2878_v38 = vadd.f32 %v2877_v6, %v2265_v35  ;;  %v1967_v58 = vadd.f32 %v6583_v40, %v1966_v37  ;;  %v4063_v33 = vld [vmem:[%s8082_s0 + $0x218] sm:$0xf0]  ;;  %v4551_v35 = vld [vmem:[%s8082_s0 + $0x5e8] sm:$0xf0] }
 0x21a   :  { %v3353_v39 = vpack.c.bf16 %v3112_v36, %v3112_v36  ;;  %v3232_v41 = vmax.f32 %v2878_v38, 0.0 }
 0x21b   :  { %v2882_v43 = vpop.f32.mrf.mxu3 }
 0x21c   :  { %3595 = vst.msk [vmem:[%s8084_s3 + $0xb8] sm:$0xf] %vm3548_vm3, %v3353_v39  ;;  %v3473_v47 = vpack.c.bf16 %v3232_v41, %v3232_v41  ;;  %v4554_v41 = vor.u32 %v5124_v34, %v4551_v35 }
 0x21d   :  { %v2579_v48 = vpop.f32.mrf.mxu1  ;;  %v2266_v50 = vpop.f32.mrf.mxu2 }
 0x21e   :  { %v2580_v49 = vadd.f32 %v2579_v48, %v1967_v58  ;;  %3715 = vst.msk [vmem:[%s8084_s3 + $0x298] sm:$0xf] %vm3548_vm3, %v3473_v47  ;;  %v2267_v51 = vadd.f32 %v6583_v40, %v2266_v50  ;;  %v4066_v58 = vor.u32 %v5002_v31, %v4063_v33  ;;  %v4077_v31 = vld [vmem:[%s8082_s0 + $0x230] sm:$0xf] }
 0x21f   :  { %v1969_v55 = vpop.f32.mrf.mxu0 }
 0x220   :  { %v3113_v54 = vmax.f32 %v2580_v49, 0.0  ;;  %v2880_v57 = vadd.f32 %v2879_v28, %v2267_v51  ;;  %v1970_v63 = vadd.f32 %v6583_v40, %v1969_v55  ;;  %v4062_v28 = vor.u32 %v5003_v21, %v4061_v20 }
 0x222   :  { %v3354_v62 = vpack.c.bf16 %v3113_v54, %v3113_v54  ;;  %v3233_v0 = vmax.f32 %v2880_v57, 0.0  ;;  %2308 = vmatmul.bf16.gmra.mxu2 %v4534_v52  ;;  %2008 = vmatmul.bf16.gmra.mxu0 %v4054_v53  ;;  %v4549_v53 = vld [vmem:[%s8082_s0 + $0x5e0] sm:$0xf]  ;;  %v5125_v54 = vld [vmem:[%s8082_s0 + $0x5e4] sm:$0xf0] }
 0x223   :  { %v2884_v1 = vpop.f32.mrf.mxu3  ;;  %v5005_v57 = vld [vmem:[%s8082_s0 + $0x224] sm:$0xf0] }
 0x224   :  { %3596 = vst.msk [vmem:[%s8084_s3 + $0xbc] sm:$0xf] %vm3548_vm3, %v3354_v62  ;;  %v3474_v4 = vpack.c.bf16 %v3233_v0, %v3233_v0  ;;  %v4550_v0 = vor.u32 %v5125_v54, %v4549_v53 }
 0x225   :  { %v2582_v5 = vpop.f32.mrf.mxu1  ;;  %v2269_v8 = vpop.f32.mrf.mxu2 }
 0x226   :  { %v2583_v6 = vadd.f32 %v2582_v5, %v1970_v63  ;;  %3716 = vst.msk [vmem:[%s8084_s3 + $0x29c] sm:$0xf] %vm3548_vm3, %v3474_v4  ;;  %v2270_v9 = vadd.f32 %v6583_v40, %v2269_v8  ;;  %v5004_v4 = vld [vmem:[%s8082_s0 + $0x224] sm:$0xf]  ;;  %v5126_v8 = vld [vmem:[%s8082_s0 + $0x5f4] sm:$0xf] }
 0x227   :  { %v1971_v11 = vpop.f32.mrf.mxu0 }
 0x228   :  { %v3114_v10 = vmax.f32 %v2583_v6, 0.0  ;;  %4847 = vmatmul.msk.bf16.gmra.mxu1 %vm1469_vm2, %v4058_v2  ;;  %4908 = vmatmul.msk.bf16.gmra.mxu3 %vm1469_vm2, %v4546_v3  ;;  %v2883_v12 = vadd.f32 %v2882_v43, %v2270_v9  ;;  %v1972_v14 = vadd.f32 %v6583_v40, %v1971_v11  ;;  %v4071_v6 = vld [vmem:[%s8082_s0 + $0x228] sm:$0xf0]  ;;  %v4559_v9 = vld [vmem:[%s8082_s0 + $0x5f8] sm:$0xf0] }
 0x22a   :  { %v3355_v13 = vpack.c.bf16 %v3114_v10, %v3114_v10  ;;  %v3234_v15 = vmax.f32 %v2883_v12, 0.0 }
 0x22b   :  { %v2887_v18 = vpop.f32.mrf.mxu3 }
 0x22c   :  { %3597 = vst.msk [vmem:[%s8084_s3 + $0xc0] sm:$0xf] %vm3548_vm3, %v3355_v13  ;;  %v3475_v22 = vpack.c.bf16 %v3234_v15, %v3234_v15  ;;  %v4562_v15 = vor.u32 %v5126_v8, %v4559_v9 }
 0x22d   :  { %v2584_v23 = vpop.f32.mrf.mxu1  ;;  %v2271_v25 = vpop.f32.mrf.mxu2 }
 0x22e   :  { %v2585_v24 = vadd.f32 %v2584_v23, %v1972_v14  ;;  %3717 = vst.msk [vmem:[%s8084_s3 + $0x2a0] sm:$0xf] %vm3548_vm3, %v3475_v22  ;;  %v2272_v26 = vadd.f32 %v6583_v40, %v2271_v25  ;;  %v4074_v14 = vor.u32 %v5004_v4, %v4071_v6  ;;  %v4085_v4 = vld [vmem:[%s8082_s0 + $0x240] sm:$0xf] }
 0x22f   :  { %v1974_v30 = vpop.f32.mrf.mxu0 }
 0x230   :  { %v3115_v29 = vmax.f32 %v2585_v24, 0.0  ;;  %v2885_v32 = vadd.f32 %v2884_v1, %v2272_v26  ;;  %v1975_v37 = vadd.f32 %v6583_v40, %v1974_v30  ;;  %v4070_v1 = vor.u32 %v5005_v57, %v4069_v56 }
 0x232   :  { %v3356_v36 = vpack.c.bf16 %v3115_v29, %v3115_v29  ;;  %v3235_v38 = vmax.f32 %v2885_v32, 0.0  ;;  %2313 = vmatmul.bf16.gmra.mxu2 %v4542_v27  ;;  %2013 = vmatmul.bf16.gmra.mxu0 %v4062_v28  ;;  %v4557_v28 = vld [vmem:[%s8082_s0 + $0x5f0] sm:$0xf]  ;;  %v5127_v29 = vld [vmem:[%s8082_s0 + $0x5f4] sm:$0xf0] }
 0x233   :  { %v2889_v39 = vpop.f32.mrf.mxu3  ;;  %v5007_v32 = vld [vmem:[%s8082_s0 + $0x234] sm:$0xf0] }
 0x234   :  { %3598 = vst.msk [vmem:[%s8084_s3 + $0xc4] sm:$0xf] %vm3548_vm3, %v3356_v36  ;;  %v3476_v45 = vpack.c.bf16 %v3235_v38, %v3235_v38  ;;  %v4558_v38 = vor.u32 %v5127_v29, %v4557_v28 }
 0x235   :  { %v2587_v42 = vpop.f32.mrf.mxu1  ;;  %v2274_v44 = vpop.f32.mrf.mxu2 }
 0x236   :  { %v2588_v43 = vadd.f32 %v2587_v42, %v1975_v37  ;;  %3718 = vst.msk [vmem:[%s8084_s3 + $0x2a4] sm:$0xf] %vm3548_vm3, %v3476_v45  ;;  %v2275_v46 = vadd.f32 %v6583_v40, %v2274_v44  ;;  %v5006_v45 = vld [vmem:[%s8082_s0 + $0x234] sm:$0xf]  ;;  %v5128_v44 = vld [vmem:[%s8082_s0 + $0x604] sm:$0xf] }
 0x237   :  { %v1976_v48 = vpop.f32.mrf.mxu0 }
 0x238   :  { %v3116_v47 = vmax.f32 %v2588_v43, 0.0  ;;  %4848 = vmatmul.msk.bf16.gmra.mxu1 %vm1469_vm2, %v4066_v58  ;;  %4909 = vmatmul.msk.bf16.gmra.mxu3 %vm1469_vm2, %v4554_v41  ;;  %v2888_v49 = vadd.f32 %v2887_v18, %v2275_v46  ;;  %v1977_v51 = vadd.f32 %v6583_v40, %v1976_v48  ;;  %v4079_v43 = vld [vmem:[%s8082_s0 + $0x238] sm:$0xf0]  ;;  %v4567_v46 = vld [vmem:[%s8082_s0 + $0x608] sm:$0xf0] }
 0x23a   :  { %v3357_v50 = vpack.c.bf16 %v3116_v47, %v3116_v47  ;;  %v3236_v52 = vmax.f32 %v2888_v49, 0.0 }
 0x23b   :  { %v2892_v55 = vpop.f32.mrf.mxu3 }
 0x23c   :  { %3599 = vst.msk [vmem:[%s8084_s3 + $0xc8] sm:$0xf] %vm3548_vm3, %v3357_v50  ;;  %v3477_v59 = vpack.c.bf16 %v3236_v52, %v3236_v52  ;;  %v4570_v52 = vor.u32 %v5128_v44, %v4567_v46 }
 0x23d   :  { %v2589_v60 = vpop.f32.mrf.mxu1  ;;  %v2276_v62 = vpop.f32.mrf.mxu2 }
 0x23e   :  { %v2590_v61 = vadd.f32 %v2589_v60, %v1977_v51  ;;  %3719 = vst.msk [vmem:[%s8084_s3 + $0x2a8] sm:$0xf] %vm3548_vm3, %v3477_v59  ;;  %v2277_v63 = vadd.f32 %v6583_v40, %v2276_v62  ;;  %v4082_v51 = vor.u32 %v5006_v45, %v4079_v43  ;;  %v4093_v45 = vld [vmem:[%s8082_s0 + $0x250] sm:$0xf] }
 0x23f   :  { %v1979_v3 = vpop.f32.mrf.mxu0 }
 0x240   :  { %v3117_v2 = vmax.f32 %v2590_v61, 0.0  ;;  %v2890_v5 = vadd.f32 %v2889_v39, %v2277_v63  ;;  %v1980_v11 = vadd.f32 %v6583_v40, %v1979_v3  ;;  %v4078_v39 = vor.u32 %v5007_v32, %v4077_v31 }
 0x242   :  { %v3358_v10 = vpack.c.bf16 %v3117_v2, %v3117_v2  ;;  %v3237_v12 = vmax.f32 %v2890_v5, 0.0  ;;  %2318 = vmatmul.bf16.gmra.mxu2 %v4550_v0  ;;  %2018 = vmatmul.bf16.gmra.mxu0 %v4070_v1  ;;  %v4565_v1 = vld [vmem:[%s8082_s0 + $0x600] sm:$0xf]  ;;  %v5129_v2 = vld [vmem:[%s8082_s0 + $0x604] sm:$0xf0] }
 0x243   :  { %v2894_v13 = vpop.f32.mrf.mxu3  ;;  %v5009_v5 = vld [vmem:[%s8082_s0 + $0x244] sm:$0xf0] }
 0x244   :  { %3600 = vst.msk [vmem:[%s8084_s3 + $0xcc] sm:$0xf] %vm3548_vm3, %v3358_v10  ;;  %v3478_v16 = vpack.c.bf16 %v3237_v12, %v3237_v12  ;;  %v4566_v12 = vor.u32 %v5129_v2, %v4565_v1 }
 0x245   :  { %v2592_v17 = vpop.f32.mrf.mxu1  ;;  %v2279_v20 = vpop.f32.mrf.mxu2 }
 0x246   :  { %v2593_v18 = vadd.f32 %v2592_v17, %v1980_v11  ;;  %3720 = vst.msk [vmem:[%s8084_s3 + $0x2ac] sm:$0xf] %vm3548_vm3, %v3478_v16  ;;  %v2280_v21 = vadd.f32 %v6583_v40, %v2279_v20  ;;  %v5008_v16 = vld [vmem:[%s8082_s0 + $0x244] sm:$0xf]  ;;  %v5130_v20 = vld [vmem:[%s8082_s0 + $0x614] sm:$0xf] }
 0x247   :  { %v1981_v23 = vpop.f32.mrf.mxu0 }
 0x248   :  { %v3118_v22 = vmax.f32 %v2593_v18, 0.0  ;;  %4849 = vmatmul.msk.bf16.gmra.mxu1 %vm1469_vm2, %v4074_v14  ;;  %4910 = vmatmul.msk.bf16.gmra.mxu3 %vm1469_vm2, %v4562_v15  ;;  %v2893_v24 = vadd.f32 %v2892_v55, %v2280_v21  ;;  %v1982_v26 = vadd.f32 %v6583_v40, %v1981_v23  ;;  %v4087_v18 = vld [vmem:[%s8082_s0 + $0x248] sm:$0xf0]  ;;  %v4575_v21 = vld [vmem:[%s8082_s0 + $0x618] sm:$0xf0] }
 0x24a   :  { %v3359_v25 = vpack.c.bf16 %v3118_v22, %v3118_v22  ;;  %v3238_v27 = vmax.f32 %v2893_v24, 0.0 }
 0x24b   :  { %v2897_v30 = vpop.f32.mrf.mxu3 }
 0x24c   :  { %3601 = vst.msk [vmem:[%s8084_s3 + $0xd0] sm:$0xf] %vm3548_vm3, %v3359_v25  ;;  %v3479_v33 = vpack.c.bf16 %v3238_v27, %v3238_v27  ;;  %v4578_v27 = vor.u32 %v5130_v20, %v4575_v21 }
 0x24d   :  { %v2594_v34 = vpop.f32.mrf.mxu1  ;;  %v2281_v36 = vpop.f32.mrf.mxu2 }
 0x24e   :  { %v2595_v35 = vadd.f32 %v2594_v34, %v1982_v26  ;;  %3721 = vst.msk [vmem:[%s8084_s3 + $0x2b0] sm:$0xf] %vm3548_vm3, %v3479_v33  ;;  %v2282_v37 = vadd.f32 %v6583_v40, %v2281_v36  ;;  %v4090_v26 = vor.u32 %v5008_v16, %v4087_v18  ;;  %v4101_v16 = vld [vmem:[%s8082_s0 + $0x260] sm:$0xf] }
 0x24f   :  { %v1984_v41 = vpop.f32.mrf.mxu0 }
 0x250   :  { %v3119_v58 = vmax.f32 %v2595_v35, 0.0  ;;  %v2895_v42 = vadd.f32 %v2894_v13, %v2282_v37  ;;  %v1985_v48 = vadd.f32 %v6583_v40, %v1984_v41  ;;  %v4086_v13 = vor.u32 %v5009_v5, %v4085_v4 }
 0x252   :  { %v3360_v47 = vpack.c.bf16 %v3119_v58, %v3119_v58  ;;  %v3239_v49 = vmax.f32 %v2895_v42, 0.0  ;;  %2323 = vmatmul.bf16.gmra.mxu2 %v4558_v38  ;;  %2023 = vmatmul.bf16.gmra.mxu0 %v4078_v39  ;;  %v4573_v39 = vld [vmem:[%s8082_s0 + $0x610] sm:$0xf]  ;;  %v5131_v58 = vld [vmem:[%s8082_s0 + $0x614] sm:$0xf0] }
 0x253   :  { %v2899_v50 = vpop.f32.mrf.mxu3  ;;  %v5011_v42 = vld [vmem:[%s8082_s0 + $0x254] sm:$0xf0] }
 0x254   :  { %3602 = vst.msk [vmem:[%s8084_s3 + $0xd4] sm:$0xf] %vm3548_vm3, %v3360_v47  ;;  %v3480_v53 = vpack.c.bf16 %v3239_v49, %v3239_v49  ;;  %v4574_v49 = vor.u32 %v5131_v58, %v4573_v39 }
 0x255   :  { %v2597_v54 = vpop.f32.mrf.mxu1  ;;  %v2284_v56 = vpop.f32.mrf.mxu2 }
 0x256   :  { %v2598_v55 = vadd.f32 %v2597_v54, %v1985_v48  ;;  %3722 = vst.msk [vmem:[%s8084_s3 + $0x2b4] sm:$0xf] %vm3548_vm3, %v3480_v53  ;;  %v2285_v57 = vadd.f32 %v6583_v40, %v2284_v56  ;;  %v5010_v53 = vld [vmem:[%s8082_s0 + $0x254] sm:$0xf]  ;;  %v5132_v56 = vld [vmem:[%s8082_s0 + $0x624] sm:$0xf] }
 0x257   :  { %v1986_v60 = vpop.f32.mrf.mxu0 }
 0x258   :  { %v3120_v59 = vmax.f32 %v2598_v55, 0.0  ;;  %4850 = vmatmul.msk.bf16.gmra.mxu1 %vm1469_vm2, %v4082_v51  ;;  %4911 = vmatmul.msk.bf16.gmra.mxu3 %vm1469_vm2, %v4570_v52  ;;  %v2898_v61 = vadd.f32 %v2897_v30, %v2285_v57  ;;  %v1987_v63 = vadd.f32 %v6583_v40, %v1986_v60  ;;  %v4095_v55 = vld [vmem:[%s8082_s0 + $0x258] sm:$0xf0]  ;;  %v4583_v57 = vld [vmem:[%s8082_s0 + $0x628] sm:$0xf0] }
 0x25a   :  { %v3361_v62 = vpack.c.bf16 %v3120_v59, %v3120_v59  ;;  %v3240_v0 = vmax.f32 %v2898_v61, 0.0 }
 0x25b   :  { %v2902_v3 = vpop.f32.mrf.mxu3 }
 0x25c   :  { %3603 = vst.msk [vmem:[%s8084_s3 + $0xd8] sm:$0xf] %vm3548_vm3, %v3361_v62  ;;  %v3481_v6 = vpack.c.bf16 %v3240_v0, %v3240_v0  ;;  %v4586_v0 = vor.u32 %v5132_v56, %v4583_v57 }
 0x25d   :  { %v2599_v8 = vpop.f32.mrf.mxu1  ;;  %v2286_v10 = vpop.f32.mrf.mxu2 }
 0x25e   :  { %v2600_v9 = vadd.f32 %v2599_v8, %v1987_v63  ;;  %3723 = vst.msk [vmem:[%s8084_s3 + $0x2b8] sm:$0xf] %vm3548_vm3, %v3481_v6  ;;  %v2287_v11 = vadd.f32 %v6583_v40, %v2286_v10  ;;  %v4098_v63 = vor.u32 %v5010_v53, %v4095_v55  ;;  %v4109_v53 = vld [vmem:[%s8082_s0 + $0x270] sm:$0xf] }
 0x25f   :  { %v1989_v15 = vpop.f32.mrf.mxu0 }
 0x260   :  { %v3121_v14 = vmax.f32 %v2600_v9, 0.0  ;;  %v2900_v17 = vadd.f32 %v2899_v50, %v2287_v11  ;;  %v1990_v23 = vadd.f32 %v6583_v40, %v1989_v15  ;;  %v4094_v50 = vor.u32 %v5011_v42, %v4093_v45 }
 0x262   :  { %v3362_v22 = vpack.c.bf16 %v3121_v14, %v3121_v14  ;;  %v3241_v24 = vmax.f32 %v2900_v17, 0.0  ;;  %2328 = vmatmul.bf16.gmra.mxu2 %v4566_v12  ;;  %2028 = vmatmul.bf16.gmra.mxu0 %v4086_v13  ;;  %v4581_v13 = vld [vmem:[%s8082_s0 + $0x620] sm:$0xf]  ;;  %v5133_v14 = vld [vmem:[%s8082_s0 + $0x624] sm:$0xf0] }
 0x263   :  { %v2904_v25 = vpop.f32.mrf.mxu3  ;;  %v5013_v17 = vld [vmem:[%s8082_s0 + $0x264] sm:$0xf0] }
 0x264   :  { %3604 = vst.msk [vmem:[%s8084_s3 + $0xdc] sm:$0xf] %vm3548_vm3, %v3362_v22  ;;  %v3482_v28 = vpack.c.bf16 %v3241_v24, %v3241_v24  ;;  %v4582_v24 = vor.u32 %v5133_v14, %v4581_v13 }
 0x265   :  { %v2602_v29 = vpop.f32.mrf.mxu1  ;;  %v2289_v31 = vpop.f32.mrf.mxu2 }
 0x266   :  { %v2603_v30 = vadd.f32 %v2602_v29, %v1990_v23  ;;  %3724 = vst.msk [vmem:[%s8084_s3 + $0x2bc] sm:$0xf] %vm3548_vm3, %v3482_v28  ;;  %v2290_v32 = vadd.f32 %v6583_v40, %v2289_v31  ;;  %v5012_v28 = vld [vmem:[%s8082_s0 + $0x264] sm:$0xf]  ;;  %v5134_v31 = vld [vmem:[%s8082_s0 + $0x634] sm:$0xf] }
 0x267   :  { %v1991_v34 = vpop.f32.mrf.mxu0 }
 0x268   :  { %v3122_v33 = vmax.f32 %v2603_v30, 0.0  ;;  %4851 = vmatmul.msk.bf16.gmra.mxu1 %vm1469_vm2, %v4090_v26  ;;  %4912 = vmatmul.msk.bf16.gmra.mxu3 %vm1469_vm2, %v4578_v27  ;;  %v2903_v35 = vadd.f32 %v2902_v3, %v2290_v32  ;;  %v1992_v37 = vadd.f32 %v6583_v40, %v1991_v34  ;;  %v4103_v30 = vld [vmem:[%s8082_s0 + $0x268] sm:$0xf0]  ;;  %v4591_v32 = vld [vmem:[%s8082_s0 + $0x638] sm:$0xf0] }
 0x26a   :  { %v3363_v36 = vpack.c.bf16 %v3122_v33, %v3122_v33  ;;  %v3242_v38 = vmax.f32 %v2903_v35, 0.0 }
 0x26b   :  { %v2907_v41 = vpop.f32.mrf.mxu3 }
 0x26c   :  { %3605 = vst.msk [vmem:[%s8084_s3 + $0xe0] sm:$0xf] %vm3548_vm3, %v3363_v36  ;;  %v3483_v43 = vpack.c.bf16 %v3242_v38, %v3242_v38  ;;  %v4594_v38 = vor.u32 %v5134_v31, %v4591_v32 }
 0x26d   :  { %v2604_v44 = vpop.f32.mrf.mxu1  ;;  %v2291_v47 = vpop.f32.mrf.mxu2 }
 0x26e   :  { %v2605_v46 = vadd.f32 %v2604_v44, %v1992_v37  ;;  %3725 = vst.msk [vmem:[%s8084_s3 + $0x2c0] sm:$0xf] %vm3548_vm3, %v3483_v43  ;;  %v2292_v48 = vadd.f32 %v6583_v40, %v2291_v47  ;;  %v4106_v37 = vor.u32 %v5012_v28, %v4103_v30  ;;  %v4117_v28 = vld [vmem:[%s8082_s0 + $0x280] sm:$0xf] }
 0x26f   :  { %v1994_v52 = vpop.f32.mrf.mxu0 }
 0x270   :  { %v3123_v51 = vmax.f32 %v2605_v46, 0.0  ;;  %v2905_v54 = vadd.f32 %v2904_v25, %v2292_v48  ;;  %v1995_v60 = vadd.f32 %v6583_v40, %v1994_v52  ;;  %v4102_v25 = vor.u32 %v5013_v17, %v4101_v16 }
 0x272   :  { %v3364_v59 = vpack.c.bf16 %v3123_v51, %v3123_v51  ;;  %v3243_v61 = vmax.f32 %v2905_v54, 0.0  ;;  %2333 = vmatmul.bf16.gmra.mxu2 %v4574_v49  ;;  %2033 = vmatmul.bf16.gmra.mxu0 %v4094_v50  ;;  %v4589_v50 = vld [vmem:[%s8082_s0 + $0x630] sm:$0xf]  ;;  %v5135_v51 = vld [vmem:[%s8082_s0 + $0x634] sm:$0xf0] }
 0x273   :  { %v2909_v62 = vpop.f32.mrf.mxu3  ;;  %v5015_v54 = vld [vmem:[%s8082_s0 + $0x274] sm:$0xf0] }
 0x274   :  { %3606 = vst.msk [vmem:[%s8084_s3 + $0xe4] sm:$0xf] %vm3548_vm3, %v3364_v59  ;;  %v3484_v1 = vpack.c.bf16 %v3243_v61, %v3243_v61  ;;  %v4590_v61 = vor.u32 %v5135_v51, %v4589_v50 }
 0x275   :  { %v2607_v2 = vpop.f32.mrf.mxu1  ;;  %v2294_v4 = vpop.f32.mrf.mxu2 }
 0x276   :  { %v2608_v3 = vadd.f32 %v2607_v2, %v1995_v60  ;;  %3726 = vst.msk [vmem:[%s8084_s3 + $0x2c4] sm:$0xf] %vm3548_vm3, %v3484_v1  ;;  %v2295_v5 = vadd.f32 %v6583_v40, %v2294_v4  ;;  %v5014_v1 = vld [vmem:[%s8082_s0 + $0x274] sm:$0xf]  ;;  %v5136_v4 = vld [vmem:[%s8082_s0 + $0x644] sm:$0xf] }
 0x277   :  { %v1996_v8 = vpop.f32.mrf.mxu0 }
 0x278   :  { %v3124_v6 = vmax.f32 %v2608_v3, 0.0  ;;  %4852 = vmatmul.msk.bf16.gmra.mxu1 %vm1469_vm2, %v4098_v63  ;;  %4913 = vmatmul.msk.bf16.gmra.mxu3 %vm1469_vm2, %v4586_v0  ;;  %v2908_v9 = vadd.f32 %v2907_v41, %v2295_v5  ;;  %v1997_v11 = vadd.f32 %v6583_v40, %v1996_v8  ;;  %v4111_v3 = vld [vmem:[%s8082_s0 + $0x278] sm:$0xf0]  ;;  %v4599_v5 = vld [vmem:[%s8082_s0 + $0x648] sm:$0xf0] }
 0x27a   :  { %v3365_v10 = vpack.c.bf16 %v3124_v6, %v3124_v6  ;;  %v3244_v12 = vmax.f32 %v2908_v9, 0.0 }
 0x27b   :  { %v2912_v15 = vpop.f32.mrf.mxu3 }
 0x27c   :  { %3607 = vst.msk [vmem:[%s8084_s3 + $0xe8] sm:$0xf] %vm3548_vm3, %v3365_v10  ;;  %v3485_v18 = vpack.c.bf16 %v3244_v12, %v3244_v12  ;;  %v4602_v12 = vor.u32 %v5136_v4, %v4599_v5 }
 0x27d   :  { %v2609_v20 = vpop.f32.mrf.mxu1  ;;  %v2296_v22 = vpop.f32.mrf.mxu2 }
 0x27e   :  { %v2610_v21 = vadd.f32 %v2609_v20, %v1997_v11  ;;  %3727 = vst.msk [vmem:[%s8084_s3 + $0x2c8] sm:$0xf] %vm3548_vm3, %v3485_v18  ;;  %v2297_v23 = vadd.f32 %v6583_v40, %v2296_v22  ;;  %v4114_v11 = vor.u32 %v5014_v1, %v4111_v3  ;;  %v4125_v1 = vld [vmem:[%s8082_s0 + $0x290] sm:$0xf] }
 0x27f   :  { %v1999_v27 = vpop.f32.mrf.mxu0 }
 0x280   :  { %v3125_v26 = vmax.f32 %v2610_v21, 0.0  ;;  %v2910_v29 = vadd.f32 %v2909_v62, %v2297_v23  ;;  %v2000_v34 = vadd.f32 %v6583_v40, %v1999_v27  ;;  %v4110_v62 = vor.u32 %v5015_v54, %v4109_v53 }
 0x282   :  { %v3366_v33 = vpack.c.bf16 %v3125_v26, %v3125_v26  ;;  %v3245_v35 = vmax.f32 %v2910_v29, 0.0  ;;  %2338 = vmatmul.bf16.gmra.mxu2 %v4582_v24  ;;  %2038 = vmatmul.bf16.gmra.mxu0 %v4102_v25  ;;  %v4597_v25 = vld [vmem:[%s8082_s0 + $0x640] sm:$0xf]  ;;  %v5137_v26 = vld [vmem:[%s8082_s0 + $0x644] sm:$0xf0] }
 0x283   :  { %v2914_v36 = vpop.f32.mrf.mxu3  ;;  %v5017_v29 = vld [vmem:[%s8082_s0 + $0x284] sm:$0xf0] }
 0x284   :  { %3608 = vst.msk [vmem:[%s8084_s3 + $0xec] sm:$0xf] %vm3548_vm3, %v3366_v33  ;;  %v3486_v39 = vpack.c.bf16 %v3245_v35, %v3245_v35  ;;  %v4598_v35 = vor.u32 %v5137_v26, %v4597_v25 }
 0x285   :  { %v2612_v58 = vpop.f32.mrf.mxu1  ;;  %v2299_v45 = vpop.f32.mrf.mxu2 }
 0x286   :  { %v2613_v41 = vadd.f32 %v2612_v58, %v2000_v34  ;;  %3728 = vst.msk [vmem:[%s8084_s3 + $0x2cc] sm:$0xf] %vm3548_vm3, %v3486_v39  ;;  %v2300_v42 = vadd.f32 %v6583_v40, %v2299_v45  ;;  %v5016_v39 = vld [vmem:[%s8082_s0 + $0x284] sm:$0xf]  ;;  %v5138_v45 = vld [vmem:[%s8082_s0 + $0x654] sm:$0xf] }
 0x287   :  { %v2001_v44 = vpop.f32.mrf.mxu0 }
 0x288   :  { %v3126_v43 = vmax.f32 %v2613_v41, 0.0  ;;  %4853 = vmatmul.msk.bf16.gmra.mxu1 %vm1469_vm2, %v4106_v37  ;;  %4914 = vmatmul.msk.bf16.gmra.mxu3 %vm1469_vm2, %v4594_v38  ;;  %v2913_v46 = vadd.f32 %v2912_v15, %v2300_v42  ;;  %v2002_v48 = vadd.f32 %v6583_v40, %v2001_v44  ;;  %v4119_v41 = vld [vmem:[%s8082_s0 + $0x288] sm:$0xf0]  ;;  %v4607_v42 = vld [vmem:[%s8082_s0 + $0x658] sm:$0xf0] }
 0x28a   :  { %v3367_v47 = vpack.c.bf16 %v3126_v43, %v3126_v43  ;;  %v3246_v49 = vmax.f32 %v2913_v46, 0.0 }
 0x28b   :  { %v2917_v52 = vpop.f32.mrf.mxu3 }
 0x28c   :  { %3609 = vst.msk [vmem:[%s8084_s3 + $0xf0] sm:$0xf] %vm3548_vm3, %v3367_v47  ;;  %v3487_v55 = vpack.c.bf16 %v3246_v49, %v3246_v49  ;;  %v4610_v49 = vor.u32 %v5138_v45, %v4607_v42 }
 0x28d   :  { %v2614_v56 = vpop.f32.mrf.mxu1  ;;  %v2301_v59 = vpop.f32.mrf.mxu2 }
 0x28e   :  { %v2615_v57 = vadd.f32 %v2614_v56, %v2002_v48  ;;  %3729 = vst.msk [vmem:[%s8084_s3 + $0x2d0] sm:$0xf] %vm3548_vm3, %v3487_v55  ;;  %v2302_v60 = vadd.f32 %v6583_v40, %v2301_v59  ;;  %v4122_v48 = vor.u32 %v5016_v39, %v4119_v41  ;;  %v4133_v39 = vld [vmem:[%s8082_s0 + $0x2a0] sm:$0xf] }
 0x28f   :  { %v2004_v0 = vpop.f32.mrf.mxu0 }
 0x290   :  { %v3127_v63 = vmax.f32 %v2615_v57, 0.0  ;;  %v2915_v2 = vadd.f32 %v2914_v36, %v2302_v60  ;;  %v2005_v8 = vadd.f32 %v6583_v40, %v2004_v0  ;;  %v4118_v36 = vor.u32 %v5017_v29, %v4117_v28 }
 0x292   :  { %v3368_v6 = vpack.c.bf16 %v3127_v63, %v3127_v63  ;;  %v3247_v9 = vmax.f32 %v2915_v2, 0.0  ;;  %2343 = vmatmul.bf16.gmra.mxu2 %v4590_v61  ;;  %2043 = vmatmul.bf16.gmra.mxu0 %v4110_v62  ;;  %v4605_v62 = vld [vmem:[%s8082_s0 + $0x650] sm:$0xf]  ;;  %v5139_v63 = vld [vmem:[%s8082_s0 + $0x654] sm:$0xf0] }
 0x293   :  { %v2919_v10 = vpop.f32.mrf.mxu3  ;;  %v5019_v2 = vld [vmem:[%s8082_s0 + $0x294] sm:$0xf0] }
 0x294   :  { %3610 = vst.msk [vmem:[%s8084_s3 + $0xf4] sm:$0xf] %vm3548_vm3, %v3368_v6  ;;  %v3488_v13 = vpack.c.bf16 %v3247_v9, %v3247_v9  ;;  %v4606_v9 = vor.u32 %v5139_v63, %v4605_v62 }
 0x295   :  { %v2617_v14 = vpop.f32.mrf.mxu1  ;;  %v2304_v16 = vpop.f32.mrf.mxu2 }
 0x296   :  { %v2618_v15 = vadd.f32 %v2617_v14, %v2005_v8  ;;  %3730 = vst.msk [vmem:[%s8084_s3 + $0x2d4] sm:$0xf] %vm3548_vm3, %v3488_v13  ;;  %v2305_v17 = vadd.f32 %v6583_v40, %v2304_v16  ;;  %v5018_v13 = vld [vmem:[%s8082_s0 + $0x294] sm:$0xf]  ;;  %v5140_v16 = vld [vmem:[%s8082_s0 + $0x664] sm:$0xf] }
 0x297   :  { %v2006_v20 = vpop.f32.mrf.mxu0 }
 0x298   :  { %v3128_v18 = vmax.f32 %v2618_v15, 0.0  ;;  %4854 = vmatmul.msk.bf16.gmra.mxu1 %vm1469_vm2, %v4114_v11  ;;  %4915 = vmatmul.msk.bf16.gmra.mxu3 %vm1469_vm2, %v4602_v12  ;;  %v2918_v21 = vadd.f32 %v2917_v52, %v2305_v17  ;;  %v2007_v23 = vadd.f32 %v6583_v40, %v2006_v20  ;;  %v4127_v15 = vld [vmem:[%s8082_s0 + $0x298] sm:$0xf0]  ;;  %v4615_v17 = vld [vmem:[%s8082_s0 + $0x668] sm:$0xf0] }
 0x29a   :  { %v3369_v22 = vpack.c.bf16 %v3128_v18, %v3128_v18  ;;  %v3248_v24 = vmax.f32 %v2918_v21, 0.0 }
 0x29b   :  { %v2922_v27 = vpop.f32.mrf.mxu3 }
 0x29c   :  { %3611 = vst.msk [vmem:[%s8084_s3 + $0xf8] sm:$0xf] %vm3548_vm3, %v3369_v22  ;;  %v3489_v30 = vpack.c.bf16 %v3248_v24, %v3248_v24  ;;  %v4618_v24 = vor.u32 %v5140_v16, %v4615_v17 }
 0x29d   :  { %v2619_v31 = vpop.f32.mrf.mxu1  ;;  %v2306_v33 = vpop.f32.mrf.mxu2 }
 0x29e   :  { %v2620_v32 = vadd.f32 %v2619_v31, %v2007_v23  ;;  %3731 = vst.msk [vmem:[%s8084_s3 + $0x2d8] sm:$0xf] %vm3548_vm3, %v3489_v30  ;;  %v2307_v34 = vadd.f32 %v6583_v40, %v2306_v33  ;;  %v4130_v23 = vor.u32 %v5018_v13, %v4127_v15  ;;  %v4141_v13 = vld [vmem:[%s8082_s0 + $0x2b0] sm:$0xf] }
 0x29f   :  { %v2009_v38 = vpop.f32.mrf.mxu0 }
 0x2a0   :  { %v3129_v37 = vmax.f32 %v2620_v32, 0.0  ;;  %v2920_v58 = vadd.f32 %v2919_v10, %v2307_v34  ;;  %v2010_v44 = vadd.f32 %v6583_v40, %v2009_v38  ;;  %v4126_v10 = vor.u32 %v5019_v2, %v4125_v1 }
 0x2a2   :  { %v3370_v43 = vpack.c.bf16 %v3129_v37, %v3129_v37  ;;  %v3249_v46 = vmax.f32 %v2920_v58, 0.0  ;;  %2348 = vmatmul.bf16.gmra.mxu2 %v4598_v35  ;;  %2048 = vmatmul.bf16.gmra.mxu0 %v4118_v36  ;;  %v4613_v36 = vld [vmem:[%s8082_s0 + $0x660] sm:$0xf]  ;;  %v5141_v37 = vld [vmem:[%s8082_s0 + $0x664] sm:$0xf0] }
 0x2a3   :  { %v2924_v47 = vpop.f32.mrf.mxu3  ;;  %v5021_v58 = vld [vmem:[%s8082_s0 + $0x2a4] sm:$0xf0] }
 0x2a4   :  { %3612 = vst.msk [vmem:[%s8084_s3 + $0xfc] sm:$0xf] %vm3548_vm3, %v3370_v43  ;;  %v3490_v50 = vpack.c.bf16 %v3249_v46, %v3249_v46  ;;  %v4614_v46 = vor.u32 %v5141_v37, %v4613_v36 }
 0x2a5   :  { %v2622_v51 = vpop.f32.mrf.mxu1  ;;  %v2309_v53 = vpop.f32.mrf.mxu2 }
 0x2a6   :  { %v2623_v52 = vadd.f32 %v2622_v51, %v2010_v44  ;;  %3732 = vst.msk [vmem:[%s8084_s3 + $0x2dc] sm:$0xf] %vm3548_vm3, %v3490_v50  ;;  %v2310_v54 = vadd.f32 %v6583_v40, %v2309_v53  ;;  %v5020_v50 = vld [vmem:[%s8082_s0 + $0x2a4] sm:$0xf]  ;;  %v5142_v53 = vld [vmem:[%s8082_s0 + $0x674] sm:$0xf] }
 0x2a7   :  { %v2011_v56 = vpop.f32.mrf.mxu0 }
 0x2a8   :  { %v3130_v55 = vmax.f32 %v2623_v52, 0.0  ;;  %4855 = vmatmul.msk.bf16.gmra.mxu1 %vm1469_vm2, %v4122_v48  ;;  %4916 = vmatmul.msk.bf16.gmra.mxu3 %vm1469_vm2, %v4610_v49  ;;  %v2923_v57 = vadd.f32 %v2922_v27, %v2310_v54  ;;  %v2012_v60 = vadd.f32 %v6583_v40, %v2011_v56  ;;  %v4135_v52 = vld [vmem:[%s8082_s0 + $0x2a8] sm:$0xf0]  ;;  %v4623_v54 = vld [vmem:[%s8082_s0 + $0x678] sm:$0xf0] }
 0x2aa   :  { %v3371_v59 = vpack.c.bf16 %v3130_v55, %v3130_v55  ;;  %v3250_v61 = vmax.f32 %v2923_v57, 0.0 }
 0x2ab   :  { %v2927_v0 = vpop.f32.mrf.mxu3 }
 0x2ac   :  { %3613 = vst.msk [vmem:[%s8084_s3 + $0x100] sm:$0xf] %vm3548_vm3, %v3371_v59  ;;  %v3491_v3 = vpack.c.bf16 %v3250_v61, %v3250_v61  ;;  %v4626_v61 = vor.u32 %v5142_v53, %v4623_v54 }
 0x2ad   :  { %v2624_v4 = vpop.f32.mrf.mxu1  ;;  %v2311_v6 = vpop.f32.mrf.mxu2 }
 0x2ae   :  { %v2625_v5 = vadd.f32 %v2624_v4, %v2012_v60  ;;  %3733 = vst.msk [vmem:[%s8084_s3 + $0x2e0] sm:$0xf] %vm3548_vm3, %v3491_v3  ;;  %v2312_v8 = vadd.f32 %v6583_v40, %v2311_v6  ;;  %v4138_v60 = vor.u32 %v5020_v50, %v4135_v52  ;;  %v4149_v50 = vld [vmem:[%s8082_s0 + $0x2c0] sm:$0xf] }
 0x2af   :  { %v2014_v12 = vpop.f32.mrf.mxu0 }
 0x2b0   :  { %v3131_v11 = vmax.f32 %v2625_v5, 0.0  ;;  %v2925_v14 = vadd.f32 %v2924_v47, %v2312_v8  ;;  %v2015_v20 = vadd.f32 %v6583_v40, %v2014_v12  ;;  %v4134_v47 = vor.u32 %v5021_v58, %v4133_v39 }
 0x2b2   :  { %v3372_v18 = vpack.c.bf16 %v3131_v11, %v3131_v11  ;;  %v3251_v21 = vmax.f32 %v2925_v14, 0.0  ;;  %2353 = vmatmul.bf16.gmra.mxu2 %v4606_v9  ;;  %2053 = vmatmul.bf16.gmra.mxu0 %v4126_v10  ;;  %v4621_v10 = vld [vmem:[%s8082_s0 + $0x670] sm:$0xf]  ;;  %v5143_v11 = vld [vmem:[%s8082_s0 + $0x674] sm:$0xf0] }
 0x2b3   :  { %v2929_v22 = vpop.f32.mrf.mxu3  ;;  %v5023_v14 = vld [vmem:[%s8082_s0 + $0x2b4] sm:$0xf0] }
 0x2b4   :  { %3614 = vst.msk [vmem:[%s8084_s3 + $0x104] sm:$0xf] %vm3548_vm3, %v3372_v18  ;;  %v3492_v25 = vpack.c.bf16 %v3251_v21, %v3251_v21  ;;  %v4622_v21 = vor.u32 %v5143_v11, %v4621_v10 }
 0x2b5   :  { %v2627_v26 = vpop.f32.mrf.mxu1  ;;  %v2314_v28 = vpop.f32.mrf.mxu2 }
 0x2b6   :  { %v2628_v27 = vadd.f32 %v2627_v26, %v2015_v20  ;;  %3734 = vst.msk [vmem:[%s8084_s3 + $0x2e4] sm:$0xf] %vm3548_vm3, %v3492_v25  ;;  %v2315_v29 = vadd.f32 %v6583_v40, %v2314_v28  ;;  %v5022_v25 = vld [vmem:[%s8082_s0 + $0x2b4] sm:$0xf]  ;;  %v5144_v28 = vld [vmem:[%s8082_s0 + $0x684] sm:$0xf] }
 0x2b7   :  { %v2016_v31 = vpop.f32.mrf.mxu0 }
 0x2b8   :  { %v3132_v30 = vmax.f32 %v2628_v27, 0.0  ;;  %4856 = vmatmul.msk.bf16.gmra.mxu1 %vm1469_vm2, %v4130_v23  ;;  %4917 = vmatmul.msk.bf16.gmra.mxu3 %vm1469_vm2, %v4618_v24  ;;  %v2928_v32 = vadd.f32 %v2927_v0, %v2315_v29  ;;  %v2017_v34 = vadd.f32 %v6583_v40, %v2016_v31  ;;  %v4143_v27 = vld [vmem:[%s8082_s0 + $0x2b8] sm:$0xf0]  ;;  %v4631_v29 = vld [vmem:[%s8082_s0 + $0x688] sm:$0xf0] }
 0x2ba   :  { %v3373_v33 = vpack.c.bf16 %v3132_v30, %v3132_v30  ;;  %v3252_v35 = vmax.f32 %v2928_v32, 0.0 }
 0x2bb   :  { %v2932_v38 = vpop.f32.mrf.mxu3 }
 0x2bc   :  { %3615 = vst.msk [vmem:[%s8084_s3 + $0x108] sm:$0xf] %vm3548_vm3, %v3373_v33  ;;  %v3493_v41 = vpack.c.bf16 %v3252_v35, %v3252_v35  ;;  %v4634_v35 = vor.u32 %v5144_v28, %v4631_v29 }
 0x2bd   :  { %v2629_v45 = vpop.f32.mrf.mxu1  ;;  %v2316_v43 = vpop.f32.mrf.mxu2 }
 0x2be   :  { %v2630_v42 = vadd.f32 %v2629_v45, %v2017_v34  ;;  %3735 = vst.msk [vmem:[%s8084_s3 + $0x2e8] sm:$0xf] %vm3548_vm3, %v3493_v41  ;;  %v2317_v44 = vadd.f32 %v6583_v40, %v2316_v43  ;;  %v4146_v34 = vor.u32 %v5022_v25, %v4143_v27  ;;  %v4157_v25 = vld [vmem:[%s8082_s0 + $0x2d0] sm:$0xf] }
 0x2bf   :  { %v2019_v49 = vpop.f32.mrf.mxu0 }
 0x2c0   :  { %v3133_v48 = vmax.f32 %v2630_v42, 0.0  ;;  %v2930_v51 = vadd.f32 %v2929_v22, %v2317_v44  ;;  %v2020_v56 = vadd.f32 %v6583_v40, %v2019_v49  ;;  %v4142_v22 = vor.u32 %v5023_v14, %v4141_v13 }
 0x2c2   :  { %v3374_v55 = vpack.c.bf16 %v3133_v48, %v3133_v48  ;;  %v3253_v57 = vmax.f32 %v2930_v51, 0.0  ;;  %2358 = vmatmul.bf16.gmra.mxu2 %v4614_v46  ;;  %2058 = vmatmul.bf16.gmra.mxu0 %v4134_v47  ;;  %v4629_v47 = vld [vmem:[%s8082_s0 + $0x680] sm:$0xf]  ;;  %v5145_v48 = vld [vmem:[%s8082_s0 + $0x684] sm:$0xf0] }
 0x2c3   :  { %v2934_v59 = vpop.f32.mrf.mxu3  ;;  %v5025_v51 = vld [vmem:[%s8082_s0 + $0x2c4] sm:$0xf0] }
 0x2c4   :  { %3616 = vst.msk [vmem:[%s8084_s3 + $0x10c] sm:$0xf] %vm3548_vm3, %v3374_v55  ;;  %v3494_v62 = vpack.c.bf16 %v3253_v57, %v3253_v57  ;;  %v4630_v57 = vor.u32 %v5145_v48, %v4629_v47 }
 0x2c5   :  { %v2632_v63 = vpop.f32.mrf.mxu1  ;;  %v2319_v1 = vpop.f32.mrf.mxu2 }
 0x2c6   :  { %v2633_v0 = vadd.f32 %v2632_v63, %v2020_v56  ;;  %3736 = vst.msk [vmem:[%s8084_s3 + $0x2ec] sm:$0xf] %vm3548_vm3, %v3494_v62  ;;  %v2320_v2 = vadd.f32 %v6583_v40, %v2319_v1  ;;  %v5024_v62 = vld [vmem:[%s8082_s0 + $0x2c4] sm:$0xf]  ;;  %v5146_v1 = vld [vmem:[%s8082_s0 + $0x694] sm:$0xf] }
 0x2c7   :  { %v2021_v4 = vpop.f32.mrf.mxu0 }
 0x2c8   :  { %v3134_v3 = vmax.f32 %v2633_v0, 0.0  ;;  %4857 = vmatmul.msk.bf16.gmra.mxu1 %vm1469_vm2, %v4138_v60  ;;  %4918 = vmatmul.msk.bf16.gmra.mxu3 %vm1469_vm2, %v4626_v61  ;;  %v2933_v5 = vadd.f32 %v2932_v38, %v2320_v2  ;;  %v2022_v8 = vadd.f32 %v6583_v40, %v2021_v4  ;;  %v4151_v0 = vld [vmem:[%s8082_s0 + $0x2c8] sm:$0xf0]  ;;  %v4639_v2 = vld [vmem:[%s8082_s0 + $0x698] sm:$0xf0] }
 0x2ca   :  { %v3375_v6 = vpack.c.bf16 %v3134_v3, %v3134_v3  ;;  %v3254_v9 = vmax.f32 %v2933_v5, 0.0 }
 0x2cb   :  { %v2937_v12 = vpop.f32.mrf.mxu3 }
 0x2cc   :  { %3617 = vst.msk [vmem:[%s8084_s3 + $0x110] sm:$0xf] %vm3548_vm3, %v3375_v6  ;;  %v3495_v15 = vpack.c.bf16 %v3254_v9, %v3254_v9  ;;  %v4642_v9 = vor.u32 %v5146_v1, %v4639_v2 }
 0x2cd   :  { %v2634_v16 = vpop.f32.mrf.mxu1  ;;  %v2321_v18 = vpop.f32.mrf.mxu2 }
 0x2ce   :  { %v2635_v17 = vadd.f32 %v2634_v16, %v2022_v8  ;;  %3737 = vst.msk [vmem:[%s8084_s3 + $0x2f0] sm:$0xf] %vm3548_vm3, %v3495_v15  ;;  %v2322_v20 = vadd.f32 %v6583_v40, %v2321_v18  ;;  %v4154_v8 = vor.u32 %v5024_v62, %v4151_v0  ;;  %v4165_v62 = vld [vmem:[%s8082_s0 + $0x2e0] sm:$0xf] }
 0x2cf   :  { %v2024_v24 = vpop.f32.mrf.mxu0 }
 0x2d0   :  { %v3135_v23 = vmax.f32 %v2635_v17, 0.0  ;;  %v2935_v26 = vadd.f32 %v2934_v59, %v2322_v20  ;;  %v2025_v31 = vadd.f32 %v6583_v40, %v2024_v24  ;;  %v7137_v40 = vld [vmem:[%s8083_s2] ss:$0 sm:$0xff]  ;;  %v4150_v59 = vor.u32 %v5025_v51, %v4149_v50 }
 0x2d2   :  { %v3376_v30 = vpack.c.bf16 %v3135_v23, %v3135_v23  ;;  %v3255_v32 = vmax.f32 %v2935_v26, 0.0  ;;  %2363 = vmatmul.bf16.gmra.mxu2 %v4622_v21  ;;  %2063 = vmatmul.bf16.gmra.mxu0 %v4142_v22  ;;  %v4637_v22 = vld [vmem:[%s8082_s0 + $0x690] sm:$0xf]  ;;  %v5147_v23 = vld [vmem:[%s8082_s0 + $0x694] sm:$0xf0] }
 0x2d3   :  { %v2939_v33 = vpop.f32.mrf.mxu3  ;;  %v5027_v26 = vld [vmem:[%s8082_s0 + $0x2d4] sm:$0xf0] }
 0x2d4   :  { %3618 = vst.msk [vmem:[%s8084_s3 + $0x114] sm:$0xf] %vm3548_vm3, %v3376_v30  ;;  %v3496_v36 = vpack.c.bf16 %v3255_v32, %v3255_v32  ;;  %v4638_v32 = vor.u32 %v5147_v23, %v4637_v22 }
 0x2d5   :  { %v2637_v37 = vpop.f32.mrf.mxu1  ;;  %v2324_v39 = vpop.f32.mrf.mxu2 }
 0x2d6   :  { %v2638_v38 = vadd.f32 %v2637_v37, %v2025_v31  ;;  %3738 = vst.msk [vmem:[%s8084_s3 + $0x2f4] sm:$0xf] %vm3548_vm3, %v3496_v36  ;;  %v2325_v58 = vadd.f32 %v7137_v40, %v2324_v39  ;;  %v5026_v36 = vld [vmem:[%s8082_s0 + $0x2d4] sm:$0xf]  ;;  %v5148_v39 = vld [vmem:[%s8082_s0 + $0x6a4] sm:$0xf] }
 0x2d7   :  { %v2026_v45 = vpop.f32.mrf.mxu0 }
 0x2d8   :  { %v3136_v41 = vmax.f32 %v2638_v38, 0.0  ;;  %4858 = vmatmul.msk.bf16.gmra.mxu1 %vm1469_vm2, %v4146_v34  ;;  %4919 = vmatmul.msk.bf16.gmra.mxu3 %vm1469_vm2, %v4634_v35  ;;  %v2938_v42 = vadd.f32 %v2937_v12, %v2325_v58  ;;  %v2027_v44 = vadd.f32 %v7137_v40, %v2026_v45  ;;  %v4159_v38 = vld [vmem:[%s8082_s0 + $0x2d8] sm:$0xf0]  ;;  %v4647_v58 = vld [vmem:[%s8082_s0 + $0x6a8] sm:$0xf0] }
 0x2da   :  { %v3377_v43 = vpack.c.bf16 %v3136_v41, %v3136_v41  ;;  %v3256_v46 = vmax.f32 %v2938_v42, 0.0 }
 0x2db   :  { %v2942_v49 = vpop.f32.mrf.mxu3 }
 0x2dc   :  { %3619 = vst.msk [vmem:[%s8084_s3 + $0x118] sm:$0xf] %vm3548_vm3, %v3377_v43  ;;  %v3497_v52 = vpack.c.bf16 %v3256_v46, %v3256_v46  ;;  %v4650_v46 = vor.u32 %v5148_v39, %v4647_v58 }
 0x2dd   :  { %v2639_v53 = vpop.f32.mrf.mxu1  ;;  %v2326_v55 = vpop.f32.mrf.mxu2 }
 0x2de   :  { %v2640_v54 = vadd.f32 %v2639_v53, %v2027_v44  ;;  %3739 = vst.msk [vmem:[%s8084_s3 + $0x2f8] sm:$0xf] %vm3548_vm3, %v3497_v52  ;;  %v2327_v56 = vadd.f32 %v7137_v40, %v2326_v55  ;;  %v4162_v44 = vor.u32 %v5026_v36, %v4159_v38  ;;  %v4173_v36 = vld [vmem:[%s8082_s0 + $0x2f0] sm:$0xf] }
 0x2df   :  { %v2029_v61 = vpop.f32.mrf.mxu0 }
 0x2e0   :  { %v3137_v60 = vmax.f32 %v2640_v54, 0.0  ;;  %v2940_v63 = vadd.f32 %v2939_v33, %v2327_v56  ;;  %v2030_v4 = vadd.f32 %v7137_v40, %v2029_v61  ;;  %v4158_v33 = vor.u32 %v5027_v26, %v4157_v25 }
 0x2e2   :  { %v3378_v3 = vpack.c.bf16 %v3137_v60, %v3137_v60  ;;  %v3257_v5 = vmax.f32 %v2940_v63, 0.0  ;;  %2368 = vmatmul.bf16.gmra.mxu2 %v4630_v57  ;;  %2068 = vmatmul.bf16.gmra.mxu0 %v4150_v59  ;;  %v4645_v59 = vld [vmem:[%s8082_s0 + $0x6a0] sm:$0xf]  ;;  %v5149_v60 = vld [vmem:[%s8082_s0 + $0x6a4] sm:$0xf0] }
 0x2e3   :  { %v2944_v6 = vpop.f32.mrf.mxu3  ;;  %v5029_v63 = vld [vmem:[%s8082_s0 + $0x2e4] sm:$0xf0] }
 0x2e4   :  { %3620 = vst.msk [vmem:[%s8084_s3 + $0x11c] sm:$0xf] %vm3548_vm3, %v3378_v3  ;;  %v3498_v10 = vpack.c.bf16 %v3257_v5, %v3257_v5  ;;  %v4646_v5 = vor.u32 %v5149_v60, %v4645_v59 }
 0x2e5   :  { %v2642_v11 = vpop.f32.mrf.mxu1  ;;  %v2329_v13 = vpop.f32.mrf.mxu2 }
 0x2e6   :  { %v2643_v12 = vadd.f32 %v2642_v11, %v2030_v4  ;;  %3740 = vst.msk [vmem:[%s8084_s3 + $0x2fc] sm:$0xf] %vm3548_vm3, %v3498_v10  ;;  %v2330_v14 = vadd.f32 %v7137_v40, %v2329_v13  ;;  %v5028_v10 = vld [vmem:[%s8082_s0 + $0x2e4] sm:$0xf]  ;;  %v5150_v13 = vld [vmem:[%s8082_s0 + $0x6b4] sm:$0xf] }
 0x2e7   :  { %v2031_v16 = vpop.f32.mrf.mxu0 }
 0x2e8   :  { %v3138_v15 = vmax.f32 %v2643_v12, 0.0  ;;  %4859 = vmatmul.msk.bf16.gmra.mxu1 %vm1469_vm2, %v4154_v8  ;;  %4920 = vmatmul.msk.bf16.gmra.mxu3 %vm1469_vm2, %v4642_v9  ;;  %v2943_v17 = vadd.f32 %v2942_v49, %v2330_v14  ;;  %v2032_v20 = vadd.f32 %v7137_v40, %v2031_v16  ;;  %v4167_v12 = vld [vmem:[%s8082_s0 + $0x2e8] sm:$0xf0]  ;;  %v4655_v14 = vld [vmem:[%s8082_s0 + $0x6b8] sm:$0xf0] }
 0x2ea   :  { %v3379_v18 = vpack.c.bf16 %v3138_v15, %v3138_v15  ;;  %v3258_v21 = vmax.f32 %v2943_v17, 0.0 }
 0x2eb   :  { %v2947_v24 = vpop.f32.mrf.mxu3 }
 0x2ec   :  { %3621 = vst.msk [vmem:[%s8084_s3 + $0x120] sm:$0xf] %vm3548_vm3, %v3379_v18  ;;  %v3499_v27 = vpack.c.bf16 %v3258_v21, %v3258_v21  ;;  %v4658_v21 = vor.u32 %v5150_v13, %v4655_v14 }
 0x2ed   :  { %v2644_v28 = vpop.f32.mrf.mxu1  ;;  %v2331_v30 = vpop.f32.mrf.mxu2 }
 0x2ee   :  { %v2645_v29 = vadd.f32 %v2644_v28, %v2032_v20  ;;  %3741 = vst.msk [vmem:[%s8084_s3 + $0x300] sm:$0xf] %vm3548_vm3, %v3499_v27  ;;  %v2332_v31 = vadd.f32 %v7137_v40, %v2331_v30  ;;  %v4170_v20 = vor.u32 %v5028_v10, %v4167_v12  ;;  %v4181_v10 = vld [vmem:[%s8082_s0 + $0x300] sm:$0xf] }
 0x2ef   :  { %v2034_v35 = vpop.f32.mrf.mxu0 }
 0x2f0   :  { %v3139_v34 = vmax.f32 %v2645_v29, 0.0  ;;  %v2945_v37 = vadd.f32 %v2944_v6, %v2332_v31  ;;  %v2035_v45 = vadd.f32 %v7137_v40, %v2034_v35  ;;  %v4166_v6 = vor.u32 %v5029_v63, %v4165_v62 }
 0x2f2   :  { %v3380_v41 = vpack.c.bf16 %v3139_v34, %v3139_v34  ;;  %v3259_v42 = vmax.f32 %v2945_v37, 0.0  ;;  %2373 = vmatmul.bf16.gmra.mxu2 %v4638_v32  ;;  %2073 = vmatmul.bf16.gmra.mxu0 %v4158_v33  ;;  %v4653_v33 = vld [vmem:[%s8082_s0 + $0x6b0] sm:$0xf]  ;;  %v5151_v34 = vld [vmem:[%s8082_s0 + $0x6b4] sm:$0xf0] }
 0x2f3   :  { %v2949_v43 = vpop.f32.mrf.mxu3  ;;  %v5031_v37 = vld [vmem:[%s8082_s0 + $0x2f4] sm:$0xf0] }
 0x2f4   :  { %3622 = vst.msk [vmem:[%s8084_s3 + $0x124] sm:$0xf] %vm3548_vm3, %v3380_v41  ;;  %v3500_v47 = vpack.c.bf16 %v3259_v42, %v3259_v42  ;;  %v4654_v42 = vor.u32 %v5151_v34, %v4653_v33 }
 0x2f5   :  { %v2647_v48 = vpop.f32.mrf.mxu1  ;;  %v2334_v50 = vpop.f32.mrf.mxu2 }
 0x2f6   :  { %v2648_v49 = vadd.f32 %v2647_v48, %v2035_v45  ;;  %3742 = vst.msk [vmem:[%s8084_s3 + $0x304] sm:$0xf] %vm3548_vm3, %v3500_v47  ;;  %v2335_v51 = vadd.f32 %v7137_v40, %v2334_v50  ;;  %v5030_v47 = vld [vmem:[%s8082_s0 + $0x2f4] sm:$0xf]  ;;  %v5152_v50 = vld [vmem:[%s8082_s0 + $0x6c4] sm:$0xf] }
 0x2f7   :  { %v2036_v53 = vpop.f32.mrf.mxu0 }
 0x2f8   :  { %v3140_v52 = vmax.f32 %v2648_v49, 0.0  ;;  %4860 = vmatmul.msk.bf16.gmra.mxu1 %vm1469_vm2, %v4162_v44  ;;  %4921 = vmatmul.msk.bf16.gmra.mxu3 %vm1469_vm2, %v4650_v46  ;;  %v2948_v54 = vadd.f32 %v2947_v24, %v2335_v51  ;;  %v2037_v56 = vadd.f32 %v7137_v40, %v2036_v53  ;;  %v4175_v49 = vld [vmem:[%s8082_s0 + $0x2f8] sm:$0xf0]  ;;  %v4663_v51 = vld [vmem:[%s8082_s0 + $0x6c8] sm:$0xf0] }
 0x2fa   :  { %v3381_v55 = vpack.c.bf16 %v3140_v52, %v3140_v52  ;;  %v3260_v57 = vmax.f32 %v2948_v54, 0.0 }
 0x2fb   :  { %v2952_v61 = vpop.f32.mrf.mxu3 }
 0x2fc   :  { %3623 = vst.msk [vmem:[%s8084_s3 + $0x128] sm:$0xf] %vm3548_vm3, %v3381_v55  ;;  %v3501_v0 = vpack.c.bf16 %v3260_v57, %v3260_v57  ;;  %v4666_v57 = vor.u32 %v5152_v50, %v4663_v51 }
 0x2fd   :  { %v2649_v1 = vpop.f32.mrf.mxu1  ;;  %v2336_v3 = vpop.f32.mrf.mxu2 }
 0x2fe   :  { %v2650_v2 = vadd.f32 %v2649_v1, %v2037_v56  ;;  %3743 = vst.msk [vmem:[%s8084_s3 + $0x308] sm:$0xf] %vm3548_vm3, %v3501_v0  ;;  %v2337_v4 = vadd.f32 %v7137_v40, %v2336_v3  ;;  %v4178_v56 = vor.u32 %v5030_v47, %v4175_v49  ;;  %v4189_v47 = vld [vmem:[%s8082_s0 + $0x310] sm:$0xf] }
 0x2ff   :  { %v2039_v9 = vpop.f32.mrf.mxu0 }
 0x300   :  { %v3141_v8 = vmax.f32 %v2650_v2, 0.0  ;;  %v2950_v11 = vadd.f32 %v2949_v43, %v2337_v4  ;;  %v2040_v16 = vadd.f32 %v7137_v40, %v2039_v9  ;;  %v4174_v43 = vor.u32 %v5031_v37, %v4173_v36 }
 0x302   :  { %v3382_v15 = vpack.c.bf16 %v3141_v8, %v3141_v8  ;;  %v3261_v17 = vmax.f32 %v2950_v11, 0.0  ;;  %2378 = vmatmul.bf16.gmra.mxu2 %v4646_v5  ;;  %2078 = vmatmul.bf16.gmra.mxu0 %v4166_v6  ;;  %v4661_v6 = vld [vmem:[%s8082_s0 + $0x6c0] sm:$0xf]  ;;  %v5153_v8 = vld [vmem:[%s8082_s0 + $0x6c4] sm:$0xf0] }
 0x303   :  { %v2954_v18 = vpop.f32.mrf.mxu3  ;;  %v5033_v11 = vld [vmem:[%s8082_s0 + $0x304] sm:$0xf0] }
 0x304   :  { %3624 = vst.msk [vmem:[%s8084_s3 + $0x12c] sm:$0xf] %vm3548_vm3, %v3382_v15  ;;  %v3502_v22 = vpack.c.bf16 %v3261_v17, %v3261_v17  ;;  %v4662_v17 = vor.u32 %v5153_v8, %v4661_v6 }
 0x305   :  { %v2652_v23 = vpop.f32.mrf.mxu1  ;;  %v2339_v25 = vpop.f32.mrf.mxu2 }
 0x306   :  { %v2653_v24 = vadd.f32 %v2652_v23, %v2040_v16  ;;  %3744 = vst.msk [vmem:[%s8084_s3 + $0x30c] sm:$0xf] %vm3548_vm3, %v3502_v22  ;;  %v2340_v26 = vadd.f32 %v7137_v40, %v2339_v25  ;;  %v5032_v22 = vld [vmem:[%s8082_s0 + $0x304] sm:$0xf]  ;;  %v5154_v25 = vld [vmem:[%s8082_s0 + $0x6d4] sm:$0xf] }
 0x307   :  { %v2041_v28 = vpop.f32.mrf.mxu0 }
 0x308   :  { %v3142_v27 = vmax.f32 %v2653_v24, 0.0  ;;  %4861 = vmatmul.msk.bf16.gmra.mxu1 %vm1469_vm2, %v4170_v20  ;;  %4922 = vmatmul.msk.bf16.gmra.mxu3 %vm1469_vm2, %v4658_v21  ;;  %v2953_v29 = vadd.f32 %v2952_v61, %v2340_v26  ;;  %v2042_v31 = vadd.f32 %v7137_v40, %v2041_v28  ;;  %v4183_v24 = vld [vmem:[%s8082_s0 + $0x308] sm:$0xf0]  ;;  %v4671_v26 = vld [vmem:[%s8082_s0 + $0x6d8] sm:$0xf0] }
 0x30a   :  { %v3383_v30 = vpack.c.bf16 %v3142_v27, %v3142_v27  ;;  %v3262_v32 = vmax.f32 %v2953_v29, 0.0 }
 0x30b   :  { %v2957_v35 = vpop.f32.mrf.mxu3 }
 0x30c   :  { %3625 = vst.msk [vmem:[%s8084_s3 + $0x130] sm:$0xf] %vm3548_vm3, %v3383_v30  ;;  %v3503_v38 = vpack.c.bf16 %v3262_v32, %v3262_v32  ;;  %v4674_v32 = vor.u32 %v5154_v25, %v4671_v26 }
 0x30d   :  { %v2654_v39 = vpop.f32.mrf.mxu1  ;;  %v2341_v41 = vpop.f32.mrf.mxu2 }
 0x30e   :  { %v2655_v58 = vadd.f32 %v2654_v39, %v2042_v31  ;;  %3745 = vst.msk [vmem:[%s8084_s3 + $0x310] sm:$0xf] %vm3548_vm3, %v3503_v38  ;;  %v2342_v45 = vadd.f32 %v7137_v40, %v2341_v41  ;;  %v4186_v31 = vor.u32 %v5032_v22, %v4183_v24  ;;  %v4197_v22 = vld [vmem:[%s8082_s0 + $0x320] sm:$0xf] }
 0x30f   :  { %v2044_v46 = vpop.f32.mrf.mxu0 }
 0x310   :  { %v3143_v44 = vmax.f32 %v2655_v58, 0.0  ;;  %v2955_v48 = vadd.f32 %v2954_v18, %v2342_v45  ;;  %v2045_v53 = vadd.f32 %v7137_v40, %v2044_v46  ;;  %v4182_v18 = vor.u32 %v5033_v11, %v4181_v10 }
 0x312   :  { %v3384_v52 = vpack.c.bf16 %v3143_v44, %v3143_v44  ;;  %v3263_v54 = vmax.f32 %v2955_v48, 0.0  ;;  %2383 = vmatmul.bf16.gmra.mxu2 %v4654_v42  ;;  %2083 = vmatmul.bf16.gmra.mxu0 %v4174_v43  ;;  %v4669_v43 = vld [vmem:[%s8082_s0 + $0x6d0] sm:$0xf]  ;;  %v5155_v44 = vld [vmem:[%s8082_s0 + $0x6d4] sm:$0xf0] }
 0x313   :  { %v2959_v55 = vpop.f32.mrf.mxu3  ;;  %v5035_v48 = vld [vmem:[%s8082_s0 + $0x314] sm:$0xf0] }
 0x314   :  { %3626 = vst.msk [vmem:[%s8084_s3 + $0x134] sm:$0xf] %vm3548_vm3, %v3384_v52  ;;  %v3504_v59 = vpack.c.bf16 %v3263_v54, %v3263_v54  ;;  %v4670_v54 = vor.u32 %v5155_v44, %v4669_v43 }
 0x315   :  { %v2657_v60 = vpop.f32.mrf.mxu1  ;;  %v2344_v62 = vpop.f32.mrf.mxu2 }
 0x316   :  { %v2658_v61 = vadd.f32 %v2657_v60, %v2045_v53  ;;  %3746 = vst.msk [vmem:[%s8084_s3 + $0x314] sm:$0xf] %vm3548_vm3, %v3504_v59  ;;  %v2345_v63 = vadd.f32 %v7137_v40, %v2344_v62  ;;  %v5034_v59 = vld [vmem:[%s8082_s0 + $0x314] sm:$0xf]  ;;  %v5156_v62 = vld [vmem:[%s8082_s0 + $0x6e4] sm:$0xf] }
 0x317   :  { %v2046_v1 = vpop.f32.mrf.mxu0 }
 0x318   :  { %v3144_v0 = vmax.f32 %v2658_v61, 0.0  ;;  %4862 = vmatmul.msk.bf16.gmra.mxu1 %vm1469_vm2, %v4178_v56  ;;  %4923 = vmatmul.msk.bf16.gmra.mxu3 %vm1469_vm2, %v4666_v57  ;;  %v2958_v2 = vadd.f32 %v2957_v35, %v2345_v63  ;;  %v2047_v4 = vadd.f32 %v7137_v40, %v2046_v1  ;;  %v4191_v61 = vld [vmem:[%s8082_s0 + $0x318] sm:$0xf0]  ;;  %v4679_v63 = vld [vmem:[%s8082_s0 + $0x6e8] sm:$0xf0] }
 0x31a   :  { %v3385_v3 = vpack.c.bf16 %v3144_v0, %v3144_v0  ;;  %v3264_v5 = vmax.f32 %v2958_v2, 0.0 }
 0x31b   :  { %v2962_v9 = vpop.f32.mrf.mxu3 }
 0x31c   :  { %3627 = vst.msk [vmem:[%s8084_s3 + $0x138] sm:$0xf] %vm3548_vm3, %v3385_v3  ;;  %v3505_v12 = vpack.c.bf16 %v3264_v5, %v3264_v5  ;;  %v4682_v5 = vor.u32 %v5156_v62, %v4679_v63 }
 0x31d   :  { %v2659_v13 = vpop.f32.mrf.mxu1  ;;  %v2346_v15 = vpop.f32.mrf.mxu2 }
 0x31e   :  { %v2660_v14 = vadd.f32 %v2659_v13, %v2047_v4  ;;  %3747 = vst.msk [vmem:[%s8084_s3 + $0x318] sm:$0xf] %vm3548_vm3, %v3505_v12  ;;  %v2347_v16 = vadd.f32 %v7137_v40, %v2346_v15  ;;  %v4194_v4 = vor.u32 %v5034_v59, %v4191_v61  ;;  %v4205_v59 = vld [vmem:[%s8082_s0 + $0x330] sm:$0xf] }
 0x31f   :  { %v2049_v21 = vpop.f32.mrf.mxu0 }
 0x320   :  { %v3145_v20 = vmax.f32 %v2660_v14, 0.0  ;;  %v2960_v23 = vadd.f32 %v2959_v55, %v2347_v16  ;;  %v2050_v28 = vadd.f32 %v7137_v40, %v2049_v21  ;;  %v4190_v55 = vor.u32 %v5035_v48, %v4189_v47 }
 0x322   :  { %v3386_v27 = vpack.c.bf16 %v3145_v20, %v3145_v20  ;;  %v3265_v29 = vmax.f32 %v2960_v23, 0.0  ;;  %2388 = vmatmul.bf16.gmra.mxu2 %v4662_v17  ;;  %2088 = vmatmul.bf16.gmra.mxu0 %v4182_v18  ;;  %v4677_v18 = vld [vmem:[%s8082_s0 + $0x6e0] sm:$0xf]  ;;  %v5157_v20 = vld [vmem:[%s8082_s0 + $0x6e4] sm:$0xf0] }
 0x323   :  { %v2964_v30 = vpop.f32.mrf.mxu3  ;;  %v5037_v23 = vld [vmem:[%s8082_s0 + $0x324] sm:$0xf0] }
 0x324   :  { %3628 = vst.msk [vmem:[%s8084_s3 + $0x13c] sm:$0xf] %vm3548_vm3, %v3386_v27  ;;  %v3506_v33 = vpack.c.bf16 %v3265_v29, %v3265_v29  ;;  %v4678_v29 = vor.u32 %v5157_v20, %v4677_v18 }
 0x325   :  { %v2662_v34 = vpop.f32.mrf.mxu1  ;;  %v2349_v36 = vpop.f32.mrf.mxu2 }
 0x326   :  { %v2663_v35 = vadd.f32 %v2662_v34, %v2050_v28  ;;  %3748 = vst.msk [vmem:[%s8084_s3 + $0x31c] sm:$0xf] %vm3548_vm3, %v3506_v33  ;;  %v2350_v37 = vadd.f32 %v7137_v40, %v2349_v36  ;;  %v5036_v33 = vld [vmem:[%s8082_s0 + $0x324] sm:$0xf]  ;;  %v5158_v36 = vld [vmem:[%s8082_s0 + $0x6f4] sm:$0xf] }
 0x327   :  { %v2051_v39 = vpop.f32.mrf.mxu0 }
 0x328   :  { %v3146_v38 = vmax.f32 %v2663_v35, 0.0  ;;  %4863 = vmatmul.msk.bf16.gmra.mxu1 %vm1469_vm2, %v4186_v31  ;;  %4924 = vmatmul.msk.bf16.gmra.mxu3 %vm1469_vm2, %v4674_v32  ;;  %v2963_v58 = vadd.f32 %v2962_v9, %v2350_v37  ;;  %v2052_v45 = vadd.f32 %v7137_v40, %v2051_v39  ;;  %v4199_v35 = vld [vmem:[%s8082_s0 + $0x328] sm:$0xf0]  ;;  %v4687_v37 = vld [vmem:[%s8082_s0 + $0x6f8] sm:$0xf0] }
 0x32a   :  { %v3387_v41 = vpack.c.bf16 %v3146_v38, %v3146_v38  ;;  %v3266_v42 = vmax.f32 %v2963_v58, 0.0 }
 0x32b   :  { %v2967_v46 = vpop.f32.mrf.mxu3 }
 0x32c   :  { %3629 = vst.msk [vmem:[%s8084_s3 + $0x140] sm:$0xf] %vm3548_vm3, %v3387_v41  ;;  %v3507_v49 = vpack.c.bf16 %v3266_v42, %v3266_v42  ;;  %v4690_v42 = vor.u32 %v5158_v36, %v4687_v37 }
 0x32d   :  { %v2664_v50 = vpop.f32.mrf.mxu1  ;;  %v2351_v52 = vpop.f32.mrf.mxu2 }
 0x32e   :  { %v2665_v51 = vadd.f32 %v2664_v50, %v2052_v45  ;;  %3749 = vst.msk [vmem:[%s8084_s3 + $0x320] sm:$0xf] %vm3548_vm3, %v3507_v49  ;;  %v2352_v53 = vadd.f32 %v7137_v40, %v2351_v52  ;;  %v4202_v45 = vor.u32 %v5036_v33, %v4199_v35  ;;  %v4213_v33 = vld [vmem:[%s8082_s0 + $0x340] sm:$0xf] }
 0x32f   :  { %v2054_v57 = vpop.f32.mrf.mxu0 }
 0x330   :  { %v3147_v56 = vmax.f32 %v2665_v51, 0.0  ;;  %v2965_v60 = vadd.f32 %v2964_v30, %v2352_v53  ;;  %v2055_v1 = vadd.f32 %v7137_v40, %v2054_v57  ;;  %v4198_v30 = vor.u32 %v5037_v23, %v4197_v22 }
 0x332   :  { %v3388_v0 = vpack.c.bf16 %v3147_v56, %v3147_v56  ;;  %v3267_v2 = vmax.f32 %v2965_v60, 0.0  ;;  %2393 = vmatmul.bf16.gmra.mxu2 %v4670_v54  ;;  %2093 = vmatmul.bf16.gmra.mxu0 %v4190_v55  ;;  %v4685_v55 = vld [vmem:[%s8082_s0 + $0x6f0] sm:$0xf]  ;;  %v5159_v56 = vld [vmem:[%s8082_s0 + $0x6f4] sm:$0xf0] }
 0x333   :  { %v2969_v3 = vpop.f32.mrf.mxu3  ;;  %v5039_v60 = vld [vmem:[%s8082_s0 + $0x334] sm:$0xf0] }
 0x334   :  { %3630 = vst.msk [vmem:[%s8084_s3 + $0x144] sm:$0xf] %vm3548_vm3, %v3388_v0  ;;  %v3508_v6 = vpack.c.bf16 %v3267_v2, %v3267_v2  ;;  %v4686_v2 = vor.u32 %v5159_v56, %v4685_v55 }
 0x335   :  { %v2667_v8 = vpop.f32.mrf.mxu1  ;;  %v2354_v10 = vpop.f32.mrf.mxu2 }
 0x336   :  { %v2668_v9 = vadd.f32 %v2667_v8, %v2055_v1  ;;  %3750 = vst.msk [vmem:[%s8084_s3 + $0x324] sm:$0xf] %vm3548_vm3, %v3508_v6  ;;  %v2355_v11 = vadd.f32 %v7137_v40, %v2354_v10  ;;  %v5038_v6 = vld [vmem:[%s8082_s0 + $0x334] sm:$0xf]  ;;  %v5160_v10 = vld [vmem:[%s8082_s0 + $0x704] sm:$0xf] }
 0x337   :  { %v2056_v13 = vpop.f32.mrf.mxu0 }
 0x338   :  { %v3148_v12 = vmax.f32 %v2668_v9, 0.0  ;;  %4864 = vmatmul.msk.bf16.gmra.mxu1 %vm1469_vm2, %v4194_v4  ;;  %4925 = vmatmul.msk.bf16.gmra.mxu3 %vm1469_vm2, %v4682_v5  ;;  %v2968_v14 = vadd.f32 %v2967_v46, %v2355_v11  ;;  %v2057_v16 = vadd.f32 %v7137_v40, %v2056_v13  ;;  %v4207_v9 = vld [vmem:[%s8082_s0 + $0x338] sm:$0xf0]  ;;  %v4695_v11 = vld [vmem:[%s8082_s0 + $0x708] sm:$0xf0] }
 0x33a   :  { %v3389_v15 = vpack.c.bf16 %v3148_v12, %v3148_v12  ;;  %v3268_v17 = vmax.f32 %v2968_v14, 0.0 }
 0x33b   :  { %v2972_v21 = vpop.f32.mrf.mxu3 }
 0x33c   :  { %3631 = vst.msk [vmem:[%s8084_s3 + $0x148] sm:$0xf] %vm3548_vm3, %v3389_v15  ;;  %v3509_v24 = vpack.c.bf16 %v3268_v17, %v3268_v17  ;;  %v4698_v17 = vor.u32 %v5160_v10, %v4695_v11 }
 0x33d   :  { %v2669_v25 = vpop.f32.mrf.mxu1  ;;  %v2356_v27 = vpop.f32.mrf.mxu2 }
 0x33e   :  { %v2670_v26 = vadd.f32 %v2669_v25, %v2057_v16  ;;  %3751 = vst.msk [vmem:[%s8084_s3 + $0x328] sm:$0xf] %vm3548_vm3, %v3509_v24  ;;  %v2357_v28 = vadd.f32 %v7137_v40, %v2356_v27  ;;  %v4210_v16 = vor.u32 %v5038_v6, %v4207_v9  ;;  %v4221_v6 = vld [vmem:[%s8082_s0 + $0x350] sm:$0xf] }
 0x33f   :  { %v2059_v32 = vpop.f32.mrf.mxu0 }
 0x340   :  { %v3149_v31 = vmax.f32 %v2670_v26, 0.0  ;;  %v2970_v34 = vadd.f32 %v2969_v3, %v2357_v28  ;;  %v2060_v39 = vadd.f32 %v7137_v40, %v2059_v32  ;;  %v4206_v3 = vor.u32 %v5039_v60, %v4205_v59 }
 0x342   :  { %v3390_v38 = vpack.c.bf16 %v3149_v31, %v3149_v31  ;;  %v3269_v58 = vmax.f32 %v2970_v34, 0.0  ;;  %2398 = vmatmul.bf16.gmra.mxu2 %v4678_v29  ;;  %2098 = vmatmul.bf16.gmra.mxu0 %v4198_v30  ;;  %v4693_v30 = vld [vmem:[%s8082_s0 + $0x700] sm:$0xf]  ;;  %v5161_v31 = vld [vmem:[%s8082_s0 + $0x704] sm:$0xf0] }
 0x343   :  { %v2974_v41 = vpop.f32.mrf.mxu3  ;;  %v5041_v34 = vld [vmem:[%s8082_s0 + $0x344] sm:$0xf0] }
 0x344   :  { %3632 = vst.msk [vmem:[%s8084_s3 + $0x14c] sm:$0xf] %vm3548_vm3, %v3390_v38  ;;  %v3510_v43 = vpack.c.bf16 %v3269_v58, %v3269_v58  ;;  %v4694_v58 = vor.u32 %v5161_v31, %v4693_v30 }
 0x345   :  { %v2672_v44 = vpop.f32.mrf.mxu1  ;;  %v2359_v47 = vpop.f32.mrf.mxu2 }
 0x346   :  { %v2673_v46 = vadd.f32 %v2672_v44, %v2060_v39  ;;  %3752 = vst.msk [vmem:[%s8084_s3 + $0x32c] sm:$0xf] %vm3548_vm3, %v3510_v43  ;;  %v2360_v48 = vadd.f32 %v7137_v40, %v2359_v47  ;;  %v5040_v43 = vld [vmem:[%s8082_s0 + $0x344] sm:$0xf]  ;;  %v5162_v47 = vld [vmem:[%s8082_s0 + $0x714] sm:$0xf] }
 0x347   :  { %v2061_v50 = vpop.f32.mrf.mxu0 }
 0x348   :  { %v3150_v49 = vmax.f32 %v2673_v46, 0.0  ;;  %4865 = vmatmul.msk.bf16.gmra.mxu1 %vm1469_vm2, %v4202_v45  ;;  %4926 = vmatmul.msk.bf16.gmra.mxu3 %vm1469_vm2, %v4690_v42  ;;  %v2973_v51 = vadd.f32 %v2972_v21, %v2360_v48  ;;  %v2062_v53 = vadd.f32 %v7137_v40, %v2061_v50  ;;  %v4215_v46 = vld [vmem:[%s8082_s0 + $0x348] sm:$0xf0]  ;;  %v4703_v48 = vld [vmem:[%s8082_s0 + $0x718] sm:$0xf0] }
 0x34a   :  { %v3391_v52 = vpack.c.bf16 %v3150_v49, %v3150_v49  ;;  %v3270_v54 = vmax.f32 %v2973_v51, 0.0 }
 0x34b   :  { %v2977_v57 = vpop.f32.mrf.mxu3 }
 0x34c   :  { %3633 = vst.msk [vmem:[%s8084_s3 + $0x150] sm:$0xf] %vm3548_vm3, %v3391_v52  ;;  %v3511_v61 = vpack.c.bf16 %v3270_v54, %v3270_v54  ;;  %v4706_v54 = vor.u32 %v5162_v47, %v4703_v48 }
 0x34d   :  { %v2674_v62 = vpop.f32.mrf.mxu1  ;;  %v2361_v0 = vpop.f32.mrf.mxu2 }
 0x34e   :  { %v2675_v63 = vadd.f32 %v2674_v62, %v2062_v53  ;;  %3753 = vst.msk [vmem:[%s8084_s3 + $0x330] sm:$0xf] %vm3548_vm3, %v3511_v61  ;;  %v2362_v1 = vadd.f32 %v7137_v40, %v2361_v0  ;;  %v4218_v53 = vor.u32 %v5040_v43, %v4215_v46  ;;  %v4229_v43 = vld [vmem:[%s8082_s0 + $0x360] sm:$0xf] }
 0x34f   :  { %v2064_v5 = vpop.f32.mrf.mxu0 }
 0x350   :  { %v3151_v4 = vmax.f32 %v2675_v63, 0.0  ;;  %v2975_v8 = vadd.f32 %v2974_v41, %v2362_v1  ;;  %v2065_v13 = vadd.f32 %v7137_v40, %v2064_v5  ;;  %v4214_v41 = vor.u32 %v5041_v34, %v4213_v33 }
 0x352   :  { %v3392_v12 = vpack.c.bf16 %v3151_v4, %v3151_v4  ;;  %v3271_v14 = vmax.f32 %v2975_v8, 0.0  ;;  %2403 = vmatmul.bf16.gmra.mxu2 %v4686_v2  ;;  %2103 = vmatmul.bf16.gmra.mxu0 %v4206_v3  ;;  %v4701_v3 = vld [vmem:[%s8082_s0 + $0x710] sm:$0xf]  ;;  %v5163_v4 = vld [vmem:[%s8082_s0 + $0x714] sm:$0xf0] }
 0x353   :  { %v2979_v15 = vpop.f32.mrf.mxu3  ;;  %v5043_v8 = vld [vmem:[%s8082_s0 + $0x354] sm:$0xf0] }
 0x354   :  { %3634 = vst.msk [vmem:[%s8084_s3 + $0x154] sm:$0xf] %vm3548_vm3, %v3392_v12  ;;  %v3512_v18 = vpack.c.bf16 %v3271_v14, %v3271_v14  ;;  %v4702_v14 = vor.u32 %v5163_v4, %v4701_v3 }
 0x355   :  { %v2677_v20 = vpop.f32.mrf.mxu1  ;;  %v2364_v22 = vpop.f32.mrf.mxu2 }
 0x356   :  { %v2678_v21 = vadd.f32 %v2677_v20, %v2065_v13  ;;  %3754 = vst.msk [vmem:[%s8084_s3 + $0x334] sm:$0xf] %vm3548_vm3, %v3512_v18  ;;  %v2365_v23 = vadd.f32 %v7137_v40, %v2364_v22  ;;  %v5042_v18 = vld [vmem:[%s8082_s0 + $0x354] sm:$0xf]  ;;  %v5164_v22 = vld [vmem:[%s8082_s0 + $0x724] sm:$0xf] }
 0x357   :  { %v2066_v25 = vpop.f32.mrf.mxu0 }
 0x358   :  { %v3152_v24 = vmax.f32 %v2678_v21, 0.0  ;;  %4866 = vmatmul.msk.bf16.gmra.mxu1 %vm1469_vm2, %v4210_v16  ;;  %4927 = vmatmul.msk.bf16.gmra.mxu3 %vm1469_vm2, %v4698_v17  ;;  %v2978_v26 = vadd.f32 %v2977_v57, %v2365_v23  ;;  %v2067_v28 = vadd.f32 %v7137_v40, %v2066_v25  ;;  %v4223_v21 = vld [vmem:[%s8082_s0 + $0x358] sm:$0xf0]  ;;  %v4711_v23 = vld [vmem:[%s8082_s0 + $0x728] sm:$0xf0] }
 0x35a   :  { %v3393_v27 = vpack.c.bf16 %v3152_v24, %v3152_v24  ;;  %v3272_v29 = vmax.f32 %v2978_v26, 0.0 }
 0x35b   :  { %v2982_v32 = vpop.f32.mrf.mxu3 }
 0x35c   :  { %3635 = vst.msk [vmem:[%s8084_s3 + $0x158] sm:$0xf] %vm3548_vm3, %v3393_v27  ;;  %v3513_v35 = vpack.c.bf16 %v3272_v29, %v3272_v29  ;;  %v4714_v29 = vor.u32 %v5164_v22, %v4711_v23 }
 0x35d   :  { %v2679_v36 = vpop.f32.mrf.mxu1  ;;  %v2366_v38 = vpop.f32.mrf.mxu2 }
 0x35e   :  { %v2680_v37 = vadd.f32 %v2679_v36, %v2067_v28  ;;  %3755 = vst.msk [vmem:[%s8084_s3 + $0x338] sm:$0xf] %vm3548_vm3, %v3513_v35  ;;  %v2367_v39 = vadd.f32 %v7137_v40, %v2366_v38  ;;  %v4226_v28 = vor.u32 %v5042_v18, %v4223_v21  ;;  %v4237_v18 = vld [vmem:[%s8082_s0 + $0x370] sm:$0xf] }
 0x35f   :  { %v2069_v42 = vpop.f32.mrf.mxu0 }
 0x360   :  { %v3153_v45 = vmax.f32 %v2680_v37, 0.0  ;;  %v2980_v44 = vadd.f32 %v2979_v15, %v2367_v39  ;;  %v2070_v50 = vadd.f32 %v7137_v40, %v2069_v42  ;;  %v4222_v15 = vor.u32 %v5043_v8, %v4221_v6 }
 0x362   :  { %v3394_v49 = vpack.c.bf16 %v3153_v45, %v3153_v45  ;;  %v3273_v51 = vmax.f32 %v2980_v44, 0.0  ;;  %2408 = vmatmul.bf16.gmra.mxu2 %v4694_v58  ;;  %2108 = vmatmul.bf16.gmra.mxu0 %v4214_v41  ;;  %v4709_v41 = vld [vmem:[%s8082_s0 + $0x720] sm:$0xf]  ;;  %v5165_v45 = vld [vmem:[%s8082_s0 + $0x724] sm:$0xf0] }
 0x363   :  { %v2984_v52 = vpop.f32.mrf.mxu3  ;;  %v5045_v44 = vld [vmem:[%s8082_s0 + $0x364] sm:$0xf0] }
 0x364   :  { %3636 = vst.msk [vmem:[%s8084_s3 + $0x15c] sm:$0xf] %vm3548_vm3, %v3394_v49  ;;  %v3514_v55 = vpack.c.bf16 %v3273_v51, %v3273_v51  ;;  %v4710_v51 = vor.u32 %v5165_v45, %v4709_v41 }
 0x365   :  { %v2682_v56 = vpop.f32.mrf.mxu1  ;;  %v2369_v59 = vpop.f32.mrf.mxu2 }
 0x366   :  { %v2683_v57 = vadd.f32 %v2682_v56, %v2070_v50  ;;  %3756 = vst.msk [vmem:[%s8084_s3 + $0x33c] sm:$0xf] %vm3548_vm3, %v3514_v55  ;;  %v2370_v60 = vadd.f32 %v7137_v40, %v2369_v59  ;;  %v5044_v55 = vld [vmem:[%s8082_s0 + $0x364] sm:$0xf]  ;;  %v5166_v59 = vld [vmem:[%s8082_s0 + $0x734] sm:$0xf] }
 0x367   :  { %v2071_v62 = vpop.f32.mrf.mxu0 }
 0x368   :  { %v3154_v61 = vmax.f32 %v2683_v57, 0.0  ;;  %4867 = vmatmul.msk.bf16.gmra.mxu1 %vm1469_vm2, %v4218_v53  ;;  %4928 = vmatmul.msk.bf16.gmra.mxu3 %vm1469_vm2, %v4706_v54  ;;  %v2983_v63 = vadd.f32 %v2982_v32, %v2370_v60  ;;  %v2072_v1 = vadd.f32 %v7137_v40, %v2071_v62  ;;  %v4231_v57 = vld [vmem:[%s8082_s0 + $0x368] sm:$0xf0]  ;;  %v4719_v60 = vld [vmem:[%s8082_s0 + $0x738] sm:$0xf0] }
 0x36a   :  { %v3395_v0 = vpack.c.bf16 %v3154_v61, %v3154_v61  ;;  %v3274_v2 = vmax.f32 %v2983_v63, 0.0 }
 0x36b   :  { %v2987_v5 = vpop.f32.mrf.mxu3 }
 0x36c   :  { %3637 = vst.msk [vmem:[%s8084_s3 + $0x160] sm:$0xf] %vm3548_vm3, %v3395_v0  ;;  %v3515_v9 = vpack.c.bf16 %v3274_v2, %v3274_v2  ;;  %v4722_v2 = vor.u32 %v5166_v59, %v4719_v60 }
 0x36d   :  { %v2684_v10 = vpop.f32.mrf.mxu1  ;;  %v2371_v12 = vpop.f32.mrf.mxu2 }
 0x36e   :  { %v2685_v11 = vadd.f32 %v2684_v10, %v2072_v1  ;;  %3757 = vst.msk [vmem:[%s8084_s3 + $0x340] sm:$0xf] %vm3548_vm3, %v3515_v9  ;;  %v2372_v13 = vadd.f32 %v7137_v40, %v2371_v12  ;;  %v4234_v1 = vor.u32 %v5044_v55, %v4231_v57  ;;  %v4245_v55 = vld [vmem:[%s8082_s0 + $0x380] sm:$0xf] }
 0x36f   :  { %v2074_v17 = vpop.f32.mrf.mxu0 }
 0x370   :  { %v3155_v16 = vmax.f32 %v2685_v11, 0.0  ;;  %v2985_v20 = vadd.f32 %v2984_v52, %v2372_v13  ;;  %v2075_v25 = vadd.f32 %v7137_v40, %v2074_v17  ;;  %v4230_v52 = vor.u32 %v5045_v44, %v4229_v43 }
 0x372   :  { %v3396_v24 = vpack.c.bf16 %v3155_v16, %v3155_v16  ;;  %v3275_v26 = vmax.f32 %v2985_v20, 0.0  ;;  %2413 = vmatmul.bf16.gmra.mxu2 %v4702_v14  ;;  %2113 = vmatmul.bf16.gmra.mxu0 %v4222_v15  ;;  %v4717_v15 = vld [vmem:[%s8082_s0 + $0x730] sm:$0xf]  ;;  %v5167_v16 = vld [vmem:[%s8082_s0 + $0x734] sm:$0xf0] }
 0x373   :  { %v2989_v27 = vpop.f32.mrf.mxu3  ;;  %v5047_v20 = vld [vmem:[%s8082_s0 + $0x374] sm:$0xf0] }
 0x374   :  { %3638 = vst.msk [vmem:[%s8084_s3 + $0x164] sm:$0xf] %vm3548_vm3, %v3396_v24  ;;  %v3516_v30 = vpack.c.bf16 %v3275_v26, %v3275_v26  ;;  %v4718_v26 = vor.u32 %v5167_v16, %v4717_v15 }
 0x375   :  { %v2687_v31 = vpop.f32.mrf.mxu1  ;;  %v2374_v33 = vpop.f32.mrf.mxu2 }
 0x376   :  { %v2688_v32 = vadd.f32 %v2687_v31, %v2075_v25  ;;  %3758 = vst.msk [vmem:[%s8084_s3 + $0x344] sm:$0xf] %vm3548_vm3, %v3516_v30  ;;  %v2375_v34 = vadd.f32 %v7137_v40, %v2374_v33  ;;  %v5046_v30 = vld [vmem:[%s8082_s0 + $0x374] sm:$0xf]  ;;  %v5168_v33 = vld [vmem:[%s8082_s0 + $0x744] sm:$0xf] }
 0x377   :  { %v2076_v36 = vpop.f32.mrf.mxu0 }
 0x378   :  { %v3156_v35 = vmax.f32 %v2688_v32, 0.0  ;;  %4868 = vmatmul.msk.bf16.gmra.mxu1 %vm1469_vm2, %v4226_v28  ;;  %4929 = vmatmul.msk.bf16.gmra.mxu3 %vm1469_vm2, %v4714_v29  ;;  %v2988_v37 = vadd.f32 %v2987_v5, %v2375_v34  ;;  %v2077_v39 = vadd.f32 %v7137_v40, %v2076_v36  ;;  %v4239_v32 = vld [vmem:[%s8082_s0 + $0x378] sm:$0xf0] }
 0x37a   :  { %v3397_v38 = vpack.c.bf16 %v3156_v35, %v3156_v35  ;;  %v3276_v58 = vmax.f32 %v2988_v37, 0.0  ;;  %v7685_v35 = vld [vmem:[%s8083_s2] ss:$0 sm:$0xff] }
 0x37b   :  { %v2992_v42 = vpop.f32.mrf.mxu3 }
 0x37c   :  { %3639 = vst.msk [vmem:[%s8084_s3 + $0x168] sm:$0xf] %vm3548_vm3, %v3397_v38  ;;  %v3517_v46 = vpack.c.bf16 %v3276_v58, %v3276_v58 }
 0x37d   :  { %v2689_v47 = vpop.f32.mrf.mxu1  ;;  %v2376_v49 = vpop.f32.mrf.mxu2 }
 0x37e   :  { %v2690_v48 = vadd.f32 %v2689_v47, %v2077_v39  ;;  %3759 = vst.msk [vmem:[%s8084_s3 + $0x348] sm:$0xf] %vm3548_vm3, %v3517_v46  ;;  %v2377_v50 = vadd.f32 %v7137_v40, %v2376_v49  ;;  %v4242_v39 = vor.u32 %v5046_v30, %v4239_v32  ;;  %v4253_v30 = vld [vmem:[%s8082_s0 + $0x390] sm:$0xf] }
 0x37f   :  { %v2079_v54 = vpop.f32.mrf.mxu0 }
 0x380   :  { %v3157_v53 = vmax.f32 %v2690_v48, 0.0  ;;  %v2990_v56 = vadd.f32 %v2989_v27, %v2377_v50  ;;  %v2080_v62 = vadd.f32 %v7137_v40, %v2079_v54  ;;  %v4238_v27 = vor.u32 %v5047_v20, %v4237_v18 }
 0x382   :  { %v3398_v61 = vpack.c.bf16 %v3157_v53, %v3157_v53  ;;  %v3277_v63 = vmax.f32 %v2990_v56, 0.0  ;;  %2418 = vmatmul.bf16.gmra.mxu2 %v4710_v51  ;;  %2118 = vmatmul.bf16.gmra.mxu0 %v4230_v52  ;;  %v4725_v52 = vld [vmem:[%s8082_s0 + $0x740] sm:$0xf]  ;;  %v5169_v53 = vld [vmem:[%s8082_s0 + $0x744] sm:$0xf0] }
 0x383   :  { %v2994_v0 = vpop.f32.mrf.mxu3  ;;  %v5049_v56 = vld [vmem:[%s8082_s0 + $0x384] sm:$0xf0] }
 0x384   :  { %3640 = vst.msk [vmem:[%s8084_s3 + $0x16c] sm:$0xf] %vm3548_vm3, %v3398_v61  ;;  %v3518_v3 = vpack.c.bf16 %v3277_v63, %v3277_v63  ;;  %v4726_v63 = vor.u32 %v5169_v53, %v4725_v52 }
 0x385   :  { %v2692_v4 = vpop.f32.mrf.mxu1  ;;  %v2379_v6 = vpop.f32.mrf.mxu2 }
 0x386   :  { %v2693_v5 = vadd.f32 %v2692_v4, %v2080_v62  ;;  %3760 = vst.msk [vmem:[%s8084_s3 + $0x34c] sm:$0xf] %vm3548_vm3, %v3518_v3  ;;  %v2380_v8 = vadd.f32 %v7137_v40, %v2379_v6  ;;  %v5048_v3 = vld [vmem:[%s8082_s0 + $0x384] sm:$0xf]  ;;  %v5170_v6 = vld [vmem:[%s8082_s0 + $0x754] sm:$0xf] }
 0x387   :  { %v2081_v10 = vpop.f32.mrf.mxu0 }
 0x388   :  { %v3158_v9 = vmax.f32 %v2693_v5, 0.0  ;;  %4869 = vmatmul.msk.bf16.gmra.mxu1 %vm1469_vm2, %v4234_v1  ;;  %4930 = vmatmul.msk.bf16.gmra.mxu3 %vm1469_vm2, %v4722_v2  ;;  %v2993_v11 = vadd.f32 %v2992_v42, %v2380_v8  ;;  %v2082_v13 = vadd.f32 %v7137_v40, %v2081_v10  ;;  %v4247_v5 = vld [vmem:[%s8082_s0 + $0x388] sm:$0xf0]  ;;  %v4735_v8 = vld [vmem:[%s8082_s0 + $0x758] sm:$0xf0] }
 0x38a   :  { %v3399_v12 = vpack.c.bf16 %v3158_v9, %v3158_v9  ;;  %v3278_v14 = vmax.f32 %v2993_v11, 0.0 }
 0x38b   :  { %v2997_v17 = vpop.f32.mrf.mxu3 }
 0x38c   :  { %3641 = vst.msk [vmem:[%s8084_s3 + $0x170] sm:$0xf] %vm3548_vm3, %v3399_v12  ;;  %v3519_v21 = vpack.c.bf16 %v3278_v14, %v3278_v14  ;;  %v4738_v14 = vor.u32 %v5170_v6, %v4735_v8 }
 0x38d   :  { %v2694_v22 = vpop.f32.mrf.mxu1  ;;  %v2381_v24 = vpop.f32.mrf.mxu2 }
 0x38e   :  { %v2695_v23 = vadd.f32 %v2694_v22, %v2082_v13  ;;  %3761 = vst.msk [vmem:[%s8084_s3 + $0x350] sm:$0xf] %vm3548_vm3, %v3519_v21  ;;  %v2382_v25 = vadd.f32 %v7137_v40, %v2381_v24  ;;  %v4727_v40 = vld [vmem:[%s8082_s0 + $0x748] sm:$0xf0]  ;;  %v4250_v13 = vor.u32 %v5048_v3, %v4247_v5  ;;  %v4261_v3 = vld [vmem:[%s8082_s0 + $0x3a0] sm:$0xf] }
 0x38f   :  { %v2084_v29 = vpop.f32.mrf.mxu0  ;;  %v4730_v58 = vor.u32 %v5168_v33, %v4727_v40 }
 0x390   :  { %v3159_v28 = vmax.f32 %v2695_v23, 0.0  ;;  %v2995_v31 = vadd.f32 %v2994_v0, %v2382_v25  ;;  %v2085_v36 = vadd.f32 %v7685_v35, %v2084_v29  ;;  %v4246_v0 = vor.u32 %v5049_v56, %v4245_v55 }
 0x392   :  { %v3400_v34 = vpack.c.bf16 %v3159_v28, %v3159_v28  ;;  %v3279_v37 = vmax.f32 %v2995_v31, 0.0  ;;  %2423 = vmatmul.bf16.gmra.mxu2 %v4718_v26  ;;  %2123 = vmatmul.bf16.gmra.mxu0 %v4238_v27  ;;  %v4733_v27 = vld [vmem:[%s8082_s0 + $0x750] sm:$0xf]  ;;  %v5171_v28 = vld [vmem:[%s8082_s0 + $0x754] sm:$0xf0] }
 0x393   :  { %v2999_v38 = vpop.f32.mrf.mxu3  ;;  %v5051_v31 = vld [vmem:[%s8082_s0 + $0x394] sm:$0xf0] }
 0x394   :  { %3642 = vst.msk [vmem:[%s8084_s3 + $0x174] sm:$0xf] %vm3548_vm3, %v3400_v34  ;;  %v3520_v41 = vpack.c.bf16 %v3279_v37, %v3279_v37  ;;  %v4734_v37 = vor.u32 %v5171_v28, %v4733_v27 }
 0x395   :  { %v2697_v45 = vpop.f32.mrf.mxu1  ;;  %v2384_v43 = vpop.f32.mrf.mxu2 }
 0x396   :  { %v2698_v42 = vadd.f32 %v2697_v45, %v2085_v36  ;;  %3762 = vst.msk [vmem:[%s8084_s3 + $0x354] sm:$0xf] %vm3548_vm3, %v3520_v41  ;;  %v2385_v44 = vadd.f32 %v7685_v35, %v2384_v43  ;;  %v5050_v41 = vld [vmem:[%s8082_s0 + $0x394] sm:$0xf]  ;;  %v5172_v43 = vld [vmem:[%s8082_s0 + $0x764] sm:$0xf] }
 0x397   :  { %v2086_v47 = vpop.f32.mrf.mxu0 }
 0x398   :  { %v3160_v46 = vmax.f32 %v2698_v42, 0.0  ;;  %4870 = vmatmul.msk.bf16.gmra.mxu1 %vm1469_vm2, %v4242_v39  ;;  %4931 = vmatmul.msk.bf16.gmra.mxu3 %vm1469_vm2, %v4730_v58  ;;  %v2998_v48 = vadd.f32 %v2997_v17, %v2385_v44  ;;  %v2087_v50 = vadd.f32 %v7685_v35, %v2086_v47  ;;  %v4255_v42 = vld [vmem:[%s8082_s0 + $0x398] sm:$0xf0]  ;;  %v4743_v44 = vld [vmem:[%s8082_s0 + $0x768] sm:$0xf0] }
 0x39a   :  { %v3401_v49 = vpack.c.bf16 %v3160_v46, %v3160_v46  ;;  %v3280_v51 = vmax.f32 %v2998_v48, 0.0 }
 0x39b   :  { %v3002_v54 = vpop.f32.mrf.mxu3 }
 0x39c   :  { %3643 = vst.msk [vmem:[%s8084_s3 + $0x178] sm:$0xf] %vm3548_vm3, %v3401_v49  ;;  %v3521_v57 = vpack.c.bf16 %v3280_v51, %v3280_v51  ;;  %v4746_v51 = vor.u32 %v5172_v43, %v4743_v44  ;;  %v254_v44 = vld [vmem:[%s8082_s0 + $0x780] sm:$0x11] }
 0x39d   :  { %v2699_v59 = vpop.f32.mrf.mxu1  ;;  %v2386_v61 = vpop.f32.mrf.mxu2 }
 0x39e   :  { %v2700_v60 = vadd.f32 %v2699_v59, %v2087_v50  ;;  %3763 = vst.msk [vmem:[%s8084_s3 + $0x358] sm:$0xf] %vm3548_vm3, %v3521_v57  ;;  %v2387_v62 = vadd.f32 %v7685_v35, %v2386_v61  ;;  %v4258_v50 = vor.u32 %v5050_v41, %v4255_v42  ;;  %v4269_v41 = vld [vmem:[%s8082_s0 + $0x3b0] sm:$0xf] }
 0x39f   :  { %v2089_v2 = vpop.f32.mrf.mxu0 }
 0x3a0   :  { %v3161_v1 = vmax.f32 %v2700_v60, 0.0  ;;  %v3000_v4 = vadd.f32 %v2999_v38, %v2387_v62  ;;  %v2090_v10 = vadd.f32 %v7685_v35, %v2089_v2  ;;  %v4254_v38 = vor.u32 %v5051_v31, %v4253_v30 }
 0x3a2   :  { %v3402_v9 = vpack.c.bf16 %v3161_v1, %v3161_v1  ;;  %v3281_v11 = vmax.f32 %v3000_v4, 0.0  ;;  %2428 = vmatmul.bf16.gmra.mxu2 %v4726_v63  ;;  %2128 = vmatmul.bf16.gmra.mxu0 %v4246_v0  ;;  %v4741_v0 = vld [vmem:[%s8082_s0 + $0x760] sm:$0xf]  ;;  %v5173_v1 = vld [vmem:[%s8082_s0 + $0x764] sm:$0xf0] }
 0x3a3   :  { %v3004_v12 = vpop.f32.mrf.mxu3  ;;  %v5053_v4 = vld [vmem:[%s8082_s0 + $0x3a4] sm:$0xf0] }
 0x3a4   :  { %3644 = vst.msk [vmem:[%s8084_s3 + $0x17c] sm:$0xf] %vm3548_vm3, %v3402_v9  ;;  %v3522_v15 = vpack.c.bf16 %v3281_v11, %v3281_v11  ;;  %v4742_v11 = vor.u32 %v5173_v1, %v4741_v0 }
 0x3a5   :  { %v2702_v16 = vpop.f32.mrf.mxu1  ;;  %v2389_v18 = vpop.f32.mrf.mxu2 }
 0x3a6   :  { %v2703_v17 = vadd.f32 %v2702_v16, %v2090_v10  ;;  %3764 = vst.msk [vmem:[%s8084_s3 + $0x35c] sm:$0xf] %vm3548_vm3, %v3522_v15  ;;  %v2390_v20 = vadd.f32 %v7685_v35, %v2389_v18  ;;  %v5052_v15 = vld [vmem:[%s8082_s0 + $0x3a4] sm:$0xf]  ;;  %v5174_v18 = vld [vmem:[%s8082_s0 + $0x774] sm:$0xf] }
 0x3a7   :  { %v2091_v22 = vpop.f32.mrf.mxu0 }
 0x3a8   :  { %v3162_v21 = vmax.f32 %v2703_v17, 0.0  ;;  %4871 = vmatmul.msk.bf16.gmra.mxu1 %vm1469_vm2, %v4250_v13  ;;  %4932 = vmatmul.msk.bf16.gmra.mxu3 %vm1469_vm2, %v4738_v14  ;;  %v3003_v23 = vadd.f32 %v3002_v54, %v2390_v20  ;;  %v2092_v25 = vadd.f32 %v7685_v35, %v2091_v22  ;;  %v4263_v17 = vld [vmem:[%s8082_s0 + $0x3a8] sm:$0xf0]  ;;  %v4751_v20 = vld [vmem:[%s8082_s0 + $0x778] sm:$0xf0] }
 0x3aa   :  { %v3403_v24 = vpack.c.bf16 %v3162_v21, %v3162_v21  ;;  %v3282_v26 = vmax.f32 %v3003_v23, 0.0 }
 0x3ab   :  { %v3007_v29 = vpop.f32.mrf.mxu3 }
 0x3ac   :  { %3645 = vst.msk [vmem:[%s8084_s3 + $0x180] sm:$0xf] %vm3548_vm3, %v3403_v24  ;;  %v3523_v32 = vpack.c.bf16 %v3282_v26, %v3282_v26  ;;  %v4754_v26 = vor.u32 %v5174_v18, %v4751_v20 }
 0x3ad   :  { %v2704_v33 = vpop.f32.mrf.mxu1  ;;  %v2391_v34 = vpop.f32.mrf.mxu2 }
 0x3ae   :  { %v2705_v40 = vadd.f32 %v2704_v33, %v2092_v25  ;;  %3765 = vst.msk [vmem:[%s8084_s3 + $0x360] sm:$0xf] %vm3548_vm3, %v3523_v32  ;;  %v2392_v36 = vadd.f32 %v7685_v35, %v2391_v34  ;;  %v4266_v25 = vor.u32 %v5052_v15, %v4263_v17 }
 0x3af   :  { %v2094_v58 = vpop.f32.mrf.mxu0 }
 0x3b0   :  { %v3163_v39 = vmax.f32 %v2705_v40, 0.0  ;;  %v3005_v45 = vadd.f32 %v3004_v12, %v2392_v36  ;;  %v2095_v47 = vadd.f32 %v7685_v35, %v2094_v58  ;;  %v4262_v12 = vor.u32 %v5053_v4, %v4261_v3 }
 0x3b2   :  { %v3404_v46 = vpack.c.bf16 %v3163_v39, %v3163_v39  ;;  %v3283_v48 = vmax.f32 %v3005_v45, 0.0  ;;  %2433 = vmatmul.bf16.gmra.mxu2 %v4734_v37  ;;  %2133 = vmatmul.bf16.gmra.mxu0 %v4254_v38  ;;  %v4749_v38 = vld [vmem:[%s8082_s0 + $0x770] sm:$0xf]  ;;  %v5175_v39 = vld [vmem:[%s8082_s0 + $0x774] sm:$0xf0] }
 0x3b3   :  { %v3009_v49 = vpop.f32.mrf.mxu3  ;;  %v5055_v45 = vld [vmem:[%s8082_s0 + $0x3b4] sm:$0xf0] }
 0x3b4   :  { %3646 = vst.msk [vmem:[%s8084_s3 + $0x184] sm:$0xf] %vm3548_vm3, %v3404_v46  ;;  %v3524_v52 = vpack.c.bf16 %v3283_v48, %v3283_v48 }
 0x3b5   :  { %v2707_v53 = vpop.f32.mrf.mxu1  ;;  %v2394_v55 = vpop.f32.mrf.mxu2 }
 0x3b6   :  { %v2708_v54 = vadd.f32 %v2707_v53, %v2095_v47  ;;  %3766 = vst.msk [vmem:[%s8084_s3 + $0x364] sm:$0xf] %vm3548_vm3, %v3524_v52  ;;  %v2395_v56 = vadd.f32 %v7685_v35, %v2394_v55  ;;  %v1012_v53 = vunpack.c.h.b16 %v254_v44  ;;  %v5054_v55 = vld [vmem:[%s8082_s0 + $0x3b4] sm:$0xf] }
 0x3b7   :  { %v2096_v59 = vpop.f32.mrf.mxu0 }
 0x3b8   :  { %v3164_v57 = vmax.f32 %v2708_v54, 0.0  ;;  %4872 = vmatmul.msk.bf16.gmra.mxu1 %vm1469_vm2, %v4258_v50  ;;  %4933 = vmatmul.msk.bf16.gmra.mxu3 %vm1469_vm2, %v4746_v51  ;;  %v3008_v60 = vadd.f32 %v3007_v29, %v2395_v56  ;;  %v2097_v62 = vadd.f32 %v7685_v35, %v2096_v59  ;;  %v4270_v50 = vor.u32 %v5055_v45, %v4269_v41  ;;  %v4271_v56 = vld [vmem:[%s8082_s0 + $0x3b8] sm:$0xf0] }
 0x3ba   :  { %v3405_v61 = vpack.c.bf16 %v3164_v57, %v3164_v57  ;;  %v3284_v63 = vmax.f32 %v3008_v60, 0.0 }
 0x3bb   :  { %v3012_v2 = vpop.f32.mrf.mxu3 }
 0x3bc   :  { %3647 = vst.msk [vmem:[%s8084_s3 + $0x188] sm:$0xf] %vm3548_vm3, %v3405_v61  ;;  %v3525_v5 = vpack.c.bf16 %v3284_v63, %v3284_v63  ;;  %v1254_v63 = vpack.c.b16 %v1012_v53, %v1012_v53 }
 0x3bd   :  { %v2709_v6 = vpop.f32.mrf.mxu1  ;;  %v2396_v9 = vpop.f32.mrf.mxu2 }
 0x3be   :  { %v2710_v8 = vadd.f32 %v2709_v6, %v2097_v62  ;;  %3767 = vst.msk [vmem:[%s8084_s3 + $0x368] sm:$0xf] %vm3548_vm3, %v3525_v5  ;;  %v2397_v10 = vadd.f32 %v7685_v35, %v2396_v9  ;;  %v4274_v62 = vor.u32 %v5054_v55, %v4271_v56 }
 0x3bf   :  { %v2099_v14 = vpop.f32.mrf.mxu0 }
 0x3c0   :  { %v3165_v13 = vmax.f32 %v2710_v8, 0.0  ;;  %v3010_v16 = vadd.f32 %v3009_v49, %v2397_v10  ;;  %v2100_v22 = vadd.f32 %v7685_v35, %v2099_v14  ;;  %v4750_v49 = vor.u32 %v5175_v39, %v4749_v38 }
 0x3c2   :  { %v3406_v21 = vpack.c.bf16 %v3165_v13, %v3165_v13  ;;  %v3285_v23 = vmax.f32 %v3010_v16, 0.0  ;;  %2438 = vmatmul.bf16.gmra.mxu2 %v4742_v11  ;;  %2138 = vmatmul.bf16.gmra.mxu0 %v4262_v12  ;;  %v1011_v12 = vunpack.c.l.b16 %v254_v44 }
 0x3c3   :  { %v3014_v24 = vpop.f32.mrf.mxu3 }
 0x3c4   :  { %3648 = vst.msk [vmem:[%s8084_s3 + $0x18c] sm:$0xf] %vm3548_vm3, %v3406_v21  ;;  %v3526_v27 = vpack.c.bf16 %v3285_v23, %v3285_v23  ;;  %v1253_v20 = vpack.c.b16 %v1011_v12, %v1011_v12 }
 0x3c5   :  { %v2712_v28 = vpop.f32.mrf.mxu1  ;;  %v2399_v30 = vpop.f32.mrf.mxu2 }
 0x3c6   :  { %v2713_v29 = vadd.f32 %v2712_v28, %v2100_v22  ;;  %3768 = vst.msk [vmem:[%s8084_s3 + $0x36c] sm:$0xf] %vm3548_vm3, %v3526_v27  ;;  %v2400_v31 = vadd.f32 %v7685_v35, %v2399_v30 }
 0x3c7   :  { %v2101_v33 = vpop.f32.mrf.mxu0 }
 0x3c8   :  { %v3166_v32 = vmax.f32 %v2713_v29, 0.0  ;;  %4873 = vmatmul.msk.bf16.gmra.mxu1 %vm1469_vm2, %v4266_v25  ;;  %4934 = vmatmul.msk.bf16.gmra.mxu3 %vm1469_vm2, %v4754_v26  ;;  %v3013_v40 = vadd.f32 %v3012_v2, %v2400_v31  ;;  %v2102_v36 = vadd.f32 %v7685_v35, %v2101_v33  ;;  %v4279_v25 = vld [vmem:[%s8082_s0 + $0x3c8] sm:$0xf0] }
 0x3ca   :  { %v3407_v34 = vpack.c.bf16 %v3166_v32, %v3166_v32  ;;  %v3286_v37 = vmax.f32 %v3013_v40, 0.0 }
 0x3cb   :  { %v3017_v58 = vpop.f32.mrf.mxu3 }
 0x3cc   :  { %3649 = vst.msk [vmem:[%s8084_s3 + $0x190] sm:$0xf] %vm3548_vm3, %v3407_v34  ;;  %v3527_v42 = vpack.c.bf16 %v3286_v37, %v3286_v37 }
 0x3cd   :  { %v2714_v43 = vpop.f32.mrf.mxu1  ;;  %v2401_v47 = vpop.f32.mrf.mxu2 }
 0x3ce   :  { %v2715_v46 = vadd.f32 %v2714_v43, %v2102_v36  ;;  %3769 = vst.msk [vmem:[%s8084_s3 + $0x370] sm:$0xf] %vm3548_vm3, %v3527_v42  ;;  %v2402_v48 = vadd.f32 %v7685_v35, %v2401_v47 }
 0x3cf   :  { %v2104_v52 = vpop.f32.mrf.mxu0 }
 0x3d0   :  { %v3167_v51 = vmax.f32 %v2715_v46, 0.0  ;;  %v3015_v54 = vadd.f32 %v3014_v24, %v2402_v48  ;;  %v2105_v59 = vadd.f32 %v7685_v35, %v2104_v52  ;;  %v5056_v24 = vld [vmem:[%s8082_s0 + $0x3c4] sm:$0xf] }
 0x3d1   :  { %v4282_v30 = vor.u32 %v5056_v24, %v4279_v25 }
 0x3d2   :  { %v3408_v57 = vpack.c.bf16 %v3167_v51, %v3167_v51  ;;  %v3287_v60 = vmax.f32 %v3015_v54, 0.0  ;;  %2443 = vmatmul.bf16.gmra.mxu2 %v4750_v49  ;;  %2143 = vmatmul.bf16.gmra.mxu0 %v4270_v50 }
 0x3d3   :  { %v3019_v61 = vpop.f32.mrf.mxu3 }
 0x3d4   :  { %3650 = vst.msk [vmem:[%s8084_s3 + $0x194] sm:$0xf] %vm3548_vm3, %v3408_v57  ;;  %v3528_v0 = vpack.c.bf16 %v3287_v60, %v3287_v60 }
 0x3d5   :  { %v2717_v1 = vpop.f32.mrf.mxu1  ;;  %v2404_v3 = vpop.f32.mrf.mxu2 }
 0x3d6   :  { %v2718_v2 = vadd.f32 %v2717_v1, %v2105_v59  ;;  %3770 = vst.msk [vmem:[%s8084_s3 + $0x374] sm:$0xf] %vm3548_vm3, %v3528_v0  ;;  %v2405_v4 = vadd.f32 %v7685_v35, %v2404_v3 }
 0x3d7   :  { %v2106_v6 = vpop.f32.mrf.mxu0 }
 0x3d8   :  { %v3168_v5 = vmax.f32 %v2718_v2, 0.0  ;;  %4874 = vmatmul.msk.bf16.gmra.mxu1 %vm1469_vm2, %v4274_v62  ;;  %4935 = vmatmul.msk.bf16.gmra.mxu3 %vm1469_vm2, %v1254_v63  ;;  %v3018_v8 = vadd.f32 %v3017_v58, %v2405_v4  ;;  %v2107_v10 = vadd.f32 %v7685_v35, %v2106_v6 }
 0x3da   :  { %v3409_v9 = vpack.c.bf16 %v3168_v5, %v3168_v5  ;;  %v3288_v11 = vmax.f32 %v3018_v8, 0.0 }
 0x3db   :  { %v3022_v13 = vpop.f32.mrf.mxu3 }
 0x3dc   :  { %3651 = vst.msk [vmem:[%s8084_s3 + $0x198] sm:$0xf] %vm3548_vm3, %v3409_v9  ;;  %v3529_v14 = vpack.c.bf16 %v3288_v11, %v3288_v11 }
 0x3dd   :  { %v2719_v15 = vpop.f32.mrf.mxu1  ;;  %v2406_v17 = vpop.f32.mrf.mxu2 }
 0x3de   :  { %v2720_v16 = vadd.f32 %v2719_v15, %v2107_v10  ;;  %3771 = vst.msk [vmem:[%s8084_s3 + $0x378] sm:$0xf] %vm3548_vm3, %v3529_v14  ;;  %v2407_v18 = vadd.f32 %v7685_v35, %v2406_v17 }
 0x3df   :  { %v2109_v22 = vpop.f32.mrf.mxu0 }
 0x3e0   :  { %v3169_v21 = vmax.f32 %v2720_v16, 0.0  ;;  %v3020_v23 = vadd.f32 %v3019_v61, %v2407_v18  ;;  %v2110_v27 = vadd.f32 %v7685_v35, %v2109_v22 }
 0x3e2   :  { %v3410_v26 = vpack.c.bf16 %v3169_v21, %v3169_v21  ;;  %v3289_v28 = vmax.f32 %v3020_v23, 0.0  ;;  %2448 = vmatmul.bf16.gmra.mxu2 %v1253_v20 }
 0x3e3   :  { %v3024_v29 = vpop.f32.mrf.mxu3 }
 0x3e4   :  { %3652 = vst.msk [vmem:[%s8084_s3 + $0x19c] sm:$0xf] %vm3548_vm3, %v3410_v26  ;;  %v3530_v31 = vpack.c.bf16 %v3289_v28, %v3289_v28 }
 0x3e5   :  { %v2722_v32 = vpop.f32.mrf.mxu1  ;;  %v2409_v40 = vpop.f32.mrf.mxu2 }
 0x3e6   :  { %v2723_v33 = vadd.f32 %v2722_v32, %v2110_v27  ;;  %3772 = vst.msk [vmem:[%s8084_s3 + $0x37c] sm:$0xf] %vm3548_vm3, %v3530_v31  ;;  %v2410_v34 = vadd.f32 %v7685_v35, %v2409_v40 }
 0x3e7   :  { %v2111_v37 = vpop.f32.mrf.mxu0 }
 0x3e8   :  { %v3170_v36 = vmax.f32 %v2723_v33, 0.0  ;;  %4875 = vmatmul.msk.bf16.gmra.mxu1 %vm1469_vm2, %v4282_v30  ;;  %v3023_v38 = vadd.f32 %v3022_v13, %v2410_v34  ;;  %v2112_v58 = vadd.f32 %v7685_v35, %v2111_v37 }
 0x3ea   :  { %v3411_v39 = vpack.c.bf16 %v3170_v36, %v3170_v36  ;;  %v3290_v41 = vmax.f32 %v3023_v38, 0.0 }
 0x3eb   :  { %v3027_v45 = vpop.f32.mrf.mxu3 }
 0x3ec   :  { %3653 = vst.msk [vmem:[%s8084_s3 + $0x1a0] sm:$0xf] %vm3548_vm3, %v3411_v39  ;;  %v3531_v42 = vpack.c.bf16 %v3290_v41, %v3290_v41 }
 0x3ed   :  { %v2724_v43 = vpop.f32.mrf.mxu1  ;;  %v2411_v46 = vpop.f32.mrf.mxu2 }
 0x3ee   :  { %v2725_v44 = vadd.f32 %v2724_v43, %v2112_v58  ;;  %3773 = vst.msk [vmem:[%s8084_s3 + $0x380] sm:$0xf] %vm3548_vm3, %v3531_v42  ;;  %v2412_v47 = vadd.f32 %v7685_v35, %v2411_v46 }
 0x3ef   :  { %v2114_v49 = vpop.f32.mrf.mxu0 }
 0x3f0   :  { %v3171_v48 = vmax.f32 %v2725_v44, 0.0  ;;  %v3025_v50 = vadd.f32 %v3024_v29, %v2412_v47  ;;  %v2115_v52 = vadd.f32 %v7685_v35, %v2114_v49 }
 0x3f2   :  { %v3412_v51 = vpack.c.bf16 %v3171_v48, %v3171_v48  ;;  %v3291_v53 = vmax.f32 %v3025_v50, 0.0 }
 0x3f3   :  { %v3029_v54 = vpop.f32.mrf.mxu3 }
 0x3f4   :  { %3654 = vst.msk [vmem:[%s8084_s3 + $0x1a4] sm:$0xf] %vm3548_vm3, %v3412_v51  ;;  %v3532_v55 = vpack.c.bf16 %v3291_v53, %v3291_v53 }
 0x3f5   :  { %v2727_v56 = vpop.f32.mrf.mxu1  ;;  %v2414_v59 = vpop.f32.mrf.mxu2 }
 0x3f6   :  { %v2728_v57 = vadd.f32 %v2727_v56, %v2115_v52  ;;  %3774 = vst.msk [vmem:[%s8084_s3 + $0x384] sm:$0xf] %vm3548_vm3, %v3532_v55  ;;  %v2415_v60 = vadd.f32 %v7685_v35, %v2414_v59 }
 0x3f7   :  { %v2116_v62 = vpop.f32.mrf.mxu0 }
 0x3f8   :  { %v3172_v61 = vmax.f32 %v2728_v57, 0.0  ;;  %v3028_v63 = vadd.f32 %v3027_v45, %v2415_v60  ;;  %v2117_v1 = vadd.f32 %v7685_v35, %v2116_v62 }
 0x3fa   :  { %v3413_v0 = vpack.c.bf16 %v3172_v61, %v3172_v61  ;;  %v3292_v2 = vmax.f32 %v3028_v63, 0.0 }
 0x3fb   :  { %v3032_v3 = vpop.f32.mrf.mxu3 }
 0x3fc   :  { %3655 = vst.msk [vmem:[%s8084_s3 + $0x1a8] sm:$0xf] %vm3548_vm3, %v3413_v0  ;;  %v3533_v4 = vpack.c.bf16 %v3292_v2, %v3292_v2 }
 0x3fd   :  { %v2729_v5 = vpop.f32.mrf.mxu1  ;;  %v2416_v8 = vpop.f32.mrf.mxu2 }
 0x3fe   :  { %v2730_v6 = vadd.f32 %v2729_v5, %v2117_v1  ;;  %3775 = vst.msk [vmem:[%s8084_s3 + $0x388] sm:$0xf] %vm3548_vm3, %v3533_v4  ;;  %v2417_v9 = vadd.f32 %v7685_v35, %v2416_v8 }
 0x3ff   :  { %v2119_v11 = vpop.f32.mrf.mxu0 }
 0x400   :  { %v3173_v10 = vmax.f32 %v2730_v6, 0.0  ;;  %v3030_v12 = vadd.f32 %v3029_v54, %v2417_v9  ;;  %v2120_v14 = vadd.f32 %v7685_v35, %v2119_v11 }
 0x402   :  { %v3414_v13 = vpack.c.bf16 %v3173_v10, %v3173_v10  ;;  %v3293_v15 = vmax.f32 %v3030_v12, 0.0 }
 0x403   :  { %v3034_v16 = vpop.f32.mrf.mxu3 }
 0x404   :  { %3656 = vst.msk [vmem:[%s8084_s3 + $0x1ac] sm:$0xf] %vm3548_vm3, %v3414_v13  ;;  %v3534_v17 = vpack.c.bf16 %v3293_v15, %v3293_v15 }
 0x405   :  { %v2732_v18 = vpop.f32.mrf.mxu1  ;;  %v2419_v21 = vpop.f32.mrf.mxu2 }
 0x406   :  { %v2733_v20 = vadd.f32 %v2732_v18, %v2120_v14  ;;  %3776 = vst.msk [vmem:[%s8084_s3 + $0x38c] sm:$0xf] %vm3548_vm3, %v3534_v17  ;;  %v2420_v22 = vadd.f32 %v7685_v35, %v2419_v21 }
 0x407   :  { %v2121_v24 = vpop.f32.mrf.mxu0 }
 0x408   :  { %v3174_v23 = vmax.f32 %v2733_v20, 0.0  ;;  %v3033_v25 = vadd.f32 %v3032_v3, %v2420_v22  ;;  %v2122_v27 = vadd.f32 %v7685_v35, %v2121_v24 }
 0x40a   :  { %v3415_v26 = vpack.c.bf16 %v3174_v23, %v3174_v23  ;;  %v3294_v28 = vmax.f32 %v3033_v25, 0.0 }
 0x40b   :  { %v3037_v29 = vpop.f32.mrf.mxu3 }
 0x40c   :  { %3657 = vst.msk [vmem:[%s8084_s3 + $0x1b0] sm:$0xf] %vm3548_vm3, %v3415_v26  ;;  %v3535_v30 = vpack.c.bf16 %v3294_v28, %v3294_v28 }
 0x40d   :  { %v2734_v31 = vpop.f32.mrf.mxu1  ;;  %v2421_v33 = vpop.f32.mrf.mxu2 }
 0x40e   :  { %v2735_v32 = vadd.f32 %v2734_v31, %v2122_v27  ;;  %3777 = vst.msk [vmem:[%s8084_s3 + $0x390] sm:$0xf] %vm3548_vm3, %v3535_v30  ;;  %v2422_v40 = vadd.f32 %v7685_v35, %v2421_v33 }
 0x40f   :  { %v2124_v36 = vpop.f32.mrf.mxu0 }
 0x410   :  { %v3175_v34 = vmax.f32 %v2735_v32, 0.0  ;;  %v3035_v37 = vadd.f32 %v3034_v16, %v2422_v40  ;;  %v2125_v39 = vadd.f32 %v7685_v35, %v2124_v36 }
 0x412   :  { %v3416_v38 = vpack.c.bf16 %v3175_v34, %v3175_v34  ;;  %v3295_v58 = vmax.f32 %v3035_v37, 0.0 }
 0x413   :  { %v3039_v41 = vpop.f32.mrf.mxu3 }
 0x414   :  { %3658 = vst.msk [vmem:[%s8084_s3 + $0x1b4] sm:$0xf] %vm3548_vm3, %v3416_v38  ;;  %v3536_v45 = vpack.c.bf16 %v3295_v58, %v3295_v58 }
 0x415   :  { %v2737_v42 = vpop.f32.mrf.mxu1  ;;  %v2424_v44 = vpop.f32.mrf.mxu2 }
 0x416   :  { %v2738_v43 = vadd.f32 %v2737_v42, %v2125_v39  ;;  %3778 = vst.msk [vmem:[%s8084_s3 + $0x394] sm:$0xf] %vm3548_vm3, %v3536_v45  ;;  %v2425_v46 = vadd.f32 %v7685_v35, %v2424_v44 }
 0x417   :  { %v2126_v48 = vpop.f32.mrf.mxu0 }
 0x418   :  { %v3176_v47 = vmax.f32 %v2738_v43, 0.0  ;;  %v3038_v49 = vadd.f32 %v3037_v29, %v2425_v46  ;;  %v2127_v51 = vadd.f32 %v7685_v35, %v2126_v48 }
 0x41a   :  { %v3417_v50 = vpack.c.bf16 %v3176_v47, %v3176_v47  ;;  %v3296_v52 = vmax.f32 %v3038_v49, 0.0 }
 0x41b   :  { %v3042_v53 = vpop.f32.mrf.mxu3 }
 0x41c   :  { %3659 = vst.msk [vmem:[%s8084_s3 + $0x1b8] sm:$0xf] %vm3548_vm3, %v3417_v50  ;;  %v3537_v54 = vpack.c.bf16 %v3296_v52, %v3296_v52 }
 0x41d   :  { %v2739_v55 = vpop.f32.mrf.mxu1  ;;  %v2426_v57 = vpop.f32.mrf.mxu2 }
 0x41e   :  { %v2740_v56 = vadd.f32 %v2739_v55, %v2127_v51  ;;  %3779 = vst.msk [vmem:[%s8084_s3 + $0x398] sm:$0xf] %vm3548_vm3, %v3537_v54  ;;  %v2427_v59 = vadd.f32 %v7685_v35, %v2426_v57 }
 0x41f   :  { %v2129_v61 = vpop.f32.mrf.mxu0 }
 0x420   :  { %v3177_v60 = vmax.f32 %v2740_v56, 0.0  ;;  %v3040_v62 = vadd.f32 %v3039_v41, %v2427_v59  ;;  %v2130_v0 = vadd.f32 %v7685_v35, %v2129_v61 }
 0x422   :  { %v3418_v63 = vpack.c.bf16 %v3177_v60, %v3177_v60  ;;  %v3297_v1 = vmax.f32 %v3040_v62, 0.0 }
 0x423   :  { %v3044_v2 = vpop.f32.mrf.mxu3 }
 0x424   :  { %3660 = vst.msk [vmem:[%s8084_s3 + $0x1bc] sm:$0xf] %vm3548_vm3, %v3418_v63  ;;  %v3538_v3 = vpack.c.bf16 %v3297_v1, %v3297_v1 }
 0x425   :  { %v2742_v4 = vpop.f32.mrf.mxu1  ;;  %v2429_v6 = vpop.f32.mrf.mxu2 }
 0x426   :  { %v2743_v5 = vadd.f32 %v2742_v4, %v2130_v0  ;;  %3780 = vst.msk [vmem:[%s8084_s3 + $0x39c] sm:$0xf] %vm3548_vm3, %v3538_v3  ;;  %v2430_v8 = vadd.f32 %v7685_v35, %v2429_v6 }
 0x427   :  { %v2131_v10 = vpop.f32.mrf.mxu0 }
 0x428   :  { %v3178_v9 = vmax.f32 %v2743_v5, 0.0  ;;  %v3043_v11 = vadd.f32 %v3042_v53, %v2430_v8  ;;  %v2132_v13 = vadd.f32 %v7685_v35, %v2131_v10 }
 0x42a   :  { %v3419_v12 = vpack.c.bf16 %v3178_v9, %v3178_v9  ;;  %v3298_v14 = vmax.f32 %v3043_v11, 0.0 }
 0x42b   :  { %v3047_v15 = vpop.f32.mrf.mxu3 }
 0x42c   :  { %3661 = vst.msk [vmem:[%s8084_s3 + $0x1c0] sm:$0xf] %vm3548_vm3, %v3419_v12  ;;  %v3539_v16 = vpack.c.bf16 %v3298_v14, %v3298_v14 }
 0x42d   :  { %v2744_v17 = vpop.f32.mrf.mxu1  ;;  %v2431_v20 = vpop.f32.mrf.mxu2 }
 0x42e   :  { %v2745_v18 = vadd.f32 %v2744_v17, %v2132_v13  ;;  %3781 = vst.msk [vmem:[%s8084_s3 + $0x3a0] sm:$0xf] %vm3548_vm3, %v3539_v16  ;;  %v2432_v21 = vadd.f32 %v7685_v35, %v2431_v20 }
 0x42f   :  { %v2134_v23 = vpop.f32.mrf.mxu0 }
 0x430   :  { %v3179_v22 = vmax.f32 %v2745_v18, 0.0  ;;  %v3045_v24 = vadd.f32 %v3044_v2, %v2432_v21  ;;  %v2135_v26 = vadd.f32 %v7685_v35, %v2134_v23 }
 0x432   :  { %v3420_v25 = vpack.c.bf16 %v3179_v22, %v3179_v22  ;;  %v3299_v27 = vmax.f32 %v3045_v24, 0.0 }
 0x433   :  { %v3049_v28 = vpop.f32.mrf.mxu3 }
 0x434   :  { %3662 = vst.msk [vmem:[%s8084_s3 + $0x1c4] sm:$0xf] %vm3548_vm3, %v3420_v25  ;;  %v3540_v29 = vpack.c.bf16 %v3299_v27, %v3299_v27 }
 0x435   :  { %v2747_v30 = vpop.f32.mrf.mxu1  ;;  %v2434_v32 = vpop.f32.mrf.mxu2 }
 0x436   :  { %v2748_v31 = vadd.f32 %v2747_v30, %v2135_v26  ;;  %3782 = vst.msk [vmem:[%s8084_s3 + $0x3a4] sm:$0xf] %vm3548_vm3, %v3540_v29  ;;  %v2435_v33 = vadd.f32 %v7685_v35, %v2434_v32 }
 0x437   :  { %v2136_v34 = vpop.f32.mrf.mxu0 }
 0x438   :  { %v3180_v40 = vmax.f32 %v2748_v31, 0.0  ;;  %v3048_v36 = vadd.f32 %v3047_v15, %v2435_v33  ;;  %v2137_v38 = vadd.f32 %v7685_v35, %v2136_v34 }
 0x43a   :  { %v3421_v37 = vpack.c.bf16 %v3180_v40, %v3180_v40  ;;  %v3300_v39 = vmax.f32 %v3048_v36, 0.0 }
 0x43b   :  { %v3052_v58 = vpop.f32.mrf.mxu3 }
 0x43c   :  { %3663 = vst.msk [vmem:[%s8084_s3 + $0x1c8] sm:$0xf] %vm3548_vm3, %v3421_v37  ;;  %v3541_v41 = vpack.c.bf16 %v3300_v39, %v3300_v39 }
 0x43d   :  { %v2749_v45 = vpop.f32.mrf.mxu1  ;;  %v2436_v43 = vpop.f32.mrf.mxu2 }
 0x43e   :  { %v2750_v42 = vadd.f32 %v2749_v45, %v2137_v38  ;;  %3783 = vst.msk [vmem:[%s8084_s3 + $0x3a8] sm:$0xf] %vm3548_vm3, %v3541_v41  ;;  %v2437_v44 = vadd.f32 %v7685_v35, %v2436_v43  ;;  %v2150_v38 = vadd.f32 %v7685_v35, %v5520_v7 }
 0x43f   :  { %v2139_v47 = vpop.f32.mrf.mxu0 }
 0x440   :  { %v3181_v46 = vmax.f32 %v2750_v42, 0.0  ;;  %v3050_v48 = vadd.f32 %v3049_v28, %v2437_v44  ;;  %v2140_v50 = vadd.f32 %v7685_v35, %v2139_v47  ;;  %v2152_v47 = vadd.f32 %v7685_v35, %v5541_v19 }
 0x442   :  { %v3422_v49 = vpack.c.bf16 %v3181_v46, %v3181_v46  ;;  %v3301_v51 = vmax.f32 %v3050_v48, 0.0 }
 0x443   :  { %v3054_v52 = vpop.f32.mrf.mxu3 }
 0x444   :  { %3664 = vst.msk [vmem:[%s8084_s3 + $0x1cc] sm:$0xf] %vm3548_vm3, %v3422_v49  ;;  %v3542_v53 = vpack.c.bf16 %v3301_v51, %v3301_v51 }
 0x445   :  { %v2752_v54 = vpop.f32.mrf.mxu1  ;;  %v2439_v56 = vpop.f32.mrf.mxu2 }
 0x446   :  { %v2753_v55 = vadd.f32 %v2752_v54, %v2140_v50  ;;  %3784 = vst.msk [vmem:[%s8084_s3 + $0x3ac] sm:$0xf] %vm3548_vm3, %v3542_v53  ;;  %v2440_v57 = vadd.f32 %v7685_v35, %v2439_v56 }
 0x447   :  { %v2141_v60 = vpop.f32.mrf.mxu0 }
 0x448   :  { %v3182_v59 = vmax.f32 %v2753_v55, 0.0  ;;  %v3053_v61 = vadd.f32 %v3052_v58, %v2440_v57  ;;  %v2142_v63 = vadd.f32 %v7685_v35, %v2141_v60 }
 0x44a   :  { %v3423_v62 = vpack.c.bf16 %v3182_v59, %v3182_v59  ;;  %v3302_v0 = vmax.f32 %v3053_v61, 0.0 }
 0x44b   :  { %v3057_v1 = vpop.f32.mrf.mxu3 }
 0x44c   :  { %3665 = vst.msk [vmem:[%s8084_s3 + $0x1d0] sm:$0xf] %vm3548_vm3, %v3423_v62  ;;  %v3543_v2 = vpack.c.bf16 %v3302_v0, %v3302_v0 }
 0x44d   :  { %v2754_v3 = vpop.f32.mrf.mxu1  ;;  %v2441_v5 = vpop.f32.mrf.mxu2 }
 0x44e   :  { %v2755_v4 = vadd.f32 %v2754_v3, %v2142_v63  ;;  %3785 = vst.msk [vmem:[%s8084_s3 + $0x3b0] sm:$0xf] %vm3548_vm3, %v3543_v2  ;;  %v2442_v6 = vadd.f32 %v7685_v35, %v2441_v5 }
 0x44f   :  { %v2144_v9 = vpop.f32.mrf.mxu0 }
 0x450   :  { %v3183_v8 = vmax.f32 %v2755_v4, 0.0  ;;  %v3055_v10 = vadd.f32 %v3054_v52, %v2442_v6  ;;  %v2145_v12 = vadd.f32 %v7685_v35, %v2144_v9 }
 0x452   :  { %v3424_v11 = vpack.c.bf16 %v3183_v8, %v3183_v8  ;;  %v3303_v13 = vmax.f32 %v3055_v10, 0.0 }
 0x453   :  { %v3059_v14 = vpop.f32.mrf.mxu3 }
 0x454   :  { %3666 = vst.msk [vmem:[%s8084_s3 + $0x1d4] sm:$0xf] %vm3548_vm3, %v3424_v11  ;;  %v3544_v15 = vpack.c.bf16 %v3303_v13, %v3303_v13 }
 0x455   :  { %v2757_v16 = vpop.f32.mrf.mxu1  ;;  %v2444_v18 = vpop.f32.mrf.mxu2 }
 0x456   :  { %v2758_v17 = vadd.f32 %v2757_v16, %v2145_v12  ;;  %3786 = vst.msk [vmem:[%s8084_s3 + $0x3b4] sm:$0xf] %vm3548_vm3, %v3544_v15  ;;  %v2445_v20 = vadd.f32 %v7685_v35, %v2444_v18 }
 0x457   :  { %v2146_v22 = vpop.f32.mrf.mxu0 }
 0x458   :  { %v3184_v21 = vmax.f32 %v2758_v17, 0.0  ;;  %v3058_v23 = vadd.f32 %v3057_v1, %v2445_v20  ;;  %v2147_v25 = vadd.f32 %v7685_v35, %v2146_v22 }
 0x45a   :  { %v3425_v24 = vpack.c.bf16 %v3184_v21, %v3184_v21  ;;  %v3304_v26 = vmax.f32 %v3058_v23, 0.0 }
 0x45b   :  { %v3062_v27 = vpop.f32.mrf.mxu3 }
 0x45c   :  { %3667 = vst.msk [vmem:[%s8084_s3 + $0x1d8] sm:$0xf] %vm3548_vm3, %v3425_v24  ;;  %v3545_v28 = vpack.c.bf16 %v3304_v26, %v3304_v26 }
 0x45d   :  { %v2759_v29 = vpop.f32.mrf.mxu1  ;;  %v2446_v31 = vpop.f32.mrf.mxu2 }
 0x45e   :  { %v2760_v30 = vadd.f32 %v2759_v29, %v2147_v25  ;;  %3787 = vst.msk [vmem:[%s8084_s3 + $0x3b8] sm:$0xf] %vm3548_vm3, %v3545_v28  ;;  %v2447_v32 = vadd.f32 %v7685_v35, %v2446_v31 }
 0x460   :  { %v3185_v33 = vmax.f32 %v2760_v30, 0.0  ;;  %v3060_v40 = vadd.f32 %v3059_v14, %v2447_v32 }
 0x462   :  { %v3426_v34 = vpack.c.bf16 %v3185_v33, %v3185_v33  ;;  %v3305_v36 = vmax.f32 %v3060_v40, 0.0 }
 0x463   :  { %v3064_v37 = vpop.f32.mrf.mxu3 }
 0x464   :  { %3668 = vst.msk [vmem:[%s8084_s3 + $0x1dc] sm:$0xf] %vm3548_vm3, %v3426_v34  ;;  %v3546_v39 = vpack.c.bf16 %v3305_v36, %v3305_v36 }
 0x465   :  { %v2762_v58 = vpop.f32.mrf.mxu1  ;;  %v2449_v45 = vpop.f32.mrf.mxu2 }
 0x466   :  { %v2763_v41 = vadd.f32 %v2762_v58, %v2150_v38  ;;  %3788 = vst.msk [vmem:[%s8084_s3 + $0x3bc] sm:$0xf] %vm3548_vm3, %v3546_v39  ;;  %v2450_v42 = vadd.f32 %v7685_v35, %v2449_v45 }
 0x468   :  { %v3186_v43 = vmax.f32 %v2763_v41, 0.0  ;;  %v3063_v44 = vadd.f32 %v3062_v27, %v2450_v42 }
 0x46a   :  { %v3427_v46 = vpack.c.bf16 %v3186_v43, %v3186_v43  ;;  %v3306_v7 = vmax.f32 %v3063_v44, 0.0 }
 0x46c   :  { %3669 = vst.msk [vmem:[%s8084_s3 + $0x1e0] sm:$0xf] %vm3548_vm3, %v3427_v46  ;;  %v3547_v48 = vpack.c.bf16 %v3306_v7, %v3306_v7 }
 0x46d   :  { %v2764_v49 = vpop.f32.mrf.mxu1  ;;  %v2451_v51 = vpop.f32.mrf.mxu2 }
 0x46e   :  { %v2765_v50 = vadd.f32 %v2764_v49, %v2152_v47  ;;  %3790 = vst.msk [vmem:[%s8084_s3 + $0x3c0] sm:$0x1] %vm3789_vm4, %v3547_v48 }
 0x470   :  { %v3187_v52 = vmax.f32 %v2765_v50, 0.0 }
 0x472   :  { %v3428_v53 = vpack.c.bf16 %v3187_v52, %v3187_v52 }
 0x474   :  { %3670 = vst.msk [vmem:[%s8084_s3 + $0x1e4] sm:$0xf] %vm3548_vm3, %v3428_v53 }

// kernel: conv_autoencoder_shallow_forward.4
= control target key start
LH: loop header
LB: loop body
LE: loop exit
PB: predicated region body
PF: predicated region fallthrough
CT: control target
= control target key end

     0   :  { %vm409_vm0 = vcmask 130048   ;;  %vm982_vm1 = vcmask 1041408   ;;  %vm894_vm2 = vcmask 31744   ;;  %vm1406_vm3 = vcmask 123904   ;;  %s2772_s1 = inlined_call_operand.vmem [shape: bf16[144,4], index: 1, kind: input, shape index: {}]   ;;  %s2773_s0 = inlined_call_operand.vmem [shape: bf16[450,144], index: 0, kind: input, shape index: {}]   ;;  %s2774_s2 = inlined_call_operand.vmem [shape: f32[1,4], index: 2, kind: input, shape index: {}]   ;;  %s2775_s3 = inlined_call_operand.vmem [shape: bf16[4,144], index: 3, kind: input, shape index: {}]   ;;  %s2776_s4 = inlined_call_operand.vmem [shape: f32[450,144], index: 4, kind: output, shape index: {}]  }
   0x1   :  { %v1822_v0 = vld [vmem:[%s2772_s1 + $0x38] sm:$0xff]  ;;  %v1821_v1 = vld [vmem:[%s2772_s1 + $0x30] sm:$0xff]  ;;  %v1823_v2 = vld [vmem:[%s2772_s1 + $0x40] sm:$0xff] }
   0x2   :  { %497 = vmatpush.bf16.msra.mxu0 %v1822_v0  ;;  %v1759_v3 = vld [vmem:[%s2773_s0 + $0x4] sm:$0xf]  ;;  %v1416_v4 = vld [vmem:[%s2773_s0 + $0x8] sm:$0xf0]  ;;  %657 = vmatpush.bf16.msra.mxu1 %v1823_v2  ;;  %v1818_v8 = vld [vmem:[%s2772_s1 + $0x18] sm:$0xff] }
   0x3   :  { %v1419_v5 = vor.u32 %v1759_v3, %v1416_v4  ;;  %v1820_v6 = vld [vmem:[%s2772_s1 + $0x28] sm:$0xff]  ;;  %v1819_v7 = vld [vmem:[%s2772_s1 + $0x20] sm:$0xff]  ;;  %v1761_v9 = vld [vmem:[%s2773_s0 + $0x14] sm:$0xf] }
   0x4   :  { %v1424_v10 = vld [vmem:[%s2773_s0 + $0x18] sm:$0xf0]  ;;  %v1817_v11 = vld [vmem:[%s2772_s1 + $0x10] sm:$0xff]  ;;  %v1816_v13 = vld [vmem:[%s2772_s1 + $0x8] sm:$0xff] }
   0x5   :  { %1672 = vmatmul.msk.bf16.vlgmr.msra.gmra.mxu1 %vm409_vm0, %v1419_v5  ;;  %v1427_v12 = vor.u32 %v1761_v9, %v1424_v10  ;;  %v1815_v14 = vld [vmem:[%s2772_s1] sm:$0xff]  ;;  %v1760_v16 = vld [vmem:[%s2773_s0 + $0x4] sm:$0xf0]  ;;  %v1432_v19 = vld [vmem:[%s2773_s0 + $0x28] sm:$0xf0] }
   0x6   :  { %498 = vmatpush.bf16.msra.mxu0 %v1821_v1  ;;  %v1414_v15 = vld [vmem:[%s2773_s0] sm:$0xf]  ;;  %v1763_v18 = vld [vmem:[%s2773_s0 + $0x24] sm:$0xf]  ;;  %v1422_v21 = vld [vmem:[%s2773_s0 + $0x10] sm:$0xf] }
   0x7   :  { %v1415_v17 = vor.u32 %v1760_v16, %v1414_v15  ;;  %v1435_v20 = vor.u32 %v1763_v18, %v1432_v19  ;;  %v1762_v22 = vld [vmem:[%s2773_s0 + $0x14] sm:$0xf0]  ;;  %v1765_v24 = vld [vmem:[%s2773_s0 + $0x34] sm:$0xf]  ;;  %v1440_v25 = vld [vmem:[%s2773_s0 + $0x38] sm:$0xf0] }
   0x8   :  { %v1423_v23 = vor.u32 %v1762_v22, %v1422_v21  ;;  %v1443_v26 = vor.u32 %v1765_v24, %v1440_v25  ;;  %v1430_v27 = vld [vmem:[%s2773_s0 + $0x20] sm:$0xf]  ;;  %v1764_v28 = vld [vmem:[%s2773_s0 + $0x24] sm:$0xf0]  ;;  %v1767_v30 = vld [vmem:[%s2773_s0 + $0x44] sm:$0xf] }
   0x9   :  { %v1431_v29 = vor.u32 %v1764_v28, %v1430_v27  ;;  %v1448_v31 = vld [vmem:[%s2773_s0 + $0x48] sm:$0xf0]  ;;  %v1438_v33 = vld [vmem:[%s2773_s0 + $0x30] sm:$0xf]  ;;  %v1766_v34 = vld [vmem:[%s2773_s0 + $0x34] sm:$0xf0] }
   0xa   :  { %499 = vmatpush.bf16.msra.mxu0 %v1820_v6  ;;  %v1451_v32 = vor.u32 %v1767_v30, %v1448_v31  ;;  %v1439_v35 = vor.u32 %v1766_v34, %v1438_v33  ;;  %v1769_v36 = vld [vmem:[%s2773_s0 + $0x54] sm:$0xf]  ;;  %v1456_v37 = vld [vmem:[%s2773_s0 + $0x58] sm:$0xf0]  ;;  %v1446_v39 = vld [vmem:[%s2773_s0 + $0x40] sm:$0xf] }
   0xb   :  { %v1459_v38 = vor.u32 %v1769_v36, %v1456_v37  ;;  %v1768_v40 = vld [vmem:[%s2773_s0 + $0x44] sm:$0xf0]  ;;  %v1771_v42 = vld [vmem:[%s2773_s0 + $0x64] sm:$0xf]  ;;  %v1464_v43 = vld [vmem:[%s2773_s0 + $0x68] sm:$0xf0] }
   0xc   :  { %v1447_v41 = vor.u32 %v1768_v40, %v1446_v39  ;;  %v1467_v44 = vor.u32 %v1771_v42, %v1464_v43  ;;  %v1454_v45 = vld [vmem:[%s2773_s0 + $0x50] sm:$0xf]  ;;  %v1770_v46 = vld [vmem:[%s2773_s0 + $0x54] sm:$0xf0]  ;;  %v1773_v48 = vld [vmem:[%s2773_s0 + $0x74] sm:$0xf] }
   0xd   :  { %v1455_v47 = vor.u32 %v1770_v46, %v1454_v45  ;;  %v1472_v49 = vld [vmem:[%s2773_s0 + $0x78] sm:$0xf0]  ;;  %v1462_v51 = vld [vmem:[%s2773_s0 + $0x60] sm:$0xf]  ;;  %v1772_v52 = vld [vmem:[%s2773_s0 + $0x64] sm:$0xf0] }
   0xe   :  { %500 = vmatpush.bf16.msra.mxu0 %v1819_v7  ;;  %v1475_v50 = vor.u32 %v1773_v48, %v1472_v49  ;;  %v1463_v53 = vor.u32 %v1772_v52, %v1462_v51  ;;  %v1775_v54 = vld [vmem:[%s2773_s0 + $0x84] sm:$0xf]  ;;  %v1480_v55 = vld [vmem:[%s2773_s0 + $0x88] sm:$0xf0]  ;;  %v889_v56 = vld [vmem:[%s2775_s3] sm:$0xf] }
   0xf   :  { %v1483_v57 = vor.u32 %v1775_v54, %v1480_v55  ;;  %891 = vst [vmem:[#allocation1] ss:$4 sm:$0xff] %v889_v56  ;;  %v1470_v59 = vld [vmem:[%s2773_s0 + $0x70] sm:$0xf]  ;;  %v1774_v60 = vld [vmem:[%s2773_s0 + $0x74] sm:$0xf0] }
  0x10   :  { %v1471_v2 = vor.u32 %v1774_v60, %v1470_v59  ;;  %v1777_v3 = vld [vmem:[%s2773_s0 + $0x94] sm:$0xf]  ;;  %v1488_v4 = vld [vmem:[%s2773_s0 + $0x98] sm:$0xf0]  ;;  %v1478_v7 = vld [vmem:[%s2773_s0 + $0x80] sm:$0xf] }
  0x11   :  { %v1491_v5 = vor.u32 %v1777_v3, %v1488_v4  ;;  %v1486_v22 = vld [vmem:[%s2773_s0 + $0x90] sm:$0xf]  ;;  %v1781_v30 = vld [vmem:[%s2773_s0 + $0xb4] sm:$0xf]  ;;  %v1504_v31 = vld [vmem:[%s2773_s0 + $0xb8] sm:$0xf0] }
  0x12   :  { %501 = vmatpush.bf16.msra.mxu0 %v1818_v8  ;;  %v1776_v8 = vld [vmem:[%s2773_s0 + $0x84] sm:$0xf0]  ;;  %v1507_v33 = vor.u32 %v1781_v30, %v1504_v31  ;;  %v1494_v39 = vld [vmem:[%s2773_s0 + $0xa0] sm:$0xf]  ;;  %v1512_v48 = vld [vmem:[%s2773_s0 + $0xc8] sm:$0xf0] }
  0x13   :  { %v1479_v10 = vor.u32 %v1776_v8, %v1478_v7  ;;  %v1780_v40 = vld [vmem:[%s2773_s0 + $0xa4] sm:$0xf0]  ;;  %v1502_v56 = vld [vmem:[%s2773_s0 + $0xb0] sm:$0xf] }
  0x14   :  { %v1495_v45 = vor.u32 %v1780_v40, %v1494_v39 }
  0x15   :  { %1673 = vmatmul.msk.bf16.gmra.mxu1 %vm409_vm0, %v1427_v12  ;;  %v2008_v12 = vld [vmem:[%s2774_s2] ss:$0 sm:$0xff] }
  0x16   :  { %502 = vmatpush.bf16.msra.mxu0 %v1817_v11  ;;  %v892_v61 = vld.sshfl [vmem:[#allocation1] sm:$0xff pattern:$0x73625140]  ;;  %v893_v63 = vld.sshfl [vmem:[#allocation1 + $0x8] sm:$0xff pattern:$0x73625140] }
  0x17   :  { %v983_v62 = vsel %vm982_vm1, %v892_v61, 0  ;;  %v985_v1 = vsel %vm982_vm1, %v893_v63, 0 }
  0x18   :  { %994 = vmatpush.bf16.msra.mxu2 %v983_v62  ;;  %1147 = vmatpush.bf16.msra.mxu3 %v985_v1  ;;  %v1520_v1 = vld [vmem:[%s2773_s0 + $0xd8] sm:$0xf0] }
  0x1a   :  { %503 = vmatpush.bf16.msra.mxu0 %v1816_v13  ;;  %v1779_v13 = vld [vmem:[%s2773_s0 + $0xa4] sm:$0xf] }
  0x1e   :  { %504 = vmatpush.bf16.msra.mxu0 %v1815_v14  ;;  %v1496_v14 = vld [vmem:[%s2773_s0 + $0xa8] sm:$0xf0] }
  0x1f   :  { %v1499_v16 = vor.u32 %v1779_v13, %v1496_v14 }
  0x21   :  { %505 = vmatmul.bf16.vlgmr.msra.gmra.mxu0 %v1415_v17 }
  0x25   :  { %1674 = vmatmul.msk.bf16.gmra.mxu1 %vm409_vm0, %v1435_v20 }
  0x31   :  { %510 = vmatmul.bf16.gmra.mxu0 %v1423_v23  ;;  %v1778_v23 = vld [vmem:[%s2773_s0 + $0x94] sm:$0xf0] }
  0x32   :  { %v1487_v28 = vor.u32 %v1778_v23, %v1486_v22 }
  0x35   :  { %1675 = vmatmul.msk.bf16.gmra.mxu1 %vm409_vm0, %v1443_v26 }
  0x41   :  { %515 = vmatmul.bf16.gmra.mxu0 %v1431_v29 }
  0x45   :  { %1676 = vmatmul.msk.bf16.gmra.mxu1 %vm409_vm0, %v1451_v32 }
  0x51   :  { %520 = vmatmul.bf16.gmra.mxu0 %v1439_v35 }
  0x55   :  { %1677 = vmatmul.msk.bf16.gmra.mxu1 %vm409_vm0, %v1459_v38 }
  0x61   :  { %525 = vmatmul.bf16.gmra.mxu0 %v1447_v41 }
  0x65   :  { %1678 = vmatmul.msk.bf16.gmra.mxu1 %vm409_vm0, %v1467_v44 }
  0x71   :  { %530 = vmatmul.bf16.gmra.mxu0 %v1455_v47  ;;  %v1783_v47 = vld [vmem:[%s2773_s0 + $0xc4] sm:$0xf] }
  0x75   :  { %1679 = vmatmul.msk.bf16.gmra.mxu1 %vm409_vm0, %v1475_v50  ;;  %v1515_v50 = vor.u32 %v1783_v47, %v1512_v48 }
  0x81   :  { %535 = vmatmul.bf16.gmra.mxu0 %v1463_v53 }
  0x82   :  { %v659_v58 = vpop.f32.mrf.mxu1 }
  0x85   :  { %1680 = vmatmul.msk.bf16.gmra.mxu1 %vm409_vm0, %v1483_v57  ;;  %v1782_v57 = vld [vmem:[%s2773_s0 + $0xb4] sm:$0xf0] }
  0x86   :  { %v1503_v62 = vor.u32 %v1782_v57, %v1502_v56 }
  0x8a   :  { %v661_v0 = vpop.f32.mrf.mxu1 }
  0x91   :  { %540 = vmatmul.bf16.gmra.mxu0 %v1471_v2 }
  0x92   :  { %v664_v6 = vpop.f32.mrf.mxu1 }
  0x95   :  { %1681 = vmatmul.msk.bf16.gmra.mxu1 %vm409_vm0, %v1491_v5 }
  0x9a   :  { %v666_v9 = vpop.f32.mrf.mxu1 }
  0x9e   :  { %v506_v11 = vpop.f32.mrf.mxu0 }
  0x9f   :  { %v507_v15 = vadd.f32 %v2008_v12, %v506_v11 }
  0xa1   :  { %545 = vmatmul.bf16.gmra.mxu0 %v1479_v10  ;;  %v660_v19 = vadd.f32 %v659_v58, %v507_v15  ;;  %v1784_v10 = vld [vmem:[%s2773_s0 + $0xc4] sm:$0xf0] }
  0xa2   :  { %v669_v17 = vpop.f32.mrf.mxu1 }
  0xa3   :  { %v803_v24 = vmax.f32 %v660_v19, 0.0  ;;  %v1528_v19 = vld [vmem:[%s2773_s0 + $0xe8] sm:$0xf0] }
  0xa5   :  { %1682 = vmatmul.msk.bf16.gmra.mxu1 %vm409_vm0, %v1499_v16 }
  0xa6   :  { %v508_v18 = vpop.f32.mrf.mxu0 }
  0xa7   :  { %v509_v20 = vadd.f32 %v2008_v12, %v508_v18  ;;  %v1787_v18 = vld [vmem:[%s2773_s0 + $0xe4] sm:$0xf] }
  0xa9   :  { %v662_v21 = vadd.f32 %v661_v0, %v509_v20  ;;  %v1785_v0 = vld [vmem:[%s2773_s0 + $0xd4] sm:$0xf] }
  0xaa   :  { %v671_v26 = vpop.f32.mrf.mxu1  ;;  %v1523_v3 = vor.u32 %v1785_v0, %v1520_v1 }
  0xab   :  { %v804_v25 = vmax.f32 %v662_v21, 0.0  ;;  %v1531_v21 = vor.u32 %v1787_v18, %v1528_v19 }
  0xad   :  { %v860_v27 = vpack.c.bf16 %v804_v25, %v803_v24 }
  0xae   :  { %v511_v29 = vpop.f32.mrf.mxu0 }
  0xaf   :  { %1701 = vmatmul.msk.bf16.vlgmr.msra.gmra.mxu2 %vm894_vm2, %v860_v27  ;;  %1730 = vmatmul.msk.bf16.vlgmr.msra.gmra.mxu3 %vm894_vm2, %v860_v27  ;;  %v512_v32 = vadd.f32 %v2008_v12, %v511_v29  ;;  %v1518_v27 = vld [vmem:[%s2773_s0 + $0xd0] sm:$0xf] }
  0xb1   :  { %550 = vmatmul.bf16.gmra.mxu0 %v1487_v28  ;;  %v665_v36 = vadd.f32 %v664_v6, %v512_v32  ;;  %v1786_v28 = vld [vmem:[%s2773_s0 + $0xd4] sm:$0xf0] }
  0xb2   :  { %v674_v34 = vpop.f32.mrf.mxu1 }
  0xb3   :  { %v805_v41 = vmax.f32 %v665_v36, 0.0  ;;  %v1536_v36 = vld [vmem:[%s2773_s0 + $0xf8] sm:$0xf0] }
  0xb5   :  { %1683 = vmatmul.msk.bf16.gmra.mxu1 %vm409_vm0, %v1507_v33  ;;  %v1519_v33 = vor.u32 %v1786_v28, %v1518_v27 }
  0xb6   :  { %v513_v35 = vpop.f32.mrf.mxu0 }
  0xb7   :  { %v514_v37 = vadd.f32 %v2008_v12, %v513_v35  ;;  %v1789_v35 = vld [vmem:[%s2773_s0 + $0xf4] sm:$0xf] }
  0xb9   :  { %v667_v38 = vadd.f32 %v666_v9, %v514_v37  ;;  %v1510_v9 = vld [vmem:[%s2773_s0 + $0xc0] sm:$0xf] }
  0xba   :  { %v676_v43 = vpop.f32.mrf.mxu1  ;;  %v1511_v16 = vor.u32 %v1784_v10, %v1510_v9 }
  0xbb   :  { %v806_v42 = vmax.f32 %v667_v38, 0.0  ;;  %v1539_v38 = vor.u32 %v1789_v35, %v1536_v36 }
  0xbd   :  { %v861_v44 = vpack.c.bf16 %v806_v42, %v805_v41 }
  0xbe   :  { %v516_v46 = vpop.f32.mrf.mxu0 }
  0xbf   :  { %1702 = vmatmul.msk.bf16.gmra.mxu2 %vm894_vm2, %v861_v44  ;;  %1731 = vmatmul.msk.bf16.gmra.mxu3 %vm894_vm2, %v861_v44  ;;  %v517_v49 = vadd.f32 %v2008_v12, %v516_v46  ;;  %v1526_v44 = vld [vmem:[%s2773_s0 + $0xe0] sm:$0xf] }
  0xc1   :  { %555 = vmatmul.bf16.gmra.mxu0 %v1495_v45  ;;  %v670_v53 = vadd.f32 %v669_v17, %v517_v49  ;;  %v1788_v45 = vld [vmem:[%s2773_s0 + $0xe4] sm:$0xf0] }
  0xc2   :  { %v679_v51 = vpop.f32.mrf.mxu1 }
  0xc3   :  { %v807_v58 = vmax.f32 %v670_v53, 0.0  ;;  %v1544_v53 = vld [vmem:[%s2773_s0 + $0x108] sm:$0xf0] }
  0xc5   :  { %1684 = vmatmul.msk.bf16.gmra.mxu1 %vm409_vm0, %v1515_v50  ;;  %v1527_v50 = vor.u32 %v1788_v45, %v1526_v44 }
  0xc6   :  { %v518_v52 = vpop.f32.mrf.mxu0 }
  0xc7   :  { %v519_v54 = vadd.f32 %v2008_v12, %v518_v52  ;;  %v1791_v52 = vld [vmem:[%s2773_s0 + $0x104] sm:$0xf] }
  0xc9   :  { %v672_v55 = vadd.f32 %v671_v26, %v519_v54 }
  0xca   :  { %v681_v60 = vpop.f32.mrf.mxu1 }
  0xcb   :  { %v808_v59 = vmax.f32 %v672_v55, 0.0  ;;  %v1547_v55 = vor.u32 %v1791_v52, %v1544_v53  ;;  %v1558_v53 = vld [vmem:[%s2773_s0 + $0x120] sm:$0xf] }
  0xcd   :  { %v862_v61 = vpack.c.bf16 %v808_v59, %v807_v58 }
  0xce   :  { %v521_v63 = vpop.f32.mrf.mxu0 }
  0xcf   :  { %1703 = vmatmul.msk.bf16.gmra.mxu2 %vm894_vm2, %v862_v61  ;;  %1732 = vmatmul.msk.bf16.gmra.mxu3 %vm894_vm2, %v862_v61  ;;  %v522_v2 = vadd.f32 %v2008_v12, %v521_v63  ;;  %v1534_v61 = vld [vmem:[%s2773_s0 + $0xf0] sm:$0xf] }
  0xd1   :  { %560 = vmatmul.bf16.gmra.mxu0 %v1503_v62  ;;  %v675_v6 = vadd.f32 %v674_v34, %v522_v2  ;;  %v1790_v62 = vld [vmem:[%s2773_s0 + $0xf4] sm:$0xf0] }
  0xd2   :  { %v684_v4 = vpop.f32.mrf.mxu1 }
  0xd3   :  { %v809_v11 = vmax.f32 %v675_v6, 0.0  ;;  %v1552_v6 = vld [vmem:[%s2773_s0 + $0x118] sm:$0xf0] }
  0xd5   :  { %1685 = vmatmul.msk.bf16.gmra.mxu1 %vm409_vm0, %v1523_v3  ;;  %v1535_v3 = vor.u32 %v1790_v62, %v1534_v61  ;;  %v1799_v61 = vld [vmem:[%s2773_s0 + $0x144] sm:$0xf]  ;;  %v1576_v62 = vld [vmem:[%s2773_s0 + $0x148] sm:$0xf0] }
  0xd6   :  { %v523_v5 = vpop.f32.mrf.mxu0 }
  0xd7   :  { %v524_v7 = vadd.f32 %v2008_v12, %v523_v5  ;;  %v1793_v5 = vld [vmem:[%s2773_s0 + $0x114] sm:$0xf] }
  0xd9   :  { %v677_v8 = vadd.f32 %v676_v43, %v524_v7 }
  0xda   :  { %v686_v14 = vpop.f32.mrf.mxu1 }
  0xdb   :  { %v810_v13 = vmax.f32 %v677_v8, 0.0  ;;  %v1555_v8 = vor.u32 %v1793_v5, %v1552_v6 }
  0xdd   :  { %v863_v15 = vpack.c.bf16 %v810_v13, %v809_v11 }
  0xde   :  { %v526_v17 = vpop.f32.mrf.mxu0 }
  0xdf   :  { %1704 = vmatmul.msk.bf16.gmra.mxu2 %vm894_vm2, %v863_v15  ;;  %1733 = vmatmul.msk.bf16.gmra.mxu3 %vm894_vm2, %v863_v15  ;;  %v527_v20 = vadd.f32 %v2008_v12, %v526_v17  ;;  %v1542_v15 = vld [vmem:[%s2773_s0 + $0x100] sm:$0xf] }
  0xe1   :  { %565 = vmatmul.bf16.gmra.mxu0 %v1511_v16  ;;  %v680_v24 = vadd.f32 %v679_v51, %v527_v20  ;;  %v1792_v16 = vld [vmem:[%s2773_s0 + $0x104] sm:$0xf0] }
  0xe2   :  { %v689_v22 = vpop.f32.mrf.mxu1 }
  0xe3   :  { %v811_v29 = vmax.f32 %v680_v24, 0.0  ;;  %v1560_v24 = vld [vmem:[%s2773_s0 + $0x128] sm:$0xf0] }
  0xe5   :  { %1686 = vmatmul.msk.bf16.gmra.mxu1 %vm409_vm0, %v1531_v21  ;;  %v1543_v21 = vor.u32 %v1792_v16, %v1542_v15 }
  0xe6   :  { %v528_v23 = vpop.f32.mrf.mxu0 }
  0xe7   :  { %v529_v25 = vadd.f32 %v2008_v12, %v528_v23  ;;  %v1795_v23 = vld [vmem:[%s2773_s0 + $0x124] sm:$0xf] }
  0xe9   :  { %v682_v26 = vadd.f32 %v681_v60, %v529_v25 }
  0xea   :  { %v691_v31 = vpop.f32.mrf.mxu1 }
  0xeb   :  { %v812_v30 = vmax.f32 %v682_v26, 0.0  ;;  %v1563_v26 = vor.u32 %v1795_v23, %v1560_v24 }
  0xed   :  { %v864_v32 = vpack.c.bf16 %v812_v30, %v811_v29 }
  0xee   :  { %v531_v34 = vpop.f32.mrf.mxu0 }
  0xef   :  { %1705 = vmatmul.msk.bf16.gmra.mxu2 %vm894_vm2, %v864_v32  ;;  %1734 = vmatmul.msk.bf16.gmra.mxu3 %vm894_vm2, %v864_v32  ;;  %v532_v37 = vadd.f32 %v2008_v12, %v531_v34  ;;  %v1550_v32 = vld [vmem:[%s2773_s0 + $0x110] sm:$0xf] }
  0xf1   :  { %570 = vmatmul.bf16.gmra.mxu0 %v1519_v33  ;;  %v685_v41 = vadd.f32 %v684_v4, %v532_v37  ;;  %v1794_v33 = vld [vmem:[%s2773_s0 + $0x114] sm:$0xf0] }
  0xf2   :  { %v694_v39 = vpop.f32.mrf.mxu1 }
  0xf3   :  { %v813_v46 = vmax.f32 %v685_v41, 0.0  ;;  %v1568_v41 = vld [vmem:[%s2773_s0 + $0x138] sm:$0xf0] }
  0xf5   :  { %1687 = vmatmul.msk.bf16.gmra.mxu1 %vm409_vm0, %v1539_v38  ;;  %v1551_v38 = vor.u32 %v1794_v33, %v1550_v32  ;;  %v1574_v32 = vld [vmem:[%s2773_s0 + $0x140] sm:$0xf]  ;;  %v1800_v33 = vld [vmem:[%s2773_s0 + $0x144] sm:$0xf0] }
  0xf6   :  { %v533_v40 = vpop.f32.mrf.mxu0 }
  0xf7   :  { %v534_v42 = vadd.f32 %v2008_v12, %v533_v40  ;;  %v1797_v40 = vld [vmem:[%s2773_s0 + $0x134] sm:$0xf] }
  0xf8   :  { %v1571_v45 = vor.u32 %v1797_v40, %v1568_v41  ;;  %v1803_v40 = vld [vmem:[%s2773_s0 + $0x164] sm:$0xf]  ;;  %v1592_v41 = vld [vmem:[%s2773_s0 + $0x168] sm:$0xf0] }
  0xf9   :  { %v687_v43 = vadd.f32 %v686_v14, %v534_v42 }
  0xfa   :  { %v696_v48 = vpop.f32.mrf.mxu1 }
  0xfb   :  { %v814_v47 = vmax.f32 %v687_v43, 0.0 }
  0xfd   :  { %v865_v49 = vpack.c.bf16 %v814_v47, %v813_v46 }
  0xfe   :  { %v536_v51 = vpop.f32.mrf.mxu0 }
  0xff   :  { %1706 = vmatmul.msk.bf16.gmra.mxu2 %vm894_vm2, %v865_v49  ;;  %1735 = vmatmul.msk.bf16.gmra.mxu3 %vm894_vm2, %v865_v49  ;;  %v537_v54 = vadd.f32 %v2008_v12, %v536_v51 }
 0x101   :  { %575 = vmatmul.bf16.gmra.mxu0 %v1527_v50  ;;  %v690_v58 = vadd.f32 %v689_v22, %v537_v54  ;;  %v1796_v54 = vld [vmem:[%s2773_s0 + $0x124] sm:$0xf0] }
 0x102   :  { %v699_v56 = vpop.f32.mrf.mxu1 }
 0x103   :  { %v815_v63 = vmax.f32 %v690_v58, 0.0 }
 0x105   :  { %1688 = vmatmul.msk.bf16.gmra.mxu1 %vm409_vm0, %v1547_v55 }
 0x106   :  { %v538_v57 = vpop.f32.mrf.mxu0 }
 0x107   :  { %v539_v59 = vadd.f32 %v2008_v12, %v538_v57 }
 0x109   :  { %v692_v60 = vadd.f32 %v691_v31, %v539_v59  ;;  %v1559_v59 = vor.u32 %v1796_v54, %v1558_v53  ;;  %v1582_v53 = vld [vmem:[%s2773_s0 + $0x150] sm:$0xf]  ;;  %v1802_v54 = vld [vmem:[%s2773_s0 + $0x154] sm:$0xf0] }
 0x10a   :  { %v701_v1 = vpop.f32.mrf.mxu1 }
 0x10b   :  { %v816_v0 = vmax.f32 %v692_v60, 0.0 }
 0x10d   :  { %v866_v2 = vpack.c.bf16 %v816_v0, %v815_v63 }
 0x10e   :  { %v541_v4 = vpop.f32.mrf.mxu0 }
 0x10f   :  { %1707 = vmatmul.msk.bf16.gmra.mxu2 %vm894_vm2, %v866_v2  ;;  %1736 = vmatmul.msk.bf16.gmra.mxu3 %vm894_vm2, %v866_v2  ;;  %v542_v7 = vadd.f32 %v2008_v12, %v541_v4  ;;  %v1579_v2 = vor.u32 %v1799_v61, %v1576_v62  ;;  %v1805_v61 = vld [vmem:[%s2773_s0 + $0x174] sm:$0xf]  ;;  %v1600_v62 = vld [vmem:[%s2773_s0 + $0x178] sm:$0xf0] }
 0x111   :  { %580 = vmatmul.bf16.gmra.mxu0 %v1535_v3  ;;  %v695_v11 = vadd.f32 %v694_v39, %v542_v7 }
 0x112   :  { %v704_v9 = vpop.f32.mrf.mxu1 }
 0x113   :  { %v817_v17 = vmax.f32 %v695_v11, 0.0  ;;  %v1798_v11 = vld [vmem:[%s2773_s0 + $0x134] sm:$0xf0] }
 0x115   :  { %1689 = vmatmul.msk.bf16.gmra.mxu1 %vm409_vm0, %v1555_v8 }
 0x116   :  { %v543_v10 = vpop.f32.mrf.mxu0 }
 0x117   :  { %v544_v13 = vadd.f32 %v2008_v12, %v543_v10  ;;  %v1566_v10 = vld [vmem:[%s2773_s0 + $0x130] sm:$0xf] }
 0x119   :  { %v697_v14 = vadd.f32 %v696_v48, %v544_v13 }
 0x11a   :  { %v706_v19 = vpop.f32.mrf.mxu1 }
 0x11b   :  { %v818_v18 = vmax.f32 %v697_v14, 0.0 }
 0x11d   :  { %v867_v20 = vpack.c.bf16 %v818_v18, %v817_v17  ;;  %v1567_v17 = vor.u32 %v1798_v11, %v1566_v10  ;;  %v1590_v10 = vld [vmem:[%s2773_s0 + $0x160] sm:$0xf]  ;;  %v1804_v11 = vld [vmem:[%s2773_s0 + $0x164] sm:$0xf0] }
 0x11e   :  { %v546_v22 = vpop.f32.mrf.mxu0 }
 0x11f   :  { %1708 = vmatmul.msk.bf16.gmra.mxu2 %vm894_vm2, %v867_v20  ;;  %1737 = vmatmul.msk.bf16.gmra.mxu3 %vm894_vm2, %v867_v20  ;;  %v547_v25 = vadd.f32 %v2008_v12, %v546_v22  ;;  %v1584_v20 = vld [vmem:[%s2773_s0 + $0x158] sm:$0xf0] }
 0x121   :  { %585 = vmatmul.bf16.gmra.mxu0 %v1543_v21  ;;  %v700_v29 = vadd.f32 %v699_v56, %v547_v25 }
 0x122   :  { %v709_v27 = vpop.f32.mrf.mxu1 }
 0x123   :  { %v819_v34 = vmax.f32 %v700_v29, 0.0 }
 0x125   :  { %1690 = vmatmul.msk.bf16.gmra.mxu1 %vm409_vm0, %v1563_v26 }
 0x126   :  { %v548_v28 = vpop.f32.mrf.mxu0 }
 0x127   :  { %v549_v30 = vadd.f32 %v2008_v12, %v548_v28 }
 0x129   :  { %v702_v31 = vadd.f32 %v701_v1, %v549_v30 }
 0x12a   :  { %v711_v36 = vpop.f32.mrf.mxu1 }
 0x12b   :  { %v820_v35 = vmax.f32 %v702_v31, 0.0 }
 0x12d   :  { %v868_v37 = vpack.c.bf16 %v820_v35, %v819_v34 }
 0x12e   :  { %v551_v39 = vpop.f32.mrf.mxu0 }
 0x12f   :  { %1709 = vmatmul.msk.bf16.gmra.mxu2 %vm894_vm2, %v868_v37  ;;  %1738 = vmatmul.msk.bf16.gmra.mxu3 %vm894_vm2, %v868_v37  ;;  %v552_v44 = vadd.f32 %v2008_v12, %v551_v39 }
 0x131   :  { %590 = vmatmul.bf16.gmra.mxu0 %v1551_v38  ;;  %v705_v48 = vadd.f32 %v704_v9, %v552_v44  ;;  %v1575_v38 = vor.u32 %v1800_v33, %v1574_v32  ;;  %v1598_v32 = vld [vmem:[%s2773_s0 + $0x170] sm:$0xf]  ;;  %v1806_v33 = vld [vmem:[%s2773_s0 + $0x174] sm:$0xf0] }
 0x132   :  { %v996_v42 = vpop.f32.mrf.mxu2  ;;  %v1149_v43 = vpop.f32.mrf.mxu3 }
 0x133   :  { %1293 = vst [vmem:[%s2776_s4] sm:$0xff] %v996_v42  ;;  %v714_v46 = vpop.f32.mrf.mxu1  ;;  %v821_v55 = vmax.f32 %v705_v48, 0.0 }
 0x134   :  { %1294 = vst.msk [vmem:[%s2776_s4 + $0x8] sm:$0xff] %vm409_vm0, %v1149_v43 }
 0x135   :  { %1691 = vmatmul.msk.bf16.gmra.mxu1 %vm409_vm0, %v1571_v45  ;;  %v1595_v45 = vor.u32 %v1803_v40, %v1592_v41  ;;  %v1809_v40 = vld [vmem:[%s2773_s0 + $0x194] sm:$0xf]  ;;  %v1616_v41 = vld [vmem:[%s2773_s0 + $0x198] sm:$0xf0] }
 0x136   :  { %v553_v47 = vpop.f32.mrf.mxu0 }
 0x137   :  { %v554_v49 = vadd.f32 %v2008_v12, %v553_v47 }
 0x139   :  { %v707_v50 = vadd.f32 %v706_v19, %v554_v49  ;;  %v1801_v19 = vld [vmem:[%s2773_s0 + $0x154] sm:$0xf] }
 0x13a   :  { %v998_v51 = vpop.f32.mrf.mxu2  ;;  %v1151_v52 = vpop.f32.mrf.mxu3  ;;  %v1587_v24 = vor.u32 %v1801_v19, %v1584_v20  ;;  %v1807_v19 = vld [vmem:[%s2773_s0 + $0x184] sm:$0xf]  ;;  %v1608_v20 = vld [vmem:[%s2773_s0 + $0x188] sm:$0xf0] }
 0x13b   :  { %v822_v56 = vmax.f32 %v707_v50, 0.0  ;;  %1295 = vst [vmem:[%s2776_s4 + $0x10] sm:$0xff] %v998_v51  ;;  %v716_v57 = vpop.f32.mrf.mxu1 }
 0x13c   :  { %1296 = vst.msk [vmem:[%s2776_s4 + $0x18] sm:$0xff] %vm409_vm0, %v1151_v52 }
 0x13d   :  { %v869_v58 = vpack.c.bf16 %v822_v56, %v821_v55 }
 0x13e   :  { %v556_v60 = vpop.f32.mrf.mxu0 }
 0x13f   :  { %1710 = vmatmul.msk.bf16.gmra.mxu2 %vm894_vm2, %v869_v58  ;;  %1739 = vmatmul.msk.bf16.gmra.mxu3 %vm894_vm2, %v869_v58  ;;  %v557_v1 = vadd.f32 %v2008_v12, %v556_v60 }
 0x141   :  { %595 = vmatmul.bf16.gmra.mxu0 %v1559_v59  ;;  %v710_v5 = vadd.f32 %v709_v27, %v557_v1  ;;  %v1583_v59 = vor.u32 %v1802_v54, %v1582_v53  ;;  %v1606_v53 = vld [vmem:[%s2773_s0 + $0x180] sm:$0xf]  ;;  %v1808_v54 = vld [vmem:[%s2773_s0 + $0x184] sm:$0xf0] }
 0x142   :  { %v1001_v63 = vpop.f32.mrf.mxu2  ;;  %v1154_v0 = vpop.f32.mrf.mxu3 }
 0x143   :  { %1297 = vst [vmem:[%s2776_s4 + $0x20] sm:$0xff] %v1001_v63  ;;  %v719_v3 = vpop.f32.mrf.mxu1  ;;  %v823_v13 = vmax.f32 %v710_v5, 0.0 }
 0x144   :  { %1298 = vst.msk [vmem:[%s2776_s4 + $0x28] sm:$0xff] %vm409_vm0, %v1154_v0 }
 0x145   :  { %1692 = vmatmul.msk.bf16.gmra.mxu1 %vm409_vm0, %v1579_v2  ;;  %v1603_v2 = vor.u32 %v1805_v61, %v1600_v62  ;;  %v1811_v61 = vld [vmem:[%s2773_s0 + $0x1a4] sm:$0xf]  ;;  %v1624_v62 = vld [vmem:[%s2773_s0 + $0x1a8] sm:$0xf0] }
 0x146   :  { %v558_v4 = vpop.f32.mrf.mxu0 }
 0x147   :  { %v559_v6 = vadd.f32 %v2008_v12, %v558_v4 }
 0x149   :  { %v712_v7 = vadd.f32 %v711_v36, %v559_v6 }
 0x14a   :  { %v1003_v8 = vpop.f32.mrf.mxu2  ;;  %v1156_v9 = vpop.f32.mrf.mxu3 }
 0x14b   :  { %v824_v14 = vmax.f32 %v712_v7, 0.0  ;;  %1299 = vst [vmem:[%s2776_s4 + $0x30] sm:$0xff] %v1003_v8  ;;  %v721_v15 = vpop.f32.mrf.mxu1 }
 0x14c   :  { %1300 = vst.msk [vmem:[%s2776_s4 + $0x38] sm:$0xff] %vm409_vm0, %v1156_v9 }
 0x14d   :  { %v870_v16 = vpack.c.bf16 %v824_v14, %v823_v13 }
 0x14e   :  { %v561_v18 = vpop.f32.mrf.mxu0 }
 0x14f   :  { %1711 = vmatmul.msk.bf16.gmra.mxu2 %vm894_vm2, %v870_v16  ;;  %1740 = vmatmul.msk.bf16.gmra.mxu3 %vm894_vm2, %v870_v16  ;;  %v562_v23 = vadd.f32 %v2008_v12, %v561_v18 }
 0x151   :  { %600 = vmatmul.bf16.gmra.mxu0 %v1567_v17  ;;  %v715_v27 = vadd.f32 %v714_v46, %v562_v23  ;;  %v1591_v17 = vor.u32 %v1804_v11, %v1590_v10  ;;  %v1614_v10 = vld [vmem:[%s2773_s0 + $0x190] sm:$0xf]  ;;  %v1810_v11 = vld [vmem:[%s2773_s0 + $0x194] sm:$0xf0] }
 0x152   :  { %v1006_v21 = vpop.f32.mrf.mxu2  ;;  %v1159_v22 = vpop.f32.mrf.mxu3 }
 0x153   :  { %1301 = vst [vmem:[%s2776_s4 + $0x40] sm:$0xff] %v1006_v21  ;;  %v724_v25 = vpop.f32.mrf.mxu1  ;;  %v825_v34 = vmax.f32 %v715_v27, 0.0 }
 0x154   :  { %1302 = vst.msk [vmem:[%s2776_s4 + $0x48] sm:$0xff] %vm409_vm0, %v1159_v22 }
 0x155   :  { %1693 = vmatmul.msk.bf16.gmra.mxu1 %vm409_vm0, %v1587_v24  ;;  %v1611_v24 = vor.u32 %v1807_v19, %v1608_v20  ;;  %v1813_v19 = vld [vmem:[%s2773_s0 + $0x1b4] sm:$0xf]  ;;  %v1632_v20 = vld [vmem:[%s2773_s0 + $0x1b8] sm:$0xf0] }
 0x156   :  { %v563_v26 = vpop.f32.mrf.mxu0 }
 0x157   :  { %v564_v28 = vadd.f32 %v2008_v12, %v563_v26 }
 0x159   :  { %v717_v29 = vadd.f32 %v716_v57, %v564_v28 }
 0x15a   :  { %v1008_v30 = vpop.f32.mrf.mxu2  ;;  %v1161_v31 = vpop.f32.mrf.mxu3 }
 0x15b   :  { %v826_v35 = vmax.f32 %v717_v29, 0.0  ;;  %1303 = vst [vmem:[%s2776_s4 + $0x50] sm:$0xff] %v1008_v30  ;;  %v726_v36 = vpop.f32.mrf.mxu1 }
 0x15c   :  { %1304 = vst.msk [vmem:[%s2776_s4 + $0x58] sm:$0xff] %vm409_vm0, %v1161_v31 }
 0x15d   :  { %v871_v37 = vpack.c.bf16 %v826_v35, %v825_v34 }
 0x15e   :  { %v566_v39 = vpop.f32.mrf.mxu0 }
 0x15f   :  { %1712 = vmatmul.msk.bf16.gmra.mxu2 %vm894_vm2, %v871_v37  ;;  %1741 = vmatmul.msk.bf16.gmra.mxu3 %vm894_vm2, %v871_v37  ;;  %v567_v44 = vadd.f32 %v2008_v12, %v566_v39 }
 0x161   :  { %605 = vmatmul.bf16.gmra.mxu0 %v1575_v38  ;;  %v720_v48 = vadd.f32 %v719_v3, %v567_v44  ;;  %v1599_v38 = vor.u32 %v1806_v33, %v1598_v32  ;;  %v1622_v32 = vld [vmem:[%s2773_s0 + $0x1a0] sm:$0xf]  ;;  %v1812_v33 = vld [vmem:[%s2773_s0 + $0x1a4] sm:$0xf0] }
 0x162   :  { %v1011_v42 = vpop.f32.mrf.mxu2  ;;  %v1164_v43 = vpop.f32.mrf.mxu3 }
 0x163   :  { %1305 = vst [vmem:[%s2776_s4 + $0x60] sm:$0xff] %v1011_v42  ;;  %v729_v46 = vpop.f32.mrf.mxu1  ;;  %v827_v55 = vmax.f32 %v720_v48, 0.0 }
 0x164   :  { %1306 = vst.msk [vmem:[%s2776_s4 + $0x68] sm:$0xff] %vm409_vm0, %v1164_v43 }
 0x165   :  { %1694 = vmatmul.msk.bf16.gmra.mxu1 %vm409_vm0, %v1595_v45  ;;  %v1619_v45 = vor.u32 %v1809_v40, %v1616_v41  ;;  %v74_v40 = vld [vmem:[%s2773_s0 + $0x1c0] sm:$0x11] }
 0x166   :  { %v568_v47 = vpop.f32.mrf.mxu0  ;;  %v267_v41 = vunpack.c.h.b16 %v74_v40 }
 0x167   :  { %v569_v49 = vadd.f32 %v2008_v12, %v568_v47 }
 0x169   :  { %v722_v50 = vadd.f32 %v721_v15, %v569_v49 }
 0x16a   :  { %v1013_v51 = vpop.f32.mrf.mxu2  ;;  %v1166_v52 = vpop.f32.mrf.mxu3 }
 0x16b   :  { %v828_v56 = vmax.f32 %v722_v50, 0.0  ;;  %1307 = vst [vmem:[%s2776_s4 + $0x70] sm:$0xff] %v1013_v51  ;;  %v731_v57 = vpop.f32.mrf.mxu1 }
 0x16c   :  { %1308 = vst.msk [vmem:[%s2776_s4 + $0x78] sm:$0xff] %vm409_vm0, %v1166_v52 }
 0x16d   :  { %v872_v58 = vpack.c.bf16 %v828_v56, %v827_v55 }
 0x16e   :  { %v571_v60 = vpop.f32.mrf.mxu0 }
 0x16f   :  { %1713 = vmatmul.msk.bf16.gmra.mxu2 %vm894_vm2, %v872_v58  ;;  %1742 = vmatmul.msk.bf16.gmra.mxu3 %vm894_vm2, %v872_v58  ;;  %v572_v1 = vadd.f32 %v2008_v12, %v571_v60 }
 0x171   :  { %610 = vmatmul.bf16.gmra.mxu0 %v1583_v59  ;;  %v725_v5 = vadd.f32 %v724_v25, %v572_v1  ;;  %v1607_v59 = vor.u32 %v1808_v54, %v1606_v53  ;;  %v1630_v53 = vld [vmem:[%s2773_s0 + $0x1b0] sm:$0xf]  ;;  %v1814_v54 = vld [vmem:[%s2773_s0 + $0x1b4] sm:$0xf0] }
 0x172   :  { %v1016_v63 = vpop.f32.mrf.mxu2  ;;  %v1169_v0 = vpop.f32.mrf.mxu3 }
 0x173   :  { %1309 = vst [vmem:[%s2776_s4 + $0x80] sm:$0xff] %v1016_v63  ;;  %v734_v3 = vpop.f32.mrf.mxu1  ;;  %v829_v13 = vmax.f32 %v725_v5, 0.0 }
 0x174   :  { %1310 = vst.msk [vmem:[%s2776_s4 + $0x88] sm:$0xff] %vm409_vm0, %v1169_v0 }
 0x175   :  { %1695 = vmatmul.msk.bf16.gmra.mxu1 %vm409_vm0, %v1603_v2  ;;  %v1627_v2 = vor.u32 %v1811_v61, %v1624_v62 }
 0x176   :  { %v573_v4 = vpop.f32.mrf.mxu0 }
 0x177   :  { %v574_v6 = vadd.f32 %v2008_v12, %v573_v4 }
 0x179   :  { %v727_v7 = vadd.f32 %v726_v36, %v574_v6 }
 0x17a   :  { %v1018_v8 = vpop.f32.mrf.mxu2  ;;  %v1171_v9 = vpop.f32.mrf.mxu3 }
 0x17b   :  { %v830_v14 = vmax.f32 %v727_v7, 0.0  ;;  %1311 = vst [vmem:[%s2776_s4 + $0x90] sm:$0xff] %v1018_v8  ;;  %v736_v15 = vpop.f32.mrf.mxu1 }
 0x17c   :  { %1312 = vst.msk [vmem:[%s2776_s4 + $0x98] sm:$0xff] %vm409_vm0, %v1171_v9 }
 0x17d   :  { %v873_v16 = vpack.c.bf16 %v830_v14, %v829_v13 }
 0x17e   :  { %v576_v18 = vpop.f32.mrf.mxu0 }
 0x17f   :  { %1714 = vmatmul.msk.bf16.gmra.mxu2 %vm894_vm2, %v873_v16  ;;  %1743 = vmatmul.msk.bf16.gmra.mxu3 %vm894_vm2, %v873_v16  ;;  %v577_v23 = vadd.f32 %v2008_v12, %v576_v18 }
 0x181   :  { %615 = vmatmul.bf16.gmra.mxu0 %v1591_v17  ;;  %v730_v27 = vadd.f32 %v729_v46, %v577_v23  ;;  %v1615_v17 = vor.u32 %v1810_v11, %v1614_v10 }
 0x182   :  { %v1021_v21 = vpop.f32.mrf.mxu2  ;;  %v1174_v22 = vpop.f32.mrf.mxu3 }
 0x183   :  { %1313 = vst [vmem:[%s2776_s4 + $0xa0] sm:$0xff] %v1021_v21  ;;  %v739_v25 = vpop.f32.mrf.mxu1  ;;  %v831_v34 = vmax.f32 %v730_v27, 0.0 }
 0x184   :  { %1314 = vst.msk [vmem:[%s2776_s4 + $0xa8] sm:$0xff] %vm409_vm0, %v1174_v22 }
 0x185   :  { %1696 = vmatmul.msk.bf16.gmra.mxu1 %vm409_vm0, %v1611_v24  ;;  %v1635_v24 = vor.u32 %v1813_v19, %v1632_v20 }
 0x186   :  { %v578_v26 = vpop.f32.mrf.mxu0 }
 0x187   :  { %v579_v28 = vadd.f32 %v2008_v12, %v578_v26 }
 0x189   :  { %v732_v29 = vadd.f32 %v731_v57, %v579_v28 }
 0x18a   :  { %v1023_v30 = vpop.f32.mrf.mxu2  ;;  %v1176_v31 = vpop.f32.mrf.mxu3 }
 0x18b   :  { %v832_v35 = vmax.f32 %v732_v29, 0.0  ;;  %1315 = vst [vmem:[%s2776_s4 + $0xb0] sm:$0xff] %v1023_v30  ;;  %v741_v36 = vpop.f32.mrf.mxu1 }
 0x18c   :  { %1316 = vst.msk [vmem:[%s2776_s4 + $0xb8] sm:$0xff] %vm409_vm0, %v1176_v31 }
 0x18d   :  { %v874_v37 = vpack.c.bf16 %v832_v35, %v831_v34 }
 0x18e   :  { %v581_v39 = vpop.f32.mrf.mxu0 }
 0x18f   :  { %1715 = vmatmul.msk.bf16.gmra.mxu2 %vm894_vm2, %v874_v37  ;;  %1744 = vmatmul.msk.bf16.gmra.mxu3 %vm894_vm2, %v874_v37  ;;  %v582_v44 = vadd.f32 %v2008_v12, %v581_v39 }
 0x191   :  { %620 = vmatmul.bf16.gmra.mxu0 %v1599_v38  ;;  %v735_v48 = vadd.f32 %v734_v3, %v582_v44  ;;  %v1623_v38 = vor.u32 %v1812_v33, %v1622_v32 }
 0x192   :  { %v1026_v42 = vpop.f32.mrf.mxu2  ;;  %v1179_v43 = vpop.f32.mrf.mxu3 }
 0x193   :  { %1317 = vst [vmem:[%s2776_s4 + $0xc0] sm:$0xff] %v1026_v42  ;;  %v744_v46 = vpop.f32.mrf.mxu1  ;;  %v833_v55 = vmax.f32 %v735_v48, 0.0 }
 0x194   :  { %1318 = vst.msk [vmem:[%s2776_s4 + $0xc8] sm:$0xff] %vm409_vm0, %v1179_v43 }
 0x195   :  { %1697 = vmatmul.msk.bf16.gmra.mxu1 %vm409_vm0, %v1619_v45  ;;  %v325_v45 = vpack.c.b16 %v267_v41, %v267_v41 }
 0x196   :  { %v583_v47 = vpop.f32.mrf.mxu0 }
 0x197   :  { %v584_v49 = vadd.f32 %v2008_v12, %v583_v47 }
 0x199   :  { %v737_v50 = vadd.f32 %v736_v15, %v584_v49 }
 0x19a   :  { %v1028_v51 = vpop.f32.mrf.mxu2  ;;  %v1181_v52 = vpop.f32.mrf.mxu3 }
 0x19b   :  { %v834_v56 = vmax.f32 %v737_v50, 0.0  ;;  %1319 = vst [vmem:[%s2776_s4 + $0xd0] sm:$0xff] %v1028_v51  ;;  %v746_v57 = vpop.f32.mrf.mxu1 }
 0x19c   :  { %1320 = vst.msk [vmem:[%s2776_s4 + $0xd8] sm:$0xff] %vm409_vm0, %v1181_v52 }
 0x19d   :  { %v875_v58 = vpack.c.bf16 %v834_v56, %v833_v55 }
 0x19e   :  { %v586_v60 = vpop.f32.mrf.mxu0 }
 0x19f   :  { %1716 = vmatmul.msk.bf16.gmra.mxu2 %vm894_vm2, %v875_v58  ;;  %1745 = vmatmul.msk.bf16.gmra.mxu3 %vm894_vm2, %v875_v58  ;;  %v587_v1 = vadd.f32 %v2008_v12, %v586_v60 }
 0x1a1   :  { %625 = vmatmul.bf16.gmra.mxu0 %v1607_v59  ;;  %v740_v5 = vadd.f32 %v739_v25, %v587_v1  ;;  %v1631_v59 = vor.u32 %v1814_v54, %v1630_v53 }
 0x1a2   :  { %v1031_v63 = vpop.f32.mrf.mxu2  ;;  %v1184_v0 = vpop.f32.mrf.mxu3 }
 0x1a3   :  { %1321 = vst [vmem:[%s2776_s4 + $0xe0] sm:$0xff] %v1031_v63  ;;  %v749_v3 = vpop.f32.mrf.mxu1  ;;  %v835_v13 = vmax.f32 %v740_v5, 0.0  ;;  %v266_v5 = vunpack.c.l.b16 %v74_v40 }
 0x1a4   :  { %1322 = vst.msk [vmem:[%s2776_s4 + $0xe8] sm:$0xff] %vm409_vm0, %v1184_v0 }
 0x1a5   :  { %1698 = vmatmul.msk.bf16.gmra.mxu1 %vm409_vm0, %v1627_v2 }
 0x1a6   :  { %v588_v4 = vpop.f32.mrf.mxu0 }
 0x1a7   :  { %v589_v6 = vadd.f32 %v2008_v12, %v588_v4 }
 0x1a9   :  { %v742_v7 = vadd.f32 %v741_v36, %v589_v6 }
 0x1aa   :  { %v1033_v8 = vpop.f32.mrf.mxu2  ;;  %v1186_v9 = vpop.f32.mrf.mxu3 }
 0x1ab   :  { %v836_v14 = vmax.f32 %v742_v7, 0.0  ;;  %1323 = vst [vmem:[%s2776_s4 + $0xf0] sm:$0xff] %v1033_v8  ;;  %v751_v15 = vpop.f32.mrf.mxu1 }
 0x1ac   :  { %1324 = vst.msk [vmem:[%s2776_s4 + $0xf8] sm:$0xff] %vm409_vm0, %v1186_v9 }
 0x1ad   :  { %v876_v16 = vpack.c.bf16 %v836_v14, %v835_v13  ;;  %v324_v13 = vpack.c.b16 %v266_v5, %v266_v5 }
 0x1ae   :  { %v591_v18 = vpop.f32.mrf.mxu0 }
 0x1af   :  { %1717 = vmatmul.msk.bf16.gmra.mxu2 %vm894_vm2, %v876_v16  ;;  %1746 = vmatmul.msk.bf16.gmra.mxu3 %vm894_vm2, %v876_v16  ;;  %v592_v23 = vadd.f32 %v2008_v12, %v591_v18 }
 0x1b1   :  { %630 = vmatmul.bf16.gmra.mxu0 %v1615_v17  ;;  %v745_v27 = vadd.f32 %v744_v46, %v592_v23 }
 0x1b2   :  { %v1036_v21 = vpop.f32.mrf.mxu2  ;;  %v1189_v22 = vpop.f32.mrf.mxu3 }
 0x1b3   :  { %1325 = vst [vmem:[%s2776_s4 + $0x100] sm:$0xff] %v1036_v21  ;;  %v754_v25 = vpop.f32.mrf.mxu1  ;;  %v837_v34 = vmax.f32 %v745_v27, 0.0  ;;  %v2499_v21 = vld [vmem:[%s2774_s2] ss:$0 sm:$0xff] }
 0x1b4   :  { %1326 = vst.msk [vmem:[%s2776_s4 + $0x108] sm:$0xff] %vm409_vm0, %v1189_v22 }
 0x1b5   :  { %1699 = vmatmul.msk.bf16.gmra.mxu1 %vm409_vm0, %v1635_v24 }
 0x1b6   :  { %v593_v26 = vpop.f32.mrf.mxu0 }
 0x1b7   :  { %v594_v28 = vadd.f32 %v2008_v12, %v593_v26 }
 0x1b9   :  { %v747_v29 = vadd.f32 %v746_v57, %v594_v28 }
 0x1ba   :  { %v1038_v30 = vpop.f32.mrf.mxu2  ;;  %v1191_v31 = vpop.f32.mrf.mxu3 }
 0x1bb   :  { %v838_v35 = vmax.f32 %v747_v29, 0.0  ;;  %1327 = vst [vmem:[%s2776_s4 + $0x110] sm:$0xff] %v1038_v30  ;;  %v756_v36 = vpop.f32.mrf.mxu1 }
 0x1bc   :  { %1328 = vst.msk [vmem:[%s2776_s4 + $0x118] sm:$0xff] %vm409_vm0, %v1191_v31 }
 0x1bd   :  { %v877_v37 = vpack.c.bf16 %v838_v35, %v837_v34 }
 0x1be   :  { %v596_v39 = vpop.f32.mrf.mxu0 }
 0x1bf   :  { %1718 = vmatmul.msk.bf16.gmra.mxu2 %vm894_vm2, %v877_v37  ;;  %1747 = vmatmul.msk.bf16.gmra.mxu3 %vm894_vm2, %v877_v37  ;;  %v597_v44 = vadd.f32 %v2008_v12, %v596_v39 }
 0x1c1   :  { %635 = vmatmul.bf16.gmra.mxu0 %v1623_v38  ;;  %v750_v48 = vadd.f32 %v749_v3, %v597_v44 }
 0x1c2   :  { %v1041_v42 = vpop.f32.mrf.mxu2  ;;  %v1194_v43 = vpop.f32.mrf.mxu3 }
 0x1c3   :  { %1329 = vst [vmem:[%s2776_s4 + $0x120] sm:$0xff] %v1041_v42  ;;  %v759_v46 = vpop.f32.mrf.mxu1  ;;  %v839_v55 = vmax.f32 %v750_v48, 0.0 }
 0x1c4   :  { %1330 = vst.msk [vmem:[%s2776_s4 + $0x128] sm:$0xff] %vm409_vm0, %v1194_v43 }
 0x1c5   :  { %1700 = vmatmul.msk.bf16.gmra.mxu1 %vm409_vm0, %v325_v45 }
 0x1c6   :  { %v598_v47 = vpop.f32.mrf.mxu0 }
 0x1c7   :  { %v599_v49 = vadd.f32 %v2008_v12, %v598_v47 }
 0x1c9   :  { %v752_v50 = vadd.f32 %v751_v15, %v599_v49 }
 0x1ca   :  { %v1043_v51 = vpop.f32.mrf.mxu2  ;;  %v1196_v52 = vpop.f32.mrf.mxu3 }
 0x1cb   :  { %v840_v56 = vmax.f32 %v752_v50, 0.0  ;;  %1331 = vst [vmem:[%s2776_s4 + $0x130] sm:$0xff] %v1043_v51  ;;  %v761_v57 = vpop.f32.mrf.mxu1 }
 0x1cc   :  { %1332 = vst.msk [vmem:[%s2776_s4 + $0x138] sm:$0xff] %vm409_vm0, %v1196_v52 }
 0x1cd   :  { %v878_v58 = vpack.c.bf16 %v840_v56, %v839_v55 }
 0x1ce   :  { %v601_v60 = vpop.f32.mrf.mxu0 }
 0x1cf   :  { %1719 = vmatmul.msk.bf16.gmra.mxu2 %vm894_vm2, %v878_v58  ;;  %1748 = vmatmul.msk.bf16.gmra.mxu3 %vm894_vm2, %v878_v58  ;;  %v602_v63 = vadd.f32 %v2008_v12, %v601_v60 }
 0x1d1   :  { %640 = vmatmul.bf16.gmra.mxu0 %v1631_v59  ;;  %v755_v2 = vadd.f32 %v754_v25, %v602_v63 }
 0x1d2   :  { %v1046_v61 = vpop.f32.mrf.mxu2  ;;  %v1199_v62 = vpop.f32.mrf.mxu3 }
 0x1d3   :  { %1333 = vst [vmem:[%s2776_s4 + $0x140] sm:$0xff] %v1046_v61  ;;  %v764_v0 = vpop.f32.mrf.mxu1  ;;  %v841_v8 = vmax.f32 %v755_v2, 0.0 }
 0x1d4   :  { %1334 = vst.msk [vmem:[%s2776_s4 + $0x148] sm:$0xff] %vm409_vm0, %v1199_v62 }
 0x1d6   :  { %v603_v1 = vpop.f32.mrf.mxu0 }
 0x1d7   :  { %v604_v3 = vadd.f32 %v2008_v12, %v603_v1 }
 0x1d9   :  { %v757_v4 = vadd.f32 %v756_v36, %v604_v3 }
 0x1da   :  { %v1048_v6 = vpop.f32.mrf.mxu2  ;;  %v1201_v7 = vpop.f32.mrf.mxu3 }
 0x1db   :  { %v842_v9 = vmax.f32 %v757_v4, 0.0  ;;  %1335 = vst [vmem:[%s2776_s4 + $0x150] sm:$0xff] %v1048_v6  ;;  %v766_v10 = vpop.f32.mrf.mxu1 }
 0x1dc   :  { %1336 = vst.msk [vmem:[%s2776_s4 + $0x158] sm:$0xff] %vm409_vm0, %v1201_v7 }
 0x1dd   :  { %v879_v11 = vpack.c.bf16 %v842_v9, %v841_v8 }
 0x1de   :  { %v606_v14 = vpop.f32.mrf.mxu0 }
 0x1df   :  { %1720 = vmatmul.msk.bf16.gmra.mxu2 %vm894_vm2, %v879_v11  ;;  %1749 = vmatmul.msk.bf16.gmra.mxu3 %vm894_vm2, %v879_v11  ;;  %v607_v17 = vadd.f32 %v2008_v12, %v606_v14 }
 0x1e1   :  { %645 = vmatmul.bf16.gmra.mxu0 %v324_v13  ;;  %v760_v20 = vadd.f32 %v759_v46, %v607_v17 }
 0x1e2   :  { %v1051_v15 = vpop.f32.mrf.mxu2  ;;  %v1204_v16 = vpop.f32.mrf.mxu3 }
 0x1e3   :  { %1337 = vst [vmem:[%s2776_s4 + $0x160] sm:$0xff] %v1051_v15  ;;  %v769_v18 = vpop.f32.mrf.mxu1  ;;  %v843_v25 = vmax.f32 %v760_v20, 0.0 }
 0x1e4   :  { %1338 = vst.msk [vmem:[%s2776_s4 + $0x168] sm:$0xff] %vm409_vm0, %v1204_v16 }
 0x1e6   :  { %v608_v19 = vpop.f32.mrf.mxu0 }
 0x1e7   :  { %v609_v22 = vadd.f32 %v2499_v21, %v608_v19 }
 0x1e9   :  { %v762_v12 = vadd.f32 %v761_v57, %v609_v22 }
 0x1ea   :  { %v1053_v23 = vpop.f32.mrf.mxu2  ;;  %v1206_v24 = vpop.f32.mrf.mxu3 }
 0x1eb   :  { %v844_v26 = vmax.f32 %v762_v12, 0.0  ;;  %1339 = vst [vmem:[%s2776_s4 + $0x170] sm:$0xff] %v1053_v23  ;;  %v771_v27 = vpop.f32.mrf.mxu1 }
 0x1ec   :  { %1340 = vst.msk [vmem:[%s2776_s4 + $0x178] sm:$0xff] %vm409_vm0, %v1206_v24 }
 0x1ed   :  { %v880_v28 = vpack.c.bf16 %v844_v26, %v843_v25 }
 0x1ee   :  { %v611_v29 = vpop.f32.mrf.mxu0 }
 0x1ef   :  { %1721 = vmatmul.msk.bf16.gmra.mxu2 %vm894_vm2, %v880_v28  ;;  %1750 = vmatmul.msk.bf16.gmra.mxu3 %vm894_vm2, %v880_v28  ;;  %v612_v32 = vadd.f32 %v2499_v21, %v611_v29 }
 0x1f1   :  { %v765_v35 = vadd.f32 %v764_v0, %v612_v32 }
 0x1f2   :  { %v1056_v30 = vpop.f32.mrf.mxu2  ;;  %v1209_v31 = vpop.f32.mrf.mxu3 }
 0x1f3   :  { %1341 = vst [vmem:[%s2776_s4 + $0x180] sm:$0xff] %v1056_v30  ;;  %v774_v33 = vpop.f32.mrf.mxu1  ;;  %v845_v40 = vmax.f32 %v765_v35, 0.0 }
 0x1f4   :  { %1342 = vst.msk [vmem:[%s2776_s4 + $0x188] sm:$0xff] %vm409_vm0, %v1209_v31 }
 0x1f6   :  { %v613_v34 = vpop.f32.mrf.mxu0 }
 0x1f7   :  { %v614_v36 = vadd.f32 %v2499_v21, %v613_v34 }
 0x1f9   :  { %v767_v37 = vadd.f32 %v766_v10, %v614_v36 }
 0x1fa   :  { %v1058_v38 = vpop.f32.mrf.mxu2  ;;  %v1211_v39 = vpop.f32.mrf.mxu3 }
 0x1fb   :  { %v846_v41 = vmax.f32 %v767_v37, 0.0  ;;  %1343 = vst [vmem:[%s2776_s4 + $0x190] sm:$0xff] %v1058_v38  ;;  %v776_v42 = vpop.f32.mrf.mxu1 }
 0x1fc   :  { %1344 = vst.msk [vmem:[%s2776_s4 + $0x198] sm:$0xff] %vm409_vm0, %v1211_v39 }
 0x1fd   :  { %v881_v43 = vpack.c.bf16 %v846_v41, %v845_v40 }
 0x1fe   :  { %v616_v44 = vpop.f32.mrf.mxu0 }
 0x1ff   :  { %1722 = vmatmul.msk.bf16.gmra.mxu2 %vm894_vm2, %v881_v43  ;;  %1751 = vmatmul.msk.bf16.gmra.mxu3 %vm894_vm2, %v881_v43  ;;  %v617_v47 = vadd.f32 %v2499_v21, %v616_v44 }
 0x201   :  { %v770_v50 = vadd.f32 %v769_v18, %v617_v47 }
 0x202   :  { %v1061_v45 = vpop.f32.mrf.mxu2  ;;  %v1214_v46 = vpop.f32.mrf.mxu3 }
 0x203   :  { %1345 = vst [vmem:[%s2776_s4 + $0x1a0] sm:$0xff] %v1061_v45  ;;  %v779_v48 = vpop.f32.mrf.mxu1  ;;  %v847_v55 = vmax.f32 %v770_v50, 0.0 }
 0x204   :  { %1346 = vst.msk [vmem:[%s2776_s4 + $0x1a8] sm:$0xff] %vm409_vm0, %v1214_v46 }
 0x206   :  { %v618_v49 = vpop.f32.mrf.mxu0 }
 0x207   :  { %v619_v51 = vadd.f32 %v2499_v21, %v618_v49 }
 0x209   :  { %v772_v52 = vadd.f32 %v771_v27, %v619_v51 }
 0x20a   :  { %v1063_v53 = vpop.f32.mrf.mxu2  ;;  %v1216_v54 = vpop.f32.mrf.mxu3 }
 0x20b   :  { %v848_v56 = vmax.f32 %v772_v52, 0.0  ;;  %1347 = vst [vmem:[%s2776_s4 + $0x1b0] sm:$0xff] %v1063_v53  ;;  %v781_v57 = vpop.f32.mrf.mxu1 }
 0x20c   :  { %1348 = vst.msk [vmem:[%s2776_s4 + $0x1b8] sm:$0xff] %vm409_vm0, %v1216_v54 }
 0x20d   :  { %v882_v58 = vpack.c.bf16 %v848_v56, %v847_v55 }
 0x20e   :  { %v621_v59 = vpop.f32.mrf.mxu0 }
 0x20f   :  { %1723 = vmatmul.msk.bf16.gmra.mxu2 %vm894_vm2, %v882_v58  ;;  %1752 = vmatmul.msk.bf16.gmra.mxu3 %vm894_vm2, %v882_v58  ;;  %v622_v62 = vadd.f32 %v2499_v21, %v621_v59 }
 0x211   :  { %v775_v1 = vadd.f32 %v774_v33, %v622_v62 }
 0x212   :  { %v1066_v60 = vpop.f32.mrf.mxu2  ;;  %v1219_v61 = vpop.f32.mrf.mxu3 }
 0x213   :  { %1349 = vst [vmem:[%s2776_s4 + $0x1c0] sm:$0xff] %v1066_v60  ;;  %v784_v63 = vpop.f32.mrf.mxu1  ;;  %v849_v6 = vmax.f32 %v775_v1, 0.0 }
 0x214   :  { %1350 = vst.msk [vmem:[%s2776_s4 + $0x1c8] sm:$0xff] %vm409_vm0, %v1219_v61 }
 0x216   :  { %v623_v0 = vpop.f32.mrf.mxu0 }
 0x217   :  { %v624_v2 = vadd.f32 %v2499_v21, %v623_v0 }
 0x219   :  { %v777_v3 = vadd.f32 %v776_v42, %v624_v2 }
 0x21a   :  { %v1068_v4 = vpop.f32.mrf.mxu2  ;;  %v1221_v5 = vpop.f32.mrf.mxu3 }
 0x21b   :  { %v850_v7 = vmax.f32 %v777_v3, 0.0  ;;  %1351 = vst [vmem:[%s2776_s4 + $0x1d0] sm:$0xff] %v1068_v4  ;;  %v786_v8 = vpop.f32.mrf.mxu1 }
 0x21c   :  { %1352 = vst.msk [vmem:[%s2776_s4 + $0x1d8] sm:$0xff] %vm409_vm0, %v1221_v5 }
 0x21d   :  { %v883_v9 = vpack.c.bf16 %v850_v7, %v849_v6 }
 0x21e   :  { %v626_v10 = vpop.f32.mrf.mxu0 }
 0x21f   :  { %1724 = vmatmul.msk.bf16.gmra.mxu2 %vm894_vm2, %v883_v9  ;;  %1753 = vmatmul.msk.bf16.gmra.mxu3 %vm894_vm2, %v883_v9  ;;  %v627_v14 = vadd.f32 %v2499_v21, %v626_v10 }
 0x221   :  { %v780_v17 = vadd.f32 %v779_v48, %v627_v14 }
 0x222   :  { %v1071_v11 = vpop.f32.mrf.mxu2  ;;  %v1224_v13 = vpop.f32.mrf.mxu3 }
 0x223   :  { %1353 = vst [vmem:[%s2776_s4 + $0x1e0] sm:$0xff] %v1071_v11  ;;  %v789_v15 = vpop.f32.mrf.mxu1  ;;  %v851_v12 = vmax.f32 %v780_v17, 0.0 }
 0x224   :  { %1354 = vst.msk [vmem:[%s2776_s4 + $0x1e8] sm:$0xff] %vm409_vm0, %v1224_v13 }
 0x226   :  { %v628_v16 = vpop.f32.mrf.mxu0 }
 0x227   :  { %v629_v18 = vadd.f32 %v2499_v21, %v628_v16 }
 0x229   :  { %v782_v19 = vadd.f32 %v781_v57, %v629_v18 }
 0x22a   :  { %v1073_v20 = vpop.f32.mrf.mxu2  ;;  %v1226_v22 = vpop.f32.mrf.mxu3 }
 0x22b   :  { %v852_v23 = vmax.f32 %v782_v19, 0.0  ;;  %1355 = vst [vmem:[%s2776_s4 + $0x1f0] sm:$0xff] %v1073_v20  ;;  %v791_v24 = vpop.f32.mrf.mxu1 }
 0x22c   :  { %1356 = vst.msk [vmem:[%s2776_s4 + $0x1f8] sm:$0xff] %vm409_vm0, %v1226_v22 }
 0x22d   :  { %v884_v25 = vpack.c.bf16 %v852_v23, %v851_v12 }
 0x22e   :  { %v631_v26 = vpop.f32.mrf.mxu0 }
 0x22f   :  { %1725 = vmatmul.msk.bf16.gmra.mxu2 %vm894_vm2, %v884_v25  ;;  %1754 = vmatmul.msk.bf16.gmra.mxu3 %vm894_vm2, %v884_v25  ;;  %v632_v29 = vadd.f32 %v2499_v21, %v631_v26 }
 0x231   :  { %v785_v32 = vadd.f32 %v784_v63, %v632_v29 }
 0x232   :  { %v1076_v27 = vpop.f32.mrf.mxu2  ;;  %v1229_v28 = vpop.f32.mrf.mxu3 }
 0x233   :  { %1357 = vst [vmem:[%s2776_s4 + $0x200] sm:$0xff] %v1076_v27  ;;  %v794_v30 = vpop.f32.mrf.mxu1  ;;  %v853_v37 = vmax.f32 %v785_v32, 0.0 }
 0x234   :  { %1358 = vst.msk [vmem:[%s2776_s4 + $0x208] sm:$0xff] %vm409_vm0, %v1229_v28 }
 0x236   :  { %v633_v31 = vpop.f32.mrf.mxu0 }
 0x237   :  { %v634_v33 = vadd.f32 %v2499_v21, %v633_v31 }
 0x239   :  { %v787_v34 = vadd.f32 %v786_v8, %v634_v33 }
 0x23a   :  { %v1078_v35 = vpop.f32.mrf.mxu2  ;;  %v1231_v36 = vpop.f32.mrf.mxu3 }
 0x23b   :  { %v854_v38 = vmax.f32 %v787_v34, 0.0  ;;  %1359 = vst [vmem:[%s2776_s4 + $0x210] sm:$0xff] %v1078_v35  ;;  %v796_v39 = vpop.f32.mrf.mxu1 }
 0x23c   :  { %1360 = vst.msk [vmem:[%s2776_s4 + $0x218] sm:$0xff] %vm409_vm0, %v1231_v36 }
 0x23d   :  { %v885_v40 = vpack.c.bf16 %v854_v38, %v853_v37 }
 0x23e   :  { %v636_v41 = vpop.f32.mrf.mxu0 }
 0x23f   :  { %1726 = vmatmul.msk.bf16.gmra.mxu2 %vm894_vm2, %v885_v40  ;;  %1755 = vmatmul.msk.bf16.gmra.mxu3 %vm894_vm2, %v885_v40  ;;  %v637_v44 = vadd.f32 %v2499_v21, %v636_v41 }
 0x241   :  { %v790_v47 = vadd.f32 %v789_v15, %v637_v44 }
 0x242   :  { %v1081_v42 = vpop.f32.mrf.mxu2  ;;  %v1234_v43 = vpop.f32.mrf.mxu3 }
 0x243   :  { %1361 = vst [vmem:[%s2776_s4 + $0x220] sm:$0xff] %v1081_v42  ;;  %v799_v45 = vpop.f32.mrf.mxu1  ;;  %v855_v52 = vmax.f32 %v790_v47, 0.0 }
 0x244   :  { %1362 = vst.msk [vmem:[%s2776_s4 + $0x228] sm:$0xff] %vm409_vm0, %v1234_v43 }
 0x246   :  { %v638_v46 = vpop.f32.mrf.mxu0 }
 0x247   :  { %v639_v48 = vadd.f32 %v2499_v21, %v638_v46 }
 0x249   :  { %v792_v49 = vadd.f32 %v791_v24, %v639_v48 }
 0x24a   :  { %v1083_v50 = vpop.f32.mrf.mxu2  ;;  %v1236_v51 = vpop.f32.mrf.mxu3 }
 0x24b   :  { %v856_v53 = vmax.f32 %v792_v49, 0.0  ;;  %1363 = vst [vmem:[%s2776_s4 + $0x230] sm:$0xff] %v1083_v50  ;;  %v801_v54 = vpop.f32.mrf.mxu1 }
 0x24c   :  { %1364 = vst.msk [vmem:[%s2776_s4 + $0x238] sm:$0xff] %vm409_vm0, %v1236_v51 }
 0x24d   :  { %v886_v55 = vpack.c.bf16 %v856_v53, %v855_v52 }
 0x24e   :  { %v641_v56 = vpop.f32.mrf.mxu0 }
 0x24f   :  { %1727 = vmatmul.msk.bf16.gmra.mxu2 %vm894_vm2, %v886_v55  ;;  %1756 = vmatmul.msk.bf16.gmra.mxu3 %vm894_vm2, %v886_v55  ;;  %v642_v59 = vadd.f32 %v2499_v21, %v641_v56 }
 0x251   :  { %v795_v61 = vadd.f32 %v794_v30, %v642_v59 }
 0x252   :  { %v1086_v57 = vpop.f32.mrf.mxu2  ;;  %v1239_v58 = vpop.f32.mrf.mxu3 }
 0x253   :  { %1365 = vst [vmem:[%s2776_s4 + $0x240] sm:$0xff] %v1086_v57  ;;  %v857_v2 = vmax.f32 %v795_v61, 0.0 }
 0x254   :  { %1366 = vst.msk [vmem:[%s2776_s4 + $0x248] sm:$0xff] %vm409_vm0, %v1239_v58 }
 0x256   :  { %v643_v60 = vpop.f32.mrf.mxu0 }
 0x257   :  { %v644_v62 = vadd.f32 %v2499_v21, %v643_v60 }
 0x259   :  { %v797_v63 = vadd.f32 %v796_v39, %v644_v62 }
 0x25a   :  { %v1088_v0 = vpop.f32.mrf.mxu2  ;;  %v1241_v1 = vpop.f32.mrf.mxu3 }
 0x25b   :  { %v858_v3 = vmax.f32 %v797_v63, 0.0  ;;  %1367 = vst [vmem:[%s2776_s4 + $0x250] sm:$0xff] %v1088_v0 }
 0x25c   :  { %1368 = vst.msk [vmem:[%s2776_s4 + $0x258] sm:$0xff] %vm409_vm0, %v1241_v1 }
 0x25d   :  { %v887_v4 = vpack.c.bf16 %v858_v3, %v857_v2 }
 0x25e   :  { %v646_v5 = vpop.f32.mrf.mxu0 }
 0x25f   :  { %v647_v6 = vadd.f32 %v2499_v21, %v646_v5  ;;  %1728 = vmatmul.msk.bf16.gmra.mxu2 %vm894_vm2, %v887_v4  ;;  %1757 = vmatmul.msk.bf16.gmra.mxu3 %vm894_vm2, %v887_v4 }
 0x261   :  { %v800_v9 = vadd.f32 %v799_v45, %v647_v6 }
 0x262   :  { %v1091_v7 = vpop.f32.mrf.mxu2  ;;  %v1244_v8 = vpop.f32.mrf.mxu3 }
 0x263   :  { %1369 = vst [vmem:[%s2776_s4 + $0x260] sm:$0xff] %v1091_v7  ;;  %v859_v11 = vmax.f32 %v800_v9, 0.0 }
 0x264   :  { %1370 = vst.msk [vmem:[%s2776_s4 + $0x268] sm:$0xff] %vm409_vm0, %v1244_v8 }
 0x265   :  { %v888_v14 = vpack.c.bf16 %v859_v11, %v859_v11 }
 0x266   :  { %v648_v10 = vpop.f32.mrf.mxu0 }
 0x26a   :  { %v1093_v13 = vpop.f32.mrf.mxu2  ;;  %v1246_v21 = vpop.f32.mrf.mxu3 }
 0x26b   :  { %1371 = vst [vmem:[%s2776_s4 + $0x270] sm:$0xff] %v1093_v13 }
 0x26c   :  { %1372 = vst.msk [vmem:[%s2776_s4 + $0x278] sm:$0xff] %vm409_vm0, %v1246_v21 }
 0x26f   :  { %1729 = vmatmul.msk.bf16.gmra.mxu2 %vm894_vm2, %v888_v14  ;;  %1758 = vmatmul.msk.bf16.gmra.mxu3 %vm894_vm2, %v888_v14 }
 0x272   :  { %v1096_v15 = vpop.f32.mrf.mxu2  ;;  %v1249_v16 = vpop.f32.mrf.mxu3 }
 0x273   :  { %1373 = vst [vmem:[%s2776_s4 + $0x280] sm:$0xff] %v1096_v15 }
 0x274   :  { %1374 = vst.msk [vmem:[%s2776_s4 + $0x288] sm:$0xff] %vm409_vm0, %v1249_v16 }
 0x27a   :  { %v1098_v17 = vpop.f32.mrf.mxu2  ;;  %v1251_v18 = vpop.f32.mrf.mxu3 }
 0x27b   :  { %1375 = vst [vmem:[%s2776_s4 + $0x290] sm:$0xff] %v1098_v17 }
 0x27c   :  { %1376 = vst.msk [vmem:[%s2776_s4 + $0x298] sm:$0xff] %vm409_vm0, %v1251_v18 }
 0x282   :  { %v1101_v19 = vpop.f32.mrf.mxu2  ;;  %v1254_v20 = vpop.f32.mrf.mxu3 }
 0x283   :  { %1377 = vst [vmem:[%s2776_s4 + $0x2a0] sm:$0xff] %v1101_v19 }
 0x284   :  { %1378 = vst.msk [vmem:[%s2776_s4 + $0x2a8] sm:$0xff] %vm409_vm0, %v1254_v20 }
 0x28a   :  { %v1103_v22 = vpop.f32.mrf.mxu2  ;;  %v1256_v12 = vpop.f32.mrf.mxu3 }
 0x28b   :  { %1379 = vst [vmem:[%s2776_s4 + $0x2b0] sm:$0xff] %v1103_v22 }
 0x28c   :  { %1380 = vst.msk [vmem:[%s2776_s4 + $0x2b8] sm:$0xff] %vm409_vm0, %v1256_v12 }
 0x292   :  { %v1106_v23 = vpop.f32.mrf.mxu2  ;;  %v1259_v24 = vpop.f32.mrf.mxu3 }
 0x293   :  { %1381 = vst [vmem:[%s2776_s4 + $0x2c0] sm:$0xff] %v1106_v23 }
 0x294   :  { %1382 = vst.msk [vmem:[%s2776_s4 + $0x2c8] sm:$0xff] %vm409_vm0, %v1259_v24 }
 0x29a   :  { %v1108_v25 = vpop.f32.mrf.mxu2  ;;  %v1261_v26 = vpop.f32.mrf.mxu3 }
 0x29b   :  { %1383 = vst [vmem:[%s2776_s4 + $0x2d0] sm:$0xff] %v1108_v25 }
 0x29c   :  { %1384 = vst.msk [vmem:[%s2776_s4 + $0x2d8] sm:$0xff] %vm409_vm0, %v1261_v26 }
 0x2a2   :  { %v1111_v27 = vpop.f32.mrf.mxu2  ;;  %v1264_v28 = vpop.f32.mrf.mxu3 }
 0x2a3   :  { %1385 = vst [vmem:[%s2776_s4 + $0x2e0] sm:$0xff] %v1111_v27 }
 0x2a4   :  { %1386 = vst.msk [vmem:[%s2776_s4 + $0x2e8] sm:$0xff] %vm409_vm0, %v1264_v28 }
 0x2aa   :  { %v1113_v29 = vpop.f32.mrf.mxu2  ;;  %v1266_v30 = vpop.f32.mrf.mxu3 }
 0x2ab   :  { %1387 = vst [vmem:[%s2776_s4 + $0x2f0] sm:$0xff] %v1113_v29 }
 0x2ac   :  { %1388 = vst.msk [vmem:[%s2776_s4 + $0x2f8] sm:$0xff] %vm409_vm0, %v1266_v30 }
 0x2b2   :  { %v1116_v31 = vpop.f32.mrf.mxu2  ;;  %v1269_v32 = vpop.f32.mrf.mxu3 }
 0x2b3   :  { %1389 = vst [vmem:[%s2776_s4 + $0x300] sm:$0xff] %v1116_v31 }
 0x2b4   :  { %1390 = vst.msk [vmem:[%s2776_s4 + $0x308] sm:$0xff] %vm409_vm0, %v1269_v32 }
 0x2ba   :  { %v1118_v33 = vpop.f32.mrf.mxu2  ;;  %v1271_v34 = vpop.f32.mrf.mxu3 }
 0x2bb   :  { %1391 = vst [vmem:[%s2776_s4 + $0x310] sm:$0xff] %v1118_v33 }
 0x2bc   :  { %1392 = vst.msk [vmem:[%s2776_s4 + $0x318] sm:$0xff] %vm409_vm0, %v1271_v34 }
 0x2c2   :  { %v1121_v35 = vpop.f32.mrf.mxu2  ;;  %v1274_v36 = vpop.f32.mrf.mxu3 }
 0x2c3   :  { %1393 = vst [vmem:[%s2776_s4 + $0x320] sm:$0xff] %v1121_v35 }
 0x2c4   :  { %1394 = vst.msk [vmem:[%s2776_s4 + $0x328] sm:$0xff] %vm409_vm0, %v1274_v36 }
 0x2ca   :  { %v1123_v37 = vpop.f32.mrf.mxu2  ;;  %v1276_v38 = vpop.f32.mrf.mxu3 }
 0x2cb   :  { %1395 = vst [vmem:[%s2776_s4 + $0x330] sm:$0xff] %v1123_v37 }
 0x2cc   :  { %1396 = vst.msk [vmem:[%s2776_s4 + $0x338] sm:$0xff] %vm409_vm0, %v1276_v38 }
 0x2d2   :  { %v1126_v39 = vpop.f32.mrf.mxu2  ;;  %v1279_v40 = vpop.f32.mrf.mxu3 }
 0x2d3   :  { %1397 = vst [vmem:[%s2776_s4 + $0x340] sm:$0xff] %v1126_v39 }
 0x2d4   :  { %1398 = vst.msk [vmem:[%s2776_s4 + $0x348] sm:$0xff] %vm409_vm0, %v1279_v40 }
 0x2da   :  { %v1128_v41 = vpop.f32.mrf.mxu2  ;;  %v1281_v42 = vpop.f32.mrf.mxu3 }
 0x2db   :  { %1399 = vst [vmem:[%s2776_s4 + $0x350] sm:$0xff] %v1128_v41 }
 0x2dc   :  { %1400 = vst.msk [vmem:[%s2776_s4 + $0x358] sm:$0xff] %vm409_vm0, %v1281_v42 }
 0x2e2   :  { %v1131_v43 = vpop.f32.mrf.mxu2  ;;  %v1284_v44 = vpop.f32.mrf.mxu3 }
 0x2e3   :  { %1401 = vst [vmem:[%s2776_s4 + $0x360] sm:$0xff] %v1131_v43 }
 0x2e4   :  { %1402 = vst.msk [vmem:[%s2776_s4 + $0x368] sm:$0xff] %vm409_vm0, %v1284_v44 }
 0x2ea   :  { %v1133_v45 = vpop.f32.mrf.mxu2  ;;  %v1286_v46 = vpop.f32.mrf.mxu3 }
 0x2eb   :  { %1403 = vst [vmem:[%s2776_s4 + $0x370] sm:$0xff] %v1133_v45 }
 0x2ec   :  { %1404 = vst.msk [vmem:[%s2776_s4 + $0x378] sm:$0xff] %vm409_vm0, %v1286_v46 }
 0x2f2   :  { %v1136_v47 = vpop.f32.mrf.mxu2  ;;  %v1289_v48 = vpop.f32.mrf.mxu3 }
 0x2f3   :  { %1405 = vst [vmem:[%s2776_s4 + $0x380] sm:$0x3] %v1136_v47 }
 0x2f4   :  { %1407 = vst.msk [vmem:[%s2776_s4 + $0x388] sm:$0x3] %vm1406_vm3, %v1289_v48 }
 0x2fa   :  { %v1138_v49 = vpop.f32.mrf.mxu2  ;;  %v1291_v50 = vpop.f32.mrf.mxu3 }

// kernel: conv_autoencoder_shallow_forward.5
= control target key start
LH: loop header
LB: loop body
LE: loop exit
PB: predicated region body
PF: predicated region fallthrough
CT: control target
= control target key end

     0   :  { %vm875_vm0 = vcmask 130048   ;;  %s5913_s2 = inlined_call_operand.vmem [shape: bf16[16,256], index: 2, kind: input, shape index: {}]   ;;  %s5914_s0 = inlined_call_operand.vmem [shape: f32[1922,16], index: 0, kind: input, shape index: {}]   ;;  %s5915_s1 = inlined_call_operand.vmem [shape: f32[1,16], index: 1, kind: input, shape index: {}]   ;;  %s5916_s3 = inlined_call_operand.vmem [shape: f32[1922,256], index: 3, kind: output, shape index: {}]  }
   0x1   :  { %v2953_v0 = vld [vmem:[%s5913_s2] sm:$0xf]  ;;  %v3202_v1 = vld [vmem:[%s5913_s2 + $0x4] sm:$0xf0]  ;;  %v3201_v2 = vld [vmem:[%s5913_s2 + $0x4] sm:$0xf] }
   0x2   :  { %v2954_v3 = vor.u32 %v3202_v1, %v2953_v0  ;;  %v2955_v4 = vld [vmem:[%s5913_s2 + $0x8] sm:$0xf0]  ;;  %v15_v5 = vld [vmem:[%s5914_s0] sm:$0xff]  ;;  %v137_v9 = vld [vmem:[%s5914_s0 + $0x3d0] sm:$0xff] }
   0x3   :  { %v16_v6 = vld [vmem:[%s5914_s0 + $0x8] sm:$0xff]  ;;  %v2958_v7 = vor.u32 %v3201_v2, %v2955_v4  ;;  %v3250_v8 = vld [vmem:[%s5915_s1] ss:$0 sm:$0xff]  ;;  %v138_v10 = vld [vmem:[%s5914_s0 + $0x3d8] sm:$0xff] }
   0x4   :  { %1246 = vmatpush.bf16.msra.mxu0 %v2954_v3  ;;  %3203 = vmatpush.bf16.msra.mxu2 %v2954_v3  ;;  %v260_v11 = vadd.f32 %v3250_v8, %v15_v5  ;;  %v261_v12 = vadd.f32 %v3250_v8, %v16_v6  ;;  %v382_v13 = vadd.f32 %v3250_v8, %v137_v9  ;;  %v17_v21 = vld [vmem:[%s5914_s0 + $0x10] sm:$0xff]  ;;  %v18_v22 = vld [vmem:[%s5914_s0 + $0x18] sm:$0xff]  ;;  %v139_v23 = vld [vmem:[%s5914_s0 + $0x3e0] sm:$0xff] }
   0x5   :  { %1859 = vmatpush.bf16.msra.mxu1 %v2958_v7  ;;  %3204 = vmatpush.bf16.msra.mxu3 %v2958_v7  ;;  %v383_v14 = vadd.f32 %v3250_v8, %v138_v10  ;;  %v140_v24 = vld [vmem:[%s5914_s0 + $0x3e8] sm:$0xff]  ;;  %v262_v25 = vadd.f32 %v3250_v8, %v17_v21  ;;  %v263_v26 = vadd.f32 %v3250_v8, %v18_v22  ;;  %v19_v35 = vld [vmem:[%s5914_s0 + $0x20] sm:$0xff]  ;;  %v141_v37 = vld [vmem:[%s5914_s0 + $0x3f0] sm:$0xff] }
   0x6   :  { %v501_v15 = vmax.f32 %v260_v11, 0.0  ;;  %v502_v16 = vmax.f32 %v261_v12, 0.0  ;;  %v623_v17 = vmax.f32 %v382_v13, 0.0  ;;  %v384_v27 = vadd.f32 %v3250_v8, %v139_v23  ;;  %v20_v36 = vld [vmem:[%s5914_s0 + $0x28] sm:$0xff]  ;;  %v142_v38 = vld [vmem:[%s5914_s0 + $0x3f8] sm:$0xff]  ;;  %v21_v49 = vld [vmem:[%s5914_s0 + $0x30] sm:$0xff] }
   0x7   :  { %v624_v18 = vmax.f32 %v383_v14, 0.0  ;;  %v385_v28 = vadd.f32 %v3250_v8, %v140_v24  ;;  %v503_v29 = vmax.f32 %v262_v25, 0.0  ;;  %v504_v30 = vmax.f32 %v263_v26, 0.0  ;;  %v22_v50 = vld [vmem:[%s5914_s0 + $0x38] sm:$0xff]  ;;  %v143_v51 = vld [vmem:[%s5914_s0 + $0x400] sm:$0xff]  ;;  %v144_v52 = vld [vmem:[%s5914_s0 + $0x408] sm:$0xff] }
   0x8   :  { %v742_v19 = vpack.c.bf16 %v502_v16, %v501_v15  ;;  %v625_v31 = vmax.f32 %v384_v27, 0.0  ;;  %v264_v39 = vadd.f32 %v3250_v8, %v19_v35  ;;  %v265_v40 = vadd.f32 %v3250_v8, %v20_v36  ;;  %v23_v63 = vld [vmem:[%s5914_s0 + $0x40] sm:$0xff]  ;;  %v24_v0 = vld [vmem:[%s5914_s0 + $0x48] sm:$0xff]  ;;  %v145_v1 = vld [vmem:[%s5914_s0 + $0x410] sm:$0xff] }
   0x9   :  { %v803_v20 = vpack.c.bf16 %v624_v18, %v623_v17  ;;  %v626_v32 = vmax.f32 %v385_v28, 0.0  ;;  %v743_v33 = vpack.c.bf16 %v504_v30, %v503_v29  ;;  %v386_v41 = vadd.f32 %v3250_v8, %v141_v37  ;;  %v146_v2 = vld [vmem:[%s5914_s0 + $0x418] sm:$0xff]  ;;  %v25_v14 = vld [vmem:[%s5914_s0 + $0x50] sm:$0xff]  ;;  %v147_v16 = vld [vmem:[%s5914_s0 + $0x420] sm:$0xff] }
   0xa   :  { %2959 = vmatmul.msk.bf16.vlgmr.msra.gmra.mxu0 %vm875_vm0, %v742_v19  ;;  %3080 = vmatmul.msk.bf16.vlgmr.msra.gmra.mxu1 %vm875_vm0, %v742_v19  ;;  %v387_v42 = vadd.f32 %v3250_v8, %v142_v38  ;;  %v505_v43 = vmax.f32 %v264_v39, 0.0  ;;  %v506_v44 = vmax.f32 %v265_v40, 0.0  ;;  %v266_v53 = vadd.f32 %v3250_v8, %v21_v49  ;;  %v26_v15 = vld [vmem:[%s5914_s0 + $0x58] sm:$0xff]  ;;  %v148_v17 = vld [vmem:[%s5914_s0 + $0x428] sm:$0xff]  ;;  %v27_v28 = vld [vmem:[%s5914_s0 + $0x60] sm:$0xff] }
   0xb   :  { %3020 = vmatmul.msk.bf16.vlgmr.msra.gmra.mxu2 %vm875_vm0, %v803_v20  ;;  %3141 = vmatmul.msk.bf16.vlgmr.msra.gmra.mxu3 %vm875_vm0, %v803_v20  ;;  %v804_v34 = vpack.c.bf16 %v626_v32, %v625_v31  ;;  %v627_v45 = vmax.f32 %v386_v41, 0.0  ;;  %v267_v54 = vadd.f32 %v3250_v8, %v22_v50  ;;  %v388_v55 = vadd.f32 %v3250_v8, %v143_v51  ;;  %v28_v29 = vld [vmem:[%s5914_s0 + $0x68] sm:$0xff]  ;;  %v149_v30 = vld [vmem:[%s5914_s0 + $0x430] sm:$0xff]  ;;  %v150_v31 = vld [vmem:[%s5914_s0 + $0x438] sm:$0xff] }
   0xc   :  { %v628_v46 = vmax.f32 %v387_v42, 0.0  ;;  %v744_v47 = vpack.c.bf16 %v506_v44, %v505_v43  ;;  %v389_v56 = vadd.f32 %v3250_v8, %v144_v52  ;;  %v507_v57 = vmax.f32 %v266_v53, 0.0  ;;  %v29_v42 = vld [vmem:[%s5914_s0 + $0x70] sm:$0xff]  ;;  %v30_v43 = vld [vmem:[%s5914_s0 + $0x78] sm:$0xff]  ;;  %v151_v44 = vld [vmem:[%s5914_s0 + $0x440] sm:$0xff] }
   0xd   :  { %v508_v58 = vmax.f32 %v267_v54, 0.0  ;;  %v629_v59 = vmax.f32 %v388_v55, 0.0  ;;  %v268_v3 = vadd.f32 %v3250_v8, %v23_v63  ;;  %v269_v4 = vadd.f32 %v3250_v8, %v24_v0 }
   0xe   :  { %v805_v48 = vpack.c.bf16 %v628_v46, %v627_v45  ;;  %v630_v60 = vmax.f32 %v389_v56, 0.0  ;;  %v390_v5 = vadd.f32 %v3250_v8, %v145_v1  ;;  %v391_v6 = vadd.f32 %v3250_v8, %v146_v2  ;;  %v152_v45 = vld [vmem:[%s5914_s0 + $0x448] sm:$0xff]  ;;  %v31_v56 = vld [vmem:[%s5914_s0 + $0x80] sm:$0xff] }
   0xf   :  { %v745_v61 = vpack.c.bf16 %v508_v58, %v507_v57  ;;  %v509_v7 = vmax.f32 %v268_v3, 0.0  ;;  %v510_v9 = vmax.f32 %v269_v4, 0.0  ;;  %v270_v18 = vadd.f32 %v3250_v8, %v25_v14  ;;  %v32_v57 = vld [vmem:[%s5914_s0 + $0x88] sm:$0xff]  ;;  %v153_v58 = vld [vmem:[%s5914_s0 + $0x450] sm:$0xff] }
  0x10   :  { %v806_v62 = vpack.c.bf16 %v630_v60, %v629_v59  ;;  %v631_v10 = vmax.f32 %v390_v5, 0.0  ;;  %v632_v11 = vmax.f32 %v391_v6, 0.0  ;;  %v271_v19 = vadd.f32 %v3250_v8, %v26_v15  ;;  %v154_v59 = vld [vmem:[%s5914_s0 + $0x458] sm:$0xff] }
  0x11   :  { %v746_v12 = vpack.c.bf16 %v510_v9, %v509_v7  ;;  %v392_v20 = vadd.f32 %v3250_v8, %v147_v16  ;;  %v393_v21 = vadd.f32 %v3250_v8, %v148_v17  ;;  %v511_v22 = vmax.f32 %v270_v18, 0.0  ;;  %v33_v9 = vld [vmem:[%s5914_s0 + $0x90] sm:$0xff] }
  0x12   :  { %v807_v13 = vpack.c.bf16 %v632_v11, %v631_v10  ;;  %v512_v23 = vmax.f32 %v271_v19, 0.0  ;;  %v272_v32 = vadd.f32 %v3250_v8, %v27_v28  ;;  %v395_v35 = vadd.f32 %v3250_v8, %v150_v31  ;;  %v34_v10 = vld [vmem:[%s5914_s0 + $0x98] sm:$0xff]  ;;  %v155_v11 = vld [vmem:[%s5914_s0 + $0x460] sm:$0xff] }
  0x13   :  { %v633_v24 = vmax.f32 %v392_v20, 0.0  ;;  %v634_v25 = vmax.f32 %v393_v21, 0.0  ;;  %v274_v46 = vadd.f32 %v3250_v8, %v29_v42  ;;  %v397_v49 = vadd.f32 %v3250_v8, %v152_v45  ;;  %v35_v31 = vld [vmem:[%s5914_s0 + $0xa0] sm:$0xff] }
  0x14   :  { %v747_v26 = vpack.c.bf16 %v512_v23, %v511_v22  ;;  %v513_v36 = vmax.f32 %v272_v32, 0.0  ;;  %v636_v39 = vmax.f32 %v395_v35, 0.0  ;;  %v276_v60 = vadd.f32 %v3250_v8, %v31_v56  ;;  %v36_v32 = vld [vmem:[%s5914_s0 + $0xa8] sm:$0xff] }
  0x15   :  { %v808_v27 = vpack.c.bf16 %v634_v25, %v633_v24  ;;  %v515_v50 = vmax.f32 %v274_v46, 0.0  ;;  %v638_v53 = vmax.f32 %v397_v49, 0.0  ;;  %v399_v63 = vadd.f32 %v3250_v8, %v154_v59  ;;  %v160_v56 = vld [vmem:[%s5914_s0 + $0x488] sm:$0xff] }
  0x16   :  { %v517_v0 = vmax.f32 %v276_v60, 0.0  ;;  %v278_v15 = vadd.f32 %v3250_v8, %v33_v9  ;;  %v279_v16 = vadd.f32 %v3250_v8, %v34_v10  ;;  %v400_v19 = vadd.f32 %v3250_v8, %v155_v11 }
  0x17   :  { %v640_v3 = vmax.f32 %v399_v63, 0.0 }
  0x18   :  { %v519_v21 = vmax.f32 %v278_v15, 0.0  ;;  %v520_v22 = vmax.f32 %v279_v16, 0.0  ;;  %v641_v23 = vmax.f32 %v400_v19, 0.0  ;;  %v162_v15 = vld [vmem:[%s5914_s0 + $0x498] sm:$0xff] }
  0x1a   :  { %2960 = vmatmul.msk.bf16.gmra.mxu0 %vm875_vm0, %v743_v33  ;;  %3081 = vmatmul.msk.bf16.gmra.mxu1 %vm875_vm0, %v743_v33  ;;  %v273_v33 = vadd.f32 %v3250_v8, %v28_v29 }
  0x1b   :  { %3021 = vmatmul.msk.bf16.gmra.mxu2 %vm875_vm0, %v804_v34  ;;  %3142 = vmatmul.msk.bf16.gmra.mxu3 %vm875_vm0, %v804_v34  ;;  %v394_v34 = vadd.f32 %v3250_v8, %v149_v30 }
  0x1c   :  { %v514_v37 = vmax.f32 %v273_v33, 0.0  ;;  %v157_v33 = vld [vmem:[%s5914_s0 + $0x470] sm:$0xff] }
  0x1d   :  { %v635_v38 = vmax.f32 %v394_v34, 0.0  ;;  %v158_v34 = vld [vmem:[%s5914_s0 + $0x478] sm:$0xff] }
  0x1e   :  { %v748_v40 = vpack.c.bf16 %v514_v37, %v513_v36  ;;  %v280_v37 = vadd.f32 %v3250_v8, %v35_v31  ;;  %v403_v42 = vadd.f32 %v3250_v8, %v158_v34  ;;  %v41_v34 = vld [vmem:[%s5914_s0 + $0xd0] sm:$0xff] }
  0x1f   :  { %v809_v41 = vpack.c.bf16 %v636_v39, %v635_v38  ;;  %v281_v38 = vadd.f32 %v3250_v8, %v36_v32 }
  0x20   :  { %v644_v46 = vmax.f32 %v403_v42, 0.0 }
  0x2a   :  { %2961 = vmatmul.msk.bf16.gmra.mxu0 %vm875_vm0, %v744_v47  ;;  %3082 = vmatmul.msk.bf16.gmra.mxu1 %vm875_vm0, %v744_v47  ;;  %v275_v47 = vadd.f32 %v3250_v8, %v30_v43  ;;  %v521_v43 = vmax.f32 %v280_v37, 0.0  ;;  %v164_v37 = vld [vmem:[%s5914_s0 + $0x4a8] sm:$0xff] }
  0x2b   :  { %3022 = vmatmul.msk.bf16.gmra.mxu2 %vm875_vm0, %v805_v48  ;;  %3143 = vmatmul.msk.bf16.gmra.mxu3 %vm875_vm0, %v805_v48  ;;  %v396_v48 = vadd.f32 %v3250_v8, %v151_v44  ;;  %v522_v44 = vmax.f32 %v281_v38, 0.0 }
  0x2c   :  { %v516_v51 = vmax.f32 %v275_v47, 0.0 }
  0x2d   :  { %v637_v52 = vmax.f32 %v396_v48, 0.0  ;;  %v752_v49 = vpack.c.bf16 %v522_v44, %v521_v43 }
  0x2e   :  { %v749_v54 = vpack.c.bf16 %v516_v51, %v515_v50 }
  0x2f   :  { %v810_v55 = vpack.c.bf16 %v638_v53, %v637_v52  ;;  %v37_v53 = vld [vmem:[%s5914_s0 + $0xb0] sm:$0xff] }
  0x30   :  { %v282_v59 = vadd.f32 %v3250_v8, %v37_v53 }
  0x3a   :  { %2962 = vmatmul.msk.bf16.gmra.mxu0 %vm875_vm0, %v745_v61  ;;  %3083 = vmatmul.msk.bf16.gmra.mxu1 %vm875_vm0, %v745_v61  ;;  %v277_v61 = vadd.f32 %v3250_v8, %v32_v57 }
  0x3b   :  { %3023 = vmatmul.msk.bf16.gmra.mxu2 %vm875_vm0, %v806_v62  ;;  %3144 = vmatmul.msk.bf16.gmra.mxu3 %vm875_vm0, %v806_v62  ;;  %v398_v62 = vadd.f32 %v3250_v8, %v153_v58 }
  0x3c   :  { %v518_v1 = vmax.f32 %v277_v61, 0.0 }
  0x3d   :  { %v639_v2 = vmax.f32 %v398_v62, 0.0 }
  0x3e   :  { %v750_v4 = vpack.c.bf16 %v518_v1, %v517_v0  ;;  %v405_v0 = vadd.f32 %v3250_v8, %v160_v56  ;;  %v523_v1 = vmax.f32 %v282_v59, 0.0  ;;  %v43_v56 = vld [vmem:[%s5914_s0 + $0xe0] sm:$0xff]  ;;  %v166_v59 = vld [vmem:[%s5914_s0 + $0x4b8] sm:$0xff] }
  0x3f   :  { %v811_v7 = vpack.c.bf16 %v640_v3, %v639_v2 }
  0x4a   :  { %2963 = vmatmul.msk.bf16.gmra.mxu0 %vm875_vm0, %v746_v12  ;;  %3084 = vmatmul.msk.bf16.gmra.mxu1 %vm875_vm0, %v746_v12  ;;  %v156_v12 = vld [vmem:[%s5914_s0 + $0x468] sm:$0xff] }
  0x4b   :  { %3024 = vmatmul.msk.bf16.gmra.mxu2 %vm875_vm0, %v807_v13  ;;  %3145 = vmatmul.msk.bf16.gmra.mxu3 %vm875_vm0, %v807_v13  ;;  %v401_v20 = vadd.f32 %v3250_v8, %v156_v12  ;;  %v39_v12 = vld [vmem:[%s5914_s0 + $0xc0] sm:$0xff] }
  0x4d   :  { %v642_v24 = vmax.f32 %v401_v20, 0.0 }
  0x4f   :  { %v812_v30 = vpack.c.bf16 %v642_v24, %v641_v23  ;;  %v407_v23 = vadd.f32 %v3250_v8, %v162_v15  ;;  %v45_v15 = vld [vmem:[%s5914_s0 + $0xf0] sm:$0xff] }
  0x5a   :  { %2964 = vmatmul.msk.bf16.gmra.mxu0 %vm875_vm0, %v747_v26  ;;  %3085 = vmatmul.msk.bf16.gmra.mxu1 %vm875_vm0, %v747_v26 }
  0x5b   :  { %3025 = vmatmul.msk.bf16.gmra.mxu2 %vm875_vm0, %v808_v27  ;;  %3146 = vmatmul.msk.bf16.gmra.mxu3 %vm875_vm0, %v808_v27  ;;  %v751_v27 = vpack.c.bf16 %v520_v22, %v519_v21 }
  0x6a   :  { %2965 = vmatmul.msk.bf16.gmra.mxu0 %vm875_vm0, %v748_v40  ;;  %3086 = vmatmul.msk.bf16.gmra.mxu1 %vm875_vm0, %v748_v40 }
  0x6b   :  { %3026 = vmatmul.msk.bf16.gmra.mxu2 %vm875_vm0, %v809_v41  ;;  %3147 = vmatmul.msk.bf16.gmra.mxu3 %vm875_vm0, %v809_v41  ;;  %v402_v41 = vadd.f32 %v3250_v8, %v157_v33 }
  0x6d   :  { %v643_v45 = vmax.f32 %v402_v41, 0.0 }
  0x6f   :  { %v813_v52 = vpack.c.bf16 %v644_v46, %v643_v45  ;;  %v409_v45 = vadd.f32 %v3250_v8, %v164_v37  ;;  %v47_v37 = vld [vmem:[%s5914_s0 + $0x100] sm:$0xff] }
  0x7a   :  { %2966 = vmatmul.msk.bf16.gmra.mxu0 %vm875_vm0, %v749_v54  ;;  %3087 = vmatmul.msk.bf16.gmra.mxu1 %vm875_vm0, %v749_v54  ;;  %v38_v54 = vld [vmem:[%s5914_s0 + $0xb8] sm:$0xff] }
  0x7b   :  { %3027 = vmatmul.msk.bf16.gmra.mxu2 %vm875_vm0, %v810_v55  ;;  %3148 = vmatmul.msk.bf16.gmra.mxu3 %vm875_vm0, %v810_v55  ;;  %v159_v55 = vld [vmem:[%s5914_s0 + $0x480] sm:$0xff]  ;;  %v283_v60 = vadd.f32 %v3250_v8, %v38_v54 }
  0x7c   :  { %v404_v63 = vadd.f32 %v3250_v8, %v159_v55 }
  0x7d   :  { %v524_v2 = vmax.f32 %v283_v60, 0.0 }
  0x7e   :  { %v645_v3 = vmax.f32 %v404_v63, 0.0 }
  0x87   :  { %v1248_v5 = vpop.f32.mrf.mxu0  ;;  %v1861_v6 = vpop.f32.mrf.mxu1 }
  0x88   :  { %2465 = vst [vmem:[%s5916_s3] sm:$0xff] %v1248_v5 }
  0x89   :  { %2466 = vst [vmem:[%s5916_s3 + $0x8] sm:$0xff] %v1861_v6 }
  0x8a   :  { %2967 = vmatmul.msk.bf16.gmra.mxu0 %vm875_vm0, %v750_v4  ;;  %3088 = vmatmul.msk.bf16.gmra.mxu1 %vm875_vm0, %v750_v4  ;;  %v646_v4 = vmax.f32 %v405_v0, 0.0 }
  0x8b   :  { %3028 = vmatmul.msk.bf16.gmra.mxu2 %vm875_vm0, %v811_v7  ;;  %3149 = vmatmul.msk.bf16.gmra.mxu3 %vm875_vm0, %v811_v7  ;;  %v753_v7 = vpack.c.bf16 %v524_v2, %v523_v1 }
  0x8c   :  { %v814_v11 = vpack.c.bf16 %v646_v4, %v645_v3  ;;  %v411_v3 = vadd.f32 %v3250_v8, %v166_v59  ;;  %v49_v59 = vld [vmem:[%s5914_s0 + $0x110] sm:$0xff] }
  0x8e   :  { %v1553_v13 = vpop.f32.mrf.mxu2  ;;  %v2166_v14 = vpop.f32.mrf.mxu3 }
  0x8f   :  { %v1250_v17 = vpop.f32.mrf.mxu0  ;;  %v1863_v18 = vpop.f32.mrf.mxu1  ;;  %2709 = vst [vmem:[%s5916_s3 + $0x7a0] sm:$0xff] %v1553_v13  ;;  %v40_v13 = vld [vmem:[%s5914_s0 + $0xc8] sm:$0xff] }
  0x90   :  { %2467 = vst [vmem:[%s5916_s3 + $0x10] sm:$0xff] %v1250_v17  ;;  %v285_v19 = vadd.f32 %v3250_v8, %v40_v13 }
  0x91   :  { %2468 = vst [vmem:[%s5916_s3 + $0x18] sm:$0xff] %v1863_v18  ;;  %v284_v18 = vadd.f32 %v3250_v8, %v39_v12 }
  0x92   :  { %2710 = vst [vmem:[%s5916_s3 + $0x7a8] sm:$0xff] %v2166_v14  ;;  %v161_v14 = vld [vmem:[%s5914_s0 + $0x490] sm:$0xff] }
  0x93   :  { %v406_v22 = vadd.f32 %v3250_v8, %v161_v14  ;;  %v525_v24 = vmax.f32 %v284_v18, 0.0  ;;  %v168_v18 = vld [vmem:[%s5914_s0 + $0x4c8] sm:$0xff] }
  0x96   :  { %v1555_v25 = vpop.f32.mrf.mxu2  ;;  %v2168_v26 = vpop.f32.mrf.mxu3 }
  0x97   :  { %v1253_v28 = vpop.f32.mrf.mxu0  ;;  %v1866_v29 = vpop.f32.mrf.mxu1  ;;  %2711 = vst [vmem:[%s5916_s3 + $0x7b0] sm:$0xff] %v1555_v25  ;;  %v526_v25 = vmax.f32 %v285_v19, 0.0 }
  0x98   :  { %2469 = vst [vmem:[%s5916_s3 + $0x20] sm:$0xff] %v1253_v28 }
  0x99   :  { %2470 = vst [vmem:[%s5916_s3 + $0x28] sm:$0xff] %v1866_v29 }
  0x9a   :  { %2712 = vst [vmem:[%s5916_s3 + $0x7b8] sm:$0xff] %v2168_v26  ;;  %2968 = vmatmul.msk.bf16.gmra.mxu0 %vm875_vm0, %v751_v27  ;;  %3089 = vmatmul.msk.bf16.gmra.mxu1 %vm875_vm0, %v751_v27  ;;  %v647_v26 = vmax.f32 %v406_v22, 0.0  ;;  %v648_v27 = vmax.f32 %v407_v23, 0.0 }
  0x9b   :  { %3029 = vmatmul.msk.bf16.gmra.mxu2 %vm875_vm0, %v812_v30  ;;  %3150 = vmatmul.msk.bf16.gmra.mxu3 %vm875_vm0, %v812_v30  ;;  %v754_v30 = vpack.c.bf16 %v526_v25, %v525_v24 }
  0x9c   :  { %v815_v33 = vpack.c.bf16 %v648_v27, %v647_v26  ;;  %v413_v26 = vadd.f32 %v3250_v8, %v168_v18  ;;  %v51_v18 = vld [vmem:[%s5914_s0 + $0x120] sm:$0xff] }
  0x9e   :  { %v1558_v35 = vpop.f32.mrf.mxu2  ;;  %v2171_v36 = vpop.f32.mrf.mxu3 }
  0x9f   :  { %v1255_v39 = vpop.f32.mrf.mxu0  ;;  %v1868_v40 = vpop.f32.mrf.mxu1  ;;  %2713 = vst [vmem:[%s5916_s3 + $0x7c0] sm:$0xff] %v1558_v35  ;;  %v42_v35 = vld [vmem:[%s5914_s0 + $0xd8] sm:$0xff] }
  0xa0   :  { %2471 = vst [vmem:[%s5916_s3 + $0x30] sm:$0xff] %v1255_v39  ;;  %v287_v41 = vadd.f32 %v3250_v8, %v42_v35 }
  0xa1   :  { %2472 = vst [vmem:[%s5916_s3 + $0x38] sm:$0xff] %v1868_v40  ;;  %v286_v40 = vadd.f32 %v3250_v8, %v41_v34 }
  0xa2   :  { %2714 = vst [vmem:[%s5916_s3 + $0x7c8] sm:$0xff] %v2171_v36  ;;  %v163_v36 = vld [vmem:[%s5914_s0 + $0x4a0] sm:$0xff] }
  0xa3   :  { %v408_v44 = vadd.f32 %v3250_v8, %v163_v36  ;;  %v527_v46 = vmax.f32 %v286_v40, 0.0  ;;  %v170_v40 = vld [vmem:[%s5914_s0 + $0x4d8] sm:$0xff] }
  0xa6   :  { %v1560_v47 = vpop.f32.mrf.mxu2  ;;  %v2173_v48 = vpop.f32.mrf.mxu3 }
  0xa7   :  { %v1258_v50 = vpop.f32.mrf.mxu0  ;;  %v1871_v51 = vpop.f32.mrf.mxu1  ;;  %2715 = vst [vmem:[%s5916_s3 + $0x7d0] sm:$0xff] %v1560_v47  ;;  %v528_v47 = vmax.f32 %v287_v41, 0.0 }
  0xa8   :  { %2473 = vst [vmem:[%s5916_s3 + $0x40] sm:$0xff] %v1258_v50 }
  0xa9   :  { %2474 = vst [vmem:[%s5916_s3 + $0x48] sm:$0xff] %v1871_v51 }
  0xaa   :  { %2716 = vst [vmem:[%s5916_s3 + $0x7d8] sm:$0xff] %v2173_v48  ;;  %2969 = vmatmul.msk.bf16.gmra.mxu0 %vm875_vm0, %v752_v49  ;;  %3090 = vmatmul.msk.bf16.gmra.mxu1 %vm875_vm0, %v752_v49  ;;  %v649_v48 = vmax.f32 %v408_v44, 0.0  ;;  %v650_v49 = vmax.f32 %v409_v45, 0.0 }
  0xab   :  { %3030 = vmatmul.msk.bf16.gmra.mxu2 %vm875_vm0, %v813_v52  ;;  %3151 = vmatmul.msk.bf16.gmra.mxu3 %vm875_vm0, %v813_v52  ;;  %v755_v52 = vpack.c.bf16 %v528_v47, %v527_v46 }
  0xac   :  { %v816_v55 = vpack.c.bf16 %v650_v49, %v649_v48  ;;  %v415_v48 = vadd.f32 %v3250_v8, %v170_v40  ;;  %v54_v40 = vld [vmem:[%s5914_s0 + $0x138] sm:$0xff] }
  0xae   :  { %v1563_v57 = vpop.f32.mrf.mxu2  ;;  %v2176_v58 = vpop.f32.mrf.mxu3 }
  0xaf   :  { %v1260_v61 = vpop.f32.mrf.mxu0  ;;  %v1873_v62 = vpop.f32.mrf.mxu1  ;;  %2717 = vst [vmem:[%s5916_s3 + $0x7e0] sm:$0xff] %v1563_v57  ;;  %v44_v57 = vld [vmem:[%s5914_s0 + $0xe8] sm:$0xff] }
  0xb0   :  { %2475 = vst [vmem:[%s5916_s3 + $0x50] sm:$0xff] %v1260_v61  ;;  %v289_v63 = vadd.f32 %v3250_v8, %v44_v57 }
  0xb1   :  { %2476 = vst [vmem:[%s5916_s3 + $0x58] sm:$0xff] %v1873_v62  ;;  %v288_v62 = vadd.f32 %v3250_v8, %v43_v56 }
  0xb2   :  { %2718 = vst [vmem:[%s5916_s3 + $0x7e8] sm:$0xff] %v2176_v58  ;;  %v165_v58 = vld [vmem:[%s5914_s0 + $0x4b0] sm:$0xff] }
  0xb3   :  { %v410_v2 = vadd.f32 %v3250_v8, %v165_v58  ;;  %v529_v4 = vmax.f32 %v288_v62, 0.0  ;;  %v172_v62 = vld [vmem:[%s5914_s0 + $0x4e8] sm:$0xff] }
  0xb6   :  { %v1565_v5 = vpop.f32.mrf.mxu2  ;;  %v2178_v6 = vpop.f32.mrf.mxu3 }
  0xb7   :  { %v1263_v9 = vpop.f32.mrf.mxu0  ;;  %v1876_v10 = vpop.f32.mrf.mxu1  ;;  %2719 = vst [vmem:[%s5916_s3 + $0x7f0] sm:$0xff] %v1565_v5  ;;  %v530_v5 = vmax.f32 %v289_v63, 0.0 }
  0xb8   :  { %2477 = vst [vmem:[%s5916_s3 + $0x60] sm:$0xff] %v1263_v9 }
  0xb9   :  { %2478 = vst [vmem:[%s5916_s3 + $0x68] sm:$0xff] %v1876_v10 }
  0xba   :  { %2720 = vst [vmem:[%s5916_s3 + $0x7f8] sm:$0xff] %v2178_v6  ;;  %2970 = vmatmul.msk.bf16.gmra.mxu0 %vm875_vm0, %v753_v7  ;;  %3091 = vmatmul.msk.bf16.gmra.mxu1 %vm875_vm0, %v753_v7  ;;  %v651_v6 = vmax.f32 %v410_v2, 0.0  ;;  %v652_v7 = vmax.f32 %v411_v3, 0.0 }
  0xbb   :  { %3031 = vmatmul.msk.bf16.gmra.mxu2 %vm875_vm0, %v814_v11  ;;  %3152 = vmatmul.msk.bf16.gmra.mxu3 %vm875_vm0, %v814_v11  ;;  %v756_v11 = vpack.c.bf16 %v530_v5, %v529_v4 }
  0xbc   :  { %v817_v14 = vpack.c.bf16 %v652_v7, %v651_v6  ;;  %v417_v6 = vadd.f32 %v3250_v8, %v172_v62  ;;  %v55_v62 = vld [vmem:[%s5914_s0 + $0x140] sm:$0xff] }
  0xbe   :  { %v1568_v16 = vpop.f32.mrf.mxu2  ;;  %v2181_v17 = vpop.f32.mrf.mxu3 }
  0xbf   :  { %v1265_v20 = vpop.f32.mrf.mxu0  ;;  %v1878_v21 = vpop.f32.mrf.mxu1  ;;  %2721 = vst [vmem:[%s5916_s3 + $0x800] sm:$0xff] %v1568_v16  ;;  %v46_v16 = vld [vmem:[%s5914_s0 + $0xf8] sm:$0xff] }
  0xc0   :  { %2479 = vst [vmem:[%s5916_s3 + $0x70] sm:$0xff] %v1265_v20  ;;  %v291_v22 = vadd.f32 %v3250_v8, %v46_v16 }
  0xc1   :  { %2480 = vst [vmem:[%s5916_s3 + $0x78] sm:$0xff] %v1878_v21  ;;  %v290_v21 = vadd.f32 %v3250_v8, %v45_v15 }
  0xc2   :  { %2722 = vst [vmem:[%s5916_s3 + $0x808] sm:$0xff] %v2181_v17  ;;  %v167_v17 = vld [vmem:[%s5914_s0 + $0x4c0] sm:$0xff] }
  0xc3   :  { %v412_v25 = vadd.f32 %v3250_v8, %v167_v17  ;;  %v531_v27 = vmax.f32 %v290_v21, 0.0  ;;  %v174_v21 = vld [vmem:[%s5914_s0 + $0x4f8] sm:$0xff] }
  0xc6   :  { %v1570_v28 = vpop.f32.mrf.mxu2  ;;  %v2183_v29 = vpop.f32.mrf.mxu3 }
  0xc7   :  { %v1268_v31 = vpop.f32.mrf.mxu0  ;;  %v1881_v32 = vpop.f32.mrf.mxu1  ;;  %2723 = vst [vmem:[%s5916_s3 + $0x810] sm:$0xff] %v1570_v28  ;;  %v532_v28 = vmax.f32 %v291_v22, 0.0 }
  0xc8   :  { %2481 = vst [vmem:[%s5916_s3 + $0x80] sm:$0xff] %v1268_v31 }
  0xc9   :  { %2482 = vst [vmem:[%s5916_s3 + $0x88] sm:$0xff] %v1881_v32 }
  0xca   :  { %2724 = vst [vmem:[%s5916_s3 + $0x818] sm:$0xff] %v2183_v29  ;;  %2971 = vmatmul.msk.bf16.gmra.mxu0 %vm875_vm0, %v754_v30  ;;  %3092 = vmatmul.msk.bf16.gmra.mxu1 %vm875_vm0, %v754_v30  ;;  %v653_v29 = vmax.f32 %v412_v25, 0.0  ;;  %v654_v30 = vmax.f32 %v413_v26, 0.0 }
  0xcb   :  { %3032 = vmatmul.msk.bf16.gmra.mxu2 %vm875_vm0, %v815_v33  ;;  %3153 = vmatmul.msk.bf16.gmra.mxu3 %vm875_vm0, %v815_v33  ;;  %v757_v33 = vpack.c.bf16 %v532_v28, %v531_v27 }
  0xcc   :  { %v818_v36 = vpack.c.bf16 %v654_v30, %v653_v29  ;;  %v419_v29 = vadd.f32 %v3250_v8, %v174_v21  ;;  %v57_v21 = vld [vmem:[%s5914_s0 + $0x150] sm:$0xff] }
  0xce   :  { %v1573_v38 = vpop.f32.mrf.mxu2  ;;  %v2186_v39 = vpop.f32.mrf.mxu3 }
  0xcf   :  { %v1270_v42 = vpop.f32.mrf.mxu0  ;;  %v1883_v43 = vpop.f32.mrf.mxu1  ;;  %2725 = vst [vmem:[%s5916_s3 + $0x820] sm:$0xff] %v1573_v38  ;;  %v48_v38 = vld [vmem:[%s5914_s0 + $0x108] sm:$0xff] }
  0xd0   :  { %2483 = vst [vmem:[%s5916_s3 + $0x90] sm:$0xff] %v1270_v42  ;;  %v293_v44 = vadd.f32 %v3250_v8, %v48_v38 }
  0xd1   :  { %2484 = vst [vmem:[%s5916_s3 + $0x98] sm:$0xff] %v1883_v43  ;;  %v292_v43 = vadd.f32 %v3250_v8, %v47_v37 }
  0xd2   :  { %2726 = vst [vmem:[%s5916_s3 + $0x828] sm:$0xff] %v2186_v39  ;;  %v169_v39 = vld [vmem:[%s5914_s0 + $0x4d0] sm:$0xff] }
  0xd3   :  { %v414_v47 = vadd.f32 %v3250_v8, %v169_v39  ;;  %v533_v49 = vmax.f32 %v292_v43, 0.0  ;;  %v53_v39 = vld [vmem:[%s5914_s0 + $0x130] sm:$0xff] }
  0xd6   :  { %v1575_v50 = vpop.f32.mrf.mxu2  ;;  %v2188_v51 = vpop.f32.mrf.mxu3 }
  0xd7   :  { %v1273_v53 = vpop.f32.mrf.mxu0  ;;  %v1886_v54 = vpop.f32.mrf.mxu1  ;;  %2727 = vst [vmem:[%s5916_s3 + $0x830] sm:$0xff] %v1575_v50  ;;  %v534_v50 = vmax.f32 %v293_v44, 0.0 }
  0xd8   :  { %2485 = vst [vmem:[%s5916_s3 + $0xa0] sm:$0xff] %v1273_v53 }
  0xd9   :  { %2486 = vst [vmem:[%s5916_s3 + $0xa8] sm:$0xff] %v1886_v54 }
  0xda   :  { %2728 = vst [vmem:[%s5916_s3 + $0x838] sm:$0xff] %v2188_v51  ;;  %2972 = vmatmul.msk.bf16.gmra.mxu0 %vm875_vm0, %v755_v52  ;;  %3093 = vmatmul.msk.bf16.gmra.mxu1 %vm875_vm0, %v755_v52  ;;  %v655_v51 = vmax.f32 %v414_v47, 0.0  ;;  %v656_v52 = vmax.f32 %v415_v48, 0.0 }
  0xdb   :  { %3033 = vmatmul.msk.bf16.gmra.mxu2 %vm875_vm0, %v816_v55  ;;  %3154 = vmatmul.msk.bf16.gmra.mxu3 %vm875_vm0, %v816_v55  ;;  %v758_v55 = vpack.c.bf16 %v534_v50, %v533_v49 }
  0xdc   :  { %v819_v58 = vpack.c.bf16 %v656_v52, %v655_v51 }
  0xde   :  { %v1578_v60 = vpop.f32.mrf.mxu2  ;;  %v2191_v61 = vpop.f32.mrf.mxu3 }
  0xdf   :  { %v1275_v0 = vpop.f32.mrf.mxu0  ;;  %v1888_v1 = vpop.f32.mrf.mxu1  ;;  %2729 = vst [vmem:[%s5916_s3 + $0x840] sm:$0xff] %v1578_v60  ;;  %v50_v60 = vld [vmem:[%s5914_s0 + $0x118] sm:$0xff] }
  0xe0   :  { %2487 = vst [vmem:[%s5916_s3 + $0xb0] sm:$0xff] %v1275_v0  ;;  %v295_v2 = vadd.f32 %v3250_v8, %v50_v60 }
  0xe1   :  { %2488 = vst [vmem:[%s5916_s3 + $0xb8] sm:$0xff] %v1888_v1  ;;  %v294_v1 = vadd.f32 %v3250_v8, %v49_v59 }
  0xe2   :  { %2730 = vst [vmem:[%s5916_s3 + $0x848] sm:$0xff] %v2191_v61  ;;  %v171_v61 = vld [vmem:[%s5914_s0 + $0x4e0] sm:$0xff] }
  0xe3   :  { %v416_v5 = vadd.f32 %v3250_v8, %v171_v61  ;;  %v535_v7 = vmax.f32 %v294_v1, 0.0  ;;  %v178_v1 = vld [vmem:[%s5914_s0 + $0x518] sm:$0xff] }
  0xe6   :  { %v1580_v9 = vpop.f32.mrf.mxu2  ;;  %v2193_v10 = vpop.f32.mrf.mxu3 }
  0xe7   :  { %v1278_v12 = vpop.f32.mrf.mxu0  ;;  %v1891_v13 = vpop.f32.mrf.mxu1  ;;  %2731 = vst [vmem:[%s5916_s3 + $0x850] sm:$0xff] %v1580_v9  ;;  %v536_v9 = vmax.f32 %v295_v2, 0.0 }
  0xe8   :  { %2489 = vst [vmem:[%s5916_s3 + $0xc0] sm:$0xff] %v1278_v12 }
  0xe9   :  { %2490 = vst [vmem:[%s5916_s3 + $0xc8] sm:$0xff] %v1891_v13 }
  0xea   :  { %2732 = vst [vmem:[%s5916_s3 + $0x858] sm:$0xff] %v2193_v10  ;;  %2973 = vmatmul.msk.bf16.gmra.mxu0 %vm875_vm0, %v756_v11  ;;  %3094 = vmatmul.msk.bf16.gmra.mxu1 %vm875_vm0, %v756_v11  ;;  %v657_v10 = vmax.f32 %v416_v5, 0.0  ;;  %v658_v11 = vmax.f32 %v417_v6, 0.0 }
  0xeb   :  { %3034 = vmatmul.msk.bf16.gmra.mxu2 %vm875_vm0, %v817_v14  ;;  %3155 = vmatmul.msk.bf16.gmra.mxu3 %vm875_vm0, %v817_v14  ;;  %v759_v14 = vpack.c.bf16 %v536_v9, %v535_v7 }
  0xec   :  { %v820_v17 = vpack.c.bf16 %v658_v11, %v657_v10 }
  0xee   :  { %v1583_v19 = vpop.f32.mrf.mxu2  ;;  %v2196_v20 = vpop.f32.mrf.mxu3 }
  0xef   :  { %v1280_v23 = vpop.f32.mrf.mxu0  ;;  %v1893_v24 = vpop.f32.mrf.mxu1  ;;  %2733 = vst [vmem:[%s5916_s3 + $0x860] sm:$0xff] %v1583_v19  ;;  %v52_v19 = vld [vmem:[%s5914_s0 + $0x128] sm:$0xff] }
  0xf0   :  { %2491 = vst [vmem:[%s5916_s3 + $0xd0] sm:$0xff] %v1280_v23  ;;  %v297_v25 = vadd.f32 %v3250_v8, %v52_v19 }
  0xf1   :  { %2492 = vst [vmem:[%s5916_s3 + $0xd8] sm:$0xff] %v1893_v24  ;;  %v296_v24 = vadd.f32 %v3250_v8, %v51_v18 }
  0xf2   :  { %2734 = vst [vmem:[%s5916_s3 + $0x868] sm:$0xff] %v2196_v20  ;;  %v173_v20 = vld [vmem:[%s5914_s0 + $0x4f0] sm:$0xff] }
  0xf3   :  { %v418_v28 = vadd.f32 %v3250_v8, %v173_v20  ;;  %v537_v30 = vmax.f32 %v296_v24, 0.0  ;;  %v180_v24 = vld [vmem:[%s5914_s0 + $0x528] sm:$0xff] }
  0xf6   :  { %v1585_v31 = vpop.f32.mrf.mxu2  ;;  %v2198_v32 = vpop.f32.mrf.mxu3 }
  0xf7   :  { %v1283_v34 = vpop.f32.mrf.mxu0  ;;  %v1896_v35 = vpop.f32.mrf.mxu1  ;;  %2735 = vst [vmem:[%s5916_s3 + $0x870] sm:$0xff] %v1585_v31  ;;  %v538_v31 = vmax.f32 %v297_v25, 0.0 }
  0xf8   :  { %2493 = vst [vmem:[%s5916_s3 + $0xe0] sm:$0xff] %v1283_v34 }
  0xf9   :  { %2494 = vst [vmem:[%s5916_s3 + $0xe8] sm:$0xff] %v1896_v35 }
  0xfa   :  { %2736 = vst [vmem:[%s5916_s3 + $0x878] sm:$0xff] %v2198_v32  ;;  %2974 = vmatmul.msk.bf16.gmra.mxu0 %vm875_vm0, %v757_v33  ;;  %3095 = vmatmul.msk.bf16.gmra.mxu1 %vm875_vm0, %v757_v33  ;;  %v659_v32 = vmax.f32 %v418_v28, 0.0  ;;  %v660_v33 = vmax.f32 %v419_v29, 0.0 }
  0xfb   :  { %3035 = vmatmul.msk.bf16.gmra.mxu2 %vm875_vm0, %v818_v36  ;;  %3156 = vmatmul.msk.bf16.gmra.mxu3 %vm875_vm0, %v818_v36  ;;  %v760_v36 = vpack.c.bf16 %v538_v31, %v537_v30 }
  0xfc   :  { %v821_v38 = vpack.c.bf16 %v660_v33, %v659_v32 }
  0xfe   :  { %v1588_v41 = vpop.f32.mrf.mxu2  ;;  %v2201_v42 = vpop.f32.mrf.mxu3 }
  0xff   :  { %v1285_v45 = vpop.f32.mrf.mxu0  ;;  %v1898_v46 = vpop.f32.mrf.mxu1  ;;  %2737 = vst [vmem:[%s5916_s3 + $0x880] sm:$0xff] %v1588_v41  ;;  %v175_v41 = vld [vmem:[%s5914_s0 + $0x500] sm:$0xff] }
 0x100   :  { %2495 = vst [vmem:[%s5916_s3 + $0xf0] sm:$0xff] %v1285_v45  ;;  %v3887_v45 = vld [vmem:[%s5915_s1] ss:$0 sm:$0xff] }
 0x101   :  { %2496 = vst [vmem:[%s5916_s3 + $0xf8] sm:$0xff] %v1898_v46  ;;  %v298_v46 = vadd.f32 %v3887_v45, %v53_v39  ;;  %v299_v47 = vadd.f32 %v3887_v45, %v54_v40  ;;  %v420_v50 = vadd.f32 %v3887_v45, %v175_v41  ;;  %v423_v10 = vadd.f32 %v3887_v45, %v178_v1  ;;  %v61_v1 = vld [vmem:[%s5914_s0 + $0x170] sm:$0xff] }
 0x102   :  { %2738 = vst [vmem:[%s5916_s3 + $0x888] sm:$0xff] %v2201_v42  ;;  %v176_v42 = vld [vmem:[%s5914_s0 + $0x508] sm:$0xff]  ;;  %v425_v32 = vadd.f32 %v3887_v45, %v180_v24  ;;  %v63_v24 = vld [vmem:[%s5914_s0 + $0x180] sm:$0xff] }
 0x103   :  { %v421_v51 = vadd.f32 %v3887_v45, %v176_v42  ;;  %v539_v52 = vmax.f32 %v298_v46, 0.0  ;;  %v59_v42 = vld [vmem:[%s5914_s0 + $0x160] sm:$0xff]  ;;  %v182_v46 = vld [vmem:[%s5914_s0 + $0x538] sm:$0xff] }
 0x106   :  { %v1590_v53 = vpop.f32.mrf.mxu2  ;;  %v2203_v54 = vpop.f32.mrf.mxu3 }
 0x107   :  { %v1288_v56 = vpop.f32.mrf.mxu0  ;;  %v1901_v57 = vpop.f32.mrf.mxu1  ;;  %2739 = vst [vmem:[%s5916_s3 + $0x890] sm:$0xff] %v1590_v53  ;;  %v540_v53 = vmax.f32 %v299_v47, 0.0 }
 0x108   :  { %2497 = vst [vmem:[%s5916_s3 + $0x100] sm:$0xff] %v1288_v56 }
 0x109   :  { %2498 = vst [vmem:[%s5916_s3 + $0x108] sm:$0xff] %v1901_v57 }
 0x10a   :  { %2740 = vst [vmem:[%s5916_s3 + $0x898] sm:$0xff] %v2203_v54  ;;  %2975 = vmatmul.msk.bf16.gmra.mxu0 %vm875_vm0, %v758_v55  ;;  %3096 = vmatmul.msk.bf16.gmra.mxu1 %vm875_vm0, %v758_v55  ;;  %v661_v54 = vmax.f32 %v420_v50, 0.0  ;;  %v662_v55 = vmax.f32 %v421_v51, 0.0 }
 0x10b   :  { %3036 = vmatmul.msk.bf16.gmra.mxu2 %vm875_vm0, %v819_v58  ;;  %3157 = vmatmul.msk.bf16.gmra.mxu3 %vm875_vm0, %v819_v58  ;;  %v761_v58 = vpack.c.bf16 %v540_v53, %v539_v52 }
 0x10c   :  { %v822_v61 = vpack.c.bf16 %v662_v55, %v661_v54  ;;  %v427_v54 = vadd.f32 %v3887_v45, %v182_v46  ;;  %v65_v46 = vld [vmem:[%s5914_s0 + $0x190] sm:$0xff] }
 0x10e   :  { %v1593_v63 = vpop.f32.mrf.mxu2  ;;  %v2206_v0 = vpop.f32.mrf.mxu3 }
 0x10f   :  { %v1290_v3 = vpop.f32.mrf.mxu0  ;;  %v1903_v4 = vpop.f32.mrf.mxu1  ;;  %2741 = vst [vmem:[%s5916_s3 + $0x8a0] sm:$0xff] %v1593_v63  ;;  %v56_v63 = vld [vmem:[%s5914_s0 + $0x148] sm:$0xff] }
 0x110   :  { %2499 = vst [vmem:[%s5916_s3 + $0x110] sm:$0xff] %v1290_v3  ;;  %v301_v5 = vadd.f32 %v3887_v45, %v56_v63 }
 0x111   :  { %2500 = vst [vmem:[%s5916_s3 + $0x118] sm:$0xff] %v1903_v4  ;;  %v300_v4 = vadd.f32 %v3887_v45, %v55_v62 }
 0x112   :  { %2742 = vst [vmem:[%s5916_s3 + $0x8a8] sm:$0xff] %v2206_v0  ;;  %v177_v0 = vld [vmem:[%s5914_s0 + $0x510] sm:$0xff] }
 0x113   :  { %v422_v9 = vadd.f32 %v3887_v45, %v177_v0  ;;  %v541_v11 = vmax.f32 %v300_v4, 0.0  ;;  %v184_v4 = vld [vmem:[%s5914_s0 + $0x548] sm:$0xff] }
 0x116   :  { %v1595_v12 = vpop.f32.mrf.mxu2  ;;  %v2208_v13 = vpop.f32.mrf.mxu3 }
 0x117   :  { %v1293_v15 = vpop.f32.mrf.mxu0  ;;  %v1906_v16 = vpop.f32.mrf.mxu1  ;;  %2743 = vst [vmem:[%s5916_s3 + $0x8b0] sm:$0xff] %v1595_v12  ;;  %v542_v12 = vmax.f32 %v301_v5, 0.0 }
 0x118   :  { %2501 = vst [vmem:[%s5916_s3 + $0x120] sm:$0xff] %v1293_v15 }
 0x119   :  { %2502 = vst [vmem:[%s5916_s3 + $0x128] sm:$0xff] %v1906_v16 }
 0x11a   :  { %2744 = vst [vmem:[%s5916_s3 + $0x8b8] sm:$0xff] %v2208_v13  ;;  %2976 = vmatmul.msk.bf16.gmra.mxu0 %vm875_vm0, %v759_v14  ;;  %3097 = vmatmul.msk.bf16.gmra.mxu1 %vm875_vm0, %v759_v14  ;;  %v663_v13 = vmax.f32 %v422_v9, 0.0  ;;  %v664_v14 = vmax.f32 %v423_v10, 0.0 }
 0x11b   :  { %3037 = vmatmul.msk.bf16.gmra.mxu2 %vm875_vm0, %v820_v17  ;;  %3158 = vmatmul.msk.bf16.gmra.mxu3 %vm875_vm0, %v820_v17  ;;  %v762_v17 = vpack.c.bf16 %v542_v12, %v541_v11 }
 0x11c   :  { %v823_v20 = vpack.c.bf16 %v664_v14, %v663_v13  ;;  %v429_v13 = vadd.f32 %v3887_v45, %v184_v4  ;;  %v67_v4 = vld [vmem:[%s5914_s0 + $0x1a0] sm:$0xff] }
 0x11e   :  { %v1598_v22 = vpop.f32.mrf.mxu2  ;;  %v2211_v23 = vpop.f32.mrf.mxu3 }
 0x11f   :  { %v1295_v26 = vpop.f32.mrf.mxu0  ;;  %v1908_v27 = vpop.f32.mrf.mxu1  ;;  %2745 = vst [vmem:[%s5916_s3 + $0x8c0] sm:$0xff] %v1598_v22  ;;  %v58_v22 = vld [vmem:[%s5914_s0 + $0x158] sm:$0xff] }
 0x120   :  { %2503 = vst [vmem:[%s5916_s3 + $0x130] sm:$0xff] %v1295_v26  ;;  %v303_v28 = vadd.f32 %v3887_v45, %v58_v22 }
 0x121   :  { %2504 = vst [vmem:[%s5916_s3 + $0x138] sm:$0xff] %v1908_v27  ;;  %v302_v27 = vadd.f32 %v3887_v45, %v57_v21 }
 0x122   :  { %2746 = vst [vmem:[%s5916_s3 + $0x8c8] sm:$0xff] %v2211_v23  ;;  %v179_v23 = vld [vmem:[%s5914_s0 + $0x520] sm:$0xff] }
 0x123   :  { %v424_v31 = vadd.f32 %v3887_v45, %v179_v23  ;;  %v543_v33 = vmax.f32 %v302_v27, 0.0  ;;  %v186_v27 = vld [vmem:[%s5914_s0 + $0x558] sm:$0xff] }
 0x126   :  { %v1600_v34 = vpop.f32.mrf.mxu2  ;;  %v2213_v35 = vpop.f32.mrf.mxu3 }
 0x127   :  { %v1298_v8 = vpop.f32.mrf.mxu0  ;;  %v1911_v37 = vpop.f32.mrf.mxu1  ;;  %2747 = vst [vmem:[%s5916_s3 + $0x8d0] sm:$0xff] %v1600_v34  ;;  %v544_v34 = vmax.f32 %v303_v28, 0.0 }
 0x128   :  { %2505 = vst [vmem:[%s5916_s3 + $0x140] sm:$0xff] %v1298_v8 }
 0x129   :  { %2506 = vst [vmem:[%s5916_s3 + $0x148] sm:$0xff] %v1911_v37 }
 0x12a   :  { %2748 = vst [vmem:[%s5916_s3 + $0x8d8] sm:$0xff] %v2213_v35  ;;  %2977 = vmatmul.msk.bf16.gmra.mxu0 %vm875_vm0, %v760_v36  ;;  %3098 = vmatmul.msk.bf16.gmra.mxu1 %vm875_vm0, %v760_v36  ;;  %v665_v35 = vmax.f32 %v424_v31, 0.0  ;;  %v666_v36 = vmax.f32 %v425_v32, 0.0 }
 0x12b   :  { %3038 = vmatmul.msk.bf16.gmra.mxu2 %vm875_vm0, %v821_v38  ;;  %3159 = vmatmul.msk.bf16.gmra.mxu3 %vm875_vm0, %v821_v38  ;;  %v763_v38 = vpack.c.bf16 %v544_v34, %v543_v33 }
 0x12c   :  { %v824_v41 = vpack.c.bf16 %v666_v36, %v665_v35  ;;  %v431_v35 = vadd.f32 %v3887_v45, %v186_v27  ;;  %v69_v27 = vld [vmem:[%s5914_s0 + $0x1b0] sm:$0xff] }
 0x12e   :  { %v1603_v43 = vpop.f32.mrf.mxu2  ;;  %v2216_v44 = vpop.f32.mrf.mxu3 }
 0x12f   :  { %v1300_v48 = vpop.f32.mrf.mxu0  ;;  %v1913_v49 = vpop.f32.mrf.mxu1  ;;  %2749 = vst [vmem:[%s5916_s3 + $0x8e0] sm:$0xff] %v1603_v43  ;;  %v60_v43 = vld [vmem:[%s5914_s0 + $0x168] sm:$0xff] }
 0x130   :  { %2507 = vst [vmem:[%s5916_s3 + $0x150] sm:$0xff] %v1300_v48  ;;  %v305_v50 = vadd.f32 %v3887_v45, %v60_v43 }
 0x131   :  { %2508 = vst [vmem:[%s5916_s3 + $0x158] sm:$0xff] %v1913_v49  ;;  %v304_v49 = vadd.f32 %v3887_v45, %v59_v42 }
 0x132   :  { %2750 = vst [vmem:[%s5916_s3 + $0x8e8] sm:$0xff] %v2216_v44  ;;  %v181_v44 = vld [vmem:[%s5914_s0 + $0x530] sm:$0xff] }
 0x133   :  { %v426_v53 = vadd.f32 %v3887_v45, %v181_v44  ;;  %v545_v55 = vmax.f32 %v304_v49, 0.0  ;;  %v188_v49 = vld [vmem:[%s5914_s0 + $0x568] sm:$0xff] }
 0x136   :  { %v1605_v56 = vpop.f32.mrf.mxu2  ;;  %v2218_v57 = vpop.f32.mrf.mxu3 }
 0x137   :  { %v1303_v59 = vpop.f32.mrf.mxu0  ;;  %v1916_v60 = vpop.f32.mrf.mxu1  ;;  %2751 = vst [vmem:[%s5916_s3 + $0x8f0] sm:$0xff] %v1605_v56  ;;  %v546_v56 = vmax.f32 %v305_v50, 0.0 }
 0x138   :  { %2509 = vst [vmem:[%s5916_s3 + $0x160] sm:$0xff] %v1303_v59 }
 0x139   :  { %2510 = vst [vmem:[%s5916_s3 + $0x168] sm:$0xff] %v1916_v60 }
 0x13a   :  { %2752 = vst [vmem:[%s5916_s3 + $0x8f8] sm:$0xff] %v2218_v57  ;;  %2978 = vmatmul.msk.bf16.gmra.mxu0 %vm875_vm0, %v761_v58  ;;  %3099 = vmatmul.msk.bf16.gmra.mxu1 %vm875_vm0, %v761_v58  ;;  %v667_v57 = vmax.f32 %v426_v53, 0.0  ;;  %v668_v58 = vmax.f32 %v427_v54, 0.0 }
 0x13b   :  { %3039 = vmatmul.msk.bf16.gmra.mxu2 %vm875_vm0, %v822_v61  ;;  %3160 = vmatmul.msk.bf16.gmra.mxu3 %vm875_vm0, %v822_v61  ;;  %v764_v61 = vpack.c.bf16 %v546_v56, %v545_v55 }
 0x13c   :  { %v825_v0 = vpack.c.bf16 %v668_v58, %v667_v57  ;;  %v433_v57 = vadd.f32 %v3887_v45, %v188_v49  ;;  %v71_v49 = vld [vmem:[%s5914_s0 + $0x1c0] sm:$0xff] }
 0x13e   :  { %v1608_v2 = vpop.f32.mrf.mxu2  ;;  %v2221_v3 = vpop.f32.mrf.mxu3 }
 0x13f   :  { %v1305_v6 = vpop.f32.mrf.mxu0  ;;  %v1918_v7 = vpop.f32.mrf.mxu1  ;;  %2753 = vst [vmem:[%s5916_s3 + $0x900] sm:$0xff] %v1608_v2  ;;  %v62_v2 = vld [vmem:[%s5914_s0 + $0x178] sm:$0xff] }
 0x140   :  { %2511 = vst [vmem:[%s5916_s3 + $0x170] sm:$0xff] %v1305_v6  ;;  %v307_v9 = vadd.f32 %v3887_v45, %v62_v2 }
 0x141   :  { %2512 = vst [vmem:[%s5916_s3 + $0x178] sm:$0xff] %v1918_v7  ;;  %v306_v7 = vadd.f32 %v3887_v45, %v61_v1 }
 0x142   :  { %2754 = vst [vmem:[%s5916_s3 + $0x908] sm:$0xff] %v2221_v3  ;;  %v183_v3 = vld [vmem:[%s5914_s0 + $0x540] sm:$0xff] }
 0x143   :  { %v428_v12 = vadd.f32 %v3887_v45, %v183_v3  ;;  %v547_v14 = vmax.f32 %v306_v7, 0.0  ;;  %v190_v7 = vld [vmem:[%s5914_s0 + $0x578] sm:$0xff] }
 0x146   :  { %v1610_v15 = vpop.f32.mrf.mxu2  ;;  %v2223_v16 = vpop.f32.mrf.mxu3 }
 0x147   :  { %v1308_v18 = vpop.f32.mrf.mxu0  ;;  %v1921_v19 = vpop.f32.mrf.mxu1  ;;  %2755 = vst [vmem:[%s5916_s3 + $0x910] sm:$0xff] %v1610_v15  ;;  %v548_v15 = vmax.f32 %v307_v9, 0.0 }
 0x148   :  { %2513 = vst [vmem:[%s5916_s3 + $0x180] sm:$0xff] %v1308_v18 }
 0x149   :  { %2514 = vst [vmem:[%s5916_s3 + $0x188] sm:$0xff] %v1921_v19 }
 0x14a   :  { %2756 = vst [vmem:[%s5916_s3 + $0x918] sm:$0xff] %v2223_v16  ;;  %2979 = vmatmul.msk.bf16.gmra.mxu0 %vm875_vm0, %v762_v17  ;;  %3100 = vmatmul.msk.bf16.gmra.mxu1 %vm875_vm0, %v762_v17  ;;  %v669_v16 = vmax.f32 %v428_v12, 0.0  ;;  %v670_v17 = vmax.f32 %v429_v13, 0.0 }
 0x14b   :  { %3040 = vmatmul.msk.bf16.gmra.mxu2 %vm875_vm0, %v823_v20  ;;  %3161 = vmatmul.msk.bf16.gmra.mxu3 %vm875_vm0, %v823_v20  ;;  %v765_v20 = vpack.c.bf16 %v548_v15, %v547_v14 }
 0x14c   :  { %v826_v23 = vpack.c.bf16 %v670_v17, %v669_v16  ;;  %v435_v16 = vadd.f32 %v3887_v45, %v190_v7  ;;  %v73_v7 = vld [vmem:[%s5914_s0 + $0x1d0] sm:$0xff] }
 0x14e   :  { %v1613_v25 = vpop.f32.mrf.mxu2  ;;  %v2226_v26 = vpop.f32.mrf.mxu3 }
 0x14f   :  { %v1310_v29 = vpop.f32.mrf.mxu0  ;;  %v1923_v30 = vpop.f32.mrf.mxu1  ;;  %2757 = vst [vmem:[%s5916_s3 + $0x920] sm:$0xff] %v1613_v25  ;;  %v64_v25 = vld [vmem:[%s5914_s0 + $0x188] sm:$0xff] }
 0x150   :  { %2515 = vst [vmem:[%s5916_s3 + $0x190] sm:$0xff] %v1310_v29  ;;  %v309_v31 = vadd.f32 %v3887_v45, %v64_v25 }
 0x151   :  { %2516 = vst [vmem:[%s5916_s3 + $0x198] sm:$0xff] %v1923_v30  ;;  %v308_v30 = vadd.f32 %v3887_v45, %v63_v24 }
 0x152   :  { %2758 = vst [vmem:[%s5916_s3 + $0x928] sm:$0xff] %v2226_v26  ;;  %v185_v26 = vld [vmem:[%s5914_s0 + $0x550] sm:$0xff] }
 0x153   :  { %v430_v34 = vadd.f32 %v3887_v45, %v185_v26  ;;  %v549_v36 = vmax.f32 %v308_v30, 0.0  ;;  %v192_v30 = vld [vmem:[%s5914_s0 + $0x588] sm:$0xff] }
 0x156   :  { %v1615_v8 = vpop.f32.mrf.mxu2  ;;  %v2228_v37 = vpop.f32.mrf.mxu3 }
 0x157   :  { %v1313_v39 = vpop.f32.mrf.mxu0  ;;  %v1926_v40 = vpop.f32.mrf.mxu1  ;;  %2759 = vst [vmem:[%s5916_s3 + $0x930] sm:$0xff] %v1615_v8  ;;  %v550_v8 = vmax.f32 %v309_v31, 0.0 }
 0x158   :  { %2517 = vst [vmem:[%s5916_s3 + $0x1a0] sm:$0xff] %v1313_v39 }
 0x159   :  { %2518 = vst [vmem:[%s5916_s3 + $0x1a8] sm:$0xff] %v1926_v40 }
 0x15a   :  { %2760 = vst [vmem:[%s5916_s3 + $0x938] sm:$0xff] %v2228_v37  ;;  %2980 = vmatmul.msk.bf16.gmra.mxu0 %vm875_vm0, %v763_v38  ;;  %3101 = vmatmul.msk.bf16.gmra.mxu1 %vm875_vm0, %v763_v38  ;;  %v671_v37 = vmax.f32 %v430_v34, 0.0  ;;  %v672_v38 = vmax.f32 %v431_v35, 0.0 }
 0x15b   :  { %3041 = vmatmul.msk.bf16.gmra.mxu2 %vm875_vm0, %v824_v41  ;;  %3162 = vmatmul.msk.bf16.gmra.mxu3 %vm875_vm0, %v824_v41  ;;  %v766_v41 = vpack.c.bf16 %v550_v8, %v549_v36 }
 0x15c   :  { %v827_v44 = vpack.c.bf16 %v672_v38, %v671_v37  ;;  %v437_v37 = vadd.f32 %v3887_v45, %v192_v30  ;;  %v75_v30 = vld [vmem:[%s5914_s0 + $0x1e0] sm:$0xff] }
 0x15e   :  { %v1618_v47 = vpop.f32.mrf.mxu2  ;;  %v2231_v48 = vpop.f32.mrf.mxu3 }
 0x15f   :  { %v1315_v51 = vpop.f32.mrf.mxu0  ;;  %v1928_v52 = vpop.f32.mrf.mxu1  ;;  %2761 = vst [vmem:[%s5916_s3 + $0x940] sm:$0xff] %v1618_v47  ;;  %v66_v47 = vld [vmem:[%s5914_s0 + $0x198] sm:$0xff] }
 0x160   :  { %2519 = vst [vmem:[%s5916_s3 + $0x1b0] sm:$0xff] %v1315_v51  ;;  %v311_v53 = vadd.f32 %v3887_v45, %v66_v47 }
 0x161   :  { %2520 = vst [vmem:[%s5916_s3 + $0x1b8] sm:$0xff] %v1928_v52  ;;  %v310_v52 = vadd.f32 %v3887_v45, %v65_v46 }
 0x162   :  { %2762 = vst [vmem:[%s5916_s3 + $0x948] sm:$0xff] %v2231_v48  ;;  %v187_v48 = vld [vmem:[%s5914_s0 + $0x560] sm:$0xff] }
 0x163   :  { %v432_v56 = vadd.f32 %v3887_v45, %v187_v48  ;;  %v551_v58 = vmax.f32 %v310_v52, 0.0  ;;  %v194_v52 = vld [vmem:[%s5914_s0 + $0x598] sm:$0xff] }
 0x166   :  { %v1620_v59 = vpop.f32.mrf.mxu2  ;;  %v2233_v60 = vpop.f32.mrf.mxu3 }
 0x167   :  { %v1318_v62 = vpop.f32.mrf.mxu0  ;;  %v1931_v63 = vpop.f32.mrf.mxu1  ;;  %2763 = vst [vmem:[%s5916_s3 + $0x950] sm:$0xff] %v1620_v59  ;;  %v552_v59 = vmax.f32 %v311_v53, 0.0 }
 0x168   :  { %2521 = vst [vmem:[%s5916_s3 + $0x1c0] sm:$0xff] %v1318_v62 }
 0x169   :  { %2522 = vst [vmem:[%s5916_s3 + $0x1c8] sm:$0xff] %v1931_v63 }
 0x16a   :  { %2764 = vst [vmem:[%s5916_s3 + $0x958] sm:$0xff] %v2233_v60  ;;  %2981 = vmatmul.msk.bf16.gmra.mxu0 %vm875_vm0, %v764_v61  ;;  %3102 = vmatmul.msk.bf16.gmra.mxu1 %vm875_vm0, %v764_v61  ;;  %v673_v60 = vmax.f32 %v432_v56, 0.0  ;;  %v674_v61 = vmax.f32 %v433_v57, 0.0 }
 0x16b   :  { %3042 = vmatmul.msk.bf16.gmra.mxu2 %vm875_vm0, %v825_v0  ;;  %3163 = vmatmul.msk.bf16.gmra.mxu3 %vm875_vm0, %v825_v0  ;;  %v767_v0 = vpack.c.bf16 %v552_v59, %v551_v58 }
 0x16c   :  { %v828_v3 = vpack.c.bf16 %v674_v61, %v673_v60  ;;  %v439_v60 = vadd.f32 %v3887_v45, %v194_v52  ;;  %v77_v52 = vld [vmem:[%s5914_s0 + $0x1f0] sm:$0xff] }
 0x16e   :  { %v1623_v5 = vpop.f32.mrf.mxu2  ;;  %v2236_v6 = vpop.f32.mrf.mxu3 }
 0x16f   :  { %v1320_v10 = vpop.f32.mrf.mxu0  ;;  %v1933_v11 = vpop.f32.mrf.mxu1  ;;  %2765 = vst [vmem:[%s5916_s3 + $0x960] sm:$0xff] %v1623_v5  ;;  %v68_v5 = vld [vmem:[%s5914_s0 + $0x1a8] sm:$0xff] }
 0x170   :  { %2523 = vst [vmem:[%s5916_s3 + $0x1d0] sm:$0xff] %v1320_v10  ;;  %v313_v12 = vadd.f32 %v3887_v45, %v68_v5 }
 0x171   :  { %2524 = vst [vmem:[%s5916_s3 + $0x1d8] sm:$0xff] %v1933_v11  ;;  %v312_v11 = vadd.f32 %v3887_v45, %v67_v4 }
 0x172   :  { %2766 = vst [vmem:[%s5916_s3 + $0x968] sm:$0xff] %v2236_v6  ;;  %v189_v6 = vld [vmem:[%s5914_s0 + $0x570] sm:$0xff] }
 0x173   :  { %v434_v15 = vadd.f32 %v3887_v45, %v189_v6  ;;  %v553_v17 = vmax.f32 %v312_v11, 0.0  ;;  %v196_v11 = vld [vmem:[%s5914_s0 + $0x5a8] sm:$0xff] }
 0x176   :  { %v1625_v18 = vpop.f32.mrf.mxu2  ;;  %v2238_v19 = vpop.f32.mrf.mxu3 }
 0x177   :  { %v1323_v21 = vpop.f32.mrf.mxu0  ;;  %v1936_v22 = vpop.f32.mrf.mxu1  ;;  %2767 = vst [vmem:[%s5916_s3 + $0x970] sm:$0xff] %v1625_v18  ;;  %v554_v18 = vmax.f32 %v313_v12, 0.0 }
 0x178   :  { %2525 = vst [vmem:[%s5916_s3 + $0x1e0] sm:$0xff] %v1323_v21 }
 0x179   :  { %2526 = vst [vmem:[%s5916_s3 + $0x1e8] sm:$0xff] %v1936_v22 }
 0x17a   :  { %2768 = vst [vmem:[%s5916_s3 + $0x978] sm:$0xff] %v2238_v19  ;;  %2982 = vmatmul.msk.bf16.gmra.mxu0 %vm875_vm0, %v765_v20  ;;  %3103 = vmatmul.msk.bf16.gmra.mxu1 %vm875_vm0, %v765_v20  ;;  %v675_v19 = vmax.f32 %v434_v15, 0.0  ;;  %v676_v20 = vmax.f32 %v435_v16, 0.0 }
 0x17b   :  { %3043 = vmatmul.msk.bf16.gmra.mxu2 %vm875_vm0, %v826_v23  ;;  %3164 = vmatmul.msk.bf16.gmra.mxu3 %vm875_vm0, %v826_v23  ;;  %v768_v23 = vpack.c.bf16 %v554_v18, %v553_v17 }
 0x17c   :  { %v829_v26 = vpack.c.bf16 %v676_v20, %v675_v19  ;;  %v441_v19 = vadd.f32 %v3887_v45, %v196_v11  ;;  %v79_v11 = vld [vmem:[%s5914_s0 + $0x200] sm:$0xff] }
 0x17e   :  { %v1628_v28 = vpop.f32.mrf.mxu2  ;;  %v2241_v29 = vpop.f32.mrf.mxu3 }
 0x17f   :  { %v1325_v32 = vpop.f32.mrf.mxu0  ;;  %v1938_v33 = vpop.f32.mrf.mxu1  ;;  %2769 = vst [vmem:[%s5916_s3 + $0x980] sm:$0xff] %v1628_v28  ;;  %v70_v28 = vld [vmem:[%s5914_s0 + $0x1b8] sm:$0xff] }
 0x180   :  { %2527 = vst [vmem:[%s5916_s3 + $0x1f0] sm:$0xff] %v1325_v32  ;;  %v315_v34 = vadd.f32 %v3887_v45, %v70_v28 }
 0x181   :  { %2528 = vst [vmem:[%s5916_s3 + $0x1f8] sm:$0xff] %v1938_v33  ;;  %v314_v33 = vadd.f32 %v3887_v45, %v69_v27 }
 0x182   :  { %2770 = vst [vmem:[%s5916_s3 + $0x988] sm:$0xff] %v2241_v29  ;;  %v191_v29 = vld [vmem:[%s5914_s0 + $0x580] sm:$0xff] }
 0x183   :  { %v436_v8 = vadd.f32 %v3887_v45, %v191_v29  ;;  %v555_v38 = vmax.f32 %v314_v33, 0.0  ;;  %v198_v33 = vld [vmem:[%s5914_s0 + $0x5b8] sm:$0xff] }
 0x186   :  { %v1630_v39 = vpop.f32.mrf.mxu2  ;;  %v2243_v40 = vpop.f32.mrf.mxu3 }
 0x187   :  { %v1328_v42 = vpop.f32.mrf.mxu0  ;;  %v1941_v43 = vpop.f32.mrf.mxu1  ;;  %2771 = vst [vmem:[%s5916_s3 + $0x990] sm:$0xff] %v1630_v39  ;;  %v556_v39 = vmax.f32 %v315_v34, 0.0 }
 0x188   :  { %2529 = vst [vmem:[%s5916_s3 + $0x200] sm:$0xff] %v1328_v42 }
 0x189   :  { %2530 = vst [vmem:[%s5916_s3 + $0x208] sm:$0xff] %v1941_v43 }
 0x18a   :  { %2772 = vst [vmem:[%s5916_s3 + $0x998] sm:$0xff] %v2243_v40  ;;  %2983 = vmatmul.msk.bf16.gmra.mxu0 %vm875_vm0, %v766_v41  ;;  %3104 = vmatmul.msk.bf16.gmra.mxu1 %vm875_vm0, %v766_v41  ;;  %v677_v40 = vmax.f32 %v436_v8, 0.0  ;;  %v678_v41 = vmax.f32 %v437_v37, 0.0 }
 0x18b   :  { %3044 = vmatmul.msk.bf16.gmra.mxu2 %vm875_vm0, %v827_v44  ;;  %3165 = vmatmul.msk.bf16.gmra.mxu3 %vm875_vm0, %v827_v44  ;;  %v769_v44 = vpack.c.bf16 %v556_v39, %v555_v38 }
 0x18c   :  { %v830_v48 = vpack.c.bf16 %v678_v41, %v677_v40  ;;  %v443_v40 = vadd.f32 %v3887_v45, %v198_v33  ;;  %v81_v33 = vld [vmem:[%s5914_s0 + $0x210] sm:$0xff] }
 0x18e   :  { %v1633_v50 = vpop.f32.mrf.mxu2  ;;  %v2246_v51 = vpop.f32.mrf.mxu3 }
 0x18f   :  { %v1330_v54 = vpop.f32.mrf.mxu0  ;;  %v1943_v55 = vpop.f32.mrf.mxu1  ;;  %2773 = vst [vmem:[%s5916_s3 + $0x9a0] sm:$0xff] %v1633_v50  ;;  %v72_v50 = vld [vmem:[%s5914_s0 + $0x1c8] sm:$0xff] }
 0x190   :  { %2531 = vst [vmem:[%s5916_s3 + $0x210] sm:$0xff] %v1330_v54  ;;  %v317_v56 = vadd.f32 %v3887_v45, %v72_v50 }
 0x191   :  { %2532 = vst [vmem:[%s5916_s3 + $0x218] sm:$0xff] %v1943_v55  ;;  %v316_v55 = vadd.f32 %v3887_v45, %v71_v49 }
 0x192   :  { %2774 = vst [vmem:[%s5916_s3 + $0x9a8] sm:$0xff] %v2246_v51  ;;  %v193_v51 = vld [vmem:[%s5914_s0 + $0x590] sm:$0xff] }
 0x193   :  { %v438_v59 = vadd.f32 %v3887_v45, %v193_v51  ;;  %v557_v61 = vmax.f32 %v316_v55, 0.0  ;;  %v200_v55 = vld [vmem:[%s5914_s0 + $0x5c8] sm:$0xff] }
 0x196   :  { %v1635_v62 = vpop.f32.mrf.mxu2  ;;  %v2248_v63 = vpop.f32.mrf.mxu3 }
 0x197   :  { %v1333_v1 = vpop.f32.mrf.mxu0  ;;  %v1946_v2 = vpop.f32.mrf.mxu1  ;;  %2775 = vst [vmem:[%s5916_s3 + $0x9b0] sm:$0xff] %v1635_v62  ;;  %v558_v62 = vmax.f32 %v317_v56, 0.0 }
 0x198   :  { %2533 = vst [vmem:[%s5916_s3 + $0x220] sm:$0xff] %v1333_v1 }
 0x199   :  { %2534 = vst [vmem:[%s5916_s3 + $0x228] sm:$0xff] %v1946_v2 }
 0x19a   :  { %2776 = vst [vmem:[%s5916_s3 + $0x9b8] sm:$0xff] %v2248_v63  ;;  %2984 = vmatmul.msk.bf16.gmra.mxu0 %vm875_vm0, %v767_v0  ;;  %3105 = vmatmul.msk.bf16.gmra.mxu1 %vm875_vm0, %v767_v0  ;;  %v679_v63 = vmax.f32 %v438_v59, 0.0  ;;  %v680_v0 = vmax.f32 %v439_v60, 0.0 }
 0x19b   :  { %3045 = vmatmul.msk.bf16.gmra.mxu2 %vm875_vm0, %v828_v3  ;;  %3166 = vmatmul.msk.bf16.gmra.mxu3 %vm875_vm0, %v828_v3  ;;  %v770_v3 = vpack.c.bf16 %v558_v62, %v557_v61 }
 0x19c   :  { %v831_v6 = vpack.c.bf16 %v680_v0, %v679_v63  ;;  %v445_v63 = vadd.f32 %v3887_v45, %v200_v55  ;;  %v83_v55 = vld [vmem:[%s5914_s0 + $0x220] sm:$0xff] }
 0x19e   :  { %v1638_v9 = vpop.f32.mrf.mxu2  ;;  %v2251_v10 = vpop.f32.mrf.mxu3 }
 0x19f   :  { %v1335_v13 = vpop.f32.mrf.mxu0  ;;  %v1948_v14 = vpop.f32.mrf.mxu1  ;;  %2777 = vst [vmem:[%s5916_s3 + $0x9c0] sm:$0xff] %v1638_v9  ;;  %v74_v9 = vld [vmem:[%s5914_s0 + $0x1d8] sm:$0xff] }
 0x1a0   :  { %2535 = vst [vmem:[%s5916_s3 + $0x230] sm:$0xff] %v1335_v13  ;;  %v319_v15 = vadd.f32 %v3887_v45, %v74_v9 }
 0x1a1   :  { %2536 = vst [vmem:[%s5916_s3 + $0x238] sm:$0xff] %v1948_v14  ;;  %v318_v14 = vadd.f32 %v3887_v45, %v73_v7 }
 0x1a2   :  { %2778 = vst [vmem:[%s5916_s3 + $0x9c8] sm:$0xff] %v2251_v10  ;;  %v195_v10 = vld [vmem:[%s5914_s0 + $0x5a0] sm:$0xff] }
 0x1a3   :  { %v440_v18 = vadd.f32 %v3887_v45, %v195_v10  ;;  %v559_v20 = vmax.f32 %v318_v14, 0.0  ;;  %v202_v14 = vld [vmem:[%s5914_s0 + $0x5d8] sm:$0xff] }
 0x1a6   :  { %v1640_v21 = vpop.f32.mrf.mxu2  ;;  %v2253_v22 = vpop.f32.mrf.mxu3 }
 0x1a7   :  { %v1338_v24 = vpop.f32.mrf.mxu0  ;;  %v1951_v25 = vpop.f32.mrf.mxu1  ;;  %2779 = vst [vmem:[%s5916_s3 + $0x9d0] sm:$0xff] %v1640_v21  ;;  %v560_v21 = vmax.f32 %v319_v15, 0.0 }
 0x1a8   :  { %2537 = vst [vmem:[%s5916_s3 + $0x240] sm:$0xff] %v1338_v24 }
 0x1a9   :  { %2538 = vst [vmem:[%s5916_s3 + $0x248] sm:$0xff] %v1951_v25 }
 0x1aa   :  { %2780 = vst [vmem:[%s5916_s3 + $0x9d8] sm:$0xff] %v2253_v22  ;;  %2985 = vmatmul.msk.bf16.gmra.mxu0 %vm875_vm0, %v768_v23  ;;  %3106 = vmatmul.msk.bf16.gmra.mxu1 %vm875_vm0, %v768_v23  ;;  %v681_v22 = vmax.f32 %v440_v18, 0.0  ;;  %v682_v23 = vmax.f32 %v441_v19, 0.0 }
 0x1ab   :  { %3046 = vmatmul.msk.bf16.gmra.mxu2 %vm875_vm0, %v829_v26  ;;  %3167 = vmatmul.msk.bf16.gmra.mxu3 %vm875_vm0, %v829_v26  ;;  %v771_v26 = vpack.c.bf16 %v560_v21, %v559_v20 }
 0x1ac   :  { %v832_v29 = vpack.c.bf16 %v682_v23, %v681_v22  ;;  %v447_v22 = vadd.f32 %v3887_v45, %v202_v14  ;;  %v85_v14 = vld [vmem:[%s5914_s0 + $0x230] sm:$0xff] }
 0x1ae   :  { %v1643_v31 = vpop.f32.mrf.mxu2  ;;  %v2256_v32 = vpop.f32.mrf.mxu3 }
 0x1af   :  { %v1340_v35 = vpop.f32.mrf.mxu0  ;;  %v1953_v36 = vpop.f32.mrf.mxu1  ;;  %2781 = vst [vmem:[%s5916_s3 + $0x9e0] sm:$0xff] %v1643_v31  ;;  %v76_v31 = vld [vmem:[%s5914_s0 + $0x1e8] sm:$0xff] }
 0x1b0   :  { %2539 = vst [vmem:[%s5916_s3 + $0x250] sm:$0xff] %v1340_v35  ;;  %v321_v8 = vadd.f32 %v3887_v45, %v76_v31 }
 0x1b1   :  { %2540 = vst [vmem:[%s5916_s3 + $0x258] sm:$0xff] %v1953_v36  ;;  %v320_v36 = vadd.f32 %v3887_v45, %v75_v30 }
 0x1b2   :  { %2782 = vst [vmem:[%s5916_s3 + $0x9e8] sm:$0xff] %v2256_v32  ;;  %v197_v32 = vld [vmem:[%s5914_s0 + $0x5b0] sm:$0xff] }
 0x1b3   :  { %v442_v39 = vadd.f32 %v3887_v45, %v197_v32  ;;  %v561_v41 = vmax.f32 %v320_v36, 0.0  ;;  %v204_v36 = vld [vmem:[%s5914_s0 + $0x5e8] sm:$0xff] }
 0x1b6   :  { %v1645_v42 = vpop.f32.mrf.mxu2  ;;  %v2258_v43 = vpop.f32.mrf.mxu3 }
 0x1b7   :  { %v1343_v46 = vpop.f32.mrf.mxu0  ;;  %v1956_v47 = vpop.f32.mrf.mxu1  ;;  %2783 = vst [vmem:[%s5916_s3 + $0x9f0] sm:$0xff] %v1645_v42  ;;  %v562_v42 = vmax.f32 %v321_v8, 0.0 }
 0x1b8   :  { %2541 = vst [vmem:[%s5916_s3 + $0x260] sm:$0xff] %v1343_v46 }
 0x1b9   :  { %2542 = vst [vmem:[%s5916_s3 + $0x268] sm:$0xff] %v1956_v47 }
 0x1ba   :  { %2784 = vst [vmem:[%s5916_s3 + $0x9f8] sm:$0xff] %v2258_v43  ;;  %2986 = vmatmul.msk.bf16.gmra.mxu0 %vm875_vm0, %v769_v44  ;;  %3107 = vmatmul.msk.bf16.gmra.mxu1 %vm875_vm0, %v769_v44  ;;  %v683_v43 = vmax.f32 %v442_v39, 0.0  ;;  %v684_v44 = vmax.f32 %v443_v40, 0.0 }
 0x1bb   :  { %3047 = vmatmul.msk.bf16.gmra.mxu2 %vm875_vm0, %v830_v48  ;;  %3168 = vmatmul.msk.bf16.gmra.mxu3 %vm875_vm0, %v830_v48  ;;  %v772_v48 = vpack.c.bf16 %v562_v42, %v561_v41 }
 0x1bc   :  { %v833_v51 = vpack.c.bf16 %v684_v44, %v683_v43  ;;  %v449_v43 = vadd.f32 %v3887_v45, %v204_v36  ;;  %v87_v36 = vld [vmem:[%s5914_s0 + $0x240] sm:$0xff] }
 0x1be   :  { %v1648_v53 = vpop.f32.mrf.mxu2  ;;  %v2261_v54 = vpop.f32.mrf.mxu3 }
 0x1bf   :  { %v1345_v57 = vpop.f32.mrf.mxu0  ;;  %v1958_v58 = vpop.f32.mrf.mxu1  ;;  %2785 = vst [vmem:[%s5916_s3 + $0xa00] sm:$0xff] %v1648_v53  ;;  %v78_v53 = vld [vmem:[%s5914_s0 + $0x1f8] sm:$0xff] }
 0x1c0   :  { %2543 = vst [vmem:[%s5916_s3 + $0x270] sm:$0xff] %v1345_v57  ;;  %v323_v59 = vadd.f32 %v3887_v45, %v78_v53 }
 0x1c1   :  { %2544 = vst [vmem:[%s5916_s3 + $0x278] sm:$0xff] %v1958_v58  ;;  %v322_v58 = vadd.f32 %v3887_v45, %v77_v52 }
 0x1c2   :  { %2786 = vst [vmem:[%s5916_s3 + $0xa08] sm:$0xff] %v2261_v54  ;;  %v199_v54 = vld [vmem:[%s5914_s0 + $0x5c0] sm:$0xff] }
 0x1c3   :  { %v444_v62 = vadd.f32 %v3887_v45, %v199_v54  ;;  %v563_v0 = vmax.f32 %v322_v58, 0.0  ;;  %v206_v58 = vld [vmem:[%s5914_s0 + $0x5f8] sm:$0xff] }
 0x1c6   :  { %v1650_v1 = vpop.f32.mrf.mxu2  ;;  %v2263_v2 = vpop.f32.mrf.mxu3 }
 0x1c7   :  { %v1348_v4 = vpop.f32.mrf.mxu0  ;;  %v1961_v5 = vpop.f32.mrf.mxu1  ;;  %2787 = vst [vmem:[%s5916_s3 + $0xa10] sm:$0xff] %v1650_v1  ;;  %v564_v1 = vmax.f32 %v323_v59, 0.0 }
 0x1c8   :  { %2545 = vst [vmem:[%s5916_s3 + $0x280] sm:$0xff] %v1348_v4 }
 0x1c9   :  { %2546 = vst [vmem:[%s5916_s3 + $0x288] sm:$0xff] %v1961_v5 }
 0x1ca   :  { %2788 = vst [vmem:[%s5916_s3 + $0xa18] sm:$0xff] %v2263_v2  ;;  %2987 = vmatmul.msk.bf16.gmra.mxu0 %vm875_vm0, %v770_v3  ;;  %3108 = vmatmul.msk.bf16.gmra.mxu1 %vm875_vm0, %v770_v3  ;;  %v685_v2 = vmax.f32 %v444_v62, 0.0  ;;  %v686_v3 = vmax.f32 %v445_v63, 0.0 }
 0x1cb   :  { %3048 = vmatmul.msk.bf16.gmra.mxu2 %vm875_vm0, %v831_v6  ;;  %3169 = vmatmul.msk.bf16.gmra.mxu3 %vm875_vm0, %v831_v6  ;;  %v773_v6 = vpack.c.bf16 %v564_v1, %v563_v0  ;;  %v4557_v1 = vld [vmem:[%s5915_s1] ss:$0 sm:$0xff] }
 0x1cc   :  { %v834_v10 = vpack.c.bf16 %v686_v3, %v685_v2  ;;  %v451_v3 = vadd.f32 %v4557_v1, %v206_v58  ;;  %v89_v58 = vld [vmem:[%s5914_s0 + $0x250] sm:$0xff] }
 0x1ce   :  { %v1653_v12 = vpop.f32.mrf.mxu2  ;;  %v2266_v13 = vpop.f32.mrf.mxu3 }
 0x1cf   :  { %v1350_v16 = vpop.f32.mrf.mxu0  ;;  %v1963_v17 = vpop.f32.mrf.mxu1  ;;  %2789 = vst [vmem:[%s5916_s3 + $0xa20] sm:$0xff] %v1653_v12  ;;  %v80_v12 = vld [vmem:[%s5914_s0 + $0x208] sm:$0xff] }
 0x1d0   :  { %2547 = vst [vmem:[%s5916_s3 + $0x290] sm:$0xff] %v1350_v16  ;;  %v325_v18 = vadd.f32 %v3887_v45, %v80_v12 }
 0x1d1   :  { %2548 = vst [vmem:[%s5916_s3 + $0x298] sm:$0xff] %v1963_v17  ;;  %v324_v17 = vadd.f32 %v3887_v45, %v79_v11 }
 0x1d2   :  { %2790 = vst [vmem:[%s5916_s3 + $0xa28] sm:$0xff] %v2266_v13  ;;  %v201_v13 = vld [vmem:[%s5914_s0 + $0x5d0] sm:$0xff] }
 0x1d3   :  { %v446_v21 = vadd.f32 %v3887_v45, %v201_v13  ;;  %v565_v23 = vmax.f32 %v324_v17, 0.0  ;;  %v208_v17 = vld [vmem:[%s5914_s0 + $0x608] sm:$0xff] }
 0x1d6   :  { %v1655_v24 = vpop.f32.mrf.mxu2  ;;  %v2268_v25 = vpop.f32.mrf.mxu3 }
 0x1d7   :  { %v1353_v27 = vpop.f32.mrf.mxu0  ;;  %v1966_v28 = vpop.f32.mrf.mxu1  ;;  %2791 = vst [vmem:[%s5916_s3 + $0xa30] sm:$0xff] %v1655_v24  ;;  %v566_v24 = vmax.f32 %v325_v18, 0.0 }
 0x1d8   :  { %2549 = vst [vmem:[%s5916_s3 + $0x2a0] sm:$0xff] %v1353_v27 }
 0x1d9   :  { %2550 = vst [vmem:[%s5916_s3 + $0x2a8] sm:$0xff] %v1966_v28 }
 0x1da   :  { %2792 = vst [vmem:[%s5916_s3 + $0xa38] sm:$0xff] %v2268_v25  ;;  %2988 = vmatmul.msk.bf16.gmra.mxu0 %vm875_vm0, %v771_v26  ;;  %3109 = vmatmul.msk.bf16.gmra.mxu1 %vm875_vm0, %v771_v26  ;;  %v687_v25 = vmax.f32 %v446_v21, 0.0  ;;  %v688_v26 = vmax.f32 %v447_v22, 0.0 }
 0x1db   :  { %3049 = vmatmul.msk.bf16.gmra.mxu2 %vm875_vm0, %v832_v29  ;;  %3170 = vmatmul.msk.bf16.gmra.mxu3 %vm875_vm0, %v832_v29  ;;  %v774_v29 = vpack.c.bf16 %v566_v24, %v565_v23 }
 0x1dc   :  { %v835_v32 = vpack.c.bf16 %v688_v26, %v687_v25  ;;  %v453_v25 = vadd.f32 %v4557_v1, %v208_v17  ;;  %v91_v17 = vld [vmem:[%s5914_s0 + $0x260] sm:$0xff] }
 0x1de   :  { %v1658_v34 = vpop.f32.mrf.mxu2  ;;  %v2271_v35 = vpop.f32.mrf.mxu3 }
 0x1df   :  { %v1355_v37 = vpop.f32.mrf.mxu0  ;;  %v1968_v38 = vpop.f32.mrf.mxu1  ;;  %2793 = vst [vmem:[%s5916_s3 + $0xa40] sm:$0xff] %v1658_v34  ;;  %v82_v34 = vld [vmem:[%s5914_s0 + $0x218] sm:$0xff] }
 0x1e0   :  { %2551 = vst [vmem:[%s5916_s3 + $0x2b0] sm:$0xff] %v1355_v37  ;;  %v327_v39 = vadd.f32 %v3887_v45, %v82_v34 }
 0x1e1   :  { %2552 = vst [vmem:[%s5916_s3 + $0x2b8] sm:$0xff] %v1968_v38  ;;  %v326_v38 = vadd.f32 %v3887_v45, %v81_v33 }
 0x1e2   :  { %2794 = vst [vmem:[%s5916_s3 + $0xa48] sm:$0xff] %v2271_v35  ;;  %v203_v35 = vld [vmem:[%s5914_s0 + $0x5e0] sm:$0xff] }
 0x1e3   :  { %v448_v42 = vadd.f32 %v3887_v45, %v203_v35  ;;  %v567_v44 = vmax.f32 %v326_v38, 0.0  ;;  %v210_v38 = vld [vmem:[%s5914_s0 + $0x618] sm:$0xff] }
 0x1e6   :  { %v1660_v46 = vpop.f32.mrf.mxu2  ;;  %v2273_v47 = vpop.f32.mrf.mxu3 }
 0x1e7   :  { %v1358_v49 = vpop.f32.mrf.mxu0  ;;  %v1971_v50 = vpop.f32.mrf.mxu1  ;;  %2795 = vst [vmem:[%s5916_s3 + $0xa50] sm:$0xff] %v1660_v46  ;;  %v568_v46 = vmax.f32 %v327_v39, 0.0 }
 0x1e8   :  { %2553 = vst [vmem:[%s5916_s3 + $0x2c0] sm:$0xff] %v1358_v49 }
 0x1e9   :  { %2554 = vst [vmem:[%s5916_s3 + $0x2c8] sm:$0xff] %v1971_v50 }
 0x1ea   :  { %2796 = vst [vmem:[%s5916_s3 + $0xa58] sm:$0xff] %v2273_v47  ;;  %2989 = vmatmul.msk.bf16.gmra.mxu0 %vm875_vm0, %v772_v48  ;;  %3110 = vmatmul.msk.bf16.gmra.mxu1 %vm875_vm0, %v772_v48  ;;  %v689_v47 = vmax.f32 %v448_v42, 0.0  ;;  %v690_v48 = vmax.f32 %v449_v43, 0.0 }
 0x1eb   :  { %3050 = vmatmul.msk.bf16.gmra.mxu2 %vm875_vm0, %v833_v51  ;;  %3171 = vmatmul.msk.bf16.gmra.mxu3 %vm875_vm0, %v833_v51  ;;  %v775_v51 = vpack.c.bf16 %v568_v46, %v567_v44 }
 0x1ec   :  { %v836_v54 = vpack.c.bf16 %v690_v48, %v689_v47  ;;  %v455_v47 = vadd.f32 %v4557_v1, %v210_v38  ;;  %v93_v38 = vld [vmem:[%s5914_s0 + $0x270] sm:$0xff] }
 0x1ee   :  { %v1663_v56 = vpop.f32.mrf.mxu2  ;;  %v2276_v57 = vpop.f32.mrf.mxu3 }
 0x1ef   :  { %v1360_v60 = vpop.f32.mrf.mxu0  ;;  %v1973_v61 = vpop.f32.mrf.mxu1  ;;  %2797 = vst [vmem:[%s5916_s3 + $0xa60] sm:$0xff] %v1663_v56  ;;  %v84_v56 = vld [vmem:[%s5914_s0 + $0x228] sm:$0xff] }
 0x1f0   :  { %2555 = vst [vmem:[%s5916_s3 + $0x2d0] sm:$0xff] %v1360_v60  ;;  %v329_v62 = vadd.f32 %v3887_v45, %v84_v56 }
 0x1f1   :  { %2556 = vst [vmem:[%s5916_s3 + $0x2d8] sm:$0xff] %v1973_v61  ;;  %v328_v61 = vadd.f32 %v3887_v45, %v83_v55 }
 0x1f2   :  { %2798 = vst [vmem:[%s5916_s3 + $0xa68] sm:$0xff] %v2276_v57  ;;  %v205_v57 = vld [vmem:[%s5914_s0 + $0x5f0] sm:$0xff] }
 0x1f3   :  { %v450_v2 = vadd.f32 %v4557_v1, %v205_v57  ;;  %v569_v45 = vmax.f32 %v328_v61, 0.0  ;;  %v212_v61 = vld [vmem:[%s5914_s0 + $0x628] sm:$0xff] }
 0x1f6   :  { %v1665_v4 = vpop.f32.mrf.mxu2  ;;  %v2278_v5 = vpop.f32.mrf.mxu3 }
 0x1f7   :  { %v1363_v7 = vpop.f32.mrf.mxu0  ;;  %v1976_v9 = vpop.f32.mrf.mxu1  ;;  %2799 = vst [vmem:[%s5916_s3 + $0xa70] sm:$0xff] %v1665_v4  ;;  %v570_v4 = vmax.f32 %v329_v62, 0.0 }
 0x1f8   :  { %2557 = vst [vmem:[%s5916_s3 + $0x2e0] sm:$0xff] %v1363_v7 }
 0x1f9   :  { %2558 = vst [vmem:[%s5916_s3 + $0x2e8] sm:$0xff] %v1976_v9 }
 0x1fa   :  { %2800 = vst [vmem:[%s5916_s3 + $0xa78] sm:$0xff] %v2278_v5  ;;  %2990 = vmatmul.msk.bf16.gmra.mxu0 %vm875_vm0, %v773_v6  ;;  %3111 = vmatmul.msk.bf16.gmra.mxu1 %vm875_vm0, %v773_v6  ;;  %v691_v5 = vmax.f32 %v450_v2, 0.0  ;;  %v692_v6 = vmax.f32 %v451_v3, 0.0 }
 0x1fb   :  { %3051 = vmatmul.msk.bf16.gmra.mxu2 %vm875_vm0, %v834_v10  ;;  %3172 = vmatmul.msk.bf16.gmra.mxu3 %vm875_vm0, %v834_v10  ;;  %v776_v10 = vpack.c.bf16 %v570_v4, %v569_v45 }
 0x1fc   :  { %v837_v13 = vpack.c.bf16 %v692_v6, %v691_v5  ;;  %v457_v5 = vadd.f32 %v4557_v1, %v212_v61  ;;  %v95_v61 = vld [vmem:[%s5914_s0 + $0x280] sm:$0xff] }
 0x1fe   :  { %v1668_v15 = vpop.f32.mrf.mxu2  ;;  %v2281_v16 = vpop.f32.mrf.mxu3 }
 0x1ff   :  { %v1365_v19 = vpop.f32.mrf.mxu0  ;;  %v1978_v20 = vpop.f32.mrf.mxu1  ;;  %2801 = vst [vmem:[%s5916_s3 + $0xa80] sm:$0xff] %v1668_v15  ;;  %v86_v15 = vld [vmem:[%s5914_s0 + $0x238] sm:$0xff] }
 0x200   :  { %2559 = vst [vmem:[%s5916_s3 + $0x2f0] sm:$0xff] %v1365_v19  ;;  %v331_v21 = vadd.f32 %v4557_v1, %v86_v15 }
 0x201   :  { %2560 = vst [vmem:[%s5916_s3 + $0x2f8] sm:$0xff] %v1978_v20  ;;  %v330_v20 = vadd.f32 %v4557_v1, %v85_v14 }
 0x202   :  { %2802 = vst [vmem:[%s5916_s3 + $0xa88] sm:$0xff] %v2281_v16  ;;  %v207_v16 = vld [vmem:[%s5914_s0 + $0x600] sm:$0xff] }
 0x203   :  { %v452_v24 = vadd.f32 %v4557_v1, %v207_v16  ;;  %v571_v26 = vmax.f32 %v330_v20, 0.0  ;;  %v214_v20 = vld [vmem:[%s5914_s0 + $0x638] sm:$0xff] }
 0x206   :  { %v1670_v27 = vpop.f32.mrf.mxu2  ;;  %v2283_v28 = vpop.f32.mrf.mxu3 }
 0x207   :  { %v1368_v30 = vpop.f32.mrf.mxu0  ;;  %v1981_v31 = vpop.f32.mrf.mxu1  ;;  %2803 = vst [vmem:[%s5916_s3 + $0xa90] sm:$0xff] %v1670_v27  ;;  %v572_v27 = vmax.f32 %v331_v21, 0.0 }
 0x208   :  { %2561 = vst [vmem:[%s5916_s3 + $0x300] sm:$0xff] %v1368_v30 }
 0x209   :  { %2562 = vst [vmem:[%s5916_s3 + $0x308] sm:$0xff] %v1981_v31 }
 0x20a   :  { %2804 = vst [vmem:[%s5916_s3 + $0xa98] sm:$0xff] %v2283_v28  ;;  %2991 = vmatmul.msk.bf16.gmra.mxu0 %vm875_vm0, %v774_v29  ;;  %3112 = vmatmul.msk.bf16.gmra.mxu1 %vm875_vm0, %v774_v29  ;;  %v693_v28 = vmax.f32 %v452_v24, 0.0  ;;  %v694_v29 = vmax.f32 %v453_v25, 0.0 }
 0x20b   :  { %3052 = vmatmul.msk.bf16.gmra.mxu2 %vm875_vm0, %v835_v32  ;;  %3173 = vmatmul.msk.bf16.gmra.mxu3 %vm875_vm0, %v835_v32  ;;  %v777_v32 = vpack.c.bf16 %v572_v27, %v571_v26 }
 0x20c   :  { %v838_v35 = vpack.c.bf16 %v694_v29, %v693_v28  ;;  %v459_v28 = vadd.f32 %v4557_v1, %v214_v20  ;;  %v97_v20 = vld [vmem:[%s5914_s0 + $0x290] sm:$0xff] }
 0x20e   :  { %v1673_v8 = vpop.f32.mrf.mxu2  ;;  %v2286_v37 = vpop.f32.mrf.mxu3 }
 0x20f   :  { %v1370_v40 = vpop.f32.mrf.mxu0  ;;  %v1983_v41 = vpop.f32.mrf.mxu1  ;;  %2805 = vst [vmem:[%s5916_s3 + $0xaa0] sm:$0xff] %v1673_v8  ;;  %v88_v8 = vld [vmem:[%s5914_s0 + $0x248] sm:$0xff] }
 0x210   :  { %2563 = vst [vmem:[%s5916_s3 + $0x310] sm:$0xff] %v1370_v40  ;;  %v333_v42 = vadd.f32 %v4557_v1, %v88_v8 }
 0x211   :  { %2564 = vst [vmem:[%s5916_s3 + $0x318] sm:$0xff] %v1983_v41  ;;  %v332_v41 = vadd.f32 %v4557_v1, %v87_v36 }
 0x212   :  { %2806 = vst [vmem:[%s5916_s3 + $0xaa8] sm:$0xff] %v2286_v37  ;;  %v209_v37 = vld [vmem:[%s5914_s0 + $0x610] sm:$0xff] }
 0x213   :  { %v454_v46 = vadd.f32 %v4557_v1, %v209_v37  ;;  %v573_v48 = vmax.f32 %v332_v41, 0.0  ;;  %v216_v41 = vld [vmem:[%s5914_s0 + $0x648] sm:$0xff] }
 0x216   :  { %v1675_v49 = vpop.f32.mrf.mxu2  ;;  %v2288_v50 = vpop.f32.mrf.mxu3 }
 0x217   :  { %v1373_v52 = vpop.f32.mrf.mxu0  ;;  %v1986_v53 = vpop.f32.mrf.mxu1  ;;  %2807 = vst [vmem:[%s5916_s3 + $0xab0] sm:$0xff] %v1675_v49  ;;  %v574_v49 = vmax.f32 %v333_v42, 0.0 }
 0x218   :  { %2565 = vst [vmem:[%s5916_s3 + $0x320] sm:$0xff] %v1373_v52 }
 0x219   :  { %2566 = vst [vmem:[%s5916_s3 + $0x328] sm:$0xff] %v1986_v53 }
 0x21a   :  { %2808 = vst [vmem:[%s5916_s3 + $0xab8] sm:$0xff] %v2288_v50  ;;  %2992 = vmatmul.msk.bf16.gmra.mxu0 %vm875_vm0, %v775_v51  ;;  %3113 = vmatmul.msk.bf16.gmra.mxu1 %vm875_vm0, %v775_v51  ;;  %v695_v50 = vmax.f32 %v454_v46, 0.0  ;;  %v696_v51 = vmax.f32 %v455_v47, 0.0 }
 0x21b   :  { %3053 = vmatmul.msk.bf16.gmra.mxu2 %vm875_vm0, %v836_v54  ;;  %3174 = vmatmul.msk.bf16.gmra.mxu3 %vm875_vm0, %v836_v54  ;;  %v778_v54 = vpack.c.bf16 %v574_v49, %v573_v48 }
 0x21c   :  { %v839_v57 = vpack.c.bf16 %v696_v51, %v695_v50  ;;  %v461_v50 = vadd.f32 %v4557_v1, %v216_v41  ;;  %v99_v41 = vld [vmem:[%s5914_s0 + $0x2a0] sm:$0xff] }
 0x21e   :  { %v1678_v59 = vpop.f32.mrf.mxu2  ;;  %v2291_v60 = vpop.f32.mrf.mxu3 }
 0x21f   :  { %v1375_v63 = vpop.f32.mrf.mxu0  ;;  %v1988_v0 = vpop.f32.mrf.mxu1  ;;  %2809 = vst [vmem:[%s5916_s3 + $0xac0] sm:$0xff] %v1678_v59  ;;  %v90_v59 = vld [vmem:[%s5914_s0 + $0x258] sm:$0xff] }
 0x220   :  { %2567 = vst [vmem:[%s5916_s3 + $0x330] sm:$0xff] %v1375_v63  ;;  %v335_v2 = vadd.f32 %v4557_v1, %v90_v59 }
 0x221   :  { %2568 = vst [vmem:[%s5916_s3 + $0x338] sm:$0xff] %v1988_v0  ;;  %v334_v0 = vadd.f32 %v4557_v1, %v89_v58 }
 0x222   :  { %2810 = vst [vmem:[%s5916_s3 + $0xac8] sm:$0xff] %v2291_v60  ;;  %v211_v60 = vld [vmem:[%s5914_s0 + $0x620] sm:$0xff] }
 0x223   :  { %v456_v4 = vadd.f32 %v4557_v1, %v211_v60  ;;  %v575_v6 = vmax.f32 %v334_v0, 0.0  ;;  %v218_v0 = vld [vmem:[%s5914_s0 + $0x658] sm:$0xff] }
 0x226   :  { %v1680_v7 = vpop.f32.mrf.mxu2  ;;  %v2293_v9 = vpop.f32.mrf.mxu3 }
 0x227   :  { %v1378_v11 = vpop.f32.mrf.mxu0  ;;  %v1991_v12 = vpop.f32.mrf.mxu1  ;;  %2811 = vst [vmem:[%s5916_s3 + $0xad0] sm:$0xff] %v1680_v7  ;;  %v576_v7 = vmax.f32 %v335_v2, 0.0 }
 0x228   :  { %2569 = vst [vmem:[%s5916_s3 + $0x340] sm:$0xff] %v1378_v11 }
 0x229   :  { %2570 = vst [vmem:[%s5916_s3 + $0x348] sm:$0xff] %v1991_v12 }
 0x22a   :  { %2812 = vst [vmem:[%s5916_s3 + $0xad8] sm:$0xff] %v2293_v9  ;;  %2993 = vmatmul.msk.bf16.gmra.mxu0 %vm875_vm0, %v776_v10  ;;  %3114 = vmatmul.msk.bf16.gmra.mxu1 %vm875_vm0, %v776_v10  ;;  %v697_v9 = vmax.f32 %v456_v4, 0.0  ;;  %v698_v10 = vmax.f32 %v457_v5, 0.0 }
 0x22b   :  { %3054 = vmatmul.msk.bf16.gmra.mxu2 %vm875_vm0, %v837_v13  ;;  %3175 = vmatmul.msk.bf16.gmra.mxu3 %vm875_vm0, %v837_v13  ;;  %v779_v13 = vpack.c.bf16 %v576_v7, %v575_v6 }
 0x22c   :  { %v840_v16 = vpack.c.bf16 %v698_v10, %v697_v9  ;;  %v463_v9 = vadd.f32 %v4557_v1, %v218_v0  ;;  %v101_v0 = vld [vmem:[%s5914_s0 + $0x2b0] sm:$0xff] }
 0x22e   :  { %v1683_v18 = vpop.f32.mrf.mxu2  ;;  %v2296_v19 = vpop.f32.mrf.mxu3 }
 0x22f   :  { %v1380_v22 = vpop.f32.mrf.mxu0  ;;  %v1993_v23 = vpop.f32.mrf.mxu1  ;;  %2813 = vst [vmem:[%s5916_s3 + $0xae0] sm:$0xff] %v1683_v18  ;;  %v92_v18 = vld [vmem:[%s5914_s0 + $0x268] sm:$0xff] }
 0x230   :  { %2571 = vst [vmem:[%s5916_s3 + $0x350] sm:$0xff] %v1380_v22  ;;  %v337_v24 = vadd.f32 %v4557_v1, %v92_v18 }
 0x231   :  { %2572 = vst [vmem:[%s5916_s3 + $0x358] sm:$0xff] %v1993_v23  ;;  %v336_v23 = vadd.f32 %v4557_v1, %v91_v17 }
 0x232   :  { %2814 = vst [vmem:[%s5916_s3 + $0xae8] sm:$0xff] %v2296_v19  ;;  %v213_v19 = vld [vmem:[%s5914_s0 + $0x630] sm:$0xff] }
 0x233   :  { %v458_v27 = vadd.f32 %v4557_v1, %v213_v19  ;;  %v577_v29 = vmax.f32 %v336_v23, 0.0  ;;  %v220_v23 = vld [vmem:[%s5914_s0 + $0x668] sm:$0xff] }
 0x236   :  { %v1685_v30 = vpop.f32.mrf.mxu2  ;;  %v2298_v31 = vpop.f32.mrf.mxu3 }
 0x237   :  { %v1383_v33 = vpop.f32.mrf.mxu0  ;;  %v1996_v34 = vpop.f32.mrf.mxu1  ;;  %2815 = vst [vmem:[%s5916_s3 + $0xaf0] sm:$0xff] %v1685_v30  ;;  %v578_v30 = vmax.f32 %v337_v24, 0.0 }
 0x238   :  { %2573 = vst [vmem:[%s5916_s3 + $0x360] sm:$0xff] %v1383_v33 }
 0x239   :  { %2574 = vst [vmem:[%s5916_s3 + $0x368] sm:$0xff] %v1996_v34 }
 0x23a   :  { %2816 = vst [vmem:[%s5916_s3 + $0xaf8] sm:$0xff] %v2298_v31  ;;  %2994 = vmatmul.msk.bf16.gmra.mxu0 %vm875_vm0, %v777_v32  ;;  %3115 = vmatmul.msk.bf16.gmra.mxu1 %vm875_vm0, %v777_v32  ;;  %v699_v31 = vmax.f32 %v458_v27, 0.0  ;;  %v700_v32 = vmax.f32 %v459_v28, 0.0 }
 0x23b   :  { %3055 = vmatmul.msk.bf16.gmra.mxu2 %vm875_vm0, %v838_v35  ;;  %3176 = vmatmul.msk.bf16.gmra.mxu3 %vm875_vm0, %v838_v35  ;;  %v780_v35 = vpack.c.bf16 %v578_v30, %v577_v29 }
 0x23c   :  { %v841_v37 = vpack.c.bf16 %v700_v32, %v699_v31  ;;  %v465_v31 = vadd.f32 %v4557_v1, %v220_v23  ;;  %v103_v23 = vld [vmem:[%s5914_s0 + $0x2c0] sm:$0xff] }
 0x23e   :  { %v1688_v39 = vpop.f32.mrf.mxu2  ;;  %v2301_v40 = vpop.f32.mrf.mxu3 }
 0x23f   :  { %v1385_v43 = vpop.f32.mrf.mxu0  ;;  %v1998_v44 = vpop.f32.mrf.mxu1  ;;  %2817 = vst [vmem:[%s5916_s3 + $0xb00] sm:$0xff] %v1688_v39  ;;  %v94_v39 = vld [vmem:[%s5914_s0 + $0x278] sm:$0xff] }
 0x240   :  { %2575 = vst [vmem:[%s5916_s3 + $0x370] sm:$0xff] %v1385_v43  ;;  %v339_v46 = vadd.f32 %v4557_v1, %v94_v39 }
 0x241   :  { %2576 = vst [vmem:[%s5916_s3 + $0x378] sm:$0xff] %v1998_v44  ;;  %v338_v44 = vadd.f32 %v4557_v1, %v93_v38 }
 0x242   :  { %2818 = vst [vmem:[%s5916_s3 + $0xb08] sm:$0xff] %v2301_v40  ;;  %v215_v40 = vld [vmem:[%s5914_s0 + $0x640] sm:$0xff] }
 0x243   :  { %v460_v49 = vadd.f32 %v4557_v1, %v215_v40  ;;  %v579_v51 = vmax.f32 %v338_v44, 0.0  ;;  %v222_v44 = vld [vmem:[%s5914_s0 + $0x678] sm:$0xff] }
 0x246   :  { %v1690_v52 = vpop.f32.mrf.mxu2  ;;  %v2303_v53 = vpop.f32.mrf.mxu3 }
 0x247   :  { %v1388_v55 = vpop.f32.mrf.mxu0  ;;  %v2001_v56 = vpop.f32.mrf.mxu1  ;;  %2819 = vst [vmem:[%s5916_s3 + $0xb10] sm:$0xff] %v1690_v52  ;;  %v580_v52 = vmax.f32 %v339_v46, 0.0 }
 0x248   :  { %2577 = vst [vmem:[%s5916_s3 + $0x380] sm:$0xff] %v1388_v55 }
 0x249   :  { %2578 = vst [vmem:[%s5916_s3 + $0x388] sm:$0xff] %v2001_v56 }
 0x24a   :  { %2820 = vst [vmem:[%s5916_s3 + $0xb18] sm:$0xff] %v2303_v53  ;;  %2995 = vmatmul.msk.bf16.gmra.mxu0 %vm875_vm0, %v778_v54  ;;  %3116 = vmatmul.msk.bf16.gmra.mxu1 %vm875_vm0, %v778_v54  ;;  %v701_v53 = vmax.f32 %v460_v49, 0.0  ;;  %v702_v54 = vmax.f32 %v461_v50, 0.0 }
 0x24b   :  { %3056 = vmatmul.msk.bf16.gmra.mxu2 %vm875_vm0, %v839_v57  ;;  %3177 = vmatmul.msk.bf16.gmra.mxu3 %vm875_vm0, %v839_v57  ;;  %v781_v57 = vpack.c.bf16 %v580_v52, %v579_v51 }
 0x24c   :  { %v842_v60 = vpack.c.bf16 %v702_v54, %v701_v53  ;;  %v467_v53 = vadd.f32 %v4557_v1, %v222_v44  ;;  %v105_v44 = vld [vmem:[%s5914_s0 + $0x2d0] sm:$0xff] }
 0x24e   :  { %v1693_v62 = vpop.f32.mrf.mxu2  ;;  %v2306_v63 = vpop.f32.mrf.mxu3 }
 0x24f   :  { %v1390_v3 = vpop.f32.mrf.mxu0  ;;  %v2003_v45 = vpop.f32.mrf.mxu1  ;;  %2821 = vst [vmem:[%s5916_s3 + $0xb20] sm:$0xff] %v1693_v62  ;;  %v96_v62 = vld [vmem:[%s5914_s0 + $0x288] sm:$0xff] }
 0x250   :  { %2579 = vst [vmem:[%s5916_s3 + $0x390] sm:$0xff] %v1390_v3  ;;  %v341_v4 = vadd.f32 %v4557_v1, %v96_v62 }
 0x251   :  { %2580 = vst [vmem:[%s5916_s3 + $0x398] sm:$0xff] %v2003_v45  ;;  %v340_v45 = vadd.f32 %v4557_v1, %v95_v61 }
 0x252   :  { %2822 = vst [vmem:[%s5916_s3 + $0xb28] sm:$0xff] %v2306_v63  ;;  %v217_v63 = vld [vmem:[%s5914_s0 + $0x650] sm:$0xff] }
 0x253   :  { %v462_v7 = vadd.f32 %v4557_v1, %v217_v63  ;;  %v581_v10 = vmax.f32 %v340_v45, 0.0  ;;  %v224_v45 = vld [vmem:[%s5914_s0 + $0x688] sm:$0xff] }
 0x256   :  { %v1695_v11 = vpop.f32.mrf.mxu2  ;;  %v2308_v12 = vpop.f32.mrf.mxu3 }
 0x257   :  { %v1393_v14 = vpop.f32.mrf.mxu0  ;;  %v2006_v15 = vpop.f32.mrf.mxu1  ;;  %2823 = vst [vmem:[%s5916_s3 + $0xb30] sm:$0xff] %v1695_v11  ;;  %v582_v11 = vmax.f32 %v341_v4, 0.0 }
 0x258   :  { %2581 = vst [vmem:[%s5916_s3 + $0x3a0] sm:$0xff] %v1393_v14 }
 0x259   :  { %2582 = vst [vmem:[%s5916_s3 + $0x3a8] sm:$0xff] %v2006_v15 }
 0x25a   :  { %2824 = vst [vmem:[%s5916_s3 + $0xb38] sm:$0xff] %v2308_v12  ;;  %2996 = vmatmul.msk.bf16.gmra.mxu0 %vm875_vm0, %v779_v13  ;;  %3117 = vmatmul.msk.bf16.gmra.mxu1 %vm875_vm0, %v779_v13  ;;  %v703_v12 = vmax.f32 %v462_v7, 0.0  ;;  %v704_v13 = vmax.f32 %v463_v9, 0.0 }
 0x25b   :  { %3057 = vmatmul.msk.bf16.gmra.mxu2 %vm875_vm0, %v840_v16  ;;  %3178 = vmatmul.msk.bf16.gmra.mxu3 %vm875_vm0, %v840_v16  ;;  %v782_v16 = vpack.c.bf16 %v582_v11, %v581_v10 }
 0x25c   :  { %v843_v19 = vpack.c.bf16 %v704_v13, %v703_v12  ;;  %v469_v12 = vadd.f32 %v4557_v1, %v224_v45  ;;  %v107_v45 = vld [vmem:[%s5914_s0 + $0x2e0] sm:$0xff] }
 0x25e   :  { %v1698_v21 = vpop.f32.mrf.mxu2  ;;  %v2311_v22 = vpop.f32.mrf.mxu3 }
 0x25f   :  { %v1395_v25 = vpop.f32.mrf.mxu0  ;;  %v2008_v26 = vpop.f32.mrf.mxu1  ;;  %2825 = vst [vmem:[%s5916_s3 + $0xb40] sm:$0xff] %v1698_v21  ;;  %v98_v21 = vld [vmem:[%s5914_s0 + $0x298] sm:$0xff] }
 0x260   :  { %2583 = vst [vmem:[%s5916_s3 + $0x3b0] sm:$0xff] %v1395_v25  ;;  %v343_v27 = vadd.f32 %v4557_v1, %v98_v21 }
 0x261   :  { %2584 = vst [vmem:[%s5916_s3 + $0x3b8] sm:$0xff] %v2008_v26  ;;  %v342_v26 = vadd.f32 %v4557_v1, %v97_v20 }
 0x262   :  { %2826 = vst [vmem:[%s5916_s3 + $0xb48] sm:$0xff] %v2311_v22  ;;  %v219_v22 = vld [vmem:[%s5914_s0 + $0x660] sm:$0xff] }
 0x263   :  { %v464_v30 = vadd.f32 %v4557_v1, %v219_v22  ;;  %v583_v32 = vmax.f32 %v342_v26, 0.0  ;;  %v226_v26 = vld [vmem:[%s5914_s0 + $0x698] sm:$0xff] }
 0x266   :  { %v1700_v33 = vpop.f32.mrf.mxu2  ;;  %v2313_v34 = vpop.f32.mrf.mxu3 }
 0x267   :  { %v1398_v36 = vpop.f32.mrf.mxu0  ;;  %v2011_v8 = vpop.f32.mrf.mxu1  ;;  %2827 = vst [vmem:[%s5916_s3 + $0xb50] sm:$0xff] %v1700_v33  ;;  %v584_v33 = vmax.f32 %v343_v27, 0.0 }
 0x268   :  { %2585 = vst [vmem:[%s5916_s3 + $0x3c0] sm:$0xff] %v1398_v36 }
 0x269   :  { %2586 = vst [vmem:[%s5916_s3 + $0x3c8] sm:$0xff] %v2011_v8 }
 0x26a   :  { %2828 = vst [vmem:[%s5916_s3 + $0xb58] sm:$0xff] %v2313_v34  ;;  %2997 = vmatmul.msk.bf16.gmra.mxu0 %vm875_vm0, %v780_v35  ;;  %3118 = vmatmul.msk.bf16.gmra.mxu1 %vm875_vm0, %v780_v35  ;;  %v705_v34 = vmax.f32 %v464_v30, 0.0  ;;  %v706_v35 = vmax.f32 %v465_v31, 0.0 }
 0x26b   :  { %3058 = vmatmul.msk.bf16.gmra.mxu2 %vm875_vm0, %v841_v37  ;;  %3179 = vmatmul.msk.bf16.gmra.mxu3 %vm875_vm0, %v841_v37  ;;  %v783_v37 = vpack.c.bf16 %v584_v33, %v583_v32 }
 0x26c   :  { %v844_v40 = vpack.c.bf16 %v706_v35, %v705_v34  ;;  %v471_v34 = vadd.f32 %v4557_v1, %v226_v26  ;;  %v109_v26 = vld [vmem:[%s5914_s0 + $0x2f0] sm:$0xff] }
 0x26e   :  { %v1703_v42 = vpop.f32.mrf.mxu2  ;;  %v2316_v43 = vpop.f32.mrf.mxu3 }
 0x26f   :  { %v1400_v47 = vpop.f32.mrf.mxu0  ;;  %v2013_v48 = vpop.f32.mrf.mxu1  ;;  %2829 = vst [vmem:[%s5916_s3 + $0xb60] sm:$0xff] %v1703_v42  ;;  %v100_v42 = vld [vmem:[%s5914_s0 + $0x2a8] sm:$0xff] }
 0x270   :  { %2587 = vst [vmem:[%s5916_s3 + $0x3d0] sm:$0xff] %v1400_v47  ;;  %v345_v49 = vadd.f32 %v4557_v1, %v100_v42 }
 0x271   :  { %2588 = vst [vmem:[%s5916_s3 + $0x3d8] sm:$0xff] %v2013_v48  ;;  %v344_v48 = vadd.f32 %v4557_v1, %v99_v41 }
 0x272   :  { %2830 = vst [vmem:[%s5916_s3 + $0xb68] sm:$0xff] %v2316_v43  ;;  %v221_v43 = vld [vmem:[%s5914_s0 + $0x670] sm:$0xff] }
 0x273   :  { %v466_v52 = vadd.f32 %v4557_v1, %v221_v43  ;;  %v585_v54 = vmax.f32 %v344_v48, 0.0  ;;  %v228_v48 = vld [vmem:[%s5914_s0 + $0x6a8] sm:$0xff] }
 0x276   :  { %v1705_v55 = vpop.f32.mrf.mxu2  ;;  %v2318_v56 = vpop.f32.mrf.mxu3 }
 0x277   :  { %v1403_v58 = vpop.f32.mrf.mxu0  ;;  %v2016_v59 = vpop.f32.mrf.mxu1  ;;  %2831 = vst [vmem:[%s5916_s3 + $0xb70] sm:$0xff] %v1705_v55  ;;  %v586_v55 = vmax.f32 %v345_v49, 0.0 }
 0x278   :  { %2589 = vst [vmem:[%s5916_s3 + $0x3e0] sm:$0xff] %v1403_v58 }
 0x279   :  { %2590 = vst [vmem:[%s5916_s3 + $0x3e8] sm:$0xff] %v2016_v59 }
 0x27a   :  { %2832 = vst [vmem:[%s5916_s3 + $0xb78] sm:$0xff] %v2318_v56  ;;  %2998 = vmatmul.msk.bf16.gmra.mxu0 %vm875_vm0, %v781_v57  ;;  %3119 = vmatmul.msk.bf16.gmra.mxu1 %vm875_vm0, %v781_v57  ;;  %v707_v56 = vmax.f32 %v466_v52, 0.0  ;;  %v708_v57 = vmax.f32 %v467_v53, 0.0 }
 0x27b   :  { %3059 = vmatmul.msk.bf16.gmra.mxu2 %vm875_vm0, %v842_v60  ;;  %3180 = vmatmul.msk.bf16.gmra.mxu3 %vm875_vm0, %v842_v60  ;;  %v784_v60 = vpack.c.bf16 %v586_v55, %v585_v54 }
 0x27c   :  { %v845_v63 = vpack.c.bf16 %v708_v57, %v707_v56  ;;  %v473_v56 = vadd.f32 %v4557_v1, %v228_v48  ;;  %v111_v48 = vld [vmem:[%s5914_s0 + $0x300] sm:$0xff] }
 0x27e   :  { %v1708_v2 = vpop.f32.mrf.mxu2  ;;  %v2321_v3 = vpop.f32.mrf.mxu3 }
 0x27f   :  { %v1405_v5 = vpop.f32.mrf.mxu0  ;;  %v2018_v6 = vpop.f32.mrf.mxu1  ;;  %2833 = vst [vmem:[%s5916_s3 + $0xb80] sm:$0xff] %v1708_v2  ;;  %v102_v2 = vld [vmem:[%s5914_s0 + $0x2b8] sm:$0xff] }
 0x280   :  { %2591 = vst [vmem:[%s5916_s3 + $0x3f0] sm:$0xff] %v1405_v5  ;;  %v347_v7 = vadd.f32 %v4557_v1, %v102_v2 }
 0x281   :  { %2592 = vst [vmem:[%s5916_s3 + $0x3f8] sm:$0xff] %v2018_v6  ;;  %v346_v6 = vadd.f32 %v4557_v1, %v101_v0 }
 0x282   :  { %2834 = vst [vmem:[%s5916_s3 + $0xb88] sm:$0xff] %v2321_v3  ;;  %v223_v3 = vld [vmem:[%s5914_s0 + $0x680] sm:$0xff] }
 0x283   :  { %v468_v11 = vadd.f32 %v4557_v1, %v223_v3  ;;  %v587_v13 = vmax.f32 %v346_v6, 0.0  ;;  %v230_v6 = vld [vmem:[%s5914_s0 + $0x6b8] sm:$0xff] }
 0x286   :  { %v1710_v14 = vpop.f32.mrf.mxu2  ;;  %v2323_v15 = vpop.f32.mrf.mxu3 }
 0x287   :  { %v1408_v17 = vpop.f32.mrf.mxu0  ;;  %v2021_v18 = vpop.f32.mrf.mxu1  ;;  %2835 = vst [vmem:[%s5916_s3 + $0xb90] sm:$0xff] %v1710_v14  ;;  %v588_v14 = vmax.f32 %v347_v7, 0.0 }
 0x288   :  { %2593 = vst [vmem:[%s5916_s3 + $0x400] sm:$0xff] %v1408_v17 }
 0x289   :  { %2594 = vst [vmem:[%s5916_s3 + $0x408] sm:$0xff] %v2021_v18 }
 0x28a   :  { %2836 = vst [vmem:[%s5916_s3 + $0xb98] sm:$0xff] %v2323_v15  ;;  %2999 = vmatmul.msk.bf16.gmra.mxu0 %vm875_vm0, %v782_v16  ;;  %3120 = vmatmul.msk.bf16.gmra.mxu1 %vm875_vm0, %v782_v16  ;;  %v709_v15 = vmax.f32 %v468_v11, 0.0  ;;  %v710_v16 = vmax.f32 %v469_v12, 0.0 }
 0x28b   :  { %3060 = vmatmul.msk.bf16.gmra.mxu2 %vm875_vm0, %v843_v19  ;;  %3181 = vmatmul.msk.bf16.gmra.mxu3 %vm875_vm0, %v843_v19  ;;  %v785_v19 = vpack.c.bf16 %v588_v14, %v587_v13 }
 0x28c   :  { %v846_v22 = vpack.c.bf16 %v710_v16, %v709_v15  ;;  %v475_v15 = vadd.f32 %v4557_v1, %v230_v6  ;;  %v113_v6 = vld [vmem:[%s5914_s0 + $0x310] sm:$0xff] }
 0x28e   :  { %v1713_v24 = vpop.f32.mrf.mxu2  ;;  %v2326_v25 = vpop.f32.mrf.mxu3 }
 0x28f   :  { %v1410_v28 = vpop.f32.mrf.mxu0  ;;  %v2023_v29 = vpop.f32.mrf.mxu1  ;;  %2837 = vst [vmem:[%s5916_s3 + $0xba0] sm:$0xff] %v1713_v24  ;;  %v104_v24 = vld [vmem:[%s5914_s0 + $0x2c8] sm:$0xff] }
 0x290   :  { %2595 = vst [vmem:[%s5916_s3 + $0x410] sm:$0xff] %v1410_v28  ;;  %v349_v30 = vadd.f32 %v4557_v1, %v104_v24 }
 0x291   :  { %2596 = vst [vmem:[%s5916_s3 + $0x418] sm:$0xff] %v2023_v29  ;;  %v348_v29 = vadd.f32 %v4557_v1, %v103_v23 }
 0x292   :  { %2838 = vst [vmem:[%s5916_s3 + $0xba8] sm:$0xff] %v2326_v25  ;;  %v225_v25 = vld [vmem:[%s5914_s0 + $0x690] sm:$0xff] }
 0x293   :  { %v470_v33 = vadd.f32 %v4557_v1, %v225_v25  ;;  %v589_v35 = vmax.f32 %v348_v29, 0.0  ;;  %v232_v29 = vld [vmem:[%s5914_s0 + $0x6c8] sm:$0xff] }
 0x296   :  { %v1715_v36 = vpop.f32.mrf.mxu2  ;;  %v2328_v8 = vpop.f32.mrf.mxu3 }
 0x297   :  { %v1413_v38 = vpop.f32.mrf.mxu0  ;;  %v2026_v39 = vpop.f32.mrf.mxu1  ;;  %2839 = vst [vmem:[%s5916_s3 + $0xbb0] sm:$0xff] %v1715_v36  ;;  %v590_v36 = vmax.f32 %v349_v30, 0.0 }
 0x298   :  { %2597 = vst [vmem:[%s5916_s3 + $0x420] sm:$0xff] %v1413_v38 }
 0x299   :  { %2598 = vst [vmem:[%s5916_s3 + $0x428] sm:$0xff] %v2026_v39 }
 0x29a   :  { %2840 = vst [vmem:[%s5916_s3 + $0xbb8] sm:$0xff] %v2328_v8  ;;  %3000 = vmatmul.msk.bf16.gmra.mxu0 %vm875_vm0, %v783_v37  ;;  %3121 = vmatmul.msk.bf16.gmra.mxu1 %vm875_vm0, %v783_v37  ;;  %v711_v8 = vmax.f32 %v470_v33, 0.0  ;;  %v712_v37 = vmax.f32 %v471_v34, 0.0 }
 0x29b   :  { %3061 = vmatmul.msk.bf16.gmra.mxu2 %vm875_vm0, %v844_v40  ;;  %3182 = vmatmul.msk.bf16.gmra.mxu3 %vm875_vm0, %v844_v40  ;;  %v786_v40 = vpack.c.bf16 %v590_v36, %v589_v35 }
 0x29c   :  { %v847_v43 = vpack.c.bf16 %v712_v37, %v711_v8  ;;  %v477_v8 = vadd.f32 %v4557_v1, %v232_v29  ;;  %v116_v29 = vld [vmem:[%s5914_s0 + $0x328] sm:$0xff] }
 0x29e   :  { %v1718_v46 = vpop.f32.mrf.mxu2  ;;  %v2331_v47 = vpop.f32.mrf.mxu3 }
 0x29f   :  { %v1415_v50 = vpop.f32.mrf.mxu0  ;;  %v2028_v51 = vpop.f32.mrf.mxu1  ;;  %2841 = vst [vmem:[%s5916_s3 + $0xbc0] sm:$0xff] %v1718_v46  ;;  %v106_v46 = vld [vmem:[%s5914_s0 + $0x2d8] sm:$0xff] }
 0x2a0   :  { %2599 = vst [vmem:[%s5916_s3 + $0x430] sm:$0xff] %v1415_v50  ;;  %v351_v52 = vadd.f32 %v4557_v1, %v106_v46 }
 0x2a1   :  { %2600 = vst [vmem:[%s5916_s3 + $0x438] sm:$0xff] %v2028_v51  ;;  %v350_v51 = vadd.f32 %v4557_v1, %v105_v44 }
 0x2a2   :  { %2842 = vst [vmem:[%s5916_s3 + $0xbc8] sm:$0xff] %v2331_v47  ;;  %v227_v47 = vld [vmem:[%s5914_s0 + $0x6a0] sm:$0xff] }
 0x2a3   :  { %v472_v55 = vadd.f32 %v4557_v1, %v227_v47  ;;  %v591_v57 = vmax.f32 %v350_v51, 0.0  ;;  %v234_v51 = vld [vmem:[%s5914_s0 + $0x6d8] sm:$0xff] }
 0x2a6   :  { %v1720_v58 = vpop.f32.mrf.mxu2  ;;  %v2333_v59 = vpop.f32.mrf.mxu3 }
 0x2a7   :  { %v1418_v61 = vpop.f32.mrf.mxu0  ;;  %v2031_v62 = vpop.f32.mrf.mxu1  ;;  %2843 = vst [vmem:[%s5916_s3 + $0xbd0] sm:$0xff] %v1720_v58  ;;  %v592_v58 = vmax.f32 %v351_v52, 0.0 }
 0x2a8   :  { %2601 = vst [vmem:[%s5916_s3 + $0x440] sm:$0xff] %v1418_v61 }
 0x2a9   :  { %2602 = vst [vmem:[%s5916_s3 + $0x448] sm:$0xff] %v2031_v62 }
 0x2aa   :  { %2844 = vst [vmem:[%s5916_s3 + $0xbd8] sm:$0xff] %v2333_v59  ;;  %3001 = vmatmul.msk.bf16.gmra.mxu0 %vm875_vm0, %v784_v60  ;;  %3122 = vmatmul.msk.bf16.gmra.mxu1 %vm875_vm0, %v784_v60  ;;  %v713_v59 = vmax.f32 %v472_v55, 0.0  ;;  %v714_v60 = vmax.f32 %v473_v56, 0.0 }
 0x2ab   :  { %3062 = vmatmul.msk.bf16.gmra.mxu2 %vm875_vm0, %v845_v63  ;;  %3183 = vmatmul.msk.bf16.gmra.mxu3 %vm875_vm0, %v845_v63  ;;  %v787_v63 = vpack.c.bf16 %v592_v58, %v591_v57 }
 0x2ac   :  { %v848_v3 = vpack.c.bf16 %v714_v60, %v713_v59  ;;  %v479_v59 = vadd.f32 %v4557_v1, %v234_v51  ;;  %v117_v51 = vld [vmem:[%s5914_s0 + $0x330] sm:$0xff] }
 0x2ae   :  { %v1723_v4 = vpop.f32.mrf.mxu2  ;;  %v2336_v5 = vpop.f32.mrf.mxu3 }
 0x2af   :  { %v1420_v9 = vpop.f32.mrf.mxu0  ;;  %v2033_v10 = vpop.f32.mrf.mxu1  ;;  %2845 = vst [vmem:[%s5916_s3 + $0xbe0] sm:$0xff] %v1723_v4  ;;  %v108_v4 = vld [vmem:[%s5914_s0 + $0x2e8] sm:$0xff] }
 0x2b0   :  { %2603 = vst [vmem:[%s5916_s3 + $0x450] sm:$0xff] %v1420_v9  ;;  %v353_v11 = vadd.f32 %v4557_v1, %v108_v4 }
 0x2b1   :  { %2604 = vst [vmem:[%s5916_s3 + $0x458] sm:$0xff] %v2033_v10  ;;  %v352_v10 = vadd.f32 %v4557_v1, %v107_v45 }
 0x2b2   :  { %2846 = vst [vmem:[%s5916_s3 + $0xbe8] sm:$0xff] %v2336_v5  ;;  %v229_v5 = vld [vmem:[%s5914_s0 + $0x6b0] sm:$0xff] }
 0x2b3   :  { %v474_v14 = vadd.f32 %v4557_v1, %v229_v5  ;;  %v593_v16 = vmax.f32 %v352_v10, 0.0  ;;  %v236_v10 = vld [vmem:[%s5914_s0 + $0x6e8] sm:$0xff] }
 0x2b6   :  { %v1725_v17 = vpop.f32.mrf.mxu2  ;;  %v2338_v18 = vpop.f32.mrf.mxu3 }
 0x2b7   :  { %v1423_v20 = vpop.f32.mrf.mxu0  ;;  %v2036_v21 = vpop.f32.mrf.mxu1  ;;  %2847 = vst [vmem:[%s5916_s3 + $0xbf0] sm:$0xff] %v1725_v17  ;;  %v594_v17 = vmax.f32 %v353_v11, 0.0 }
 0x2b8   :  { %2605 = vst [vmem:[%s5916_s3 + $0x460] sm:$0xff] %v1423_v20 }
 0x2b9   :  { %2606 = vst [vmem:[%s5916_s3 + $0x468] sm:$0xff] %v2036_v21 }
 0x2ba   :  { %2848 = vst [vmem:[%s5916_s3 + $0xbf8] sm:$0xff] %v2338_v18  ;;  %3002 = vmatmul.msk.bf16.gmra.mxu0 %vm875_vm0, %v785_v19  ;;  %3123 = vmatmul.msk.bf16.gmra.mxu1 %vm875_vm0, %v785_v19  ;;  %v715_v18 = vmax.f32 %v474_v14, 0.0  ;;  %v716_v19 = vmax.f32 %v475_v15, 0.0 }
 0x2bb   :  { %3063 = vmatmul.msk.bf16.gmra.mxu2 %vm875_vm0, %v846_v22  ;;  %3184 = vmatmul.msk.bf16.gmra.mxu3 %vm875_vm0, %v846_v22  ;;  %v788_v22 = vpack.c.bf16 %v594_v17, %v593_v16 }
 0x2bc   :  { %v849_v25 = vpack.c.bf16 %v716_v19, %v715_v18  ;;  %v481_v18 = vadd.f32 %v4557_v1, %v236_v10  ;;  %v119_v10 = vld [vmem:[%s5914_s0 + $0x340] sm:$0xff] }
 0x2be   :  { %v1728_v27 = vpop.f32.mrf.mxu2  ;;  %v2341_v28 = vpop.f32.mrf.mxu3 }
 0x2bf   :  { %v1425_v31 = vpop.f32.mrf.mxu0  ;;  %v2038_v32 = vpop.f32.mrf.mxu1  ;;  %2849 = vst [vmem:[%s5916_s3 + $0xc00] sm:$0xff] %v1728_v27  ;;  %v110_v27 = vld [vmem:[%s5914_s0 + $0x2f8] sm:$0xff] }
 0x2c0   :  { %2607 = vst [vmem:[%s5916_s3 + $0x470] sm:$0xff] %v1425_v31  ;;  %v355_v33 = vadd.f32 %v4557_v1, %v110_v27 }
 0x2c1   :  { %2608 = vst [vmem:[%s5916_s3 + $0x478] sm:$0xff] %v2038_v32  ;;  %v354_v32 = vadd.f32 %v4557_v1, %v109_v26 }
 0x2c2   :  { %2850 = vst [vmem:[%s5916_s3 + $0xc08] sm:$0xff] %v2341_v28  ;;  %v231_v28 = vld [vmem:[%s5914_s0 + $0x6c0] sm:$0xff] }
 0x2c3   :  { %v476_v36 = vadd.f32 %v4557_v1, %v231_v28  ;;  %v595_v37 = vmax.f32 %v354_v32, 0.0  ;;  %v115_v28 = vld [vmem:[%s5914_s0 + $0x320] sm:$0xff] }
 0x2c6   :  { %v1730_v38 = vpop.f32.mrf.mxu2  ;;  %v2343_v39 = vpop.f32.mrf.mxu3 }
 0x2c7   :  { %v1428_v41 = vpop.f32.mrf.mxu0  ;;  %v2041_v42 = vpop.f32.mrf.mxu1  ;;  %2851 = vst [vmem:[%s5916_s3 + $0xc10] sm:$0xff] %v1730_v38  ;;  %v596_v38 = vmax.f32 %v355_v33, 0.0 }
 0x2c8   :  { %2609 = vst [vmem:[%s5916_s3 + $0x480] sm:$0xff] %v1428_v41 }
 0x2c9   :  { %2610 = vst [vmem:[%s5916_s3 + $0x488] sm:$0xff] %v2041_v42 }
 0x2ca   :  { %2852 = vst [vmem:[%s5916_s3 + $0xc18] sm:$0xff] %v2343_v39  ;;  %3003 = vmatmul.msk.bf16.gmra.mxu0 %vm875_vm0, %v786_v40  ;;  %3124 = vmatmul.msk.bf16.gmra.mxu1 %vm875_vm0, %v786_v40  ;;  %v717_v39 = vmax.f32 %v476_v36, 0.0  ;;  %v718_v40 = vmax.f32 %v477_v8, 0.0 }
 0x2cb   :  { %3064 = vmatmul.msk.bf16.gmra.mxu2 %vm875_vm0, %v847_v43  ;;  %3185 = vmatmul.msk.bf16.gmra.mxu3 %vm875_vm0, %v847_v43  ;;  %v789_v43 = vpack.c.bf16 %v596_v38, %v595_v37 }
 0x2cc   :  { %v850_v47 = vpack.c.bf16 %v718_v40, %v717_v39 }
 0x2ce   :  { %v1733_v49 = vpop.f32.mrf.mxu2  ;;  %v2346_v50 = vpop.f32.mrf.mxu3 }
 0x2cf   :  { %v1430_v53 = vpop.f32.mrf.mxu0  ;;  %v2043_v54 = vpop.f32.mrf.mxu1  ;;  %2853 = vst [vmem:[%s5916_s3 + $0xc20] sm:$0xff] %v1733_v49  ;;  %v112_v49 = vld [vmem:[%s5914_s0 + $0x308] sm:$0xff] }
 0x2d0   :  { %2611 = vst [vmem:[%s5916_s3 + $0x490] sm:$0xff] %v1430_v53  ;;  %v357_v55 = vadd.f32 %v4557_v1, %v112_v49 }
 0x2d1   :  { %2612 = vst [vmem:[%s5916_s3 + $0x498] sm:$0xff] %v2043_v54  ;;  %v356_v54 = vadd.f32 %v4557_v1, %v111_v48 }
 0x2d2   :  { %2854 = vst [vmem:[%s5916_s3 + $0xc28] sm:$0xff] %v2346_v50  ;;  %v233_v50 = vld [vmem:[%s5914_s0 + $0x6d0] sm:$0xff] }
 0x2d3   :  { %v478_v58 = vadd.f32 %v4557_v1, %v233_v50  ;;  %v597_v60 = vmax.f32 %v356_v54, 0.0  ;;  %v240_v54 = vld [vmem:[%s5914_s0 + $0x708] sm:$0xff] }
 0x2d6   :  { %v1735_v61 = vpop.f32.mrf.mxu2  ;;  %v2348_v62 = vpop.f32.mrf.mxu3 }
 0x2d7   :  { %v1433_v0 = vpop.f32.mrf.mxu0  ;;  %v2046_v2 = vpop.f32.mrf.mxu1  ;;  %2855 = vst [vmem:[%s5916_s3 + $0xc30] sm:$0xff] %v1735_v61  ;;  %v598_v61 = vmax.f32 %v357_v55, 0.0 }
 0x2d8   :  { %2613 = vst [vmem:[%s5916_s3 + $0x4a0] sm:$0xff] %v1433_v0 }
 0x2d9   :  { %2614 = vst [vmem:[%s5916_s3 + $0x4a8] sm:$0xff] %v2046_v2 }
 0x2da   :  { %2856 = vst [vmem:[%s5916_s3 + $0xc38] sm:$0xff] %v2348_v62  ;;  %3004 = vmatmul.msk.bf16.gmra.mxu0 %vm875_vm0, %v787_v63  ;;  %3125 = vmatmul.msk.bf16.gmra.mxu1 %vm875_vm0, %v787_v63  ;;  %v719_v62 = vmax.f32 %v478_v58, 0.0  ;;  %v720_v63 = vmax.f32 %v479_v59, 0.0 }
 0x2db   :  { %3065 = vmatmul.msk.bf16.gmra.mxu2 %vm875_vm0, %v848_v3  ;;  %3186 = vmatmul.msk.bf16.gmra.mxu3 %vm875_vm0, %v848_v3  ;;  %v790_v3 = vpack.c.bf16 %v598_v61, %v597_v60 }
 0x2dc   :  { %v851_v5 = vpack.c.bf16 %v720_v63, %v719_v62 }
 0x2de   :  { %v1738_v7 = vpop.f32.mrf.mxu2  ;;  %v2351_v9 = vpop.f32.mrf.mxu3 }
 0x2df   :  { %v1435_v12 = vpop.f32.mrf.mxu0  ;;  %v2048_v13 = vpop.f32.mrf.mxu1  ;;  %2857 = vst [vmem:[%s5916_s3 + $0xc40] sm:$0xff] %v1738_v7  ;;  %v114_v7 = vld [vmem:[%s5914_s0 + $0x318] sm:$0xff] }
 0x2e0   :  { %2615 = vst [vmem:[%s5916_s3 + $0x4b0] sm:$0xff] %v1435_v12  ;;  %v359_v14 = vadd.f32 %v4557_v1, %v114_v7 }
 0x2e1   :  { %2616 = vst [vmem:[%s5916_s3 + $0x4b8] sm:$0xff] %v2048_v13  ;;  %v358_v13 = vadd.f32 %v4557_v1, %v113_v6 }
 0x2e2   :  { %2858 = vst [vmem:[%s5916_s3 + $0xc48] sm:$0xff] %v2351_v9  ;;  %v235_v9 = vld [vmem:[%s5914_s0 + $0x6e0] sm:$0xff] }
 0x2e3   :  { %v480_v17 = vadd.f32 %v4557_v1, %v235_v9  ;;  %v599_v19 = vmax.f32 %v358_v13, 0.0  ;;  %v242_v13 = vld [vmem:[%s5914_s0 + $0x718] sm:$0xff] }
 0x2e6   :  { %v1740_v20 = vpop.f32.mrf.mxu2  ;;  %v2353_v21 = vpop.f32.mrf.mxu3 }
 0x2e7   :  { %v1438_v23 = vpop.f32.mrf.mxu0  ;;  %v2051_v24 = vpop.f32.mrf.mxu1  ;;  %2859 = vst [vmem:[%s5916_s3 + $0xc50] sm:$0xff] %v1740_v20  ;;  %v600_v20 = vmax.f32 %v359_v14, 0.0 }
 0x2e8   :  { %2617 = vst [vmem:[%s5916_s3 + $0x4c0] sm:$0xff] %v1438_v23 }
 0x2e9   :  { %2618 = vst [vmem:[%s5916_s3 + $0x4c8] sm:$0xff] %v2051_v24 }
 0x2ea   :  { %2860 = vst [vmem:[%s5916_s3 + $0xc58] sm:$0xff] %v2353_v21  ;;  %3005 = vmatmul.msk.bf16.gmra.mxu0 %vm875_vm0, %v788_v22  ;;  %3126 = vmatmul.msk.bf16.gmra.mxu1 %vm875_vm0, %v788_v22  ;;  %v721_v21 = vmax.f32 %v480_v17, 0.0  ;;  %v722_v22 = vmax.f32 %v481_v18, 0.0 }
 0x2eb   :  { %3066 = vmatmul.msk.bf16.gmra.mxu2 %vm875_vm0, %v849_v25  ;;  %3187 = vmatmul.msk.bf16.gmra.mxu3 %vm875_vm0, %v849_v25  ;;  %v791_v25 = vpack.c.bf16 %v600_v20, %v599_v19 }
 0x2ec   :  { %v852_v27 = vpack.c.bf16 %v722_v22, %v721_v21 }
 0x2ee   :  { %v1743_v30 = vpop.f32.mrf.mxu2  ;;  %v2356_v31 = vpop.f32.mrf.mxu3 }
 0x2ef   :  { %v1440_v34 = vpop.f32.mrf.mxu0  ;;  %v2053_v35 = vpop.f32.mrf.mxu1  ;;  %2861 = vst [vmem:[%s5916_s3 + $0xc60] sm:$0xff] %v1743_v30  ;;  %v237_v30 = vld [vmem:[%s5914_s0 + $0x6f0] sm:$0xff] }
 0x2f0   :  { %2619 = vst [vmem:[%s5916_s3 + $0x4d0] sm:$0xff] %v1440_v34  ;;  %v5261_v34 = vld [vmem:[%s5915_s1] ss:$0 sm:$0xff] }
 0x2f1   :  { %2620 = vst [vmem:[%s5916_s3 + $0x4d8] sm:$0xff] %v2053_v35  ;;  %v360_v35 = vadd.f32 %v5261_v34, %v115_v28  ;;  %v361_v36 = vadd.f32 %v5261_v34, %v116_v29  ;;  %v482_v38 = vadd.f32 %v5261_v34, %v237_v30  ;;  %v485_v62 = vadd.f32 %v5261_v34, %v240_v54  ;;  %v123_v54 = vld [vmem:[%s5914_s0 + $0x360] sm:$0xff] }
 0x2f2   :  { %2862 = vst [vmem:[%s5916_s3 + $0xc68] sm:$0xff] %v2356_v31  ;;  %v238_v31 = vld [vmem:[%s5914_s0 + $0x6f8] sm:$0xff]  ;;  %v487_v21 = vadd.f32 %v5261_v34, %v242_v13  ;;  %v125_v13 = vld [vmem:[%s5914_s0 + $0x370] sm:$0xff] }
 0x2f3   :  { %v483_v39 = vadd.f32 %v5261_v34, %v238_v31  ;;  %v601_v40 = vmax.f32 %v360_v35, 0.0  ;;  %v121_v31 = vld [vmem:[%s5914_s0 + $0x350] sm:$0xff]  ;;  %v244_v35 = vld [vmem:[%s5914_s0 + $0x728] sm:$0xff] }
 0x2f6   :  { %v1745_v41 = vpop.f32.mrf.mxu2  ;;  %v2358_v42 = vpop.f32.mrf.mxu3 }
 0x2f7   :  { %v1443_v44 = vpop.f32.mrf.mxu0  ;;  %v2056_v46 = vpop.f32.mrf.mxu1  ;;  %2863 = vst [vmem:[%s5916_s3 + $0xc70] sm:$0xff] %v1745_v41  ;;  %v602_v41 = vmax.f32 %v361_v36, 0.0 }
 0x2f8   :  { %2621 = vst [vmem:[%s5916_s3 + $0x4e0] sm:$0xff] %v1443_v44 }
 0x2f9   :  { %2622 = vst [vmem:[%s5916_s3 + $0x4e8] sm:$0xff] %v2056_v46 }
 0x2fa   :  { %2864 = vst [vmem:[%s5916_s3 + $0xc78] sm:$0xff] %v2358_v42  ;;  %3006 = vmatmul.msk.bf16.gmra.mxu0 %vm875_vm0, %v789_v43  ;;  %3127 = vmatmul.msk.bf16.gmra.mxu1 %vm875_vm0, %v789_v43  ;;  %v723_v42 = vmax.f32 %v482_v38, 0.0  ;;  %v724_v43 = vmax.f32 %v483_v39, 0.0 }
 0x2fb   :  { %3067 = vmatmul.msk.bf16.gmra.mxu2 %vm875_vm0, %v850_v47  ;;  %3188 = vmatmul.msk.bf16.gmra.mxu3 %vm875_vm0, %v850_v47  ;;  %v792_v47 = vpack.c.bf16 %v602_v41, %v601_v40 }
 0x2fc   :  { %v853_v50 = vpack.c.bf16 %v724_v43, %v723_v42  ;;  %v489_v42 = vadd.f32 %v5261_v34, %v244_v35  ;;  %v127_v35 = vld [vmem:[%s5914_s0 + $0x380] sm:$0xff] }
 0x2fe   :  { %v1748_v52 = vpop.f32.mrf.mxu2  ;;  %v2361_v53 = vpop.f32.mrf.mxu3 }
 0x2ff   :  { %v1445_v56 = vpop.f32.mrf.mxu0  ;;  %v2058_v57 = vpop.f32.mrf.mxu1  ;;  %2865 = vst [vmem:[%s5916_s3 + $0xc80] sm:$0xff] %v1748_v52  ;;  %v118_v52 = vld [vmem:[%s5914_s0 + $0x338] sm:$0xff] }
 0x300   :  { %2623 = vst [vmem:[%s5916_s3 + $0x4f0] sm:$0xff] %v1445_v56  ;;  %v363_v58 = vadd.f32 %v5261_v34, %v118_v52 }
 0x301   :  { %2624 = vst [vmem:[%s5916_s3 + $0x4f8] sm:$0xff] %v2058_v57  ;;  %v362_v57 = vadd.f32 %v5261_v34, %v117_v51 }
 0x302   :  { %2866 = vst [vmem:[%s5916_s3 + $0xc88] sm:$0xff] %v2361_v53  ;;  %v239_v53 = vld [vmem:[%s5914_s0 + $0x700] sm:$0xff] }
 0x303   :  { %v484_v61 = vadd.f32 %v5261_v34, %v239_v53  ;;  %v603_v63 = vmax.f32 %v362_v57, 0.0  ;;  %v246_v57 = vld [vmem:[%s5914_s0 + $0x738] sm:$0xff] }
 0x306   :  { %v1750_v0 = vpop.f32.mrf.mxu2  ;;  %v2363_v2 = vpop.f32.mrf.mxu3 }
 0x307   :  { %v1448_v45 = vpop.f32.mrf.mxu0  ;;  %v2061_v4 = vpop.f32.mrf.mxu1  ;;  %2867 = vst [vmem:[%s5916_s3 + $0xc90] sm:$0xff] %v1750_v0  ;;  %v604_v0 = vmax.f32 %v363_v58, 0.0 }
 0x308   :  { %2625 = vst [vmem:[%s5916_s3 + $0x500] sm:$0xff] %v1448_v45 }
 0x309   :  { %2626 = vst [vmem:[%s5916_s3 + $0x508] sm:$0xff] %v2061_v4 }
 0x30a   :  { %2868 = vst [vmem:[%s5916_s3 + $0xc98] sm:$0xff] %v2363_v2  ;;  %3007 = vmatmul.msk.bf16.gmra.mxu0 %vm875_vm0, %v790_v3  ;;  %3128 = vmatmul.msk.bf16.gmra.mxu1 %vm875_vm0, %v790_v3  ;;  %v725_v2 = vmax.f32 %v484_v61, 0.0  ;;  %v726_v3 = vmax.f32 %v485_v62, 0.0 }
 0x30b   :  { %3068 = vmatmul.msk.bf16.gmra.mxu2 %vm875_vm0, %v851_v5  ;;  %3189 = vmatmul.msk.bf16.gmra.mxu3 %vm875_vm0, %v851_v5  ;;  %v793_v5 = vpack.c.bf16 %v604_v0, %v603_v63 }
 0x30c   :  { %v854_v9 = vpack.c.bf16 %v726_v3, %v725_v2  ;;  %v491_v2 = vadd.f32 %v5261_v34, %v246_v57  ;;  %v129_v57 = vld [vmem:[%s5914_s0 + $0x390] sm:$0xff] }
 0x30e   :  { %v1753_v11 = vpop.f32.mrf.mxu2  ;;  %v2366_v12 = vpop.f32.mrf.mxu3 }
 0x30f   :  { %v1450_v15 = vpop.f32.mrf.mxu0  ;;  %v2063_v16 = vpop.f32.mrf.mxu1  ;;  %2869 = vst [vmem:[%s5916_s3 + $0xca0] sm:$0xff] %v1753_v11  ;;  %v120_v11 = vld [vmem:[%s5914_s0 + $0x348] sm:$0xff] }
 0x310   :  { %2627 = vst [vmem:[%s5916_s3 + $0x510] sm:$0xff] %v1450_v15  ;;  %v365_v17 = vadd.f32 %v5261_v34, %v120_v11 }
 0x311   :  { %2628 = vst [vmem:[%s5916_s3 + $0x518] sm:$0xff] %v2063_v16  ;;  %v364_v16 = vadd.f32 %v5261_v34, %v119_v10 }
 0x312   :  { %2870 = vst [vmem:[%s5916_s3 + $0xca8] sm:$0xff] %v2366_v12  ;;  %v241_v12 = vld [vmem:[%s5914_s0 + $0x710] sm:$0xff] }
 0x313   :  { %v486_v20 = vadd.f32 %v5261_v34, %v241_v12  ;;  %v605_v22 = vmax.f32 %v364_v16, 0.0  ;;  %v248_v16 = vld [vmem:[%s5914_s0 + $0x748] sm:$0xff] }
 0x316   :  { %v1755_v23 = vpop.f32.mrf.mxu2  ;;  %v2368_v24 = vpop.f32.mrf.mxu3 }
 0x317   :  { %v1453_v1 = vpop.f32.mrf.mxu0  ;;  %v2066_v26 = vpop.f32.mrf.mxu1  ;;  %2871 = vst [vmem:[%s5916_s3 + $0xcb0] sm:$0xff] %v1755_v23  ;;  %v606_v23 = vmax.f32 %v365_v17, 0.0 }
 0x318   :  { %2629 = vst [vmem:[%s5916_s3 + $0x520] sm:$0xff] %v1453_v1 }
 0x319   :  { %2630 = vst [vmem:[%s5916_s3 + $0x528] sm:$0xff] %v2066_v26 }
 0x31a   :  { %2872 = vst [vmem:[%s5916_s3 + $0xcb8] sm:$0xff] %v2368_v24  ;;  %3008 = vmatmul.msk.bf16.gmra.mxu0 %vm875_vm0, %v791_v25  ;;  %3129 = vmatmul.msk.bf16.gmra.mxu1 %vm875_vm0, %v791_v25  ;;  %v727_v24 = vmax.f32 %v486_v20, 0.0  ;;  %v728_v25 = vmax.f32 %v487_v21, 0.0 }
 0x31b   :  { %3069 = vmatmul.msk.bf16.gmra.mxu2 %vm875_vm0, %v852_v27  ;;  %3190 = vmatmul.msk.bf16.gmra.mxu3 %vm875_vm0, %v852_v27  ;;  %v794_v27 = vpack.c.bf16 %v606_v23, %v605_v22 }
 0x31c   :  { %v855_v30 = vpack.c.bf16 %v728_v25, %v727_v24  ;;  %v493_v24 = vadd.f32 %v5261_v34, %v248_v16  ;;  %v131_v16 = vld [vmem:[%s5914_s0 + $0x3a0] sm:$0xff] }
 0x31e   :  { %v1758_v32 = vpop.f32.mrf.mxu2  ;;  %v2371_v33 = vpop.f32.mrf.mxu3 }
 0x31f   :  { %v1455_v8 = vpop.f32.mrf.mxu0  ;;  %v2068_v37 = vpop.f32.mrf.mxu1  ;;  %2873 = vst [vmem:[%s5916_s3 + $0xcc0] sm:$0xff] %v1758_v32  ;;  %v122_v32 = vld [vmem:[%s5914_s0 + $0x358] sm:$0xff] }
 0x320   :  { %2631 = vst [vmem:[%s5916_s3 + $0x530] sm:$0xff] %v1455_v8  ;;  %v367_v38 = vadd.f32 %v5261_v34, %v122_v32 }
 0x321   :  { %2632 = vst [vmem:[%s5916_s3 + $0x538] sm:$0xff] %v2068_v37  ;;  %v366_v37 = vadd.f32 %v5261_v34, %v121_v31 }
 0x322   :  { %2874 = vst [vmem:[%s5916_s3 + $0xcc8] sm:$0xff] %v2371_v33  ;;  %v243_v33 = vld [vmem:[%s5914_s0 + $0x720] sm:$0xff] }
 0x323   :  { %v488_v41 = vadd.f32 %v5261_v34, %v243_v33  ;;  %v607_v43 = vmax.f32 %v366_v37, 0.0  ;;  %v250_v37 = vld [vmem:[%s5914_s0 + $0x758] sm:$0xff] }
 0x326   :  { %v1760_v44 = vpop.f32.mrf.mxu2  ;;  %v2373_v46 = vpop.f32.mrf.mxu3 }
 0x327   :  { %v1458_v48 = vpop.f32.mrf.mxu0  ;;  %v2071_v49 = vpop.f32.mrf.mxu1  ;;  %2875 = vst [vmem:[%s5916_s3 + $0xcd0] sm:$0xff] %v1760_v44  ;;  %v608_v44 = vmax.f32 %v367_v38, 0.0 }
 0x328   :  { %2633 = vst [vmem:[%s5916_s3 + $0x540] sm:$0xff] %v1458_v48 }
 0x329   :  { %2634 = vst [vmem:[%s5916_s3 + $0x548] sm:$0xff] %v2071_v49 }
 0x32a   :  { %2876 = vst [vmem:[%s5916_s3 + $0xcd8] sm:$0xff] %v2373_v46  ;;  %3009 = vmatmul.msk.bf16.gmra.mxu0 %vm875_vm0, %v792_v47  ;;  %3130 = vmatmul.msk.bf16.gmra.mxu1 %vm875_vm0, %v792_v47  ;;  %v729_v46 = vmax.f32 %v488_v41, 0.0  ;;  %v730_v47 = vmax.f32 %v489_v42, 0.0 }
 0x32b   :  { %3070 = vmatmul.msk.bf16.gmra.mxu2 %vm875_vm0, %v853_v50  ;;  %3191 = vmatmul.msk.bf16.gmra.mxu3 %vm875_vm0, %v853_v50  ;;  %v795_v50 = vpack.c.bf16 %v608_v44, %v607_v43 }
 0x32c   :  { %v856_v53 = vpack.c.bf16 %v730_v47, %v729_v46  ;;  %v495_v46 = vadd.f32 %v5261_v34, %v250_v37  ;;  %v133_v37 = vld [vmem:[%s5914_s0 + $0x3b0] sm:$0xff] }
 0x32e   :  { %v1763_v55 = vpop.f32.mrf.mxu2  ;;  %v2376_v56 = vpop.f32.mrf.mxu3 }
 0x32f   :  { %v1460_v59 = vpop.f32.mrf.mxu0  ;;  %v2073_v60 = vpop.f32.mrf.mxu1  ;;  %2877 = vst [vmem:[%s5916_s3 + $0xce0] sm:$0xff] %v1763_v55  ;;  %v124_v55 = vld [vmem:[%s5914_s0 + $0x368] sm:$0xff] }
 0x330   :  { %2635 = vst [vmem:[%s5916_s3 + $0x550] sm:$0xff] %v1460_v59  ;;  %v369_v61 = vadd.f32 %v5261_v34, %v124_v55 }
 0x331   :  { %2636 = vst [vmem:[%s5916_s3 + $0x558] sm:$0xff] %v2073_v60  ;;  %v368_v60 = vadd.f32 %v5261_v34, %v123_v54 }
 0x332   :  { %2878 = vst [vmem:[%s5916_s3 + $0xce8] sm:$0xff] %v2376_v56  ;;  %v245_v56 = vld [vmem:[%s5914_s0 + $0x730] sm:$0xff] }
 0x333   :  { %v490_v0 = vadd.f32 %v5261_v34, %v245_v56  ;;  %v609_v3 = vmax.f32 %v368_v60, 0.0  ;;  %v252_v60 = vld [vmem:[%s5914_s0 + $0x768] sm:$0xff] }
 0x336   :  { %v1765_v45 = vpop.f32.mrf.mxu2  ;;  %v2378_v4 = vpop.f32.mrf.mxu3 }
 0x337   :  { %v1463_v6 = vpop.f32.mrf.mxu0  ;;  %v2076_v7 = vpop.f32.mrf.mxu1  ;;  %2879 = vst [vmem:[%s5916_s3 + $0xcf0] sm:$0xff] %v1765_v45  ;;  %v610_v45 = vmax.f32 %v369_v61, 0.0 }
 0x338   :  { %2637 = vst [vmem:[%s5916_s3 + $0x560] sm:$0xff] %v1463_v6 }
 0x339   :  { %2638 = vst [vmem:[%s5916_s3 + $0x568] sm:$0xff] %v2076_v7 }
 0x33a   :  { %2880 = vst [vmem:[%s5916_s3 + $0xcf8] sm:$0xff] %v2378_v4  ;;  %3010 = vmatmul.msk.bf16.gmra.mxu0 %vm875_vm0, %v793_v5  ;;  %3131 = vmatmul.msk.bf16.gmra.mxu1 %vm875_vm0, %v793_v5  ;;  %v731_v4 = vmax.f32 %v490_v0, 0.0  ;;  %v732_v5 = vmax.f32 %v491_v2, 0.0 }
 0x33b   :  { %3071 = vmatmul.msk.bf16.gmra.mxu2 %vm875_vm0, %v854_v9  ;;  %3192 = vmatmul.msk.bf16.gmra.mxu3 %vm875_vm0, %v854_v9  ;;  %v796_v9 = vpack.c.bf16 %v610_v45, %v609_v3 }
 0x33c   :  { %v857_v12 = vpack.c.bf16 %v732_v5, %v731_v4  ;;  %v497_v4 = vadd.f32 %v5261_v34, %v252_v60 }
 0x33e   :  { %v1768_v14 = vpop.f32.mrf.mxu2  ;;  %v2381_v15 = vpop.f32.mrf.mxu3 }
 0x33f   :  { %v1465_v18 = vpop.f32.mrf.mxu0  ;;  %v2078_v19 = vpop.f32.mrf.mxu1  ;;  %2881 = vst [vmem:[%s5916_s3 + $0xd00] sm:$0xff] %v1768_v14  ;;  %v126_v14 = vld [vmem:[%s5914_s0 + $0x378] sm:$0xff] }
 0x340   :  { %2639 = vst [vmem:[%s5916_s3 + $0x570] sm:$0xff] %v1465_v18  ;;  %v371_v20 = vadd.f32 %v5261_v34, %v126_v14 }
 0x341   :  { %2640 = vst [vmem:[%s5916_s3 + $0x578] sm:$0xff] %v2078_v19  ;;  %v370_v19 = vadd.f32 %v5261_v34, %v125_v13 }
 0x342   :  { %2882 = vst [vmem:[%s5916_s3 + $0xd08] sm:$0xff] %v2381_v15  ;;  %v247_v15 = vld [vmem:[%s5914_s0 + $0x740] sm:$0xff] }
 0x343   :  { %v492_v23 = vadd.f32 %v5261_v34, %v247_v15  ;;  %v611_v25 = vmax.f32 %v370_v19, 0.0  ;;  %v254_v19 = vld [vmem:[%s5914_s0 + $0x778] sm:$0xff] }
 0x346   :  { %v1770_v1 = vpop.f32.mrf.mxu2  ;;  %v2383_v26 = vpop.f32.mrf.mxu3 }
 0x347   :  { %v1468_v28 = vpop.f32.mrf.mxu0  ;;  %v2081_v29 = vpop.f32.mrf.mxu1  ;;  %2883 = vst [vmem:[%s5916_s3 + $0xd10] sm:$0xff] %v1770_v1  ;;  %v612_v1 = vmax.f32 %v371_v20, 0.0 }
 0x348   :  { %2641 = vst [vmem:[%s5916_s3 + $0x580] sm:$0xff] %v1468_v28 }
 0x349   :  { %2642 = vst [vmem:[%s5916_s3 + $0x588] sm:$0xff] %v2081_v29 }
 0x34a   :  { %2884 = vst [vmem:[%s5916_s3 + $0xd18] sm:$0xff] %v2383_v26  ;;  %3011 = vmatmul.msk.bf16.gmra.mxu0 %vm875_vm0, %v794_v27  ;;  %3132 = vmatmul.msk.bf16.gmra.mxu1 %vm875_vm0, %v794_v27  ;;  %v733_v26 = vmax.f32 %v492_v23, 0.0  ;;  %v734_v27 = vmax.f32 %v493_v24, 0.0 }
 0x34b   :  { %3072 = vmatmul.msk.bf16.gmra.mxu2 %vm875_vm0, %v855_v30  ;;  %3193 = vmatmul.msk.bf16.gmra.mxu3 %vm875_vm0, %v855_v30  ;;  %v797_v30 = vpack.c.bf16 %v612_v1, %v611_v25 }
 0x34c   :  { %v858_v33 = vpack.c.bf16 %v734_v27, %v733_v26  ;;  %v499_v26 = vadd.f32 %v5261_v34, %v254_v19 }
 0x34e   :  { %v1773_v36 = vpop.f32.mrf.mxu2  ;;  %v2386_v8 = vpop.f32.mrf.mxu3 }
 0x34f   :  { %v1470_v39 = vpop.f32.mrf.mxu0  ;;  %v2083_v40 = vpop.f32.mrf.mxu1  ;;  %2885 = vst [vmem:[%s5916_s3 + $0xd20] sm:$0xff] %v1773_v36  ;;  %v128_v36 = vld [vmem:[%s5914_s0 + $0x388] sm:$0xff] }
 0x350   :  { %2643 = vst [vmem:[%s5916_s3 + $0x590] sm:$0xff] %v1470_v39  ;;  %v373_v41 = vadd.f32 %v5261_v34, %v128_v36 }
 0x351   :  { %2644 = vst [vmem:[%s5916_s3 + $0x598] sm:$0xff] %v2083_v40  ;;  %v372_v40 = vadd.f32 %v5261_v34, %v127_v35 }
 0x352   :  { %2886 = vst [vmem:[%s5916_s3 + $0xd28] sm:$0xff] %v2386_v8  ;;  %v249_v8 = vld [vmem:[%s5914_s0 + $0x750] sm:$0xff] }
 0x353   :  { %v494_v44 = vadd.f32 %v5261_v34, %v249_v8  ;;  %v613_v47 = vmax.f32 %v372_v40, 0.0 }
 0x356   :  { %v1775_v48 = vpop.f32.mrf.mxu2  ;;  %v2388_v49 = vpop.f32.mrf.mxu3 }
 0x357   :  { %v1473_v51 = vpop.f32.mrf.mxu0  ;;  %v2086_v52 = vpop.f32.mrf.mxu1  ;;  %2887 = vst [vmem:[%s5916_s3 + $0xd30] sm:$0xff] %v1775_v48  ;;  %v614_v48 = vmax.f32 %v373_v41, 0.0 }
 0x358   :  { %2645 = vst [vmem:[%s5916_s3 + $0x5a0] sm:$0xff] %v1473_v51 }
 0x359   :  { %2646 = vst [vmem:[%s5916_s3 + $0x5a8] sm:$0xff] %v2086_v52 }
 0x35a   :  { %2888 = vst [vmem:[%s5916_s3 + $0xd38] sm:$0xff] %v2388_v49  ;;  %3012 = vmatmul.msk.bf16.gmra.mxu0 %vm875_vm0, %v795_v50  ;;  %3133 = vmatmul.msk.bf16.gmra.mxu1 %vm875_vm0, %v795_v50  ;;  %v735_v49 = vmax.f32 %v494_v44, 0.0  ;;  %v736_v50 = vmax.f32 %v495_v46, 0.0 }
 0x35b   :  { %3073 = vmatmul.msk.bf16.gmra.mxu2 %vm875_vm0, %v856_v53  ;;  %3194 = vmatmul.msk.bf16.gmra.mxu3 %vm875_vm0, %v856_v53  ;;  %v798_v53 = vpack.c.bf16 %v614_v48, %v613_v47 }
 0x35c   :  { %v859_v56 = vpack.c.bf16 %v736_v50, %v735_v49 }
 0x35e   :  { %v1778_v58 = vpop.f32.mrf.mxu2  ;;  %v2391_v59 = vpop.f32.mrf.mxu3 }
 0x35f   :  { %v1475_v62 = vpop.f32.mrf.mxu0  ;;  %v2088_v63 = vpop.f32.mrf.mxu1  ;;  %2889 = vst [vmem:[%s5916_s3 + $0xd40] sm:$0xff] %v1778_v58  ;;  %v130_v58 = vld [vmem:[%s5914_s0 + $0x398] sm:$0xff] }
 0x360   :  { %2647 = vst [vmem:[%s5916_s3 + $0x5b0] sm:$0xff] %v1475_v62  ;;  %v375_v0 = vadd.f32 %v5261_v34, %v130_v58  ;;  %v136_v58 = vld [vmem:[%s5914_s0 + $0x3c8] sm:$0xff] }
 0x361   :  { %2648 = vst [vmem:[%s5916_s3 + $0x5b8] sm:$0xff] %v2088_v63  ;;  %v374_v63 = vadd.f32 %v5261_v34, %v129_v57  ;;  %v135_v57 = vld [vmem:[%s5914_s0 + $0x3c0] sm:$0xff] }
 0x362   :  { %2890 = vst [vmem:[%s5916_s3 + $0xd48] sm:$0xff] %v2391_v59  ;;  %v251_v59 = vld [vmem:[%s5914_s0 + $0x760] sm:$0xff] }
 0x363   :  { %v496_v45 = vadd.f32 %v5261_v34, %v251_v59  ;;  %v615_v5 = vmax.f32 %v374_v63, 0.0 }
 0x366   :  { %v1780_v6 = vpop.f32.mrf.mxu2  ;;  %v2393_v7 = vpop.f32.mrf.mxu3 }
 0x367   :  { %v1478_v10 = vpop.f32.mrf.mxu0  ;;  %v2091_v11 = vpop.f32.mrf.mxu1  ;;  %2891 = vst [vmem:[%s5916_s3 + $0xd50] sm:$0xff] %v1780_v6  ;;  %v616_v6 = vmax.f32 %v375_v0, 0.0 }
 0x368   :  { %2649 = vst [vmem:[%s5916_s3 + $0x5c0] sm:$0xff] %v1478_v10 }
 0x369   :  { %2650 = vst [vmem:[%s5916_s3 + $0x5c8] sm:$0xff] %v2091_v11 }
 0x36a   :  { %2892 = vst [vmem:[%s5916_s3 + $0xd58] sm:$0xff] %v2393_v7  ;;  %3013 = vmatmul.msk.bf16.gmra.mxu0 %vm875_vm0, %v796_v9  ;;  %3134 = vmatmul.msk.bf16.gmra.mxu1 %vm875_vm0, %v796_v9  ;;  %v737_v7 = vmax.f32 %v496_v45, 0.0  ;;  %v738_v9 = vmax.f32 %v497_v4, 0.0 }
 0x36b   :  { %3074 = vmatmul.msk.bf16.gmra.mxu2 %vm875_vm0, %v857_v12  ;;  %3195 = vmatmul.msk.bf16.gmra.mxu3 %vm875_vm0, %v857_v12  ;;  %v799_v12 = vpack.c.bf16 %v616_v6, %v615_v5 }
 0x36c   :  { %v860_v15 = vpack.c.bf16 %v738_v9, %v737_v7 }
 0x36e   :  { %v1783_v17 = vpop.f32.mrf.mxu2  ;;  %v2396_v18 = vpop.f32.mrf.mxu3 }
 0x36f   :  { %v1480_v21 = vpop.f32.mrf.mxu0  ;;  %v2093_v22 = vpop.f32.mrf.mxu1  ;;  %2893 = vst [vmem:[%s5916_s3 + $0xd60] sm:$0xff] %v1783_v17  ;;  %v132_v17 = vld [vmem:[%s5914_s0 + $0x3a8] sm:$0xff] }
 0x370   :  { %2651 = vst [vmem:[%s5916_s3 + $0x5d0] sm:$0xff] %v1480_v21  ;;  %v377_v23 = vadd.f32 %v5261_v34, %v132_v17 }
 0x371   :  { %2652 = vst [vmem:[%s5916_s3 + $0x5d8] sm:$0xff] %v2093_v22  ;;  %v376_v22 = vadd.f32 %v5261_v34, %v131_v16 }
 0x372   :  { %2894 = vst [vmem:[%s5916_s3 + $0xd68] sm:$0xff] %v2396_v18  ;;  %v253_v18 = vld [vmem:[%s5914_s0 + $0x770] sm:$0xff] }
 0x373   :  { %v498_v1 = vadd.f32 %v5261_v34, %v253_v18  ;;  %v617_v27 = vmax.f32 %v376_v22, 0.0 }
 0x376   :  { %v1785_v28 = vpop.f32.mrf.mxu2  ;;  %v2398_v29 = vpop.f32.mrf.mxu3 }
 0x377   :  { %v1483_v31 = vpop.f32.mrf.mxu0  ;;  %v2096_v32 = vpop.f32.mrf.mxu1  ;;  %2895 = vst [vmem:[%s5916_s3 + $0xd70] sm:$0xff] %v1785_v28  ;;  %v618_v28 = vmax.f32 %v377_v23, 0.0 }
 0x378   :  { %2653 = vst [vmem:[%s5916_s3 + $0x5e0] sm:$0xff] %v1483_v31 }
 0x379   :  { %2654 = vst [vmem:[%s5916_s3 + $0x5e8] sm:$0xff] %v2096_v32 }
 0x37a   :  { %2896 = vst [vmem:[%s5916_s3 + $0xd78] sm:$0xff] %v2398_v29  ;;  %3014 = vmatmul.msk.bf16.gmra.mxu0 %vm875_vm0, %v797_v30  ;;  %3135 = vmatmul.msk.bf16.gmra.mxu1 %vm875_vm0, %v797_v30  ;;  %v739_v29 = vmax.f32 %v498_v1, 0.0  ;;  %v740_v30 = vmax.f32 %v499_v26, 0.0 }
 0x37b   :  { %3075 = vmatmul.msk.bf16.gmra.mxu2 %vm875_vm0, %v858_v33  ;;  %3196 = vmatmul.msk.bf16.gmra.mxu3 %vm875_vm0, %v858_v33  ;;  %v800_v33 = vpack.c.bf16 %v618_v28, %v617_v27 }
 0x37c   :  { %v861_v8 = vpack.c.bf16 %v740_v30, %v739_v29 }
 0x37e   :  { %v1788_v38 = vpop.f32.mrf.mxu2  ;;  %v2401_v39 = vpop.f32.mrf.mxu3 }
 0x37f   :  { %v1485_v42 = vpop.f32.mrf.mxu0  ;;  %v2098_v43 = vpop.f32.mrf.mxu1  ;;  %2897 = vst [vmem:[%s5916_s3 + $0xd80] sm:$0xff] %v1788_v38  ;;  %v134_v38 = vld [vmem:[%s5914_s0 + $0x3b8] sm:$0xff] }
 0x380   :  { %2655 = vst [vmem:[%s5916_s3 + $0x5f0] sm:$0xff] %v1485_v42  ;;  %v378_v42 = vadd.f32 %v5261_v34, %v133_v37 }
 0x381   :  { %2656 = vst [vmem:[%s5916_s3 + $0x5f8] sm:$0xff] %v2098_v43  ;;  %v379_v43 = vadd.f32 %v5261_v34, %v134_v38 }
 0x382   :  { %2898 = vst [vmem:[%s5916_s3 + $0xd88] sm:$0xff] %v2401_v39  ;;  %v255_v39 = vld [vmem:[%s5914_s0 + $0x780] sm:$0x3]  ;;  %v619_v48 = vmax.f32 %v378_v42, 0.0 }
 0x383   :  { %v500_v47 = vadd.f32 %v5261_v34, %v255_v39  ;;  %v620_v49 = vmax.f32 %v379_v43, 0.0 }
 0x385   :  { %v741_v50 = vmax.f32 %v500_v47, 0.0 }
 0x386   :  { %v1790_v51 = vpop.f32.mrf.mxu2  ;;  %v2403_v52 = vpop.f32.mrf.mxu3 }
 0x387   :  { %v1488_v54 = vpop.f32.mrf.mxu0  ;;  %v2101_v55 = vpop.f32.mrf.mxu1  ;;  %2899 = vst [vmem:[%s5916_s3 + $0xd90] sm:$0xff] %v1790_v51 }
 0x388   :  { %2657 = vst [vmem:[%s5916_s3 + $0x600] sm:$0xff] %v1488_v54 }
 0x389   :  { %2658 = vst [vmem:[%s5916_s3 + $0x608] sm:$0xff] %v2101_v55 }
 0x38a   :  { %2900 = vst [vmem:[%s5916_s3 + $0xd98] sm:$0xff] %v2403_v52  ;;  %3015 = vmatmul.msk.bf16.gmra.mxu0 %vm875_vm0, %v798_v53  ;;  %3136 = vmatmul.msk.bf16.gmra.mxu1 %vm875_vm0, %v798_v53  ;;  %v801_v53 = vpack.c.bf16 %v620_v49, %v619_v48 }
 0x38b   :  { %3076 = vmatmul.msk.bf16.gmra.mxu2 %vm875_vm0, %v859_v56  ;;  %3197 = vmatmul.msk.bf16.gmra.mxu3 %vm875_vm0, %v859_v56  ;;  %v862_v56 = vpack.c.bf16 %v741_v50, %v741_v50 }
 0x38e   :  { %v1793_v61 = vpop.f32.mrf.mxu2  ;;  %v2406_v62 = vpop.f32.mrf.mxu3 }
 0x38f   :  { %v1490_v2 = vpop.f32.mrf.mxu0  ;;  %v2103_v3 = vpop.f32.mrf.mxu1  ;;  %2901 = vst [vmem:[%s5916_s3 + $0xda0] sm:$0xff] %v1793_v61  ;;  %v380_v61 = vadd.f32 %v5261_v34, %v135_v57 }
 0x390   :  { %2659 = vst [vmem:[%s5916_s3 + $0x610] sm:$0xff] %v1490_v2 }
 0x391   :  { %2660 = vst [vmem:[%s5916_s3 + $0x618] sm:$0xff] %v2103_v3  ;;  %v621_v2 = vmax.f32 %v380_v61, 0.0 }
 0x392   :  { %2902 = vst [vmem:[%s5916_s3 + $0xda8] sm:$0xff] %v2406_v62  ;;  %v381_v62 = vadd.f32 %v5261_v34, %v136_v58 }
 0x394   :  { %v622_v34 = vmax.f32 %v381_v62, 0.0 }
 0x396   :  { %v1795_v10 = vpop.f32.mrf.mxu2  ;;  %v2408_v11 = vpop.f32.mrf.mxu3  ;;  %v802_v4 = vpack.c.bf16 %v622_v34, %v621_v2 }
 0x397   :  { %v1493_v13 = vpop.f32.mrf.mxu0  ;;  %v2106_v14 = vpop.f32.mrf.mxu1  ;;  %2903 = vst [vmem:[%s5916_s3 + $0xdb0] sm:$0xff] %v1795_v10 }
 0x398   :  { %2661 = vst [vmem:[%s5916_s3 + $0x620] sm:$0xff] %v1493_v13 }
 0x399   :  { %2662 = vst [vmem:[%s5916_s3 + $0x628] sm:$0xff] %v2106_v14 }
 0x39a   :  { %2904 = vst [vmem:[%s5916_s3 + $0xdb8] sm:$0xff] %v2408_v11  ;;  %3016 = vmatmul.msk.bf16.gmra.mxu0 %vm875_vm0, %v799_v12  ;;  %3137 = vmatmul.msk.bf16.gmra.mxu1 %vm875_vm0, %v799_v12 }
 0x39b   :  { %3077 = vmatmul.msk.bf16.gmra.mxu2 %vm875_vm0, %v860_v15  ;;  %3198 = vmatmul.msk.bf16.gmra.mxu3 %vm875_vm0, %v860_v15 }
 0x39e   :  { %v1798_v20 = vpop.f32.mrf.mxu2  ;;  %v2411_v21 = vpop.f32.mrf.mxu3 }
 0x39f   :  { %v1495_v24 = vpop.f32.mrf.mxu0  ;;  %v2108_v25 = vpop.f32.mrf.mxu1  ;;  %2905 = vst [vmem:[%s5916_s3 + $0xdc0] sm:$0xff] %v1798_v20 }
 0x3a0   :  { %2663 = vst [vmem:[%s5916_s3 + $0x630] sm:$0xff] %v1495_v24 }
 0x3a1   :  { %2664 = vst [vmem:[%s5916_s3 + $0x638] sm:$0xff] %v2108_v25 }
 0x3a2   :  { %2906 = vst [vmem:[%s5916_s3 + $0xdc8] sm:$0xff] %v2411_v21 }
 0x3a6   :  { %v1800_v31 = vpop.f32.mrf.mxu2  ;;  %v2413_v32 = vpop.f32.mrf.mxu3 }
 0x3a7   :  { %v1498_v35 = vpop.f32.mrf.mxu0  ;;  %v2111_v36 = vpop.f32.mrf.mxu1  ;;  %2907 = vst [vmem:[%s5916_s3 + $0xdd0] sm:$0xff] %v1800_v31 }
 0x3a8   :  { %2665 = vst [vmem:[%s5916_s3 + $0x640] sm:$0xff] %v1498_v35 }
 0x3a9   :  { %2666 = vst [vmem:[%s5916_s3 + $0x648] sm:$0xff] %v2111_v36 }
 0x3aa   :  { %2908 = vst [vmem:[%s5916_s3 + $0xdd8] sm:$0xff] %v2413_v32  ;;  %3017 = vmatmul.msk.bf16.gmra.mxu0 %vm875_vm0, %v800_v33  ;;  %3138 = vmatmul.msk.bf16.gmra.mxu1 %vm875_vm0, %v800_v33 }
 0x3ab   :  { %3078 = vmatmul.msk.bf16.gmra.mxu2 %vm875_vm0, %v861_v8  ;;  %3199 = vmatmul.msk.bf16.gmra.mxu3 %vm875_vm0, %v861_v8 }
 0x3ae   :  { %v1803_v40 = vpop.f32.mrf.mxu2  ;;  %v2416_v41 = vpop.f32.mrf.mxu3 }
 0x3af   :  { %v1500_v44 = vpop.f32.mrf.mxu0  ;;  %v2113_v46 = vpop.f32.mrf.mxu1  ;;  %2909 = vst [vmem:[%s5916_s3 + $0xde0] sm:$0xff] %v1803_v40 }
 0x3b0   :  { %2667 = vst [vmem:[%s5916_s3 + $0x650] sm:$0xff] %v1500_v44 }
 0x3b1   :  { %2668 = vst [vmem:[%s5916_s3 + $0x658] sm:$0xff] %v2113_v46 }
 0x3b2   :  { %2910 = vst [vmem:[%s5916_s3 + $0xde8] sm:$0xff] %v2416_v41 }
 0x3b6   :  { %v1805_v51 = vpop.f32.mrf.mxu2  ;;  %v2418_v52 = vpop.f32.mrf.mxu3 }
 0x3b7   :  { %v1503_v54 = vpop.f32.mrf.mxu0  ;;  %v2116_v55 = vpop.f32.mrf.mxu1  ;;  %2911 = vst [vmem:[%s5916_s3 + $0xdf0] sm:$0xff] %v1805_v51 }
 0x3b8   :  { %2669 = vst [vmem:[%s5916_s3 + $0x660] sm:$0xff] %v1503_v54 }
 0x3b9   :  { %2670 = vst [vmem:[%s5916_s3 + $0x668] sm:$0xff] %v2116_v55 }
 0x3ba   :  { %2912 = vst [vmem:[%s5916_s3 + $0xdf8] sm:$0xff] %v2418_v52  ;;  %3018 = vmatmul.msk.bf16.gmra.mxu0 %vm875_vm0, %v801_v53  ;;  %3139 = vmatmul.msk.bf16.gmra.mxu1 %vm875_vm0, %v801_v53 }
 0x3bb   :  { %3079 = vmatmul.msk.bf16.gmra.mxu2 %vm875_vm0, %v862_v56  ;;  %3200 = vmatmul.msk.bf16.gmra.mxu3 %vm875_vm0, %v862_v56 }
 0x3be   :  { %v1808_v59 = vpop.f32.mrf.mxu2  ;;  %v2421_v60 = vpop.f32.mrf.mxu3 }
 0x3bf   :  { %v1505_v63 = vpop.f32.mrf.mxu0  ;;  %v2118_v0 = vpop.f32.mrf.mxu1  ;;  %2913 = vst [vmem:[%s5916_s3 + $0xe00] sm:$0xff] %v1808_v59 }
 0x3c0   :  { %2671 = vst [vmem:[%s5916_s3 + $0x670] sm:$0xff] %v1505_v63 }
 0x3c1   :  { %2672 = vst [vmem:[%s5916_s3 + $0x678] sm:$0xff] %v2118_v0 }
 0x3c2   :  { %2914 = vst [vmem:[%s5916_s3 + $0xe08] sm:$0xff] %v2421_v60 }
 0x3c6   :  { %v1810_v3 = vpop.f32.mrf.mxu2  ;;  %v2423_v45 = vpop.f32.mrf.mxu3 }
 0x3c7   :  { %v1508_v5 = vpop.f32.mrf.mxu0  ;;  %v2121_v6 = vpop.f32.mrf.mxu1  ;;  %2915 = vst [vmem:[%s5916_s3 + $0xe10] sm:$0xff] %v1810_v3 }
 0x3c8   :  { %2673 = vst [vmem:[%s5916_s3 + $0x680] sm:$0xff] %v1508_v5 }
 0x3c9   :  { %2674 = vst [vmem:[%s5916_s3 + $0x688] sm:$0xff] %v2121_v6 }
 0x3ca   :  { %2916 = vst [vmem:[%s5916_s3 + $0xe18] sm:$0xff] %v2423_v45  ;;  %3019 = vmatmul.msk.bf16.gmra.mxu0 %vm875_vm0, %v802_v4  ;;  %3140 = vmatmul.msk.bf16.gmra.mxu1 %vm875_vm0, %v802_v4 }
 0x3ce   :  { %v1813_v7 = vpop.f32.mrf.mxu2  ;;  %v2426_v9 = vpop.f32.mrf.mxu3 }
 0x3cf   :  { %v1510_v10 = vpop.f32.mrf.mxu0  ;;  %v2123_v11 = vpop.f32.mrf.mxu1  ;;  %2917 = vst [vmem:[%s5916_s3 + $0xe20] sm:$0xff] %v1813_v7 }
 0x3d0   :  { %2675 = vst [vmem:[%s5916_s3 + $0x690] sm:$0xff] %v1510_v10 }
 0x3d1   :  { %2676 = vst [vmem:[%s5916_s3 + $0x698] sm:$0xff] %v2123_v11 }
 0x3d2   :  { %2918 = vst [vmem:[%s5916_s3 + $0xe28] sm:$0xff] %v2426_v9 }
 0x3d6   :  { %v1815_v12 = vpop.f32.mrf.mxu2  ;;  %v2428_v13 = vpop.f32.mrf.mxu3 }
 0x3d7   :  { %v1513_v14 = vpop.f32.mrf.mxu0  ;;  %v2126_v15 = vpop.f32.mrf.mxu1  ;;  %2919 = vst [vmem:[%s5916_s3 + $0xe30] sm:$0xff] %v1815_v12 }
 0x3d8   :  { %2677 = vst [vmem:[%s5916_s3 + $0x6a0] sm:$0xff] %v1513_v14 }
 0x3d9   :  { %2678 = vst [vmem:[%s5916_s3 + $0x6a8] sm:$0xff] %v2126_v15 }
 0x3da   :  { %2920 = vst [vmem:[%s5916_s3 + $0xe38] sm:$0xff] %v2428_v13 }
 0x3de   :  { %v1818_v16 = vpop.f32.mrf.mxu2  ;;  %v2431_v17 = vpop.f32.mrf.mxu3 }
 0x3df   :  { %v1515_v18 = vpop.f32.mrf.mxu0  ;;  %v2128_v19 = vpop.f32.mrf.mxu1  ;;  %2921 = vst [vmem:[%s5916_s3 + $0xe40] sm:$0xff] %v1818_v16 }
 0x3e0   :  { %2679 = vst [vmem:[%s5916_s3 + $0x6b0] sm:$0xff] %v1515_v18 }
 0x3e1   :  { %2680 = vst [vmem:[%s5916_s3 + $0x6b8] sm:$0xff] %v2128_v19 }
 0x3e2   :  { %2922 = vst [vmem:[%s5916_s3 + $0xe48] sm:$0xff] %v2431_v17 }
 0x3e6   :  { %v1820_v20 = vpop.f32.mrf.mxu2  ;;  %v2433_v21 = vpop.f32.mrf.mxu3 }
 0x3e7   :  { %v1518_v22 = vpop.f32.mrf.mxu0  ;;  %v2131_v23 = vpop.f32.mrf.mxu1  ;;  %2923 = vst [vmem:[%s5916_s3 + $0xe50] sm:$0xff] %v1820_v20 }
 0x3e8   :  { %2681 = vst [vmem:[%s5916_s3 + $0x6c0] sm:$0xff] %v1518_v22 }
 0x3e9   :  { %2682 = vst [vmem:[%s5916_s3 + $0x6c8] sm:$0xff] %v2131_v23 }
 0x3ea   :  { %2924 = vst [vmem:[%s5916_s3 + $0xe58] sm:$0xff] %v2433_v21 }
 0x3ee   :  { %v1823_v24 = vpop.f32.mrf.mxu2  ;;  %v2436_v25 = vpop.f32.mrf.mxu3 }
 0x3ef   :  { %v1520_v1 = vpop.f32.mrf.mxu0  ;;  %v2133_v26 = vpop.f32.mrf.mxu1  ;;  %2925 = vst [vmem:[%s5916_s3 + $0xe60] sm:$0xff] %v1823_v24 }
 0x3f0   :  { %2683 = vst [vmem:[%s5916_s3 + $0x6d0] sm:$0xff] %v1520_v1 }
 0x3f1   :  { %2684 = vst [vmem:[%s5916_s3 + $0x6d8] sm:$0xff] %v2133_v26 }
 0x3f2   :  { %2926 = vst [vmem:[%s5916_s3 + $0xe68] sm:$0xff] %v2436_v25 }
 0x3f6   :  { %v1825_v27 = vpop.f32.mrf.mxu2  ;;  %v2438_v28 = vpop.f32.mrf.mxu3 }
 0x3f7   :  { %v1523_v29 = vpop.f32.mrf.mxu0  ;;  %v2136_v30 = vpop.f32.mrf.mxu1  ;;  %2927 = vst [vmem:[%s5916_s3 + $0xe70] sm:$0xff] %v1825_v27 }
 0x3f8   :  { %2685 = vst [vmem:[%s5916_s3 + $0x6e0] sm:$0xff] %v1523_v29 }
 0x3f9   :  { %2686 = vst [vmem:[%s5916_s3 + $0x6e8] sm:$0xff] %v2136_v30 }
 0x3fa   :  { %2928 = vst [vmem:[%s5916_s3 + $0xe78] sm:$0xff] %v2438_v28 }
 0x3fe   :  { %v1828_v31 = vpop.f32.mrf.mxu2  ;;  %v2441_v32 = vpop.f32.mrf.mxu3 }
 0x3ff   :  { %v1525_v33 = vpop.f32.mrf.mxu0  ;;  %v2138_v35 = vpop.f32.mrf.mxu1  ;;  %2929 = vst [vmem:[%s5916_s3 + $0xe80] sm:$0xff] %v1828_v31 }
 0x400   :  { %2687 = vst [vmem:[%s5916_s3 + $0x6f0] sm:$0xff] %v1525_v33 }
 0x401   :  { %2688 = vst [vmem:[%s5916_s3 + $0x6f8] sm:$0xff] %v2138_v35 }
 0x402   :  { %2930 = vst [vmem:[%s5916_s3 + $0xe88] sm:$0xff] %v2441_v32 }
 0x406   :  { %v1830_v36 = vpop.f32.mrf.mxu2  ;;  %v2443_v8 = vpop.f32.mrf.mxu3 }
 0x407   :  { %v1528_v37 = vpop.f32.mrf.mxu0  ;;  %v2141_v38 = vpop.f32.mrf.mxu1  ;;  %2931 = vst [vmem:[%s5916_s3 + $0xe90] sm:$0xff] %v1830_v36 }
 0x408   :  { %2689 = vst [vmem:[%s5916_s3 + $0x700] sm:$0xff] %v1528_v37 }
 0x409   :  { %2690 = vst [vmem:[%s5916_s3 + $0x708] sm:$0xff] %v2141_v38 }
 0x40a   :  { %2932 = vst [vmem:[%s5916_s3 + $0xe98] sm:$0xff] %v2443_v8 }
 0x40e   :  { %v1833_v39 = vpop.f32.mrf.mxu2  ;;  %v2446_v40 = vpop.f32.mrf.mxu3 }
 0x40f   :  { %v1530_v41 = vpop.f32.mrf.mxu0  ;;  %v2143_v42 = vpop.f32.mrf.mxu1  ;;  %2933 = vst [vmem:[%s5916_s3 + $0xea0] sm:$0xff] %v1833_v39 }
 0x410   :  { %2691 = vst [vmem:[%s5916_s3 + $0x710] sm:$0xff] %v1530_v41 }
 0x411   :  { %2692 = vst [vmem:[%s5916_s3 + $0x718] sm:$0xff] %v2143_v42 }
 0x412   :  { %2934 = vst [vmem:[%s5916_s3 + $0xea8] sm:$0xff] %v2446_v40 }
 0x416   :  { %v1835_v43 = vpop.f32.mrf.mxu2  ;;  %v2448_v44 = vpop.f32.mrf.mxu3 }
 0x417   :  { %v1533_v46 = vpop.f32.mrf.mxu0  ;;  %v2146_v47 = vpop.f32.mrf.mxu1  ;;  %2935 = vst [vmem:[%s5916_s3 + $0xeb0] sm:$0xff] %v1835_v43 }
 0x418   :  { %2693 = vst [vmem:[%s5916_s3 + $0x720] sm:$0xff] %v1533_v46 }
 0x419   :  { %2694 = vst [vmem:[%s5916_s3 + $0x728] sm:$0xff] %v2146_v47 }
 0x41a   :  { %2936 = vst [vmem:[%s5916_s3 + $0xeb8] sm:$0xff] %v2448_v44 }
 0x41e   :  { %v1838_v48 = vpop.f32.mrf.mxu2  ;;  %v2451_v49 = vpop.f32.mrf.mxu3 }
 0x41f   :  { %v1535_v50 = vpop.f32.mrf.mxu0  ;;  %v2148_v51 = vpop.f32.mrf.mxu1  ;;  %2937 = vst [vmem:[%s5916_s3 + $0xec0] sm:$0xff] %v1838_v48 }
 0x420   :  { %2695 = vst [vmem:[%s5916_s3 + $0x730] sm:$0xff] %v1535_v50 }
 0x421   :  { %2696 = vst [vmem:[%s5916_s3 + $0x738] sm:$0xff] %v2148_v51 }
 0x422   :  { %2938 = vst [vmem:[%s5916_s3 + $0xec8] sm:$0xff] %v2451_v49 }
 0x426   :  { %v1840_v52 = vpop.f32.mrf.mxu2  ;;  %v2453_v53 = vpop.f32.mrf.mxu3 }
 0x427   :  { %v1538_v54 = vpop.f32.mrf.mxu0  ;;  %v2151_v55 = vpop.f32.mrf.mxu1  ;;  %2939 = vst [vmem:[%s5916_s3 + $0xed0] sm:$0xff] %v1840_v52 }
 0x428   :  { %2697 = vst [vmem:[%s5916_s3 + $0x740] sm:$0xff] %v1538_v54 }
 0x429   :  { %2698 = vst [vmem:[%s5916_s3 + $0x748] sm:$0xff] %v2151_v55 }
 0x42a   :  { %2940 = vst [vmem:[%s5916_s3 + $0xed8] sm:$0xff] %v2453_v53 }
 0x42e   :  { %v1843_v56 = vpop.f32.mrf.mxu2  ;;  %v2456_v57 = vpop.f32.mrf.mxu3 }
 0x42f   :  { %v1540_v58 = vpop.f32.mrf.mxu0  ;;  %v2153_v59 = vpop.f32.mrf.mxu1  ;;  %2941 = vst [vmem:[%s5916_s3 + $0xee0] sm:$0xff] %v1843_v56 }
 0x430   :  { %2699 = vst [vmem:[%s5916_s3 + $0x750] sm:$0xff] %v1540_v58 }
 0x431   :  { %2700 = vst [vmem:[%s5916_s3 + $0x758] sm:$0xff] %v2153_v59 }
 0x432   :  { %2942 = vst [vmem:[%s5916_s3 + $0xee8] sm:$0xff] %v2456_v57 }
 0x436   :  { %v1845_v60 = vpop.f32.mrf.mxu2  ;;  %v2458_v61 = vpop.f32.mrf.mxu3 }
 0x437   :  { %v1543_v62 = vpop.f32.mrf.mxu0  ;;  %v2156_v63 = vpop.f32.mrf.mxu1  ;;  %2943 = vst [vmem:[%s5916_s3 + $0xef0] sm:$0xff] %v1845_v60 }
 0x438   :  { %2701 = vst [vmem:[%s5916_s3 + $0x760] sm:$0xff] %v1543_v62 }
 0x439   :  { %2702 = vst [vmem:[%s5916_s3 + $0x768] sm:$0xff] %v2156_v63 }
 0x43a   :  { %2944 = vst [vmem:[%s5916_s3 + $0xef8] sm:$0xff] %v2458_v61 }
 0x43e   :  { %v1848_v0 = vpop.f32.mrf.mxu2  ;;  %v2461_v2 = vpop.f32.mrf.mxu3 }
 0x43f   :  { %v1545_v34 = vpop.f32.mrf.mxu0  ;;  %v2158_v3 = vpop.f32.mrf.mxu1  ;;  %2945 = vst [vmem:[%s5916_s3 + $0xf00] sm:$0x3] %v1848_v0 }
 0x440   :  { %2703 = vst [vmem:[%s5916_s3 + $0x770] sm:$0xff] %v1545_v34 }
 0x441   :  { %2704 = vst [vmem:[%s5916_s3 + $0x778] sm:$0xff] %v2158_v3 }
 0x442   :  { %2946 = vst [vmem:[%s5916_s3 + $0xf08] sm:$0x3] %v2461_v2 }
 0x446   :  { %v1850_v45 = vpop.f32.mrf.mxu2  ;;  %v2463_v4 = vpop.f32.mrf.mxu3 }
 0x447   :  { %v1548_v5 = vpop.f32.mrf.mxu0  ;;  %v2161_v6 = vpop.f32.mrf.mxu1 }
 0x448   :  { %2705 = vst [vmem:[%s5916_s3 + $0x780] sm:$0xff] %v1548_v5 }
 0x449   :  { %2706 = vst [vmem:[%s5916_s3 + $0x788] sm:$0xff] %v2161_v6 }
 0x44f   :  { %v1550_v7 = vpop.f32.mrf.mxu0  ;;  %v2163_v9 = vpop.f32.mrf.mxu1 }
 0x450   :  { %2707 = vst [vmem:[%s5916_s3 + $0x790] sm:$0xff] %v1550_v7 }
 0x451   :  { %2708 = vst [vmem:[%s5916_s3 + $0x798] sm:$0xff] %v2163_v9 }

</bundles_post_ra>
